<compile_context>
chip_gen: v5e
topology: v5e:2x2
jax: 0.10.0
libtpu: 0.0.40
codegen_flags: <defaults>
</compile_context>

<pallas_src>
import functools

import jax
import jax.numpy as jnp
from jax.experimental import pallas as pl
from jax.experimental.pallas import tpu as pltpu


# Tile sizes: (tm*tk + tk*tn + 2*tm*tn) f32, double-buffered, stays well under
# the v5e 16 MiB scoped-VMEM default and far under v7x's 64 MiB physical VMEM.
MM_TILE_M = 512
MM_TILE_N = 512
MM_TILE_K = 512
ROW_TILE = 512          # row tile for elementwise / stats / pool kernels


def _round_up(x, m):
    return (x + m - 1) // m * m


# --------------------------------------------------------------------------
# Matmul kernel: bf16 MXU inputs, f32 VMEM accumulator, optional fused
# BatchNorm-affine+ReLU prologue on A and bias / ReLU epilogue.
# --------------------------------------------------------------------------

def _matmul_kernel(a_ref, b_ref, bias_ref, scale_ref, shift_ref, o_ref, acc_ref,
                   *, fuse_prologue, act):
    k = pl.program_id(2)

    @pl.when(k == 0)
    def _():
        acc_ref[...] = jnp.zeros_like(acc_ref)

    a = a_ref[...]
    if fuse_prologue:
        # fused BN affine + ReLU on the A operand (per K column), f32 on the VPU
        a = jnp.maximum(a * scale_ref[...] + shift_ref[...], 0.0)

    acc_ref[...] += jnp.dot(a.astype(jnp.bfloat16), b_ref[...],
                            preferred_element_type=jnp.float32)

    @pl.when(k == pl.num_programs(2) - 1)
    def _():
        out = acc_ref[...] + bias_ref[...]
        if act == "relu":
            out = jnp.maximum(out, 0.0)
        o_ref[...] = out


def matmul(a, b, bias=None, *, prologue_scale=None, prologue_shift=None,
           act="none"):
    """a: (M,K) f32, b: (K,N).  Optional fused per-K-column affine+ReLU
    prologue on `a` (BatchNorm fusion) and bias / ReLU epilogue."""
    M, K = a.shape
    K2, N = b.shape
    assert K == K2
    a = a.astype(jnp.float32)
    b = b.astype(jnp.bfloat16)          # weights are fed to the MXU in bf16

    fuse_prologue = prologue_scale is not None
    if fuse_prologue:
        scale = prologue_scale.reshape(1, K).astype(jnp.float32)
        shift = prologue_shift.reshape(1, K).astype(jnp.float32)
    else:
        scale = jnp.ones((1, K), jnp.float32)
        shift = jnp.zeros((1, K), jnp.float32)
    bias2 = (jnp.zeros((1, N), jnp.float32) if bias is None
             else bias.reshape(1, N).astype(jnp.float32))

    # Only very small GEMMs (classifier head) get rows padded to the 8-sublane
    # minimum; large activations are never copied for padding.
    M_orig = M
    if M < 8:
        a = jnp.pad(a, ((0, 8 - M), (0, 0)))
        M = 8

    # K tiling: keep K whole when it fits, else zero-pad to a tile multiple
    # (zero K-padding is exact: padded A columns only meet zero B rows).
    if K <= MM_TILE_K:
        tk = K
    else:
        tk = MM_TILE_K
        Kp = _round_up(K, tk)
        a = jnp.pad(a, ((0, 0), (0, Kp - K)))
        b = jnp.pad(b, ((0, Kp - K), (0, 0)))
        scale = jnp.pad(scale, ((0, 0), (0, Kp - K)))
        shift = jnp.pad(shift, ((0, 0), (0, Kp - K)))
        K = Kp
    n_k = K // tk

    # M / N tiling without padding A/B: edge blocks only touch output rows/cols
    # that the masked output store drops.
    tm = M if M <= MM_TILE_M else MM_TILE_M
    tn = N if N <= MM_TILE_N else MM_TILE_N
    grid = (pl.cdiv(M, tm), pl.cdiv(N, tn), n_k)

    out = pl.pallas_call(
        functools.partial(_matmul_kernel, fuse_prologue=fuse_prologue, act=act),
        out_shape=jax.ShapeDtypeStruct((M, N), jnp.float32),
        grid=grid,
        in_specs=[
            pl.BlockSpec((tm, tk), lambda i, j, k: (i, k)),
            pl.BlockSpec((tk, tn), lambda i, j, k: (k, j)),
            pl.BlockSpec((1, tn), lambda i, j, k: (0, j)),
            pl.BlockSpec((1, tk), lambda i, j, k: (0, k)),
            pl.BlockSpec((1, tk), lambda i, j, k: (0, k)),
        ],
        out_specs=pl.BlockSpec((tm, tn), lambda i, j, k: (i, j)),
        scratch_shapes=[pltpu.VMEM((tm, tn), jnp.float32)],
        compiler_params=pltpu.CompilerParams(
            dimension_semantics=("parallel", "parallel", "arbitrary")),
    )(a, b, bias2, scale, shift)
    return out[:M_orig] if M_orig != M else out


# --------------------------------------------------------------------------
# BatchNorm: row-tiled stats kernel that folds (mean, var, gamma, beta) into
# per-channel (scale, shift);  a standalone row-tiled affine+ReLU kernel is
# used where prologue fusion into a matmul is not applicable.
# --------------------------------------------------------------------------

def _bn_stats_kernel(x_ref, g_ref, b_ref, scale_ref, shift_ref, sum_sc, sq_sc,
                     *, m_total, tile_m, eps):
    i = pl.program_id(0)

    @pl.when(i == 0)
    def _():
        sum_sc[...] = jnp.zeros_like(sum_sc)
        sq_sc[...] = jnp.zeros_like(sq_sc)

    x = x_ref[...]
    if m_total % tile_m != 0:
        rows = jax.lax.broadcasted_iota(jnp.int32, x.shape, 0) + i * tile_m
        x = jnp.where(rows < m_total, x, 0.0)
    sum_sc[...] += jnp.sum(x, axis=0, keepdims=True)
    sq_sc[...] += jnp.sum(x * x, axis=0, keepdims=True)

    @pl.when(i == pl.num_programs(0) - 1)
    def _():
        inv_m = 1.0 / m_total
        mean = sum_sc[...] * inv_m
        # clamp guards against tiny negative values from the E[x^2]-mean^2 form
        var = jnp.maximum(sq_sc[...] * inv_m - mean * mean, 0.0)
        inv_std = jax.lax.rsqrt(var + eps)
        sc = g_ref[...] * inv_std
        scale_ref[...] = sc
        shift_ref[...] = b_ref[...] - mean * sc


def bn_scale_shift(x2d, gamma, beta, eps=1e-5):
    """Training-mode BatchNorm batch statistics over rows, folded into a
    per-channel (scale, shift):  y = relu(x * scale + shift) elsewhere.
    # TODO(synk): running-stats update (training side effect, not visible in
    # the forward output) is not reproduced."""
    M, C = x2d.shape
    tm = M if M <= ROW_TILE else ROW_TILE
    scale, shift = pl.pallas_call(
        functools.partial(_bn_stats_kernel, m_total=M, tile_m=tm, eps=eps),
        out_shape=(jax.ShapeDtypeStruct((1, C), jnp.float32),
                   jax.ShapeDtypeStruct((1, C), jnp.float32)),
        grid=(pl.cdiv(M, tm),),
        in_specs=[
            pl.BlockSpec((tm, C), lambda i: (i, 0)),
            pl.BlockSpec((1, C), lambda i: (0, 0)),
            pl.BlockSpec((1, C), lambda i: (0, 0)),
        ],
        out_specs=(pl.BlockSpec((1, C), lambda i: (0, 0)),
                   pl.BlockSpec((1, C), lambda i: (0, 0))),
        scratch_shapes=[pltpu.VMEM((1, C), jnp.float32),
                        pltpu.VMEM((1, C), jnp.float32)],
        compiler_params=pltpu.CompilerParams(dimension_semantics=("arbitrary",)),
    )(x2d.astype(jnp.float32), gamma.reshape(1, C).astype(jnp.float32),
      beta.reshape(1, C).astype(jnp.float32))
    return scale, shift


def _affine_relu_kernel(x_ref, scale_ref, shift_ref, o_ref):
    o_ref[...] = jnp.maximum(x_ref[...] * scale_ref[...] + shift_ref[...], 0.0)


def affine_relu_2d(x2d, scale, shift):
    M, C = x2d.shape
    tm = M if M <= ROW_TILE else ROW_TILE
    return pl.pallas_call(
        _affine_relu_kernel,
        out_shape=jax.ShapeDtypeStruct((M, C), jnp.float32),
        grid=(pl.cdiv(M, tm),),
        in_specs=[
            pl.BlockSpec((tm, C), lambda i: (i, 0)),
            pl.BlockSpec((1, C), lambda i: (0, 0)),
            pl.BlockSpec((1, C), lambda i: (0, 0)),
        ],
        out_specs=pl.BlockSpec((tm, C), lambda i: (i, 0)),
        compiler_params=pltpu.CompilerParams(dimension_semantics=("parallel",)),
    )(x2d.astype(jnp.float32), scale, shift)


# --------------------------------------------------------------------------
# Pooling kernels (row-tiled) and global average pool with optional fused
# BN affine + ReLU prologue.
# --------------------------------------------------------------------------

def _pool_max_kernel(p_ref, o_ref):
    acc = p_ref[0]
    for t in range(1, p_ref.shape[0]):
        acc = jnp.maximum(acc, p_ref[t])
    o_ref[...] = acc


def _pool_avg_kernel(p_ref, o_ref, *, inv):
    acc = p_ref[0]
    for t in range(1, p_ref.shape[0]):
        acc = acc + p_ref[t]
    o_ref[...] = acc * inv


def _extract_window_views(x, ksize, stride, padding, pad_value):
    N, H, W, C = x.shape
    xp = jnp.pad(x, ((0, 0), (padding, padding), (padding, padding), (0, 0)),
                 constant_values=pad_value)
    OH = (H + 2 * padding - ksize) // stride + 1
    OW = (W + 2 * padding - ksize) // stride + 1
    views = []
    for dh in range(ksize):
        for dw in range(ksize):
            views.append(xp[:, dh: dh + stride * OH: stride,
                            dw: dw + stride * OW: stride, :])
    return views, OH, OW


def _pool2d(x, ksize, stride, padding, mode):
    # TODO(synk): the window taps are still materialized by XLA (stacked views);
    # fully fusing the tap gather into the kernel via Element-offset index maps
    # would remove this HBM expansion.
    N, H, W, C = x.shape
    pad_value = jnp.finfo(jnp.float32).min if mode == "max" else 0.0
    views, OH, OW = _extract_window_views(x, ksize, stride, padding, pad_value)
    M = N * OH * OW
    T = ksize * ksize
    p = jnp.stack([v.reshape(M, C) for v in views], axis=0)   # (T, M, C)
    tm = M if M <= ROW_TILE else ROW_TILE
    kern = (_pool_max_kernel if mode == "max"
            else functools.partial(_pool_avg_kernel, inv=1.0 / T))
    out = pl.pallas_call(
        kern,
        out_shape=jax.ShapeDtypeStruct((M, C), jnp.float32),
        grid=(pl.cdiv(M, tm),),
        in_specs=[pl.BlockSpec((T, tm, C), lambda i: (0, i, 0))],
        out_specs=pl.BlockSpec((tm, C), lambda i: (i, 0)),
        compiler_params=pltpu.CompilerParams(dimension_semantics=("parallel",)),
    )(p)
    return out.reshape(N, OH, OW, C)


def maxpool2d(x, ksize=3, stride=2, padding=1):
    return _pool2d(x, ksize, stride, padding, "max")


def avgpool2d(x, ksize=2, stride=2):
    return _pool2d(x, ksize, stride, 0, "avg")


def _gap_kernel(x_ref, scale_ref, shift_ref, o_ref, acc_ref,
                *, hw_total, tile_hw, fuse_affine_relu):
    i = pl.program_id(0)

    @pl.when(i == 0)
    def _():
        acc_ref[...] = jnp.zeros_like(acc_ref)

    x = x_ref[...]                                      # (N, t_hw, C)
    if fuse_affine_relu:
        x = jnp.maximum(x * scale_ref[...] + shift_ref[...], 0.0)
    if hw_total % tile_hw != 0:
        pos = jax.lax.broadcasted_iota(jnp.int32, x.shape, 1) + i * tile_hw
        x = jnp.where(pos < hw_total, x, 0.0)
    acc_ref[...] += jnp.sum(x, axis=1)

    @pl.when(i == pl.num_programs(0) - 1)
    def _():
        o_ref[...] = acc_ref[...] * (1.0 / hw_total)


def global_avg_pool(x, scale=None, shift=None):
    """(N,H,W,C) -> (N,C); optionally fuses a preceding BN affine + ReLU."""
    N, H, W, C = x.shape
    HW = H * W
    x3 = x.reshape(N, HW, C).astype(jnp.float32)
    fuse = scale is not None
    if fuse:
        scale3 = scale.reshape(1, 1, C).astype(jnp.float32)
        shift3 = shift.reshape(1, 1, C).astype(jnp.float32)
    else:
        scale3 = jnp.ones((1, 1, C), jnp.float32)
        shift3 = jnp.zeros((1, 1, C), jnp.float32)
    t_hw = HW if HW <= ROW_TILE else ROW_TILE
    return pl.pallas_call(
        functools.partial(_gap_kernel, hw_total=HW, tile_hw=t_hw,
                          fuse_affine_relu=fuse),
        out_shape=jax.ShapeDtypeStruct((N, C), jnp.float32),
        grid=(pl.cdiv(HW, t_hw),),
        in_specs=[
            pl.BlockSpec((N, t_hw, C), lambda i: (0, i, 0)),
            pl.BlockSpec((1, 1, C), lambda i: (0, 0, 0)),
            pl.BlockSpec((1, 1, C), lambda i: (0, 0, 0)),
        ],
        out_specs=pl.BlockSpec((N, C), lambda i: (0, 0)),
        scratch_shapes=[pltpu.VMEM((N, C), jnp.float32)],
        compiler_params=pltpu.CompilerParams(dimension_semantics=("arbitrary",)),
    )(x3, scale3, shift3)


# --------------------------------------------------------------------------
# Fused SE excitation + scale kernel: FC -> ReLU -> FC -> sigmoid -> x*gate.
# --------------------------------------------------------------------------

def _se_kernel(x_ref, pooled_ref, w1_ref, b1_ref, w2_ref, b2_ref, o_ref):
    h = jnp.dot(pooled_ref[...], w1_ref[...], preferred_element_type=jnp.float32)
    h = jnp.maximum(h + b1_ref[...], 0.0)
    logits = jnp.dot(h, w2_ref[...], preferred_element_type=jnp.float32) + b2_ref[...]
    gate = jax.nn.sigmoid(logits)                       # (Np, C); rows >= N unused
    x = x_ref[...]                                      # (N, t_hw, C)
    for b in range(x.shape[0]):
        o_ref[b] = x[b] * gate[b:b + 1, :]


def se_block(x, w1, b1, w2, b2):
    """Squeeze-and-Excitation: avgpool -> FC -> ReLU -> FC -> sigmoid -> scale."""
    N, H, W, C = x.shape
    HW = H * W
    Cr = w1.shape[0]
    pooled = global_avg_pool(x)                          # (N, C) Pallas kernel
    Np = max(N, 8)                                       # keep MXU rows >= 8
    if Np != N:
        pooled = jnp.pad(pooled, ((0, Np - N), (0, 0)))
    x3 = x.reshape(N, HW, C).astype(jnp.float32)
    t_hw = HW if HW <= ROW_TILE else ROW_TILE
    out = pl.pallas_call(
        _se_kernel,
        out_shape=jax.ShapeDtypeStruct((N, HW, C), jnp.float32),
        grid=(pl.cdiv(HW, t_hw),),
        in_specs=[
            pl.BlockSpec((N, t_hw, C), lambda i: (0, i, 0)),
            pl.BlockSpec((Np, C), lambda i: (0, 0)),
            pl.BlockSpec((C, Cr), lambda i: (0, 0)),
            pl.BlockSpec((1, Cr), lambda i: (0, 0)),
            pl.BlockSpec((Cr, C), lambda i: (0, 0)),
            pl.BlockSpec((1, C), lambda i: (0, 0)),
        ],
        out_specs=pl.BlockSpec((N, t_hw, C), lambda i: (0, i, 0)),
        compiler_params=pltpu.CompilerParams(dimension_semantics=("parallel",)),
    )(x3, pooled,
      w1.T.astype(jnp.float32), b1.reshape(1, Cr).astype(jnp.float32),
      w2.T.astype(jnp.float32), b2.reshape(1, C).astype(jnp.float32))
    return out.reshape(N, H, W, C)


# --------------------------------------------------------------------------
# Convolution wrapper (im2col + Pallas matmul)
# --------------------------------------------------------------------------

def conv2d(x, w, stride=1, padding=0, prologue_scale=None, prologue_shift=None):
    """x: (N,H,W,Cin) NHWC, w: (Cout,Cin,kh,kw) PyTorch layout, no conv bias.
    Optional fused per-input-channel BN affine + ReLU prologue (only used for
    1x1 / unpadded convs, where no spatial zero-padding precedes the affine)."""
    N, H, W, Cin = x.shape
    Cout, _, kh, kw = w.shape
    if kh == 1 and kw == 1 and stride == 1 and padding == 0:
        a = x.reshape(N * H * W, Cin)
        b = w.reshape(Cout, Cin).T
        out = matmul(a, b, prologue_scale=prologue_scale,
                     prologue_shift=prologue_shift)
        return out.reshape(N, H, W, Cout)
    assert prologue_scale is None, "BN prologue fusion only supported for 1x1 convs"
    # TODO(synk): im2col patches are still materialized by XLA; a direct-conv
    # kernel with Element-offset index maps would avoid this HBM expansion.
    views, OH, OW = _extract_window_views(x, kh, stride, padding, 0.0)
    patches = jnp.concatenate(views, axis=-1)             # (N,OH,OW,kh*kw*Cin)
    a = patches.reshape(N * OH * OW, kh * kw * Cin)
    b = jnp.transpose(w, (2, 3, 1, 0)).reshape(kh * kw * Cin, Cout)
    return matmul(a, b).reshape(N, OH, OW, Cout)


# --------------------------------------------------------------------------
# Parameter init (deterministic, synthetic) and forward pass
# --------------------------------------------------------------------------

def _kaiming_conv(key, cout, cin, kh, kw):
    fan_in = cin * kh * kw
    return jax.random.normal(key, (cout, cin, kh, kw), jnp.float32) * jnp.sqrt(2.0 / fan_in)


def _linear_init(key, out_f, in_f):
    k1, k2 = jax.random.split(key)
    bound = 1.0 / jnp.sqrt(in_f)
    w = jax.random.uniform(k1, (out_f, in_f), jnp.float32, -bound, bound)
    b = jax.random.uniform(k2, (out_f,), jnp.float32, -bound, bound)
    return w, b


def init_densenet_params(key, growth_rate, block_config, num_init_features,
                         bn_size, num_classes, se_reduction=16):
    keys = iter(jax.random.split(key, 256))
    params = {}
    params["conv0"] = _kaiming_conv(next(keys), num_init_features, 3, 7, 7)
    params["norm0_g"] = jnp.ones((num_init_features,), jnp.float32)
    params["norm0_b"] = jnp.zeros((num_init_features,), jnp.float32)

    num_features = num_init_features
    params["blocks"] = []
    params["transitions"] = []
    for bi, num_layers in enumerate(block_config):
        layers = []
        for li in range(num_layers):
            cin = num_features + li * growth_rate
            mid = bn_size * growth_rate
            layers.append(dict(
                n1_g=jnp.ones((cin,), jnp.float32),
                n1_b=jnp.zeros((cin,), jnp.float32),
                c1_w=_kaiming_conv(next(keys), mid, cin, 1, 1),
                n2_g=jnp.ones((mid,), jnp.float32),
                n2_b=jnp.zeros((mid,), jnp.float32),
                c2_w=_kaiming_conv(next(keys), growth_rate, mid, 3, 3),
            ))
        num_features = num_features + num_layers * growth_rate
        # SE_Block is created inside forward() in the PyTorch code with fresh
        # random weights each call; here it is deterministically initialized.
        c = num_features
        cr = c // se_reduction
        w1, b1 = _linear_init(next(keys), cr, c)
        w2, b2 = _linear_init(next(keys), c, cr)
        params["blocks"].append(dict(layers=layers, se=dict(w1=w1, b1=b1, w2=w2, b2=b2)))
        if bi != len(block_config) - 1:
            cout = num_features // 2
            params["transitions"].append(dict(
                n_g=jnp.ones((num_features,), jnp.float32),
                n_b=jnp.zeros((num_features,), jnp.float32),
                c_w=_kaiming_conv(next(keys), cout, num_features, 1, 1),
            ))
            num_features = cout

    params["norm5_g"] = jnp.ones((num_features,), jnp.float32)
    params["norm5_b"] = jnp.zeros((num_features,), jnp.float32)
    cls_w, _ = _linear_init(next(keys), num_classes, num_features)
    params["cls_w"] = cls_w
    params["cls_b"] = jnp.zeros((num_classes,), jnp.float32)  # bias init'd to 0
    return params


def densenet_forward(params, x_nchw):
    x = jnp.transpose(x_nchw.astype(jnp.float32), (0, 2, 3, 1))     # NCHW -> NHWC

    # stem: conv0 7x7/2 p3 -> BN -> ReLU -> maxpool 3x3/2 p1
    x = conv2d(x, params["conv0"], stride=2, padding=3)
    N, H, W, C = x.shape
    sc0, sh0 = bn_scale_shift(x.reshape(N * H * W, C),
                              params["norm0_g"], params["norm0_b"])
    x = affine_relu_2d(x.reshape(N * H * W, C), sc0, sh0).reshape(N, H, W, C)
    x = maxpool2d(x, 3, 2, 1)

    for bi, block in enumerate(params["blocks"]):
        N, H, W, C0 = x.shape
        M = N * H * W
        g = block["layers"][0]["c2_w"].shape[0]
        c_total = C0 + len(block["layers"]) * g
        # Preallocated channel buffer: avoids the O(L^2) re-concatenation of the
        # growing feature list (new features are written into channel slices).
        buf = jnp.zeros((N, H, W, c_total), jnp.float32)
        buf = jax.lax.dynamic_update_slice(buf, x, (0, 0, 0, 0))
        c_cur = C0
        for layer in block["layers"]:
            inp = buf[:, :, :, :c_cur]
            sc1, sh1 = bn_scale_shift(inp.reshape(M, c_cur),
                                      layer["n1_g"], layer["n1_b"])
            # BN1 + ReLU fused into the 1x1 bottleneck conv (matmul prologue)
            h = conv2d(inp, layer["c1_w"], prologue_scale=sc1, prologue_shift=sh1)
            mid = h.shape[-1]
            sc2, sh2 = bn_scale_shift(h.reshape(M, mid),
                                      layer["n2_g"], layer["n2_b"])
            h = affine_relu_2d(h.reshape(M, mid), sc2, sh2).reshape(N, H, W, mid)
            h = conv2d(h, layer["c2_w"], stride=1, padding=1)         # 3x3 conv
            buf = jax.lax.dynamic_update_slice(buf, h, (0, 0, 0, c_cur))
            c_cur += g
        x = buf
        se = block["se"]
        x = se_block(x, se["w1"], se["b1"], se["w2"], se["b2"])
        if bi < len(params["transitions"]):
            t = params["transitions"][bi]
            N, H, W, C = x.shape
            sct, sht = bn_scale_shift(x.reshape(N * H * W, C), t["n_g"], t["n_b"])
            # transition BN + ReLU fused into its 1x1 conv
            x = conv2d(x, t["c_w"], prologue_scale=sct, prologue_shift=sht)
            x = avgpool2d(x, 2, 2)

    # norm5 -> ReLU fused into the global average pool, then classifier
    N, H, W, C = x.shape
    sc5, sh5 = bn_scale_shift(x.reshape(N * H * W, C),
                              params["norm5_g"], params["norm5_b"])
    pooled = global_avg_pool(x, scale=sc5, shift=sh5)                  # (N, C)
    logits = matmul(pooled, params["cls_w"].T, bias=params["cls_b"])
    return logits


# --------------------------------------------------------------------------
# Main
# --------------------------------------------------------------------------

if __name__ == "__main__":
    key = jax.random.PRNGKey(0)
    k_x, k_p = jax.random.split(key)

    # Small DenseNet configuration consistent with the module structure.
    growth_rate = 8
    block_config = (2, 2)
    num_init_features = 16
    bn_size = 2
    num_classes = 10

    x = jax.random.normal(k_x, (2, 3, 32, 32), jnp.float32)   # NCHW input
    params = init_densenet_params(k_p, growth_rate, block_config,
                                  num_init_features, bn_size, num_classes)

    fwd = jax.jit(densenet_forward)
    out = jax.block_until_ready(fwd(params, x))
    assert out.shape == (2, num_classes) and out.dtype == jnp.float32
    assert bool(jnp.all(jnp.isfinite(out)))
    print("KERNEL_OK")
</pallas_src>

<mosaic_0001>
module attributes {stable_mosaic.version = 11 : i64} {
  func.func @_bn_stats_kernel(%arg0: i32, %arg1: memref<512x16xf32, #tpu.memory_space<vmem>>, %arg2: memref<1x16xf32, #tpu.memory_space<vmem>>, %arg3: memref<1x16xf32, #tpu.memory_space<vmem>>, %arg4: memref<1x16xf32, #tpu.memory_space<vmem>>, %arg5: memref<1x16xf32, #tpu.memory_space<vmem>>, %arg6: memref<1x16xf32, #tpu.memory_space<vmem>>, %arg7: memref<1x16xf32, #tpu.memory_space<vmem>>) attributes {dimension_semantics = [#tpu.dimension_semantics<arbitrary>], iteration_bounds = array<i64: 1>, scalar_prefetch = 0 : i64, scratch_operands = 2 : i64, tpu.core_type = #tpu.core_type<tc>, window_params = [{transform_indices = @transform_0, window_bounds = array<i64: 512, 16>}, {pipeline_mode = #tpu.pipeline_mode<synchronous>, transform_indices = @transform_1, window_bounds = array<i64: 1, 16>}, {pipeline_mode = #tpu.pipeline_mode<synchronous>, transform_indices = @transform_2, window_bounds = array<i64: 1, 16>}, {pipeline_mode = #tpu.pipeline_mode<synchronous>, transform_indices = @transform_3, window_bounds = array<i64: 1, 16>}, {pipeline_mode = #tpu.pipeline_mode<synchronous>, transform_indices = @transform_4, window_bounds = array<i64: 1, 16>}]} {
    %c0_i32 = arith.constant 0 : i32
    %0 = arith.cmpi eq, %arg0, %c0_i32 : i32
    %1 = arith.extui %0 : i1 to i32
    %c0_i32_0 = arith.constant 0 : i32
    %2 = arith.cmpi ne, %1, %c0_i32_0 : i32
    scf.if %2 {
      %cst_13 = arith.constant 0.000000e+00 : f32
      %18 = vector.broadcast %cst_13 : f32 to vector<1x16xf32>
      %c0_14 = arith.constant 0 : index
      %c0_15 = arith.constant 0 : index
      %19 = vector.load %arg6[%c0_14, %c0_15] : memref<1x16xf32, #tpu.memory_space<vmem>>, vector<1x16xf32>
      tpu.vector_store %arg6[%c0_14, %c0_15], %18 {strides = array<i32>} : memref<1x16xf32, #tpu.memory_space<vmem>>, vector<1x16xf32>,
      %cst_16 = arith.constant 0.000000e+00 : f32
      %20 = vector.broadcast %cst_16 : f32 to vector<1x16xf32>
      %c0_17 = arith.constant 0 : index
      %c0_18 = arith.constant 0 : index
      %21 = vector.load %arg7[%c0_17, %c0_18] : memref<1x16xf32, #tpu.memory_space<vmem>>, vector<1x16xf32>
      tpu.vector_store %arg7[%c0_17, %c0_18], %20 {strides = array<i32>} : memref<1x16xf32, #tpu.memory_space<vmem>>, vector<1x16xf32>,
    } else {
    }
    %c0 = arith.constant 0 : index
    %c0_1 = arith.constant 0 : index
    %3 = vector.load %arg1[%c0, %c0_1] : memref<512x16xf32, #tpu.memory_space<vmem>>, vector<512x16xf32>
    %c0_2 = arith.constant 0 : index
    %c0_3 = arith.constant 0 : index
    %4 = vector.load %arg6[%c0_2, %c0_3] : memref<1x16xf32, #tpu.memory_space<vmem>>, vector<1x16xf32>
    %cst = arith.constant dense<0.000000e+00> : vector<16xf32>
    %5 = vector.multi_reduction <add>, %3, %cst [0] : vector<512x16xf32> to vector<16xf32>
    %6 = vector.shape_cast %5 : vector<16xf32> to vector<1x16xf32>
    %7 = arith.addf %4, %6 : vector<1x16xf32>
    %c0_4 = arith.constant 0 : index
    %c0_5 = arith.constant 0 : index
    %8 = vector.load %arg6[%c0_4, %c0_5] : memref<1x16xf32, #tpu.memory_space<vmem>>, vector<1x16xf32>
    tpu.vector_store %arg6[%c0_4, %c0_5], %7 {strides = array<i32>} : memref<1x16xf32, #tpu.memory_space<vmem>>, vector<1x16xf32>,
    %c0_6 = arith.constant 0 : index
    %c0_7 = arith.constant 0 : index
    %9 = vector.load %arg7[%c0_6, %c0_7] : memref<1x16xf32, #tpu.memory_space<vmem>>, vector<1x16xf32>
    %10 = arith.mulf %3, %3 : vector<512x16xf32>
    %cst_8 = arith.constant dense<0.000000e+00> : vector<16xf32>
    %11 = vector.multi_reduction <add>, %10, %cst_8 [0] : vector<512x16xf32> to vector<16xf32>
    %12 = vector.shape_cast %11 : vector<16xf32> to vector<1x16xf32>
    %13 = arith.addf %9, %12 : vector<1x16xf32>
    %c0_9 = arith.constant 0 : index
    %c0_10 = arith.constant 0 : index
    %14 = vector.load %arg7[%c0_9, %c0_10] : memref<1x16xf32, #tpu.memory_space<vmem>>, vector<1x16xf32>
    tpu.vector_store %arg7[%c0_9, %c0_10], %13 {strides = array<i32>} : memref<1x16xf32, #tpu.memory_space<vmem>>, vector<1x16xf32>,
    %c0_i32_11 = arith.constant 0 : i32
    %15 = arith.cmpi eq, %arg0, %c0_i32_11 : i32
    %16 = arith.extui %15 : i1 to i32
    %c0_i32_12 = arith.constant 0 : i32
    %17 = arith.cmpi ne, %16, %c0_i32_12 : i32
    scf.if %17 {
      %c0_13 = arith.constant 0 : index
      %c0_14 = arith.constant 0 : index
      %18 = vector.load %arg6[%c0_13, %c0_14] : memref<1x16xf32, #tpu.memory_space<vmem>>, vector<1x16xf32>
      %cst_15 = arith.constant 0.001953125 : f32
      %19 = vector.broadcast %cst_15 : f32 to vector<1x16xf32>
      %20 = arith.mulf %18, %19 : vector<1x16xf32>
      %c0_16 = arith.constant 0 : index
      %c0_17 = arith.constant 0 : index
      %21 = vector.load %arg7[%c0_16, %c0_17] : memref<1x16xf32, #tpu.memory_space<vmem>>, vector<1x16xf32>
      %cst_18 = arith.constant 0.001953125 : f32
      %22 = vector.broadcast %cst_18 : f32 to vector<1x16xf32>
      %23 = arith.mulf %21, %22 : vector<1x16xf32>
      %24 = arith.mulf %20, %20 : vector<1x16xf32>
      %25 = arith.subf %23, %24 : vector<1x16xf32>
      %cst_19 = arith.constant 0.000000e+00 : f32
      %26 = vector.broadcast %cst_19 : f32 to vector<1x16xf32>
      %27 = arith.maximumf %25, %26 : vector<1x16xf32>
      %cst_20 = arith.constant 9.99999974E-6 : f32
      %28 = vector.broadcast %cst_20 : f32 to vector<1x16xf32>
      %29 = arith.addf %27, %28 : vector<1x16xf32>
      %30 = math.rsqrt %29 : vector<1x16xf32>
      %c0_21 = arith.constant 0 : index
      %c0_22 = arith.constant 0 : index
      %31 = vector.load %arg2[%c0_21, %c0_22] : memref<1x16xf32, #tpu.memory_space<vmem>>, vector<1x16xf32>
      %32 = arith.mulf %31, %30 : vector<1x16xf32>
      %c0_23 = arith.constant 0 : index
      %c0_24 = arith.constant 0 : index
      %33 = vector.load %arg4[%c0_23, %c0_24] : memref<1x16xf32, #tpu.memory_space<vmem>>, vector<1x16xf32>
      tpu.vector_store %arg4[%c0_23, %c0_24], %32 {strides = array<i32>} : memref<1x16xf32, #tpu.memory_space<vmem>>, vector<1x16xf32>,
      %c0_25 = arith.constant 0 : index
      %c0_26 = arith.constant 0 : index
      %34 = vector.load %arg3[%c0_25, %c0_26] : memref<1x16xf32, #tpu.memory_space<vmem>>, vector<1x16xf32>
      %35 = arith.mulf %20, %32 : vector<1x16xf32>
      %36 = arith.subf %34, %35 : vector<1x16xf32>
      %c0_27 = arith.constant 0 : index
      %c0_28 = arith.constant 0 : index
      %37 = vector.load %arg5[%c0_27, %c0_28] : memref<1x16xf32, #tpu.memory_space<vmem>>, vector<1x16xf32>
      tpu.vector_store %arg5[%c0_27, %c0_28], %36 {strides = array<i32>} : memref<1x16xf32, #tpu.memory_space<vmem>>, vector<1x16xf32>,
    } else {
    }
    return
  }
  func.func @transform_0(%arg0: i32) -> (i32, i32) {
    %c0_i32 = arith.constant 0 : i32
    %c0_i32_0 = arith.constant 0 : i32
    return %arg0, %c0_i32 : i32, i32
  }
  func.func @transform_1(%arg0: i32) -> (i32, i32) {
    %c0_i32 = arith.constant 0 : i32
    %c0_i32_0 = arith.constant 0 : i32
    %c0_i32_1 = arith.constant 0 : i32
    return %c0_i32, %c0_i32_0 : i32, i32
  }
  func.func @transform_2(%arg0: i32) -> (i32, i32) {
    %c0_i32 = arith.constant 0 : i32
    %c0_i32_0 = arith.constant 0 : i32
    %c0_i32_1 = arith.constant 0 : i32
    return %c0_i32, %c0_i32_0 : i32, i32
  }
  func.func @transform_3(%arg0: i32) -> (i32, i32) {
    %c0_i32 = arith.constant 0 : i32
    %c0_i32_0 = arith.constant 0 : i32
    %c0_i32_1 = arith.constant 0 : i32
    return %c0_i32, %c0_i32_0 : i32, i32
  }
  func.func @transform_4(%arg0: i32) -> (i32, i32) {
    %c0_i32 = arith.constant 0 : i32
    %c0_i32_0 = arith.constant 0 : i32
    %c0_i32_1 = arith.constant 0 : i32
    return %c0_i32, %c0_i32_0 : i32, i32
  }
}

module attributes {stable_mosaic.version = 11 : i64} {
  func.func @_matmul_kernel(%arg0: i32, %arg1: i32, %arg2: i32, %arg3: memref<512x147xf32, #tpu.memory_space<vmem>>, %arg4: memref<147x16xbf16, #tpu.memory_space<vmem>>, %arg5: memref<1x16xf32, #tpu.memory_space<vmem>>, %arg6: memref<1x147xf32, #tpu.memory_space<vmem>>, %arg7: memref<1x147xf32, #tpu.memory_space<vmem>>, %arg8: memref<512x16xf32, #tpu.memory_space<vmem>>, %arg9: memref<512x16xf32, #tpu.memory_space<vmem>>) attributes {dimension_semantics = [#tpu.dimension_semantics<parallel>, #tpu.dimension_semantics<parallel>, #tpu.dimension_semantics<arbitrary>], iteration_bounds = array<i64: 1, 1, 1>, scalar_prefetch = 0 : i64, scratch_operands = 1 : i64, tpu.core_type = #tpu.core_type<tc>, window_params = [{transform_indices = @transform_0, window_bounds = array<i64: 512, 147>}, {transform_indices = @transform_1, window_bounds = array<i64: 147, 16>}, {transform_indices = @transform_2, window_bounds = array<i64: 1, 16>}, {transform_indices = @transform_3, window_bounds = array<i64: 1, 147>}, {transform_indices = @transform_4, window_bounds = array<i64: 1, 147>}, {transform_indices = @transform_5, window_bounds = array<i64: 512, 16>}]} {
    %c0_i32 = arith.constant 0 : i32
    %0 = arith.cmpi eq, %arg2, %c0_i32 : i32
    %1 = arith.extui %0 : i1 to i32
    %c0_i32_0 = arith.constant 0 : i32
    %2 = arith.cmpi ne, %1, %c0_i32_0 : i32
    scf.if %2 {
      %cst_10 = arith.constant 0.000000e+00 : f32
      %13 = vector.broadcast %cst_10 : f32 to vector<512x16xf32>
      %c0_11 = arith.constant 0 : index
      %c0_12 = arith.constant 0 : index
      %14 = vector.load %arg9[%c0_11, %c0_12] : memref<512x16xf32, #tpu.memory_space<vmem>>, vector<512x16xf32>
      tpu.vector_store %arg9[%c0_11, %c0_12], %13 {strides = array<i32>} : memref<512x16xf32, #tpu.memory_space<vmem>>, vector<512x16xf32>,
    } else {
    }
    %c0 = arith.constant 0 : index
    %c0_1 = arith.constant 0 : index
    %3 = vector.load %arg3[%c0, %c0_1] : memref<512x147xf32, #tpu.memory_space<vmem>>, vector<512x147xf32>
    %c0_2 = arith.constant 0 : index
    %c0_3 = arith.constant 0 : index
    %4 = vector.load %arg9[%c0_2, %c0_3] : memref<512x16xf32, #tpu.memory_space<vmem>>, vector<512x16xf32>
    %5 = arith.truncf %3 : vector<512x147xf32> to vector<512x147xbf16>
    %c0_4 = arith.constant 0 : index
    %c0_5 = arith.constant 0 : index
    %6 = vector.load %arg4[%c0_4, %c0_5] : memref<147x16xbf16, #tpu.memory_space<vmem>>, vector<147x16xbf16>
    %cst = arith.constant dense<0.000000e+00> : vector<512x16xf32>
    %7 = tpu.matmul %5, %6, %cst {dimension_numbers = #tpu.dot_dimension_numbers<[1], [0], [0], [1], [0, 0, 1, 1], [], []>} : vector<512x147xbf16>, vector<147x16xbf16>, vector<512x16xf32> -> vector<512x16xf32>
    %8 = arith.addf %4, %7 : vector<512x16xf32>
    %c0_6 = arith.constant 0 : index
    %c0_7 = arith.constant 0 : index
    %9 = vector.load %arg9[%c0_6, %c0_7] : memref<512x16xf32, #tpu.memory_space<vmem>>, vector<512x16xf32>
    tpu.vector_store %arg9[%c0_6, %c0_7], %8 {strides = array<i32>} : memref<512x16xf32, #tpu.memory_space<vmem>>, vector<512x16xf32>,
    %c0_i32_8 = arith.constant 0 : i32
    %10 = arith.cmpi eq, %arg2, %c0_i32_8 : i32
    %11 = arith.extui %10 : i1 to i32
    %c0_i32_9 = arith.constant 0 : i32
    %12 = arith.cmpi ne, %11, %c0_i32_9 : i32
    scf.if %12 {
      %c0_10 = arith.constant 0 : index
      %c0_11 = arith.constant 0 : index
      %13 = vector.load %arg9[%c0_10, %c0_11] : memref<512x16xf32, #tpu.memory_space<vmem>>, vector<512x16xf32>
      %c0_12 = arith.constant 0 : index
      %c0_13 = arith.constant 0 : index
      %14 = vector.load %arg5[%c0_12, %c0_13] : memref<1x16xf32, #tpu.memory_space<vmem>>, vector<1x16xf32>
      %15 = vector.broadcast %14 : vector<1x16xf32> to vector<512x16xf32>
      %16 = arith.addf %13, %15 : vector<512x16xf32>
      %c0_14 = arith.constant 0 : index
      %c0_15 = arith.constant 0 : index
      %17 = vector.load %arg8[%c0_14, %c0_15] : memref<512x16xf32, #tpu.memory_space<vmem>>, vector<512x16xf32>
      tpu.vector_store %arg8[%c0_14, %c0_15], %16 {strides = array<i32>} : memref<512x16xf32, #tpu.memory_space<vmem>>, vector<512x16xf32>,
    } else {
    }
    return
  }
  func.func @transform_0(%arg0: i32, %arg1: i32, %arg2: i32) -> (i32, i32) {
    %c0_i32 = arith.constant 0 : i32
    return %arg0, %arg2 : i32, i32
  }
  func.func @transform_1(%arg0: i32, %arg1: i32, %arg2: i32) -> (i32, i32) {
    %c0_i32 = arith.constant 0 : i32
    return %arg2, %arg1 : i32, i32
  }
  func.func @transform_2(%arg0: i32, %arg1: i32, %arg2: i32) -> (i32, i32) {
    %c0_i32 = arith.constant 0 : i32
    %c0_i32_0 = arith.constant 0 : i32
    return %c0_i32, %arg1 : i32, i32
  }
  func.func @transform_3(%arg0: i32, %arg1: i32, %arg2: i32) -> (i32, i32) {
    %c0_i32 = arith.constant 0 : i32
    %c0_i32_0 = arith.constant 0 : i32
    return %c0_i32, %arg2 : i32, i32
  }
  func.func @transform_4(%arg0: i32, %arg1: i32, %arg2: i32) -> (i32, i32) {
    %c0_i32 = arith.constant 0 : i32
    %c0_i32_0 = arith.constant 0 : i32
    return %c0_i32, %arg2 : i32, i32
  }
  func.func @transform_5(%arg0: i32, %arg1: i32, %arg2: i32) -> (i32, i32) {
    %c0_i32 = arith.constant 0 : i32
    return %arg0, %arg1 : i32, i32
  }
}

module attributes {stable_mosaic.version = 11 : i64} {
  func.func @_affine_relu_kernel(%arg0: i32, %arg1: memref<512x16xf32, #tpu.memory_space<vmem>>, %arg2: memref<1x16xf32, #tpu.memory_space<vmem>>, %arg3: memref<1x16xf32, #tpu.memory_space<vmem>>, %arg4: memref<512x16xf32, #tpu.memory_space<vmem>>) attributes {dimension_semantics = [#tpu.dimension_semantics<parallel>], iteration_bounds = array<i64: 1>, scalar_prefetch = 0 : i64, scratch_operands = 0 : i64, tpu.core_type = #tpu.core_type<tc>, window_params = [{transform_indices = @transform_0, window_bounds = array<i64: 512, 16>}, {pipeline_mode = #tpu.pipeline_mode<synchronous>, transform_indices = @transform_1, window_bounds = array<i64: 1, 16>}, {pipeline_mode = #tpu.pipeline_mode<synchronous>, transform_indices = @transform_2, window_bounds = array<i64: 1, 16>}, {transform_indices = @transform_3, window_bounds = array<i64: 512, 16>}]} {
    %c0 = arith.constant 0 : index
    %c0_0 = arith.constant 0 : index
    %0 = vector.load %arg1[%c0, %c0_0] : memref<512x16xf32, #tpu.memory_space<vmem>>, vector<512x16xf32>
    %c0_1 = arith.constant 0 : index
    %c0_2 = arith.constant 0 : index
    %1 = vector.load %arg2[%c0_1, %c0_2] : memref<1x16xf32, #tpu.memory_space<vmem>>, vector<1x16xf32>
    %2 = vector.broadcast %1 : vector<1x16xf32> to vector<512x16xf32>
    %3 = arith.mulf %0, %2 : vector<512x16xf32>
    %c0_3 = arith.constant 0 : index
    %c0_4 = arith.constant 0 : index
    %4 = vector.load %arg3[%c0_3, %c0_4] : memref<1x16xf32, #tpu.memory_space<vmem>>, vector<1x16xf32>
    %5 = vector.broadcast %4 : vector<1x16xf32> to vector<512x16xf32>
    %6 = arith.addf %3, %5 : vector<512x16xf32>
    %cst = arith.constant 0.000000e+00 : f32
    %7 = vector.broadcast %cst : f32 to vector<512x16xf32>
    %8 = arith.maximumf %6, %7 : vector<512x16xf32>
    %c0_5 = arith.constant 0 : index
    %c0_6 = arith.constant 0 : index
    %9 = vector.load %arg4[%c0_5, %c0_6] : memref<512x16xf32, #tpu.memory_space<vmem>>, vector<512x16xf32>
    tpu.vector_store %arg4[%c0_5, %c0_6], %8 {strides = array<i32>} : memref<512x16xf32, #tpu.memory_space<vmem>>, vector<512x16xf32>,
    return
  }
  func.func @transform_0(%arg0: i32) -> (i32, i32) {
    %c0_i32 = arith.constant 0 : i32
    %c0_i32_0 = arith.constant 0 : i32
    return %arg0, %c0_i32 : i32, i32
  }
  func.func @transform_1(%arg0: i32) -> (i32, i32) {
    %c0_i32 = arith.constant 0 : i32
    %c0_i32_0 = arith.constant 0 : i32
    %c0_i32_1 = arith.constant 0 : i32
    return %c0_i32, %c0_i32_0 : i32, i32
  }
  func.func @transform_2(%arg0: i32) -> (i32, i32) {
    %c0_i32 = arith.constant 0 : i32
    %c0_i32_0 = arith.constant 0 : i32
    %c0_i32_1 = arith.constant 0 : i32
    return %c0_i32, %c0_i32_0 : i32, i32
  }
  func.func @transform_3(%arg0: i32) -> (i32, i32) {
    %c0_i32 = arith.constant 0 : i32
    %c0_i32_0 = arith.constant 0 : i32
    return %arg0, %c0_i32 : i32, i32
  }
}

module attributes {stable_mosaic.version = 11 : i64} {
  func.func @_pool_max_kernel(%arg0: i32, %arg1: memref<9x128x16xf32, #tpu.memory_space<vmem>>, %arg2: memref<128x16xf32, #tpu.memory_space<vmem>>) attributes {dimension_semantics = [#tpu.dimension_semantics<parallel>], iteration_bounds = array<i64: 1>, scalar_prefetch = 0 : i64, scratch_operands = 0 : i64, tpu.core_type = #tpu.core_type<tc>, window_params = [{transform_indices = @transform_0, window_bounds = array<i64: 9, 128, 16>}, {transform_indices = @transform_1, window_bounds = array<i64: 128, 16>}]} {
    %c0 = arith.constant 0 : index
    %c0_0 = arith.constant 0 : index
    %c0_1 = arith.constant 0 : index
    %0 = vector.load %arg1[%c0, %c0_0, %c0_1] : memref<9x128x16xf32, #tpu.memory_space<vmem>>, vector<1x128x16xf32>
    %1 = vector.shape_cast %0 : vector<1x128x16xf32> to vector<128x16xf32>
    %c1 = arith.constant 1 : index
    %c0_2 = arith.constant 0 : index
    %c0_3 = arith.constant 0 : index
    %2 = vector.load %arg1[%c1, %c0_2, %c0_3] : memref<9x128x16xf32, #tpu.memory_space<vmem>>, vector<1x128x16xf32>
    %3 = vector.shape_cast %2 : vector<1x128x16xf32> to vector<128x16xf32>
    %4 = arith.maximumf %1, %3 : vector<128x16xf32>
    %c2 = arith.constant 2 : index
    %c0_4 = arith.constant 0 : index
    %c0_5 = arith.constant 0 : index
    %5 = vector.load %arg1[%c2, %c0_4, %c0_5] : memref<9x128x16xf32, #tpu.memory_space<vmem>>, vector<1x128x16xf32>
    %6 = vector.shape_cast %5 : vector<1x128x16xf32> to vector<128x16xf32>
    %7 = arith.maximumf %4, %6 : vector<128x16xf32>
    %c3 = arith.constant 3 : index
    %c0_6 = arith.constant 0 : index
    %c0_7 = arith.constant 0 : index
    %8 = vector.load %arg1[%c3, %c0_6, %c0_7] : memref<9x128x16xf32, #tpu.memory_space<vmem>>, vector<1x128x16xf32>
    %9 = vector.shape_cast %8 : vector<1x128x16xf32> to vector<128x16xf32>
    %10 = arith.maximumf %7, %9 : vector<128x16xf32>
    %c4 = arith.constant 4 : index
    %c0_8 = arith.constant 0 : index
    %c0_9 = arith.constant 0 : index
    %11 = vector.load %arg1[%c4, %c0_8, %c0_9] : memref<9x128x16xf32, #tpu.memory_space<vmem>>, vector<1x128x16xf32>
    %12 = vector.shape_cast %11 : vector<1x128x16xf32> to vector<128x16xf32>
    %13 = arith.maximumf %10, %12 : vector<128x16xf32>
    %c5 = arith.constant 5 : index
    %c0_10 = arith.constant 0 : index
    %c0_11 = arith.constant 0 : index
    %14 = vector.load %arg1[%c5, %c0_10, %c0_11] : memref<9x128x16xf32, #tpu.memory_space<vmem>>, vector<1x128x16xf32>
    %15 = vector.shape_cast %14 : vector<1x128x16xf32> to vector<128x16xf32>
    %16 = arith.maximumf %13, %15 : vector<128x16xf32>
    %c6 = arith.constant 6 : index
    %c0_12 = arith.constant 0 : index
    %c0_13 = arith.constant 0 : index
    %17 = vector.load %arg1[%c6, %c0_12, %c0_13] : memref<9x128x16xf32, #tpu.memory_space<vmem>>, vector<1x128x16xf32>
    %18 = vector.shape_cast %17 : vector<1x128x16xf32> to vector<128x16xf32>
    %19 = arith.maximumf %16, %18 : vector<128x16xf32>
    %c7 = arith.constant 7 : index
    %c0_14 = arith.constant 0 : index
    %c0_15 = arith.constant 0 : index
    %20 = vector.load %arg1[%c7, %c0_14, %c0_15] : memref<9x128x16xf32, #tpu.memory_space<vmem>>, vector<1x128x16xf32>
    %21 = vector.shape_cast %20 : vector<1x128x16xf32> to vector<128x16xf32>
    %22 = arith.maximumf %19, %21 : vector<128x16xf32>
    %c8 = arith.constant 8 : index
    %c0_16 = arith.constant 0 : index
    %c0_17 = arith.constant 0 : index
    %23 = vector.load %arg1[%c8, %c0_16, %c0_17] : memref<9x128x16xf32, #tpu.memory_space<vmem>>, vector<1x128x16xf32>
    %24 = vector.shape_cast %23 : vector<1x128x16xf32> to vector<128x16xf32>
    %25 = arith.maximumf %22, %24 : vector<128x16xf32>
    %c0_18 = arith.constant 0 : index
    %c0_19 = arith.constant 0 : index
    %26 = vector.load %arg2[%c0_18, %c0_19] : memref<128x16xf32, #tpu.memory_space<vmem>>, vector<128x16xf32>
    tpu.vector_store %arg2[%c0_18, %c0_19], %25 {strides = array<i32>} : memref<128x16xf32, #tpu.memory_space<vmem>>, vector<128x16xf32>,
    return
  }
  func.func @transform_0(%arg0: i32) -> (i32, i32, i32) {
    %c0_i32 = arith.constant 0 : i32
    %c0_i32_0 = arith.constant 0 : i32
    %c0_i32_1 = arith.constant 0 : i32
    return %c0_i32, %arg0, %c0_i32_0 : i32, i32, i32
  }
  func.func @transform_1(%arg0: i32) -> (i32, i32) {
    %c0_i32 = arith.constant 0 : i32
    %c0_i32_0 = arith.constant 0 : i32
    return %arg0, %c0_i32 : i32, i32
  }
}

module attributes {stable_mosaic.version = 11 : i64} {
  func.func @_bn_stats_kernel(%arg0: i32, %arg1: memref<128x16xf32, #tpu.memory_space<vmem>>, %arg2: memref<1x16xf32, #tpu.memory_space<vmem>>, %arg3: memref<1x16xf32, #tpu.memory_space<vmem>>, %arg4: memref<1x16xf32, #tpu.memory_space<vmem>>, %arg5: memref<1x16xf32, #tpu.memory_space<vmem>>, %arg6: memref<1x16xf32, #tpu.memory_space<vmem>>, %arg7: memref<1x16xf32, #tpu.memory_space<vmem>>) attributes {dimension_semantics = [#tpu.dimension_semantics<arbitrary>], iteration_bounds = array<i64: 1>, scalar_prefetch = 0 : i64, scratch_operands = 2 : i64, tpu.core_type = #tpu.core_type<tc>, window_params = [{transform_indices = @transform_0, window_bounds = array<i64: 128, 16>}, {pipeline_mode = #tpu.pipeline_mode<synchronous>, transform_indices = @transform_1, window_bounds = array<i64: 1, 16>}, {pipeline_mode = #tpu.pipeline_mode<synchronous>, transform_indices = @transform_2, window_bounds = array<i64: 1, 16>}, {pipeline_mode = #tpu.pipeline_mode<synchronous>, transform_indices = @transform_3, window_bounds = array<i64: 1, 16>}, {pipeline_mode = #tpu.pipeline_mode<synchronous>, transform_indices = @transform_4, window_bounds = array<i64: 1, 16>}]} {
    %c0_i32 = arith.constant 0 : i32
    %0 = arith.cmpi eq, %arg0, %c0_i32 : i32
    %1 = arith.extui %0 : i1 to i32
    %c0_i32_0 = arith.constant 0 : i32
    %2 = arith.cmpi ne, %1, %c0_i32_0 : i32
    scf.if %2 {
      %cst_13 = arith.constant 0.000000e+00 : f32
      %18 = vector.broadcast %cst_13 : f32 to vector<1x16xf32>
      %c0_14 = arith.constant 0 : index
      %c0_15 = arith.constant 0 : index
      %19 = vector.load %arg6[%c0_14, %c0_15] : memref<1x16xf32, #tpu.memory_space<vmem>>, vector<1x16xf32>
      tpu.vector_store %arg6[%c0_14, %c0_15], %18 {strides = array<i32>} : memref<1x16xf32, #tpu.memory_space<vmem>>, vector<1x16xf32>,
      %cst_16 = arith.constant 0.000000e+00 : f32
      %20 = vector.broadcast %cst_16 : f32 to vector<1x16xf32>
      %c0_17 = arith.constant 0 : index
      %c0_18 = arith.constant 0 : index
      %21 = vector.load %arg7[%c0_17, %c0_18] : memref<1x16xf32, #tpu.memory_space<vmem>>, vector<1x16xf32>
      tpu.vector_store %arg7[%c0_17, %c0_18], %20 {strides = array<i32>} : memref<1x16xf32, #tpu.memory_space<vmem>>, vector<1x16xf32>,
    } else {
    }
    %c0 = arith.constant 0 : index
    %c0_1 = arith.constant 0 : index
    %3 = vector.load %arg1[%c0, %c0_1] : memref<128x16xf32, #tpu.memory_space<vmem>>, vector<128x16xf32>
    %c0_2 = arith.constant 0 : index
    %c0_3 = arith.constant 0 : index
    %4 = vector.load %arg6[%c0_2, %c0_3] : memref<1x16xf32, #tpu.memory_space<vmem>>, vector<1x16xf32>
    %cst = arith.constant dense<0.000000e+00> : vector<16xf32>
    %5 = vector.multi_reduction <add>, %3, %cst [0] : vector<128x16xf32> to vector<16xf32>
    %6 = vector.shape_cast %5 : vector<16xf32> to vector<1x16xf32>
    %7 = arith.addf %4, %6 : vector<1x16xf32>
    %c0_4 = arith.constant 0 : index
    %c0_5 = arith.constant 0 : index
    %8 = vector.load %arg6[%c0_4, %c0_5] : memref<1x16xf32, #tpu.memory_space<vmem>>, vector<1x16xf32>
    tpu.vector_store %arg6[%c0_4, %c0_5], %7 {strides = array<i32>} : memref<1x16xf32, #tpu.memory_space<vmem>>, vector<1x16xf32>,
    %c0_6 = arith.constant 0 : index
    %c0_7 = arith.constant 0 : index
    %9 = vector.load %arg7[%c0_6, %c0_7] : memref<1x16xf32, #tpu.memory_space<vmem>>, vector<1x16xf32>
    %10 = arith.mulf %3, %3 : vector<128x16xf32>
    %cst_8 = arith.constant dense<0.000000e+00> : vector<16xf32>
    %11 = vector.multi_reduction <add>, %10, %cst_8 [0] : vector<128x16xf32> to vector<16xf32>
    %12 = vector.shape_cast %11 : vector<16xf32> to vector<1x16xf32>
    %13 = arith.addf %9, %12 : vector<1x16xf32>
    %c0_9 = arith.constant 0 : index
    %c0_10 = arith.constant 0 : index
    %14 = vector.load %arg7[%c0_9, %c0_10] : memref<1x16xf32, #tpu.memory_space<vmem>>, vector<1x16xf32>
    tpu.vector_store %arg7[%c0_9, %c0_10], %13 {strides = array<i32>} : memref<1x16xf32, #tpu.memory_space<vmem>>, vector<1x16xf32>,
    %c0_i32_11 = arith.constant 0 : i32
    %15 = arith.cmpi eq, %arg0, %c0_i32_11 : i32
    %16 = arith.extui %15 : i1 to i32
    %c0_i32_12 = arith.constant 0 : i32
    %17 = arith.cmpi ne, %16, %c0_i32_12 : i32
    scf.if %17 {
      %c0_13 = arith.constant 0 : index
      %c0_14 = arith.constant 0 : index
      %18 = vector.load %arg6[%c0_13, %c0_14] : memref<1x16xf32, #tpu.memory_space<vmem>>, vector<1x16xf32>
      %cst_15 = arith.constant 7.812500e-03 : f32
      %19 = vector.broadcast %cst_15 : f32 to vector<1x16xf32>
      %20 = arith.mulf %18, %19 : vector<1x16xf32>
      %c0_16 = arith.constant 0 : index
      %c0_17 = arith.constant 0 : index
      %21 = vector.load %arg7[%c0_16, %c0_17] : memref<1x16xf32, #tpu.memory_space<vmem>>, vector<1x16xf32>
      %cst_18 = arith.constant 7.812500e-03 : f32
      %22 = vector.broadcast %cst_18 : f32 to vector<1x16xf32>
      %23 = arith.mulf %21, %22 : vector<1x16xf32>
      %24 = arith.mulf %20, %20 : vector<1x16xf32>
      %25 = arith.subf %23, %24 : vector<1x16xf32>
      %cst_19 = arith.constant 0.000000e+00 : f32
      %26 = vector.broadcast %cst_19 : f32 to vector<1x16xf32>
      %27 = arith.maximumf %25, %26 : vector<1x16xf32>
      %cst_20 = arith.constant 9.99999974E-6 : f32
      %28 = vector.broadcast %cst_20 : f32 to vector<1x16xf32>
      %29 = arith.addf %27, %28 : vector<1x16xf32>
      %30 = math.rsqrt %29 : vector<1x16xf32>
      %c0_21 = arith.constant 0 : index
      %c0_22 = arith.constant 0 : index
      %31 = vector.load %arg2[%c0_21, %c0_22] : memref<1x16xf32, #tpu.memory_space<vmem>>, vector<1x16xf32>
      %32 = arith.mulf %31, %30 : vector<1x16xf32>
      %c0_23 = arith.constant 0 : index
      %c0_24 = arith.constant 0 : index
      %33 = vector.load %arg4[%c0_23, %c0_24] : memref<1x16xf32, #tpu.memory_space<vmem>>, vector<1x16xf32>
      tpu.vector_store %arg4[%c0_23, %c0_24], %32 {strides = array<i32>} : memref<1x16xf32, #tpu.memory_space<vmem>>, vector<1x16xf32>,
      %c0_25 = arith.constant 0 : index
      %c0_26 = arith.constant 0 : index
      %34 = vector.load %arg3[%c0_25, %c0_26] : memref<1x16xf32, #tpu.memory_space<vmem>>, vector<1x16xf32>
      %35 = arith.mulf %20, %32 : vector<1x16xf32>
      %36 = arith.subf %34, %35 : vector<1x16xf32>
      %c0_27 = arith.constant 0 : index
      %c0_28 = arith.constant 0 : index
      %37 = vector.load %arg5[%c0_27, %c0_28] : memref<1x16xf32, #tpu.memory_space<vmem>>, vector<1x16xf32>
      tpu.vector_store %arg5[%c0_27, %c0_28], %36 {strides = array<i32>} : memref<1x16xf32, #tpu.memory_space<vmem>>, vector<1x16xf32>,
    } else {
    }
    return
  }
  func.func @transform_0(%arg0: i32) -> (i32, i32) {
    %c0_i32 = arith.constant 0 : i32
    %c0_i32_0 = arith.constant 0 : i32
    return %arg0, %c0_i32 : i32, i32
  }
  func.func @transform_1(%arg0: i32) -> (i32, i32) {
    %c0_i32 = arith.constant 0 : i32
    %c0_i32_0 = arith.constant 0 : i32
    %c0_i32_1 = arith.constant 0 : i32
    return %c0_i32, %c0_i32_0 : i32, i32
  }
  func.func @transform_2(%arg0: i32) -> (i32, i32) {
    %c0_i32 = arith.constant 0 : i32
    %c0_i32_0 = arith.constant 0 : i32
    %c0_i32_1 = arith.constant 0 : i32
    return %c0_i32, %c0_i32_0 : i32, i32
  }
  func.func @transform_3(%arg0: i32) -> (i32, i32) {
    %c0_i32 = arith.constant 0 : i32
    %c0_i32_0 = arith.constant 0 : i32
    %c0_i32_1 = arith.constant 0 : i32
    return %c0_i32, %c0_i32_0 : i32, i32
  }
  func.func @transform_4(%arg0: i32) -> (i32, i32) {
    %c0_i32 = arith.constant 0 : i32
    %c0_i32_0 = arith.constant 0 : i32
    %c0_i32_1 = arith.constant 0 : i32
    return %c0_i32, %c0_i32_0 : i32, i32
  }
}

module attributes {stable_mosaic.version = 11 : i64} {
  func.func @_matmul_kernel(%arg0: i32, %arg1: i32, %arg2: i32, %arg3: memref<128x16xf32, #tpu.memory_space<vmem>>, %arg4: memref<16x16xbf16, #tpu.memory_space<vmem>>, %arg5: memref<1x16xf32, #tpu.memory_space<vmem>>, %arg6: memref<1x16xf32, #tpu.memory_space<vmem>>, %arg7: memref<1x16xf32, #tpu.memory_space<vmem>>, %arg8: memref<128x16xf32, #tpu.memory_space<vmem>>, %arg9: memref<128x16xf32, #tpu.memory_space<vmem>>) attributes {dimension_semantics = [#tpu.dimension_semantics<parallel>, #tpu.dimension_semantics<parallel>, #tpu.dimension_semantics<arbitrary>], iteration_bounds = array<i64: 1, 1, 1>, scalar_prefetch = 0 : i64, scratch_operands = 1 : i64, tpu.core_type = #tpu.core_type<tc>, window_params = [{transform_indices = @transform_0, window_bounds = array<i64: 128, 16>}, {transform_indices = @transform_1, window_bounds = array<i64: 16, 16>}, {transform_indices = @transform_2, window_bounds = array<i64: 1, 16>}, {transform_indices = @transform_3, window_bounds = array<i64: 1, 16>}, {transform_indices = @transform_4, window_bounds = array<i64: 1, 16>}, {transform_indices = @transform_5, window_bounds = array<i64: 128, 16>}]} {
    %c0_i32 = arith.constant 0 : i32
    %0 = arith.cmpi eq, %arg2, %c0_i32 : i32
    %1 = arith.extui %0 : i1 to i32
    %c0_i32_0 = arith.constant 0 : i32
    %2 = arith.cmpi ne, %1, %c0_i32_0 : i32
    scf.if %2 {
      %cst_15 = arith.constant 0.000000e+00 : f32
      %21 = vector.broadcast %cst_15 : f32 to vector<128x16xf32>
      %c0_16 = arith.constant 0 : index
      %c0_17 = arith.constant 0 : index
      %22 = vector.load %arg9[%c0_16, %c0_17] : memref<128x16xf32, #tpu.memory_space<vmem>>, vector<128x16xf32>
      tpu.vector_store %arg9[%c0_16, %c0_17], %21 {strides = array<i32>} : memref<128x16xf32, #tpu.memory_space<vmem>>, vector<128x16xf32>,
    } else {
    }
    %c0 = arith.constant 0 : index
    %c0_1 = arith.constant 0 : index
    %3 = vector.load %arg3[%c0, %c0_1] : memref<128x16xf32, #tpu.memory_space<vmem>>, vector<128x16xf32>
    %c0_2 = arith.constant 0 : index
    %c0_3 = arith.constant 0 : index
    %4 = vector.load %arg6[%c0_2, %c0_3] : memref<1x16xf32, #tpu.memory_space<vmem>>, vector<1x16xf32>
    %5 = vector.broadcast %4 : vector<1x16xf32> to vector<128x16xf32>
    %6 = arith.mulf %3, %5 : vector<128x16xf32>
    %c0_4 = arith.constant 0 : index
    %c0_5 = arith.constant 0 : index
    %7 = vector.load %arg7[%c0_4, %c0_5] : memref<1x16xf32, #tpu.memory_space<vmem>>, vector<1x16xf32>
    %8 = vector.broadcast %7 : vector<1x16xf32> to vector<128x16xf32>
    %9 = arith.addf %6, %8 : vector<128x16xf32>
    %cst = arith.constant 0.000000e+00 : f32
    %10 = vector.broadcast %cst : f32 to vector<128x16xf32>
    %11 = arith.maximumf %9, %10 : vector<128x16xf32>
    %c0_6 = arith.constant 0 : index
    %c0_7 = arith.constant 0 : index
    %12 = vector.load %arg9[%c0_6, %c0_7] : memref<128x16xf32, #tpu.memory_space<vmem>>, vector<128x16xf32>
    %13 = arith.truncf %11 : vector<128x16xf32> to vector<128x16xbf16>
    %c0_8 = arith.constant 0 : index
    %c0_9 = arith.constant 0 : index
    %14 = vector.load %arg4[%c0_8, %c0_9] : memref<16x16xbf16, #tpu.memory_space<vmem>>, vector<16x16xbf16>
    %cst_10 = arith.constant dense<0.000000e+00> : vector<128x16xf32>
    %15 = tpu.matmul %13, %14, %cst_10 {dimension_numbers = #tpu.dot_dimension_numbers<[1], [0], [0], [1], [0, 0, 1, 1], [], []>} : vector<128x16xbf16>, vector<16x16xbf16>, vector<128x16xf32> -> vector<128x16xf32>
    %16 = arith.addf %12, %15 : vector<128x16xf32>
    %c0_11 = arith.constant 0 : index
    %c0_12 = arith.constant 0 : index
    %17 = vector.load %arg9[%c0_11, %c0_12] : memref<128x16xf32, #tpu.memory_space<vmem>>, vector<128x16xf32>
    tpu.vector_store %arg9[%c0_11, %c0_12], %16 {strides = array<i32>} : memref<128x16xf32, #tpu.memory_space<vmem>>, vector<128x16xf32>,
    %c0_i32_13 = arith.constant 0 : i32
    %18 = arith.cmpi eq, %arg2, %c0_i32_13 : i32
    %19 = arith.extui %18 : i1 to i32
    %c0_i32_14 = arith.constant 0 : i32
    %20 = arith.cmpi ne, %19, %c0_i32_14 : i32
    scf.if %20 {
      %c0_15 = arith.constant 0 : index
      %c0_16 = arith.constant 0 : index
      %21 = vector.load %arg9[%c0_15, %c0_16] : memref<128x16xf32, #tpu.memory_space<vmem>>, vector<128x16xf32>
      %c0_17 = arith.constant 0 : index
      %c0_18 = arith.constant 0 : index
      %22 = vector.load %arg5[%c0_17, %c0_18] : memref<1x16xf32, #tpu.memory_space<vmem>>, vector<1x16xf32>
      %23 = vector.broadcast %22 : vector<1x16xf32> to vector<128x16xf32>
      %24 = arith.addf %21, %23 : vector<128x16xf32>
      %c0_19 = arith.constant 0 : index
      %c0_20 = arith.constant 0 : index
      %25 = vector.load %arg8[%c0_19, %c0_20] : memref<128x16xf32, #tpu.memory_space<vmem>>, vector<128x16xf32>
      tpu.vector_store %arg8[%c0_19, %c0_20], %24 {strides = array<i32>} : memref<128x16xf32, #tpu.memory_space<vmem>>, vector<128x16xf32>,
    } else {
    }
    return
  }
  func.func @transform_0(%arg0: i32, %arg1: i32, %arg2: i32) -> (i32, i32) {
    %c0_i32 = arith.constant 0 : i32
    return %arg0, %arg2 : i32, i32
  }
  func.func @transform_1(%arg0: i32, %arg1: i32, %arg2: i32) -> (i32, i32) {
    %c0_i32 = arith.constant 0 : i32
    return %arg2, %arg1 : i32, i32
  }
  func.func @transform_2(%arg0: i32, %arg1: i32, %arg2: i32) -> (i32, i32) {
    %c0_i32 = arith.constant 0 : i32
    %c0_i32_0 = arith.constant 0 : i32
    return %c0_i32, %arg1 : i32, i32
  }
  func.func @transform_3(%arg0: i32, %arg1: i32, %arg2: i32) -> (i32, i32) {
    %c0_i32 = arith.constant 0 : i32
    %c0_i32_0 = arith.constant 0 : i32
    return %c0_i32, %arg2 : i32, i32
  }
  func.func @transform_4(%arg0: i32, %arg1: i32, %arg2: i32) -> (i32, i32) {
    %c0_i32 = arith.constant 0 : i32
    %c0_i32_0 = arith.constant 0 : i32
    return %c0_i32, %arg2 : i32, i32
  }
  func.func @transform_5(%arg0: i32, %arg1: i32, %arg2: i32) -> (i32, i32) {
    %c0_i32 = arith.constant 0 : i32
    return %arg0, %arg1 : i32, i32
  }
}

module attributes {stable_mosaic.version = 11 : i64} {
  func.func @_affine_relu_kernel(%arg0: i32, %arg1: memref<128x16xf32, #tpu.memory_space<vmem>>, %arg2: memref<1x16xf32, #tpu.memory_space<vmem>>, %arg3: memref<1x16xf32, #tpu.memory_space<vmem>>, %arg4: memref<128x16xf32, #tpu.memory_space<vmem>>) attributes {dimension_semantics = [#tpu.dimension_semantics<parallel>], iteration_bounds = array<i64: 1>, scalar_prefetch = 0 : i64, scratch_operands = 0 : i64, tpu.core_type = #tpu.core_type<tc>, window_params = [{transform_indices = @transform_0, window_bounds = array<i64: 128, 16>}, {pipeline_mode = #tpu.pipeline_mode<synchronous>, transform_indices = @transform_1, window_bounds = array<i64: 1, 16>}, {pipeline_mode = #tpu.pipeline_mode<synchronous>, transform_indices = @transform_2, window_bounds = array<i64: 1, 16>}, {transform_indices = @transform_3, window_bounds = array<i64: 128, 16>}]} {
    %c0 = arith.constant 0 : index
    %c0_0 = arith.constant 0 : index
    %0 = vector.load %arg1[%c0, %c0_0] : memref<128x16xf32, #tpu.memory_space<vmem>>, vector<128x16xf32>
    %c0_1 = arith.constant 0 : index
    %c0_2 = arith.constant 0 : index
    %1 = vector.load %arg2[%c0_1, %c0_2] : memref<1x16xf32, #tpu.memory_space<vmem>>, vector<1x16xf32>
    %2 = vector.broadcast %1 : vector<1x16xf32> to vector<128x16xf32>
    %3 = arith.mulf %0, %2 : vector<128x16xf32>
    %c0_3 = arith.constant 0 : index
    %c0_4 = arith.constant 0 : index
    %4 = vector.load %arg3[%c0_3, %c0_4] : memref<1x16xf32, #tpu.memory_space<vmem>>, vector<1x16xf32>
    %5 = vector.broadcast %4 : vector<1x16xf32> to vector<128x16xf32>
    %6 = arith.addf %3, %5 : vector<128x16xf32>
    %cst = arith.constant 0.000000e+00 : f32
    %7 = vector.broadcast %cst : f32 to vector<128x16xf32>
    %8 = arith.maximumf %6, %7 : vector<128x16xf32>
    %c0_5 = arith.constant 0 : index
    %c0_6 = arith.constant 0 : index
    %9 = vector.load %arg4[%c0_5, %c0_6] : memref<128x16xf32, #tpu.memory_space<vmem>>, vector<128x16xf32>
    tpu.vector_store %arg4[%c0_5, %c0_6], %8 {strides = array<i32>} : memref<128x16xf32, #tpu.memory_space<vmem>>, vector<128x16xf32>,
    return
  }
  func.func @transform_0(%arg0: i32) -> (i32, i32) {
    %c0_i32 = arith.constant 0 : i32
    %c0_i32_0 = arith.constant 0 : i32
    return %arg0, %c0_i32 : i32, i32
  }
  func.func @transform_1(%arg0: i32) -> (i32, i32) {
    %c0_i32 = arith.constant 0 : i32
    %c0_i32_0 = arith.constant 0 : i32
    %c0_i32_1 = arith.constant 0 : i32
    return %c0_i32, %c0_i32_0 : i32, i32
  }
  func.func @transform_2(%arg0: i32) -> (i32, i32) {
    %c0_i32 = arith.constant 0 : i32
    %c0_i32_0 = arith.constant 0 : i32
    %c0_i32_1 = arith.constant 0 : i32
    return %c0_i32, %c0_i32_0 : i32, i32
  }
  func.func @transform_3(%arg0: i32) -> (i32, i32) {
    %c0_i32 = arith.constant 0 : i32
    %c0_i32_0 = arith.constant 0 : i32
    return %arg0, %c0_i32 : i32, i32
  }
}

module attributes {stable_mosaic.version = 11 : i64} {
  func.func @_matmul_kernel(%arg0: i32, %arg1: i32, %arg2: i32, %arg3: memref<128x144xf32, #tpu.memory_space<vmem>>, %arg4: memref<144x8xbf16, #tpu.memory_space<vmem>>, %arg5: memref<1x8xf32, #tpu.memory_space<vmem>>, %arg6: memref<1x144xf32, #tpu.memory_space<vmem>>, %arg7: memref<1x144xf32, #tpu.memory_space<vmem>>, %arg8: memref<128x8xf32, #tpu.memory_space<vmem>>, %arg9: memref<128x8xf32, #tpu.memory_space<vmem>>) attributes {dimension_semantics = [#tpu.dimension_semantics<parallel>, #tpu.dimension_semantics<parallel>, #tpu.dimension_semantics<arbitrary>], iteration_bounds = array<i64: 1, 1, 1>, scalar_prefetch = 0 : i64, scratch_operands = 1 : i64, tpu.core_type = #tpu.core_type<tc>, window_params = [{transform_indices = @transform_0, window_bounds = array<i64: 128, 144>}, {transform_indices = @transform_1, window_bounds = array<i64: 144, 8>}, {transform_indices = @transform_2, window_bounds = array<i64: 1, 8>}, {transform_indices = @transform_3, window_bounds = array<i64: 1, 144>}, {transform_indices = @transform_4, window_bounds = array<i64: 1, 144>}, {transform_indices = @transform_5, window_bounds = array<i64: 128, 8>}]} {
    %c0_i32 = arith.constant 0 : i32
    %0 = arith.cmpi eq, %arg2, %c0_i32 : i32
    %1 = arith.extui %0 : i1 to i32
    %c0_i32_0 = arith.constant 0 : i32
    %2 = arith.cmpi ne, %1, %c0_i32_0 : i32
    scf.if %2 {
      %cst_10 = arith.constant 0.000000e+00 : f32
      %13 = vector.broadcast %cst_10 : f32 to vector<128x8xf32>
      %c0_11 = arith.constant 0 : index
      %c0_12 = arith.constant 0 : index
      %14 = vector.load %arg9[%c0_11, %c0_12] : memref<128x8xf32, #tpu.memory_space<vmem>>, vector<128x8xf32>
      tpu.vector_store %arg9[%c0_11, %c0_12], %13 {strides = array<i32>} : memref<128x8xf32, #tpu.memory_space<vmem>>, vector<128x8xf32>,
    } else {
    }
    %c0 = arith.constant 0 : index
    %c0_1 = arith.constant 0 : index
    %3 = vector.load %arg3[%c0, %c0_1] : memref<128x144xf32, #tpu.memory_space<vmem>>, vector<128x144xf32>
    %c0_2 = arith.constant 0 : index
    %c0_3 = arith.constant 0 : index
    %4 = vector.load %arg9[%c0_2, %c0_3] : memref<128x8xf32, #tpu.memory_space<vmem>>, vector<128x8xf32>
    %5 = arith.truncf %3 : vector<128x144xf32> to vector<128x144xbf16>
    %c0_4 = arith.constant 0 : index
    %c0_5 = arith.constant 0 : index
    %6 = vector.load %arg4[%c0_4, %c0_5] : memref<144x8xbf16, #tpu.memory_space<vmem>>, vector<144x8xbf16>
    %cst = arith.constant dense<0.000000e+00> : vector<128x8xf32>
    %7 = tpu.matmul %5, %6, %cst {dimension_numbers = #tpu.dot_dimension_numbers<[1], [0], [0], [1], [0, 0, 1, 1], [], []>} : vector<128x144xbf16>, vector<144x8xbf16>, vector<128x8xf32> -> vector<128x8xf32>
    %8 = arith.addf %4, %7 : vector<128x8xf32>
    %c0_6 = arith.constant 0 : index
    %c0_7 = arith.constant 0 : index
    %9 = vector.load %arg9[%c0_6, %c0_7] : memref<128x8xf32, #tpu.memory_space<vmem>>, vector<128x8xf32>
    tpu.vector_store %arg9[%c0_6, %c0_7], %8 {strides = array<i32>} : memref<128x8xf32, #tpu.memory_space<vmem>>, vector<128x8xf32>,
    %c0_i32_8 = arith.constant 0 : i32
    %10 = arith.cmpi eq, %arg2, %c0_i32_8 : i32
    %11 = arith.extui %10 : i1 to i32
    %c0_i32_9 = arith.constant 0 : i32
    %12 = arith.cmpi ne, %11, %c0_i32_9 : i32
    scf.if %12 {
      %c0_10 = arith.constant 0 : index
      %c0_11 = arith.constant 0 : index
      %13 = vector.load %arg9[%c0_10, %c0_11] : memref<128x8xf32, #tpu.memory_space<vmem>>, vector<128x8xf32>
      %c0_12 = arith.constant 0 : index
      %c0_13 = arith.constant 0 : index
      %14 = vector.load %arg5[%c0_12, %c0_13] : memref<1x8xf32, #tpu.memory_space<vmem>>, vector<1x8xf32>
      %15 = vector.broadcast %14 : vector<1x8xf32> to vector<128x8xf32>
      %16 = arith.addf %13, %15 : vector<128x8xf32>
      %c0_14 = arith.constant 0 : index
      %c0_15 = arith.constant 0 : index
      %17 = vector.load %arg8[%c0_14, %c0_15] : memref<128x8xf32, #tpu.memory_space<vmem>>, vector<128x8xf32>
      tpu.vector_store %arg8[%c0_14, %c0_15], %16 {strides = array<i32>} : memref<128x8xf32, #tpu.memory_space<vmem>>, vector<128x8xf32>,
    } else {
    }
    return
  }
  func.func @transform_0(%arg0: i32, %arg1: i32, %arg2: i32) -> (i32, i32) {
    %c0_i32 = arith.constant 0 : i32
    return %arg0, %arg2 : i32, i32
  }
  func.func @transform_1(%arg0: i32, %arg1: i32, %arg2: i32) -> (i32, i32) {
    %c0_i32 = arith.constant 0 : i32
    return %arg2, %arg1 : i32, i32
  }
  func.func @transform_2(%arg0: i32, %arg1: i32, %arg2: i32) -> (i32, i32) {
    %c0_i32 = arith.constant 0 : i32
    %c0_i32_0 = arith.constant 0 : i32
    return %c0_i32, %arg1 : i32, i32
  }
  func.func @transform_3(%arg0: i32, %arg1: i32, %arg2: i32) -> (i32, i32) {
    %c0_i32 = arith.constant 0 : i32
    %c0_i32_0 = arith.constant 0 : i32
    return %c0_i32, %arg2 : i32, i32
  }
  func.func @transform_4(%arg0: i32, %arg1: i32, %arg2: i32) -> (i32, i32) {
    %c0_i32 = arith.constant 0 : i32
    %c0_i32_0 = arith.constant 0 : i32
    return %c0_i32, %arg2 : i32, i32
  }
  func.func @transform_5(%arg0: i32, %arg1: i32, %arg2: i32) -> (i32, i32) {
    %c0_i32 = arith.constant 0 : i32
    return %arg0, %arg1 : i32, i32
  }
}

module attributes {stable_mosaic.version = 11 : i64} {
  func.func @_bn_stats_kernel(%arg0: i32, %arg1: memref<128x24xf32, #tpu.memory_space<vmem>>, %arg2: memref<1x24xf32, #tpu.memory_space<vmem>>, %arg3: memref<1x24xf32, #tpu.memory_space<vmem>>, %arg4: memref<1x24xf32, #tpu.memory_space<vmem>>, %arg5: memref<1x24xf32, #tpu.memory_space<vmem>>, %arg6: memref<1x24xf32, #tpu.memory_space<vmem>>, %arg7: memref<1x24xf32, #tpu.memory_space<vmem>>) attributes {dimension_semantics = [#tpu.dimension_semantics<arbitrary>], iteration_bounds = array<i64: 1>, scalar_prefetch = 0 : i64, scratch_operands = 2 : i64, tpu.core_type = #tpu.core_type<tc>, window_params = [{transform_indices = @transform_0, window_bounds = array<i64: 128, 24>}, {pipeline_mode = #tpu.pipeline_mode<synchronous>, transform_indices = @transform_1, window_bounds = array<i64: 1, 24>}, {pipeline_mode = #tpu.pipeline_mode<synchronous>, transform_indices = @transform_2, window_bounds = array<i64: 1, 24>}, {pipeline_mode = #tpu.pipeline_mode<synchronous>, transform_indices = @transform_3, window_bounds = array<i64: 1, 24>}, {pipeline_mode = #tpu.pipeline_mode<synchronous>, transform_indices = @transform_4, window_bounds = array<i64: 1, 24>}]} {
    %c0_i32 = arith.constant 0 : i32
    %0 = arith.cmpi eq, %arg0, %c0_i32 : i32
    %1 = arith.extui %0 : i1 to i32
    %c0_i32_0 = arith.constant 0 : i32
    %2 = arith.cmpi ne, %1, %c0_i32_0 : i32
    scf.if %2 {
      %cst_13 = arith.constant 0.000000e+00 : f32
      %18 = vector.broadcast %cst_13 : f32 to vector<1x24xf32>
      %c0_14 = arith.constant 0 : index
      %c0_15 = arith.constant 0 : index
      %19 = vector.load %arg6[%c0_14, %c0_15] : memref<1x24xf32, #tpu.memory_space<vmem>>, vector<1x24xf32>
      tpu.vector_store %arg6[%c0_14, %c0_15], %18 {strides = array<i32>} : memref<1x24xf32, #tpu.memory_space<vmem>>, vector<1x24xf32>,
      %cst_16 = arith.constant 0.000000e+00 : f32
      %20 = vector.broadcast %cst_16 : f32 to vector<1x24xf32>
      %c0_17 = arith.constant 0 : index
      %c0_18 = arith.constant 0 : index
      %21 = vector.load %arg7[%c0_17, %c0_18] : memref<1x24xf32, #tpu.memory_space<vmem>>, vector<1x24xf32>
      tpu.vector_store %arg7[%c0_17, %c0_18], %20 {strides = array<i32>} : memref<1x24xf32, #tpu.memory_space<vmem>>, vector<1x24xf32>,
    } else {
    }
    %c0 = arith.constant 0 : index
    %c0_1 = arith.constant 0 : index
    %3 = vector.load %arg1[%c0, %c0_1] : memref<128x24xf32, #tpu.memory_space<vmem>>, vector<128x24xf32>
    %c0_2 = arith.constant 0 : index
    %c0_3 = arith.constant 0 : index
    %4 = vector.load %arg6[%c0_2, %c0_3] : memref<1x24xf32, #tpu.memory_space<vmem>>, vector<1x24xf32>
    %cst = arith.constant dense<0.000000e+00> : vector<24xf32>
    %5 = vector.multi_reduction <add>, %3, %cst [0] : vector<128x24xf32> to vector<24xf32>
    %6 = vector.shape_cast %5 : vector<24xf32> to vector<1x24xf32>
    %7 = arith.addf %4, %6 : vector<1x24xf32>
    %c0_4 = arith.constant 0 : index
    %c0_5 = arith.constant 0 : index
    %8 = vector.load %arg6[%c0_4, %c0_5] : memref<1x24xf32, #tpu.memory_space<vmem>>, vector<1x24xf32>
    tpu.vector_store %arg6[%c0_4, %c0_5], %7 {strides = array<i32>} : memref<1x24xf32, #tpu.memory_space<vmem>>, vector<1x24xf32>,
    %c0_6 = arith.constant 0 : index
    %c0_7 = arith.constant 0 : index
    %9 = vector.load %arg7[%c0_6, %c0_7] : memref<1x24xf32, #tpu.memory_space<vmem>>, vector<1x24xf32>
    %10 = arith.mulf %3, %3 : vector<128x24xf32>
    %cst_8 = arith.constant dense<0.000000e+00> : vector<24xf32>
    %11 = vector.multi_reduction <add>, %10, %cst_8 [0] : vector<128x24xf32> to vector<24xf32>
    %12 = vector.shape_cast %11 : vector<24xf32> to vector<1x24xf32>
    %13 = arith.addf %9, %12 : vector<1x24xf32>
    %c0_9 = arith.constant 0 : index
    %c0_10 = arith.constant 0 : index
    %14 = vector.load %arg7[%c0_9, %c0_10] : memref<1x24xf32, #tpu.memory_space<vmem>>, vector<1x24xf32>
    tpu.vector_store %arg7[%c0_9, %c0_10], %13 {strides = array<i32>} : memref<1x24xf32, #tpu.memory_space<vmem>>, vector<1x24xf32>,
    %c0_i32_11 = arith.constant 0 : i32
    %15 = arith.cmpi eq, %arg0, %c0_i32_11 : i32
    %16 = arith.extui %15 : i1 to i32
    %c0_i32_12 = arith.constant 0 : i32
    %17 = arith.cmpi ne, %16, %c0_i32_12 : i32
    scf.if %17 {
      %c0_13 = arith.constant 0 : index
      %c0_14 = arith.constant 0 : index
      %18 = vector.load %arg6[%c0_13, %c0_14] : memref<1x24xf32, #tpu.memory_space<vmem>>, vector<1x24xf32>
      %cst_15 = arith.constant 7.812500e-03 : f32
      %19 = vector.broadcast %cst_15 : f32 to vector<1x24xf32>
      %20 = arith.mulf %18, %19 : vector<1x24xf32>
      %c0_16 = arith.constant 0 : index
      %c0_17 = arith.constant 0 : index
      %21 = vector.load %arg7[%c0_16, %c0_17] : memref<1x24xf32, #tpu.memory_space<vmem>>, vector<1x24xf32>
      %cst_18 = arith.constant 7.812500e-03 : f32
      %22 = vector.broadcast %cst_18 : f32 to vector<1x24xf32>
      %23 = arith.mulf %21, %22 : vector<1x24xf32>
      %24 = arith.mulf %20, %20 : vector<1x24xf32>
      %25 = arith.subf %23, %24 : vector<1x24xf32>
      %cst_19 = arith.constant 0.000000e+00 : f32
      %26 = vector.broadcast %cst_19 : f32 to vector<1x24xf32>
      %27 = arith.maximumf %25, %26 : vector<1x24xf32>
      %cst_20 = arith.constant 9.99999974E-6 : f32
      %28 = vector.broadcast %cst_20 : f32 to vector<1x24xf32>
      %29 = arith.addf %27, %28 : vector<1x24xf32>
      %30 = math.rsqrt %29 : vector<1x24xf32>
      %c0_21 = arith.constant 0 : index
      %c0_22 = arith.constant 0 : index
      %31 = vector.load %arg2[%c0_21, %c0_22] : memref<1x24xf32, #tpu.memory_space<vmem>>, vector<1x24xf32>
      %32 = arith.mulf %31, %30 : vector<1x24xf32>
      %c0_23 = arith.constant 0 : index
      %c0_24 = arith.constant 0 : index
      %33 = vector.load %arg4[%c0_23, %c0_24] : memref<1x24xf32, #tpu.memory_space<vmem>>, vector<1x24xf32>
      tpu.vector_store %arg4[%c0_23, %c0_24], %32 {strides = array<i32>} : memref<1x24xf32, #tpu.memory_space<vmem>>, vector<1x24xf32>,
      %c0_25 = arith.constant 0 : index
      %c0_26 = arith.constant 0 : index
      %34 = vector.load %arg3[%c0_25, %c0_26] : memref<1x24xf32, #tpu.memory_space<vmem>>, vector<1x24xf32>
      %35 = arith.mulf %20, %32 : vector<1x24xf32>
      %36 = arith.subf %34, %35 : vector<1x24xf32>
      %c0_27 = arith.constant 0 : index
      %c0_28 = arith.constant 0 : index
      %37 = vector.load %arg5[%c0_27, %c0_28] : memref<1x24xf32, #tpu.memory_space<vmem>>, vector<1x24xf32>
      tpu.vector_store %arg5[%c0_27, %c0_28], %36 {strides = array<i32>} : memref<1x24xf32, #tpu.memory_space<vmem>>, vector<1x24xf32>,
    } else {
    }
    return
  }
  func.func @transform_0(%arg0: i32) -> (i32, i32) {
    %c0_i32 = arith.constant 0 : i32
    %c0_i32_0 = arith.constant 0 : i32
    return %arg0, %c0_i32 : i32, i32
  }
  func.func @transform_1(%arg0: i32) -> (i32, i32) {
    %c0_i32 = arith.constant 0 : i32
    %c0_i32_0 = arith.constant 0 : i32
    %c0_i32_1 = arith.constant 0 : i32
    return %c0_i32, %c0_i32_0 : i32, i32
  }
  func.func @transform_2(%arg0: i32) -> (i32, i32) {
    %c0_i32 = arith.constant 0 : i32
    %c0_i32_0 = arith.constant 0 : i32
    %c0_i32_1 = arith.constant 0 : i32
    return %c0_i32, %c0_i32_0 : i32, i32
  }
  func.func @transform_3(%arg0: i32) -> (i32, i32) {
    %c0_i32 = arith.constant 0 : i32
    %c0_i32_0 = arith.constant 0 : i32
    %c0_i32_1 = arith.constant 0 : i32
    return %c0_i32, %c0_i32_0 : i32, i32
  }
  func.func @transform_4(%arg0: i32) -> (i32, i32) {
    %c0_i32 = arith.constant 0 : i32
    %c0_i32_0 = arith.constant 0 : i32
    %c0_i32_1 = arith.constant 0 : i32
    return %c0_i32, %c0_i32_0 : i32, i32
  }
}

module attributes {stable_mosaic.version = 11 : i64} {
  func.func @_matmul_kernel(%arg0: i32, %arg1: i32, %arg2: i32, %arg3: memref<128x24xf32, #tpu.memory_space<vmem>>, %arg4: memref<24x16xbf16, #tpu.memory_space<vmem>>, %arg5: memref<1x16xf32, #tpu.memory_space<vmem>>, %arg6: memref<1x24xf32, #tpu.memory_space<vmem>>, %arg7: memref<1x24xf32, #tpu.memory_space<vmem>>, %arg8: memref<128x16xf32, #tpu.memory_space<vmem>>, %arg9: memref<128x16xf32, #tpu.memory_space<vmem>>) attributes {dimension_semantics = [#tpu.dimension_semantics<parallel>, #tpu.dimension_semantics<parallel>, #tpu.dimension_semantics<arbitrary>], iteration_bounds = array<i64: 1, 1, 1>, scalar_prefetch = 0 : i64, scratch_operands = 1 : i64, tpu.core_type = #tpu.core_type<tc>, window_params = [{transform_indices = @transform_0, window_bounds = array<i64: 128, 24>}, {transform_indices = @transform_1, window_bounds = array<i64: 24, 16>}, {transform_indices = @transform_2, window_bounds = array<i64: 1, 16>}, {transform_indices = @transform_3, window_bounds = array<i64: 1, 24>}, {transform_indices = @transform_4, window_bounds = array<i64: 1, 24>}, {transform_indices = @transform_5, window_bounds = array<i64: 128, 16>}]} {
    %c0_i32 = arith.constant 0 : i32
    %0 = arith.cmpi eq, %arg2, %c0_i32 : i32
    %1 = arith.extui %0 : i1 to i32
    %c0_i32_0 = arith.constant 0 : i32
    %2 = arith.cmpi ne, %1, %c0_i32_0 : i32
    scf.if %2 {
      %cst_15 = arith.constant 0.000000e+00 : f32
      %21 = vector.broadcast %cst_15 : f32 to vector<128x16xf32>
      %c0_16 = arith.constant 0 : index
      %c0_17 = arith.constant 0 : index
      %22 = vector.load %arg9[%c0_16, %c0_17] : memref<128x16xf32, #tpu.memory_space<vmem>>, vector<128x16xf32>
      tpu.vector_store %arg9[%c0_16, %c0_17], %21 {strides = array<i32>} : memref<128x16xf32, #tpu.memory_space<vmem>>, vector<128x16xf32>,
    } else {
    }
    %c0 = arith.constant 0 : index
    %c0_1 = arith.constant 0 : index
    %3 = vector.load %arg3[%c0, %c0_1] : memref<128x24xf32, #tpu.memory_space<vmem>>, vector<128x24xf32>
    %c0_2 = arith.constant 0 : index
    %c0_3 = arith.constant 0 : index
    %4 = vector.load %arg6[%c0_2, %c0_3] : memref<1x24xf32, #tpu.memory_space<vmem>>, vector<1x24xf32>
    %5 = vector.broadcast %4 : vector<1x24xf32> to vector<128x24xf32>
    %6 = arith.mulf %3, %5 : vector<128x24xf32>
    %c0_4 = arith.constant 0 : index
    %c0_5 = arith.constant 0 : index
    %7 = vector.load %arg7[%c0_4, %c0_5] : memref<1x24xf32, #tpu.memory_space<vmem>>, vector<1x24xf32>
    %8 = vector.broadcast %7 : vector<1x24xf32> to vector<128x24xf32>
    %9 = arith.addf %6, %8 : vector<128x24xf32>
    %cst = arith.constant 0.000000e+00 : f32
    %10 = vector.broadcast %cst : f32 to vector<128x24xf32>
    %11 = arith.maximumf %9, %10 : vector<128x24xf32>
    %c0_6 = arith.constant 0 : index
    %c0_7 = arith.constant 0 : index
    %12 = vector.load %arg9[%c0_6, %c0_7] : memref<128x16xf32, #tpu.memory_space<vmem>>, vector<128x16xf32>
    %13 = arith.truncf %11 : vector<128x24xf32> to vector<128x24xbf16>
    %c0_8 = arith.constant 0 : index
    %c0_9 = arith.constant 0 : index
    %14 = vector.load %arg4[%c0_8, %c0_9] : memref<24x16xbf16, #tpu.memory_space<vmem>>, vector<24x16xbf16>
    %cst_10 = arith.constant dense<0.000000e+00> : vector<128x16xf32>
    %15 = tpu.matmul %13, %14, %cst_10 {dimension_numbers = #tpu.dot_dimension_numbers<[1], [0], [0], [1], [0, 0, 1, 1], [], []>} : vector<128x24xbf16>, vector<24x16xbf16>, vector<128x16xf32> -> vector<128x16xf32>
    %16 = arith.addf %12, %15 : vector<128x16xf32>
    %c0_11 = arith.constant 0 : index
    %c0_12 = arith.constant 0 : index
    %17 = vector.load %arg9[%c0_11, %c0_12] : memref<128x16xf32, #tpu.memory_space<vmem>>, vector<128x16xf32>
    tpu.vector_store %arg9[%c0_11, %c0_12], %16 {strides = array<i32>} : memref<128x16xf32, #tpu.memory_space<vmem>>, vector<128x16xf32>,
    %c0_i32_13 = arith.constant 0 : i32
    %18 = arith.cmpi eq, %arg2, %c0_i32_13 : i32
    %19 = arith.extui %18 : i1 to i32
    %c0_i32_14 = arith.constant 0 : i32
    %20 = arith.cmpi ne, %19, %c0_i32_14 : i32
    scf.if %20 {
      %c0_15 = arith.constant 0 : index
      %c0_16 = arith.constant 0 : index
      %21 = vector.load %arg9[%c0_15, %c0_16] : memref<128x16xf32, #tpu.memory_space<vmem>>, vector<128x16xf32>
      %c0_17 = arith.constant 0 : index
      %c0_18 = arith.constant 0 : index
      %22 = vector.load %arg5[%c0_17, %c0_18] : memref<1x16xf32, #tpu.memory_space<vmem>>, vector<1x16xf32>
      %23 = vector.broadcast %22 : vector<1x16xf32> to vector<128x16xf32>
      %24 = arith.addf %21, %23 : vector<128x16xf32>
      %c0_19 = arith.constant 0 : index
      %c0_20 = arith.constant 0 : index
      %25 = vector.load %arg8[%c0_19, %c0_20] : memref<128x16xf32, #tpu.memory_space<vmem>>, vector<128x16xf32>
      tpu.vector_store %arg8[%c0_19, %c0_20], %24 {strides = array<i32>} : memref<128x16xf32, #tpu.memory_space<vmem>>, vector<128x16xf32>,
    } else {
    }
    return
  }
  func.func @transform_0(%arg0: i32, %arg1: i32, %arg2: i32) -> (i32, i32) {
    %c0_i32 = arith.constant 0 : i32
    return %arg0, %arg2 : i32, i32
  }
  func.func @transform_1(%arg0: i32, %arg1: i32, %arg2: i32) -> (i32, i32) {
    %c0_i32 = arith.constant 0 : i32
    return %arg2, %arg1 : i32, i32
  }
  func.func @transform_2(%arg0: i32, %arg1: i32, %arg2: i32) -> (i32, i32) {
    %c0_i32 = arith.constant 0 : i32
    %c0_i32_0 = arith.constant 0 : i32
    return %c0_i32, %arg1 : i32, i32
  }
  func.func @transform_3(%arg0: i32, %arg1: i32, %arg2: i32) -> (i32, i32) {
    %c0_i32 = arith.constant 0 : i32
    %c0_i32_0 = arith.constant 0 : i32
    return %c0_i32, %arg2 : i32, i32
  }
  func.func @transform_4(%arg0: i32, %arg1: i32, %arg2: i32) -> (i32, i32) {
    %c0_i32 = arith.constant 0 : i32
    %c0_i32_0 = arith.constant 0 : i32
    return %c0_i32, %arg2 : i32, i32
  }
  func.func @transform_5(%arg0: i32, %arg1: i32, %arg2: i32) -> (i32, i32) {
    %c0_i32 = arith.constant 0 : i32
    return %arg0, %arg1 : i32, i32
  }
}

module attributes {stable_mosaic.version = 11 : i64} {
  func.func @_gap_kernel(%arg0: i32, %arg1: memref<2x64x32xf32, #tpu.memory_space<vmem>>, %arg2: memref<1x1x32xf32, #tpu.memory_space<vmem>>, %arg3: memref<1x1x32xf32, #tpu.memory_space<vmem>>, %arg4: memref<2x32xf32, #tpu.memory_space<vmem>>, %arg5: memref<2x32xf32, #tpu.memory_space<vmem>>) attributes {dimension_semantics = [#tpu.dimension_semantics<arbitrary>], iteration_bounds = array<i64: 1>, scalar_prefetch = 0 : i64, scratch_operands = 1 : i64, tpu.core_type = #tpu.core_type<tc>, window_params = [{transform_indices = @transform_0, window_bounds = array<i64: 2, 64, 32>}, {pipeline_mode = #tpu.pipeline_mode<synchronous>, transform_indices = @transform_1, window_bounds = array<i64: 1, 1, 32>}, {pipeline_mode = #tpu.pipeline_mode<synchronous>, transform_indices = @transform_2, window_bounds = array<i64: 1, 1, 32>}, {pipeline_mode = #tpu.pipeline_mode<synchronous>, transform_indices = @transform_3, window_bounds = array<i64: 2, 32>}]} {
    %c0_i32 = arith.constant 0 : i32
    %0 = arith.cmpi eq, %arg0, %c0_i32 : i32
    %1 = arith.extui %0 : i1 to i32
    %c0_i32_0 = arith.constant 0 : i32
    %2 = arith.cmpi ne, %1, %c0_i32_0 : i32
    scf.if %2 {
      %cst_9 = arith.constant 0.000000e+00 : f32
      %11 = vector.broadcast %cst_9 : f32 to vector<2x32xf32>
      %c0_10 = arith.constant 0 : index
      %c0_11 = arith.constant 0 : index
      %12 = vector.load %arg5[%c0_10, %c0_11] : memref<2x32xf32, #tpu.memory_space<vmem>>, vector<2x32xf32>
      tpu.vector_store %arg5[%c0_10, %c0_11], %11 {strides = array<i32>} : memref<2x32xf32, #tpu.memory_space<vmem>>, vector<2x32xf32>,
    } else {
    }
    %c0 = arith.constant 0 : index
    %c0_1 = arith.constant 0 : index
    %c0_2 = arith.constant 0 : index
    %3 = vector.load %arg1[%c0, %c0_1, %c0_2] : memref<2x64x32xf32, #tpu.memory_space<vmem>>, vector<2x64x32xf32>
    %c0_3 = arith.constant 0 : index
    %c0_4 = arith.constant 0 : index
    %4 = vector.load %arg5[%c0_3, %c0_4] : memref<2x32xf32, #tpu.memory_space<vmem>>, vector<2x32xf32>
    %cst = arith.constant dense<0.000000e+00> : vector<2x32xf32>
    %5 = vector.multi_reduction <add>, %3, %cst [1] : vector<2x64x32xf32> to vector<2x32xf32>
    %6 = arith.addf %4, %5 : vector<2x32xf32>
    %c0_5 = arith.constant 0 : index
    %c0_6 = arith.constant 0 : index
    %7 = vector.load %arg5[%c0_5, %c0_6] : memref<2x32xf32, #tpu.memory_space<vmem>>, vector<2x32xf32>
    tpu.vector_store %arg5[%c0_5, %c0_6], %6 {strides = array<i32>} : memref<2x32xf32, #tpu.memory_space<vmem>>, vector<2x32xf32>,
    %c0_i32_7 = arith.constant 0 : i32
    %8 = arith.cmpi eq, %arg0, %c0_i32_7 : i32
    %9 = arith.extui %8 : i1 to i32
    %c0_i32_8 = arith.constant 0 : i32
    %10 = arith.cmpi ne, %9, %c0_i32_8 : i32
    scf.if %10 {
      %c0_9 = arith.constant 0 : index
      %c0_10 = arith.constant 0 : index
      %11 = vector.load %arg5[%c0_9, %c0_10] : memref<2x32xf32, #tpu.memory_space<vmem>>, vector<2x32xf32>
      %cst_11 = arith.constant 1.562500e-02 : f32
      %12 = vector.broadcast %cst_11 : f32 to vector<2x32xf32>
      %13 = arith.mulf %11, %12 : vector<2x32xf32>
      %c0_12 = arith.constant 0 : index
      %c0_13 = arith.constant 0 : index
      %14 = vector.load %arg4[%c0_12, %c0_13] : memref<2x32xf32, #tpu.memory_space<vmem>>, vector<2x32xf32>
      tpu.vector_store %arg4[%c0_12, %c0_13], %13 {strides = array<i32>} : memref<2x32xf32, #tpu.memory_space<vmem>>, vector<2x32xf32>,
    } else {
    }
    return
  }
  func.func @transform_0(%arg0: i32) -> (i32, i32, i32) {
    %c0_i32 = arith.constant 0 : i32
    %c0_i32_0 = arith.constant 0 : i32
    %c0_i32_1 = arith.constant 0 : i32
    return %c0_i32, %arg0, %c0_i32_0 : i32, i32, i32
  }
  func.func @transform_1(%arg0: i32) -> (i32, i32, i32) {
    %c0_i32 = arith.constant 0 : i32
    %c0_i32_0 = arith.constant 0 : i32
    %c0_i32_1 = arith.constant 0 : i32
    %c0_i32_2 = arith.constant 0 : i32
    return %c0_i32, %c0_i32_0, %c0_i32_1 : i32, i32, i32
  }
  func.func @transform_2(%arg0: i32) -> (i32, i32, i32) {
    %c0_i32 = arith.constant 0 : i32
    %c0_i32_0 = arith.constant 0 : i32
    %c0_i32_1 = arith.constant 0 : i32
    %c0_i32_2 = arith.constant 0 : i32
    return %c0_i32, %c0_i32_0, %c0_i32_1 : i32, i32, i32
  }
  func.func @transform_3(%arg0: i32) -> (i32, i32) {
    %c0_i32 = arith.constant 0 : i32
    %c0_i32_0 = arith.constant 0 : i32
    %c0_i32_1 = arith.constant 0 : i32
    return %c0_i32, %c0_i32_0 : i32, i32
  }
}

module attributes {stable_mosaic.version = 11 : i64} {
  func.func @_se_kernel(%arg0: i32, %arg1: memref<2x64x32xf32, #tpu.memory_space<vmem>>, %arg2: memref<8x32xf32, #tpu.memory_space<vmem>>, %arg3: memref<32x2xf32, #tpu.memory_space<vmem>>, %arg4: memref<1x2xf32, #tpu.memory_space<vmem>>, %arg5: memref<2x32xf32, #tpu.memory_space<vmem>>, %arg6: memref<1x32xf32, #tpu.memory_space<vmem>>, %arg7: memref<2x64x32xf32, #tpu.memory_space<vmem>>) attributes {dimension_semantics = [#tpu.dimension_semantics<parallel>], iteration_bounds = array<i64: 1>, scalar_prefetch = 0 : i64, scratch_operands = 0 : i64, tpu.core_type = #tpu.core_type<tc>, window_params = [{transform_indices = @transform_0, window_bounds = array<i64: 2, 64, 32>}, {pipeline_mode = #tpu.pipeline_mode<synchronous>, transform_indices = @transform_1, window_bounds = array<i64: 8, 32>}, {pipeline_mode = #tpu.pipeline_mode<synchronous>, transform_indices = @transform_2, window_bounds = array<i64: 32, 2>}, {pipeline_mode = #tpu.pipeline_mode<synchronous>, transform_indices = @transform_3, window_bounds = array<i64: 1, 2>}, {pipeline_mode = #tpu.pipeline_mode<synchronous>, transform_indices = @transform_4, window_bounds = array<i64: 2, 32>}, {pipeline_mode = #tpu.pipeline_mode<synchronous>, transform_indices = @transform_5, window_bounds = array<i64: 1, 32>}, {transform_indices = @transform_6, window_bounds = array<i64: 2, 64, 32>}]} {
    %c0 = arith.constant 0 : index
    %c0_0 = arith.constant 0 : index
    %0 = vector.load %arg2[%c0, %c0_0] : memref<8x32xf32, #tpu.memory_space<vmem>>, vector<8x32xf32>
    %c0_1 = arith.constant 0 : index
    %c0_2 = arith.constant 0 : index
    %1 = vector.load %arg3[%c0_1, %c0_2] : memref<32x2xf32, #tpu.memory_space<vmem>>, vector<32x2xf32>
    %cst = arith.constant dense<0.000000e+00> : vector<8x2xf32>
    %2 = tpu.matmul %0, %1, %cst {dimension_numbers = #tpu.dot_dimension_numbers<[1], [0], [0], [1], [0, 0, 1, 1], [], []>} : vector<8x32xf32>, vector<32x2xf32>, vector<8x2xf32> -> vector<8x2xf32>
    %c0_3 = arith.constant 0 : index
    %c0_4 = arith.constant 0 : index
    %3 = vector.load %arg4[%c0_3, %c0_4] : memref<1x2xf32, #tpu.memory_space<vmem>>, vector<1x2xf32>
    %4 = vector.broadcast %3 : vector<1x2xf32> to vector<8x2xf32>
    %5 = arith.addf %2, %4 : vector<8x2xf32>
    %cst_5 = arith.constant 0.000000e+00 : f32
    %6 = vector.broadcast %cst_5 : f32 to vector<8x2xf32>
    %7 = arith.maximumf %5, %6 : vector<8x2xf32>
    %c0_6 = arith.constant 0 : index
    %c0_7 = arith.constant 0 : index
    %8 = vector.load %arg5[%c0_6, %c0_7] : memref<2x32xf32, #tpu.memory_space<vmem>>, vector<2x32xf32>
    %cst_8 = arith.constant dense<0.000000e+00> : vector<8x32xf32>
    %9 = tpu.matmul %7, %8, %cst_8 {dimension_numbers = #tpu.dot_dimension_numbers<[1], [0], [0], [1], [0, 0, 1, 1], [], []>} : vector<8x2xf32>, vector<2x32xf32>, vector<8x32xf32> -> vector<8x32xf32>
    %c0_9 = arith.constant 0 : index
    %c0_10 = arith.constant 0 : index
    %10 = vector.load %arg6[%c0_9, %c0_10] : memref<1x32xf32, #tpu.memory_space<vmem>>, vector<1x32xf32>
    %11 = vector.broadcast %10 : vector<1x32xf32> to vector<8x32xf32>
    %12 = arith.addf %9, %11 : vector<8x32xf32>
    %13 = arith.negf %12 : vector<8x32xf32>
    %14 = math.exp %13 : vector<8x32xf32>
    %cst_11 = arith.constant 1.000000e+00 : f32
    %15 = vector.broadcast %cst_11 : f32 to vector<8x32xf32>
    %16 = arith.addf %15, %14 : vector<8x32xf32>
    %17 = arith.divf %15, %16 : vector<8x32xf32>
    %c0_12 = arith.constant 0 : index
    %c0_13 = arith.constant 0 : index
    %c0_14 = arith.constant 0 : index
    %18 = vector.load %arg1[%c0_12, %c0_13, %c0_14] : memref<2x64x32xf32, #tpu.memory_space<vmem>>, vector<2x64x32xf32>
    %19 = vector.extract_strided_slice %18 {offsets = [0, 0, 0], sizes = [1, 64, 32], strides = [1, 1, 1]} : vector<2x64x32xf32> to vector<1x64x32xf32>
    %20 = vector.shape_cast %19 : vector<1x64x32xf32> to vector<64x32xf32>
    %21 = vector.extract_strided_slice %17 {offsets = [0, 0], sizes = [1, 32], strides = [1, 1]} : vector<8x32xf32> to vector<1x32xf32>
    %22 = vector.broadcast %21 : vector<1x32xf32> to vector<64x32xf32>
    %23 = arith.mulf %20, %22 : vector<64x32xf32>
    %c0_15 = arith.constant 0 : index
    %c0_16 = arith.constant 0 : index
    %c0_17 = arith.constant 0 : index
    %24 = vector.load %arg7[%c0_15, %c0_16, %c0_17] : memref<2x64x32xf32, #tpu.memory_space<vmem>>, vector<1x64x32xf32>
    %25 = vector.shape_cast %24 : vector<1x64x32xf32> to vector<64x32xf32>
    %26 = vector.shape_cast %23 : vector<64x32xf32> to vector<1x64x32xf32>
    tpu.vector_store %arg7[%c0_15, %c0_16, %c0_17], %26 {strides = array<i32>} : memref<2x64x32xf32, #tpu.memory_space<vmem>>, vector<1x64x32xf32>,
    %27 = vector.extract_strided_slice %18 {offsets = [1, 0, 0], sizes = [1, 64, 32], strides = [1, 1, 1]} : vector<2x64x32xf32> to vector<1x64x32xf32>
    %28 = vector.shape_cast %27 : vector<1x64x32xf32> to vector<64x32xf32>
    %29 = vector.extract_strided_slice %17 {offsets = [1, 0], sizes = [1, 32], strides = [1, 1]} : vector<8x32xf32> to vector<1x32xf32>
    %30 = vector.broadcast %29 : vector<1x32xf32> to vector<64x32xf32>
    %31 = arith.mulf %28, %30 : vector<64x32xf32>
    %c1 = arith.constant 1 : index
    %c0_18 = arith.constant 0 : index
    %c0_19 = arith.constant 0 : index
    %32 = vector.load %arg7[%c1, %c0_18, %c0_19] : memref<2x64x32xf32, #tpu.memory_space<vmem>>, vector<1x64x32xf32>
    %33 = vector.shape_cast %32 : vector<1x64x32xf32> to vector<64x32xf32>
    %34 = vector.shape_cast %31 : vector<64x32xf32> to vector<1x64x32xf32>
    tpu.vector_store %arg7[%c1, %c0_18, %c0_19], %34 {strides = array<i32>} : memref<2x64x32xf32, #tpu.memory_space<vmem>>, vector<1x64x32xf32>,
    return
  }
  func.func @transform_0(%arg0: i32) -> (i32, i32, i32) {
    %c0_i32 = arith.constant 0 : i32
    %c0_i32_0 = arith.constant 0 : i32
    %c0_i32_1 = arith.constant 0 : i32
    return %c0_i32, %arg0, %c0_i32_0 : i32, i32, i32
  }
  func.func @transform_1(%arg0: i32) -> (i32, i32) {
    %c0_i32 = arith.constant 0 : i32
    %c0_i32_0 = arith.constant 0 : i32
    %c0_i32_1 = arith.constant 0 : i32
    return %c0_i32, %c0_i32_0 : i32, i32
  }
  func.func @transform_2(%arg0: i32) -> (i32, i32) {
    %c0_i32 = arith.constant 0 : i32
    %c0_i32_0 = arith.constant 0 : i32
    %c0_i32_1 = arith.constant 0 : i32
    return %c0_i32, %c0_i32_0 : i32, i32
  }
  func.func @transform_3(%arg0: i32) -> (i32, i32) {
    %c0_i32 = arith.constant 0 : i32
    %c0_i32_0 = arith.constant 0 : i32
    %c0_i32_1 = arith.constant 0 : i32
    return %c0_i32, %c0_i32_0 : i32, i32
  }
  func.func @transform_4(%arg0: i32) -> (i32, i32) {
    %c0_i32 = arith.constant 0 : i32
    %c0_i32_0 = arith.constant 0 : i32
    %c0_i32_1 = arith.constant 0 : i32
    return %c0_i32, %c0_i32_0 : i32, i32
  }
  func.func @transform_5(%arg0: i32) -> (i32, i32) {
    %c0_i32 = arith.constant 0 : i32
    %c0_i32_0 = arith.constant 0 : i32
    %c0_i32_1 = arith.constant 0 : i32
    return %c0_i32, %c0_i32_0 : i32, i32
  }
  func.func @transform_6(%arg0: i32) -> (i32, i32, i32) {
    %c0_i32 = arith.constant 0 : i32
    %c0_i32_0 = arith.constant 0 : i32
    %c0_i32_1 = arith.constant 0 : i32
    return %c0_i32, %arg0, %c0_i32_0 : i32, i32, i32
  }
}

module attributes {stable_mosaic.version = 11 : i64} {
  func.func @_bn_stats_kernel(%arg0: i32, %arg1: memref<128x32xf32, #tpu.memory_space<vmem>>, %arg2: memref<1x32xf32, #tpu.memory_space<vmem>>, %arg3: memref<1x32xf32, #tpu.memory_space<vmem>>, %arg4: memref<1x32xf32, #tpu.memory_space<vmem>>, %arg5: memref<1x32xf32, #tpu.memory_space<vmem>>, %arg6: memref<1x32xf32, #tpu.memory_space<vmem>>, %arg7: memref<1x32xf32, #tpu.memory_space<vmem>>) attributes {dimension_semantics = [#tpu.dimension_semantics<arbitrary>], iteration_bounds = array<i64: 1>, scalar_prefetch = 0 : i64, scratch_operands = 2 : i64, tpu.core_type = #tpu.core_type<tc>, window_params = [{transform_indices = @transform_0, window_bounds = array<i64: 128, 32>}, {pipeline_mode = #tpu.pipeline_mode<synchronous>, transform_indices = @transform_1, window_bounds = array<i64: 1, 32>}, {pipeline_mode = #tpu.pipeline_mode<synchronous>, transform_indices = @transform_2, window_bounds = array<i64: 1, 32>}, {pipeline_mode = #tpu.pipeline_mode<synchronous>, transform_indices = @transform_3, window_bounds = array<i64: 1, 32>}, {pipeline_mode = #tpu.pipeline_mode<synchronous>, transform_indices = @transform_4, window_bounds = array<i64: 1, 32>}]} {
    %c0_i32 = arith.constant 0 : i32
    %0 = arith.cmpi eq, %arg0, %c0_i32 : i32
    %1 = arith.extui %0 : i1 to i32
    %c0_i32_0 = arith.constant 0 : i32
    %2 = arith.cmpi ne, %1, %c0_i32_0 : i32
    scf.if %2 {
      %cst_13 = arith.constant 0.000000e+00 : f32
      %18 = vector.broadcast %cst_13 : f32 to vector<1x32xf32>
      %c0_14 = arith.constant 0 : index
      %c0_15 = arith.constant 0 : index
      %19 = vector.load %arg6[%c0_14, %c0_15] : memref<1x32xf32, #tpu.memory_space<vmem>>, vector<1x32xf32>
      tpu.vector_store %arg6[%c0_14, %c0_15], %18 {strides = array<i32>} : memref<1x32xf32, #tpu.memory_space<vmem>>, vector<1x32xf32>,
      %cst_16 = arith.constant 0.000000e+00 : f32
      %20 = vector.broadcast %cst_16 : f32 to vector<1x32xf32>
      %c0_17 = arith.constant 0 : index
      %c0_18 = arith.constant 0 : index
      %21 = vector.load %arg7[%c0_17, %c0_18] : memref<1x32xf32, #tpu.memory_space<vmem>>, vector<1x32xf32>
      tpu.vector_store %arg7[%c0_17, %c0_18], %20 {strides = array<i32>} : memref<1x32xf32, #tpu.memory_space<vmem>>, vector<1x32xf32>,
    } else {
    }
    %c0 = arith.constant 0 : index
    %c0_1 = arith.constant 0 : index
    %3 = vector.load %arg1[%c0, %c0_1] : memref<128x32xf32, #tpu.memory_space<vmem>>, vector<128x32xf32>
    %c0_2 = arith.constant 0 : index
    %c0_3 = arith.constant 0 : index
    %4 = vector.load %arg6[%c0_2, %c0_3] : memref<1x32xf32, #tpu.memory_space<vmem>>, vector<1x32xf32>
    %cst = arith.constant dense<0.000000e+00> : vector<32xf32>
    %5 = vector.multi_reduction <add>, %3, %cst [0] : vector<128x32xf32> to vector<32xf32>
    %6 = vector.shape_cast %5 : vector<32xf32> to vector<1x32xf32>
    %7 = arith.addf %4, %6 : vector<1x32xf32>
    %c0_4 = arith.constant 0 : index
    %c0_5 = arith.constant 0 : index
    %8 = vector.load %arg6[%c0_4, %c0_5] : memref<1x32xf32, #tpu.memory_space<vmem>>, vector<1x32xf32>
    tpu.vector_store %arg6[%c0_4, %c0_5], %7 {strides = array<i32>} : memref<1x32xf32, #tpu.memory_space<vmem>>, vector<1x32xf32>,
    %c0_6 = arith.constant 0 : index
    %c0_7 = arith.constant 0 : index
    %9 = vector.load %arg7[%c0_6, %c0_7] : memref<1x32xf32, #tpu.memory_space<vmem>>, vector<1x32xf32>
    %10 = arith.mulf %3, %3 : vector<128x32xf32>
    %cst_8 = arith.constant dense<0.000000e+00> : vector<32xf32>
    %11 = vector.multi_reduction <add>, %10, %cst_8 [0] : vector<128x32xf32> to vector<32xf32>
    %12 = vector.shape_cast %11 : vector<32xf32> to vector<1x32xf32>
    %13 = arith.addf %9, %12 : vector<1x32xf32>
    %c0_9 = arith.constant 0 : index
    %c0_10 = arith.constant 0 : index
    %14 = vector.load %arg7[%c0_9, %c0_10] : memref<1x32xf32, #tpu.memory_space<vmem>>, vector<1x32xf32>
    tpu.vector_store %arg7[%c0_9, %c0_10], %13 {strides = array<i32>} : memref<1x32xf32, #tpu.memory_space<vmem>>, vector<1x32xf32>,
    %c0_i32_11 = arith.constant 0 : i32
    %15 = arith.cmpi eq, %arg0, %c0_i32_11 : i32
    %16 = arith.extui %15 : i1 to i32
    %c0_i32_12 = arith.constant 0 : i32
    %17 = arith.cmpi ne, %16, %c0_i32_12 : i32
    scf.if %17 {
      %c0_13 = arith.constant 0 : index
      %c0_14 = arith.constant 0 : index
      %18 = vector.load %arg6[%c0_13, %c0_14] : memref<1x32xf32, #tpu.memory_space<vmem>>, vector<1x32xf32>
      %cst_15 = arith.constant 7.812500e-03 : f32
      %19 = vector.broadcast %cst_15 : f32 to vector<1x32xf32>
      %20 = arith.mulf %18, %19 : vector<1x32xf32>
      %c0_16 = arith.constant 0 : index
      %c0_17 = arith.constant 0 : index
      %21 = vector.load %arg7[%c0_16, %c0_17] : memref<1x32xf32, #tpu.memory_space<vmem>>, vector<1x32xf32>
      %cst_18 = arith.constant 7.812500e-03 : f32
      %22 = vector.broadcast %cst_18 : f32 to vector<1x32xf32>
      %23 = arith.mulf %21, %22 : vector<1x32xf32>
      %24 = arith.mulf %20, %20 : vector<1x32xf32>
      %25 = arith.subf %23, %24 : vector<1x32xf32>
      %cst_19 = arith.constant 0.000000e+00 : f32
      %26 = vector.broadcast %cst_19 : f32 to vector<1x32xf32>
      %27 = arith.maximumf %25, %26 : vector<1x32xf32>
      %cst_20 = arith.constant 9.99999974E-6 : f32
      %28 = vector.broadcast %cst_20 : f32 to vector<1x32xf32>
      %29 = arith.addf %27, %28 : vector<1x32xf32>
      %30 = math.rsqrt %29 : vector<1x32xf32>
      %c0_21 = arith.constant 0 : index
      %c0_22 = arith.constant 0 : index
      %31 = vector.load %arg2[%c0_21, %c0_22] : memref<1x32xf32, #tpu.memory_space<vmem>>, vector<1x32xf32>
      %32 = arith.mulf %31, %30 : vector<1x32xf32>
      %c0_23 = arith.constant 0 : index
      %c0_24 = arith.constant 0 : index
      %33 = vector.load %arg4[%c0_23, %c0_24] : memref<1x32xf32, #tpu.memory_space<vmem>>, vector<1x32xf32>
      tpu.vector_store %arg4[%c0_23, %c0_24], %32 {strides = array<i32>} : memref<1x32xf32, #tpu.memory_space<vmem>>, vector<1x32xf32>,
      %c0_25 = arith.constant 0 : index
      %c0_26 = arith.constant 0 : index
      %34 = vector.load %arg3[%c0_25, %c0_26] : memref<1x32xf32, #tpu.memory_space<vmem>>, vector<1x32xf32>
      %35 = arith.mulf %20, %32 : vector<1x32xf32>
      %36 = arith.subf %34, %35 : vector<1x32xf32>
      %c0_27 = arith.constant 0 : index
      %c0_28 = arith.constant 0 : index
      %37 = vector.load %arg5[%c0_27, %c0_28] : memref<1x32xf32, #tpu.memory_space<vmem>>, vector<1x32xf32>
      tpu.vector_store %arg5[%c0_27, %c0_28], %36 {strides = array<i32>} : memref<1x32xf32, #tpu.memory_space<vmem>>, vector<1x32xf32>,
    } else {
    }
    return
  }
  func.func @transform_0(%arg0: i32) -> (i32, i32) {
    %c0_i32 = arith.constant 0 : i32
    %c0_i32_0 = arith.constant 0 : i32
    return %arg0, %c0_i32 : i32, i32
  }
  func.func @transform_1(%arg0: i32) -> (i32, i32) {
    %c0_i32 = arith.constant 0 : i32
    %c0_i32_0 = arith.constant 0 : i32
    %c0_i32_1 = arith.constant 0 : i32
    return %c0_i32, %c0_i32_0 : i32, i32
  }
  func.func @transform_2(%arg0: i32) -> (i32, i32) {
    %c0_i32 = arith.constant 0 : i32
    %c0_i32_0 = arith.constant 0 : i32
    %c0_i32_1 = arith.constant 0 : i32
    return %c0_i32, %c0_i32_0 : i32, i32
  }
  func.func @transform_3(%arg0: i32) -> (i32, i32) {
    %c0_i32 = arith.constant 0 : i32
    %c0_i32_0 = arith.constant 0 : i32
    %c0_i32_1 = arith.constant 0 : i32
    return %c0_i32, %c0_i32_0 : i32, i32
  }
  func.func @transform_4(%arg0: i32) -> (i32, i32) {
    %c0_i32 = arith.constant 0 : i32
    %c0_i32_0 = arith.constant 0 : i32
    %c0_i32_1 = arith.constant 0 : i32
    return %c0_i32, %c0_i32_0 : i32, i32
  }
}

module attributes {stable_mosaic.version = 11 : i64} {
  func.func @_matmul_kernel(%arg0: i32, %arg1: i32, %arg2: i32, %arg3: memref<128x32xf32, #tpu.memory_space<vmem>>, %arg4: memref<32x16xbf16, #tpu.memory_space<vmem>>, %arg5: memref<1x16xf32, #tpu.memory_space<vmem>>, %arg6: memref<1x32xf32, #tpu.memory_space<vmem>>, %arg7: memref<1x32xf32, #tpu.memory_space<vmem>>, %arg8: memref<128x16xf32, #tpu.memory_space<vmem>>, %arg9: memref<128x16xf32, #tpu.memory_space<vmem>>) attributes {dimension_semantics = [#tpu.dimension_semantics<parallel>, #tpu.dimension_semantics<parallel>, #tpu.dimension_semantics<arbitrary>], iteration_bounds = array<i64: 1, 1, 1>, scalar_prefetch = 0 : i64, scratch_operands = 1 : i64, tpu.core_type = #tpu.core_type<tc>, window_params = [{transform_indices = @transform_0, window_bounds = array<i64: 128, 32>}, {transform_indices = @transform_1, window_bounds = array<i64: 32, 16>}, {transform_indices = @transform_2, window_bounds = array<i64: 1, 16>}, {transform_indices = @transform_3, window_bounds = array<i64: 1, 32>}, {transform_indices = @transform_4, window_bounds = array<i64: 1, 32>}, {transform_indices = @transform_5, window_bounds = array<i64: 128, 16>}]} {
    %c0_i32 = arith.constant 0 : i32
    %0 = arith.cmpi eq, %arg2, %c0_i32 : i32
    %1 = arith.extui %0 : i1 to i32
    %c0_i32_0 = arith.constant 0 : i32
    %2 = arith.cmpi ne, %1, %c0_i32_0 : i32
    scf.if %2 {
      %cst_15 = arith.constant 0.000000e+00 : f32
      %21 = vector.broadcast %cst_15 : f32 to vector<128x16xf32>
      %c0_16 = arith.constant 0 : index
      %c0_17 = arith.constant 0 : index
      %22 = vector.load %arg9[%c0_16, %c0_17] : memref<128x16xf32, #tpu.memory_space<vmem>>, vector<128x16xf32>
      tpu.vector_store %arg9[%c0_16, %c0_17], %21 {strides = array<i32>} : memref<128x16xf32, #tpu.memory_space<vmem>>, vector<128x16xf32>,
    } else {
    }
    %c0 = arith.constant 0 : index
    %c0_1 = arith.constant 0 : index
    %3 = vector.load %arg3[%c0, %c0_1] : memref<128x32xf32, #tpu.memory_space<vmem>>, vector<128x32xf32>
    %c0_2 = arith.constant 0 : index
    %c0_3 = arith.constant 0 : index
    %4 = vector.load %arg6[%c0_2, %c0_3] : memref<1x32xf32, #tpu.memory_space<vmem>>, vector<1x32xf32>
    %5 = vector.broadcast %4 : vector<1x32xf32> to vector<128x32xf32>
    %6 = arith.mulf %3, %5 : vector<128x32xf32>
    %c0_4 = arith.constant 0 : index
    %c0_5 = arith.constant 0 : index
    %7 = vector.load %arg7[%c0_4, %c0_5] : memref<1x32xf32, #tpu.memory_space<vmem>>, vector<1x32xf32>
    %8 = vector.broadcast %7 : vector<1x32xf32> to vector<128x32xf32>
    %9 = arith.addf %6, %8 : vector<128x32xf32>
    %cst = arith.constant 0.000000e+00 : f32
    %10 = vector.broadcast %cst : f32 to vector<128x32xf32>
    %11 = arith.maximumf %9, %10 : vector<128x32xf32>
    %c0_6 = arith.constant 0 : index
    %c0_7 = arith.constant 0 : index
    %12 = vector.load %arg9[%c0_6, %c0_7] : memref<128x16xf32, #tpu.memory_space<vmem>>, vector<128x16xf32>
    %13 = arith.truncf %11 : vector<128x32xf32> to vector<128x32xbf16>
    %c0_8 = arith.constant 0 : index
    %c0_9 = arith.constant 0 : index
    %14 = vector.load %arg4[%c0_8, %c0_9] : memref<32x16xbf16, #tpu.memory_space<vmem>>, vector<32x16xbf16>
    %cst_10 = arith.constant dense<0.000000e+00> : vector<128x16xf32>
    %15 = tpu.matmul %13, %14, %cst_10 {dimension_numbers = #tpu.dot_dimension_numbers<[1], [0], [0], [1], [0, 0, 1, 1], [], []>} : vector<128x32xbf16>, vector<32x16xbf16>, vector<128x16xf32> -> vector<128x16xf32>
    %16 = arith.addf %12, %15 : vector<128x16xf32>
    %c0_11 = arith.constant 0 : index
    %c0_12 = arith.constant 0 : index
    %17 = vector.load %arg9[%c0_11, %c0_12] : memref<128x16xf32, #tpu.memory_space<vmem>>, vector<128x16xf32>
    tpu.vector_store %arg9[%c0_11, %c0_12], %16 {strides = array<i32>} : memref<128x16xf32, #tpu.memory_space<vmem>>, vector<128x16xf32>,
    %c0_i32_13 = arith.constant 0 : i32
    %18 = arith.cmpi eq, %arg2, %c0_i32_13 : i32
    %19 = arith.extui %18 : i1 to i32
    %c0_i32_14 = arith.constant 0 : i32
    %20 = arith.cmpi ne, %19, %c0_i32_14 : i32
    scf.if %20 {
      %c0_15 = arith.constant 0 : index
      %c0_16 = arith.constant 0 : index
      %21 = vector.load %arg9[%c0_15, %c0_16] : memref<128x16xf32, #tpu.memory_space<vmem>>, vector<128x16xf32>
      %c0_17 = arith.constant 0 : index
      %c0_18 = arith.constant 0 : index
      %22 = vector.load %arg5[%c0_17, %c0_18] : memref<1x16xf32, #tpu.memory_space<vmem>>, vector<1x16xf32>
      %23 = vector.broadcast %22 : vector<1x16xf32> to vector<128x16xf32>
      %24 = arith.addf %21, %23 : vector<128x16xf32>
      %c0_19 = arith.constant 0 : index
      %c0_20 = arith.constant 0 : index
      %25 = vector.load %arg8[%c0_19, %c0_20] : memref<128x16xf32, #tpu.memory_space<vmem>>, vector<128x16xf32>
      tpu.vector_store %arg8[%c0_19, %c0_20], %24 {strides = array<i32>} : memref<128x16xf32, #tpu.memory_space<vmem>>, vector<128x16xf32>,
    } else {
    }
    return
  }
  func.func @transform_0(%arg0: i32, %arg1: i32, %arg2: i32) -> (i32, i32) {
    %c0_i32 = arith.constant 0 : i32
    return %arg0, %arg2 : i32, i32
  }
  func.func @transform_1(%arg0: i32, %arg1: i32, %arg2: i32) -> (i32, i32) {
    %c0_i32 = arith.constant 0 : i32
    return %arg2, %arg1 : i32, i32
  }
  func.func @transform_2(%arg0: i32, %arg1: i32, %arg2: i32) -> (i32, i32) {
    %c0_i32 = arith.constant 0 : i32
    %c0_i32_0 = arith.constant 0 : i32
    return %c0_i32, %arg1 : i32, i32
  }
  func.func @transform_3(%arg0: i32, %arg1: i32, %arg2: i32) -> (i32, i32) {
    %c0_i32 = arith.constant 0 : i32
    %c0_i32_0 = arith.constant 0 : i32
    return %c0_i32, %arg2 : i32, i32
  }
  func.func @transform_4(%arg0: i32, %arg1: i32, %arg2: i32) -> (i32, i32) {
    %c0_i32 = arith.constant 0 : i32
    %c0_i32_0 = arith.constant 0 : i32
    return %c0_i32, %arg2 : i32, i32
  }
  func.func @transform_5(%arg0: i32, %arg1: i32, %arg2: i32) -> (i32, i32) {
    %c0_i32 = arith.constant 0 : i32
    return %arg0, %arg1 : i32, i32
  }
}

module attributes {stable_mosaic.version = 11 : i64} {
  func.func @_pool_avg_kernel(%arg0: i32, %arg1: memref<4x32x16xf32, #tpu.memory_space<vmem>>, %arg2: memref<32x16xf32, #tpu.memory_space<vmem>>) attributes {dimension_semantics = [#tpu.dimension_semantics<parallel>], iteration_bounds = array<i64: 1>, scalar_prefetch = 0 : i64, scratch_operands = 0 : i64, tpu.core_type = #tpu.core_type<tc>, window_params = [{transform_indices = @transform_0, window_bounds = array<i64: 4, 32, 16>}, {transform_indices = @transform_1, window_bounds = array<i64: 32, 16>}]} {
    %c0 = arith.constant 0 : index
    %c0_0 = arith.constant 0 : index
    %c0_1 = arith.constant 0 : index
    %0 = vector.load %arg1[%c0, %c0_0, %c0_1] : memref<4x32x16xf32, #tpu.memory_space<vmem>>, vector<1x32x16xf32>
    %1 = vector.shape_cast %0 : vector<1x32x16xf32> to vector<32x16xf32>
    %c1 = arith.constant 1 : index
    %c0_2 = arith.constant 0 : index
    %c0_3 = arith.constant 0 : index
    %2 = vector.load %arg1[%c1, %c0_2, %c0_3] : memref<4x32x16xf32, #tpu.memory_space<vmem>>, vector<1x32x16xf32>
    %3 = vector.shape_cast %2 : vector<1x32x16xf32> to vector<32x16xf32>
    %4 = arith.addf %1, %3 : vector<32x16xf32>
    %c2 = arith.constant 2 : index
    %c0_4 = arith.constant 0 : index
    %c0_5 = arith.constant 0 : index
    %5 = vector.load %arg1[%c2, %c0_4, %c0_5] : memref<4x32x16xf32, #tpu.memory_space<vmem>>, vector<1x32x16xf32>
    %6 = vector.shape_cast %5 : vector<1x32x16xf32> to vector<32x16xf32>
    %7 = arith.addf %4, %6 : vector<32x16xf32>
    %c3 = arith.constant 3 : index
    %c0_6 = arith.constant 0 : index
    %c0_7 = arith.constant 0 : index
    %8 = vector.load %arg1[%c3, %c0_6, %c0_7] : memref<4x32x16xf32, #tpu.memory_space<vmem>>, vector<1x32x16xf32>
    %9 = vector.shape_cast %8 : vector<1x32x16xf32> to vector<32x16xf32>
    %10 = arith.addf %7, %9 : vector<32x16xf32>
    %cst = arith.constant 2.500000e-01 : f32
    %11 = vector.broadcast %cst : f32 to vector<32x16xf32>
    %12 = arith.mulf %10, %11 : vector<32x16xf32>
    %c0_8 = arith.constant 0 : index
    %c0_9 = arith.constant 0 : index
    %13 = vector.load %arg2[%c0_8, %c0_9] : memref<32x16xf32, #tpu.memory_space<vmem>>, vector<32x16xf32>
    tpu.vector_store %arg2[%c0_8, %c0_9], %12 {strides = array<i32>} : memref<32x16xf32, #tpu.memory_space<vmem>>, vector<32x16xf32>,
    return
  }
  func.func @transform_0(%arg0: i32) -> (i32, i32, i32) {
    %c0_i32 = arith.constant 0 : i32
    %c0_i32_0 = arith.constant 0 : i32
    %c0_i32_1 = arith.constant 0 : i32
    return %c0_i32, %arg0, %c0_i32_0 : i32, i32, i32
  }
  func.func @transform_1(%arg0: i32) -> (i32, i32) {
    %c0_i32 = arith.constant 0 : i32
    %c0_i32_0 = arith.constant 0 : i32
    return %arg0, %c0_i32 : i32, i32
  }
}

module attributes {stable_mosaic.version = 11 : i64} {
  func.func @_bn_stats_kernel(%arg0: i32, %arg1: memref<32x16xf32, #tpu.memory_space<vmem>>, %arg2: memref<1x16xf32, #tpu.memory_space<vmem>>, %arg3: memref<1x16xf32, #tpu.memory_space<vmem>>, %arg4: memref<1x16xf32, #tpu.memory_space<vmem>>, %arg5: memref<1x16xf32, #tpu.memory_space<vmem>>, %arg6: memref<1x16xf32, #tpu.memory_space<vmem>>, %arg7: memref<1x16xf32, #tpu.memory_space<vmem>>) attributes {dimension_semantics = [#tpu.dimension_semantics<arbitrary>], iteration_bounds = array<i64: 1>, scalar_prefetch = 0 : i64, scratch_operands = 2 : i64, tpu.core_type = #tpu.core_type<tc>, window_params = [{transform_indices = @transform_0, window_bounds = array<i64: 32, 16>}, {pipeline_mode = #tpu.pipeline_mode<synchronous>, transform_indices = @transform_1, window_bounds = array<i64: 1, 16>}, {pipeline_mode = #tpu.pipeline_mode<synchronous>, transform_indices = @transform_2, window_bounds = array<i64: 1, 16>}, {pipeline_mode = #tpu.pipeline_mode<synchronous>, transform_indices = @transform_3, window_bounds = array<i64: 1, 16>}, {pipeline_mode = #tpu.pipeline_mode<synchronous>, transform_indices = @transform_4, window_bounds = array<i64: 1, 16>}]} {
    %c0_i32 = arith.constant 0 : i32
    %0 = arith.cmpi eq, %arg0, %c0_i32 : i32
    %1 = arith.extui %0 : i1 to i32
    %c0_i32_0 = arith.constant 0 : i32
    %2 = arith.cmpi ne, %1, %c0_i32_0 : i32
    scf.if %2 {
      %cst_13 = arith.constant 0.000000e+00 : f32
      %18 = vector.broadcast %cst_13 : f32 to vector<1x16xf32>
      %c0_14 = arith.constant 0 : index
      %c0_15 = arith.constant 0 : index
      %19 = vector.load %arg6[%c0_14, %c0_15] : memref<1x16xf32, #tpu.memory_space<vmem>>, vector<1x16xf32>
      tpu.vector_store %arg6[%c0_14, %c0_15], %18 {strides = array<i32>} : memref<1x16xf32, #tpu.memory_space<vmem>>, vector<1x16xf32>,
      %cst_16 = arith.constant 0.000000e+00 : f32
      %20 = vector.broadcast %cst_16 : f32 to vector<1x16xf32>
      %c0_17 = arith.constant 0 : index
      %c0_18 = arith.constant 0 : index
      %21 = vector.load %arg7[%c0_17, %c0_18] : memref<1x16xf32, #tpu.memory_space<vmem>>, vector<1x16xf32>
      tpu.vector_store %arg7[%c0_17, %c0_18], %20 {strides = array<i32>} : memref<1x16xf32, #tpu.memory_space<vmem>>, vector<1x16xf32>,
    } else {
    }
    %c0 = arith.constant 0 : index
    %c0_1 = arith.constant 0 : index
    %3 = vector.load %arg1[%c0, %c0_1] : memref<32x16xf32, #tpu.memory_space<vmem>>, vector<32x16xf32>
    %c0_2 = arith.constant 0 : index
    %c0_3 = arith.constant 0 : index
    %4 = vector.load %arg6[%c0_2, %c0_3] : memref<1x16xf32, #tpu.memory_space<vmem>>, vector<1x16xf32>
    %cst = arith.constant dense<0.000000e+00> : vector<16xf32>
    %5 = vector.multi_reduction <add>, %3, %cst [0] : vector<32x16xf32> to vector<16xf32>
    %6 = vector.shape_cast %5 : vector<16xf32> to vector<1x16xf32>
    %7 = arith.addf %4, %6 : vector<1x16xf32>
    %c0_4 = arith.constant 0 : index
    %c0_5 = arith.constant 0 : index
    %8 = vector.load %arg6[%c0_4, %c0_5] : memref<1x16xf32, #tpu.memory_space<vmem>>, vector<1x16xf32>
    tpu.vector_store %arg6[%c0_4, %c0_5], %7 {strides = array<i32>} : memref<1x16xf32, #tpu.memory_space<vmem>>, vector<1x16xf32>,
    %c0_6 = arith.constant 0 : index
    %c0_7 = arith.constant 0 : index
    %9 = vector.load %arg7[%c0_6, %c0_7] : memref<1x16xf32, #tpu.memory_space<vmem>>, vector<1x16xf32>
    %10 = arith.mulf %3, %3 : vector<32x16xf32>
    %cst_8 = arith.constant dense<0.000000e+00> : vector<16xf32>
    %11 = vector.multi_reduction <add>, %10, %cst_8 [0] : vector<32x16xf32> to vector<16xf32>
    %12 = vector.shape_cast %11 : vector<16xf32> to vector<1x16xf32>
    %13 = arith.addf %9, %12 : vector<1x16xf32>
    %c0_9 = arith.constant 0 : index
    %c0_10 = arith.constant 0 : index
    %14 = vector.load %arg7[%c0_9, %c0_10] : memref<1x16xf32, #tpu.memory_space<vmem>>, vector<1x16xf32>
    tpu.vector_store %arg7[%c0_9, %c0_10], %13 {strides = array<i32>} : memref<1x16xf32, #tpu.memory_space<vmem>>, vector<1x16xf32>,
    %c0_i32_11 = arith.constant 0 : i32
    %15 = arith.cmpi eq, %arg0, %c0_i32_11 : i32
    %16 = arith.extui %15 : i1 to i32
    %c0_i32_12 = arith.constant 0 : i32
    %17 = arith.cmpi ne, %16, %c0_i32_12 : i32
    scf.if %17 {
      %c0_13 = arith.constant 0 : index
      %c0_14 = arith.constant 0 : index
      %18 = vector.load %arg6[%c0_13, %c0_14] : memref<1x16xf32, #tpu.memory_space<vmem>>, vector<1x16xf32>
      %cst_15 = arith.constant 3.125000e-02 : f32
      %19 = vector.broadcast %cst_15 : f32 to vector<1x16xf32>
      %20 = arith.mulf %18, %19 : vector<1x16xf32>
      %c0_16 = arith.constant 0 : index
      %c0_17 = arith.constant 0 : index
      %21 = vector.load %arg7[%c0_16, %c0_17] : memref<1x16xf32, #tpu.memory_space<vmem>>, vector<1x16xf32>
      %cst_18 = arith.constant 3.125000e-02 : f32
      %22 = vector.broadcast %cst_18 : f32 to vector<1x16xf32>
      %23 = arith.mulf %21, %22 : vector<1x16xf32>
      %24 = arith.mulf %20, %20 : vector<1x16xf32>
      %25 = arith.subf %23, %24 : vector<1x16xf32>
      %cst_19 = arith.constant 0.000000e+00 : f32
      %26 = vector.broadcast %cst_19 : f32 to vector<1x16xf32>
      %27 = arith.maximumf %25, %26 : vector<1x16xf32>
      %cst_20 = arith.constant 9.99999974E-6 : f32
      %28 = vector.broadcast %cst_20 : f32 to vector<1x16xf32>
      %29 = arith.addf %27, %28 : vector<1x16xf32>
      %30 = math.rsqrt %29 : vector<1x16xf32>
      %c0_21 = arith.constant 0 : index
      %c0_22 = arith.constant 0 : index
      %31 = vector.load %arg2[%c0_21, %c0_22] : memref<1x16xf32, #tpu.memory_space<vmem>>, vector<1x16xf32>
      %32 = arith.mulf %31, %30 : vector<1x16xf32>
      %c0_23 = arith.constant 0 : index
      %c0_24 = arith.constant 0 : index
      %33 = vector.load %arg4[%c0_23, %c0_24] : memref<1x16xf32, #tpu.memory_space<vmem>>, vector<1x16xf32>
      tpu.vector_store %arg4[%c0_23, %c0_24], %32 {strides = array<i32>} : memref<1x16xf32, #tpu.memory_space<vmem>>, vector<1x16xf32>,
      %c0_25 = arith.constant 0 : index
      %c0_26 = arith.constant 0 : index
      %34 = vector.load %arg3[%c0_25, %c0_26] : memref<1x16xf32, #tpu.memory_space<vmem>>, vector<1x16xf32>
      %35 = arith.mulf %20, %32 : vector<1x16xf32>
      %36 = arith.subf %34, %35 : vector<1x16xf32>
      %c0_27 = arith.constant 0 : index
      %c0_28 = arith.constant 0 : index
      %37 = vector.load %arg5[%c0_27, %c0_28] : memref<1x16xf32, #tpu.memory_space<vmem>>, vector<1x16xf32>
      tpu.vector_store %arg5[%c0_27, %c0_28], %36 {strides = array<i32>} : memref<1x16xf32, #tpu.memory_space<vmem>>, vector<1x16xf32>,
    } else {
    }
    return
  }
  func.func @transform_0(%arg0: i32) -> (i32, i32) {
    %c0_i32 = arith.constant 0 : i32
    %c0_i32_0 = arith.constant 0 : i32
    return %arg0, %c0_i32 : i32, i32
  }
  func.func @transform_1(%arg0: i32) -> (i32, i32) {
    %c0_i32 = arith.constant 0 : i32
    %c0_i32_0 = arith.constant 0 : i32
    %c0_i32_1 = arith.constant 0 : i32
    return %c0_i32, %c0_i32_0 : i32, i32
  }
  func.func @transform_2(%arg0: i32) -> (i32, i32) {
    %c0_i32 = arith.constant 0 : i32
    %c0_i32_0 = arith.constant 0 : i32
    %c0_i32_1 = arith.constant 0 : i32
    return %c0_i32, %c0_i32_0 : i32, i32
  }
  func.func @transform_3(%arg0: i32) -> (i32, i32) {
    %c0_i32 = arith.constant 0 : i32
    %c0_i32_0 = arith.constant 0 : i32
    %c0_i32_1 = arith.constant 0 : i32
    return %c0_i32, %c0_i32_0 : i32, i32
  }
  func.func @transform_4(%arg0: i32) -> (i32, i32) {
    %c0_i32 = arith.constant 0 : i32
    %c0_i32_0 = arith.constant 0 : i32
    %c0_i32_1 = arith.constant 0 : i32
    return %c0_i32, %c0_i32_0 : i32, i32
  }
}

module attributes {stable_mosaic.version = 11 : i64} {
  func.func @_matmul_kernel(%arg0: i32, %arg1: i32, %arg2: i32, %arg3: memref<32x16xf32, #tpu.memory_space<vmem>>, %arg4: memref<16x16xbf16, #tpu.memory_space<vmem>>, %arg5: memref<1x16xf32, #tpu.memory_space<vmem>>, %arg6: memref<1x16xf32, #tpu.memory_space<vmem>>, %arg7: memref<1x16xf32, #tpu.memory_space<vmem>>, %arg8: memref<32x16xf32, #tpu.memory_space<vmem>>, %arg9: memref<32x16xf32, #tpu.memory_space<vmem>>) attributes {dimension_semantics = [#tpu.dimension_semantics<parallel>, #tpu.dimension_semantics<parallel>, #tpu.dimension_semantics<arbitrary>], iteration_bounds = array<i64: 1, 1, 1>, scalar_prefetch = 0 : i64, scratch_operands = 1 : i64, tpu.core_type = #tpu.core_type<tc>, window_params = [{transform_indices = @transform_0, window_bounds = array<i64: 32, 16>}, {transform_indices = @transform_1, window_bounds = array<i64: 16, 16>}, {transform_indices = @transform_2, window_bounds = array<i64: 1, 16>}, {transform_indices = @transform_3, window_bounds = array<i64: 1, 16>}, {transform_indices = @transform_4, window_bounds = array<i64: 1, 16>}, {transform_indices = @transform_5, window_bounds = array<i64: 32, 16>}]} {
    %c0_i32 = arith.constant 0 : i32
    %0 = arith.cmpi eq, %arg2, %c0_i32 : i32
    %1 = arith.extui %0 : i1 to i32
    %c0_i32_0 = arith.constant 0 : i32
    %2 = arith.cmpi ne, %1, %c0_i32_0 : i32
    scf.if %2 {
      %cst_15 = arith.constant 0.000000e+00 : f32
      %21 = vector.broadcast %cst_15 : f32 to vector<32x16xf32>
      %c0_16 = arith.constant 0 : index
      %c0_17 = arith.constant 0 : index
      %22 = vector.load %arg9[%c0_16, %c0_17] : memref<32x16xf32, #tpu.memory_space<vmem>>, vector<32x16xf32>
      tpu.vector_store %arg9[%c0_16, %c0_17], %21 {strides = array<i32>} : memref<32x16xf32, #tpu.memory_space<vmem>>, vector<32x16xf32>,
    } else {
    }
    %c0 = arith.constant 0 : index
    %c0_1 = arith.constant 0 : index
    %3 = vector.load %arg3[%c0, %c0_1] : memref<32x16xf32, #tpu.memory_space<vmem>>, vector<32x16xf32>
    %c0_2 = arith.constant 0 : index
    %c0_3 = arith.constant 0 : index
    %4 = vector.load %arg6[%c0_2, %c0_3] : memref<1x16xf32, #tpu.memory_space<vmem>>, vector<1x16xf32>
    %5 = vector.broadcast %4 : vector<1x16xf32> to vector<32x16xf32>
    %6 = arith.mulf %3, %5 : vector<32x16xf32>
    %c0_4 = arith.constant 0 : index
    %c0_5 = arith.constant 0 : index
    %7 = vector.load %arg7[%c0_4, %c0_5] : memref<1x16xf32, #tpu.memory_space<vmem>>, vector<1x16xf32>
    %8 = vector.broadcast %7 : vector<1x16xf32> to vector<32x16xf32>
    %9 = arith.addf %6, %8 : vector<32x16xf32>
    %cst = arith.constant 0.000000e+00 : f32
    %10 = vector.broadcast %cst : f32 to vector<32x16xf32>
    %11 = arith.maximumf %9, %10 : vector<32x16xf32>
    %c0_6 = arith.constant 0 : index
    %c0_7 = arith.constant 0 : index
    %12 = vector.load %arg9[%c0_6, %c0_7] : memref<32x16xf32, #tpu.memory_space<vmem>>, vector<32x16xf32>
    %13 = arith.truncf %11 : vector<32x16xf32> to vector<32x16xbf16>
    %c0_8 = arith.constant 0 : index
    %c0_9 = arith.constant 0 : index
    %14 = vector.load %arg4[%c0_8, %c0_9] : memref<16x16xbf16, #tpu.memory_space<vmem>>, vector<16x16xbf16>
    %cst_10 = arith.constant dense<0.000000e+00> : vector<32x16xf32>
    %15 = tpu.matmul %13, %14, %cst_10 {dimension_numbers = #tpu.dot_dimension_numbers<[1], [0], [0], [1], [0, 0, 1, 1], [], []>} : vector<32x16xbf16>, vector<16x16xbf16>, vector<32x16xf32> -> vector<32x16xf32>
    %16 = arith.addf %12, %15 : vector<32x16xf32>
    %c0_11 = arith.constant 0 : index
    %c0_12 = arith.constant 0 : index
    %17 = vector.load %arg9[%c0_11, %c0_12] : memref<32x16xf32, #tpu.memory_space<vmem>>, vector<32x16xf32>
    tpu.vector_store %arg9[%c0_11, %c0_12], %16 {strides = array<i32>} : memref<32x16xf32, #tpu.memory_space<vmem>>, vector<32x16xf32>,
    %c0_i32_13 = arith.constant 0 : i32
    %18 = arith.cmpi eq, %arg2, %c0_i32_13 : i32
    %19 = arith.extui %18 : i1 to i32
    %c0_i32_14 = arith.constant 0 : i32
    %20 = arith.cmpi ne, %19, %c0_i32_14 : i32
    scf.if %20 {
      %c0_15 = arith.constant 0 : index
      %c0_16 = arith.constant 0 : index
      %21 = vector.load %arg9[%c0_15, %c0_16] : memref<32x16xf32, #tpu.memory_space<vmem>>, vector<32x16xf32>
      %c0_17 = arith.constant 0 : index
      %c0_18 = arith.constant 0 : index
      %22 = vector.load %arg5[%c0_17, %c0_18] : memref<1x16xf32, #tpu.memory_space<vmem>>, vector<1x16xf32>
      %23 = vector.broadcast %22 : vector<1x16xf32> to vector<32x16xf32>
      %24 = arith.addf %21, %23 : vector<32x16xf32>
      %c0_19 = arith.constant 0 : index
      %c0_20 = arith.constant 0 : index
      %25 = vector.load %arg8[%c0_19, %c0_20] : memref<32x16xf32, #tpu.memory_space<vmem>>, vector<32x16xf32>
      tpu.vector_store %arg8[%c0_19, %c0_20], %24 {strides = array<i32>} : memref<32x16xf32, #tpu.memory_space<vmem>>, vector<32x16xf32>,
    } else {
    }
    return
  }
  func.func @transform_0(%arg0: i32, %arg1: i32, %arg2: i32) -> (i32, i32) {
    %c0_i32 = arith.constant 0 : i32
    return %arg0, %arg2 : i32, i32
  }
  func.func @transform_1(%arg0: i32, %arg1: i32, %arg2: i32) -> (i32, i32) {
    %c0_i32 = arith.constant 0 : i32
    return %arg2, %arg1 : i32, i32
  }
  func.func @transform_2(%arg0: i32, %arg1: i32, %arg2: i32) -> (i32, i32) {
    %c0_i32 = arith.constant 0 : i32
    %c0_i32_0 = arith.constant 0 : i32
    return %c0_i32, %arg1 : i32, i32
  }
  func.func @transform_3(%arg0: i32, %arg1: i32, %arg2: i32) -> (i32, i32) {
    %c0_i32 = arith.constant 0 : i32
    %c0_i32_0 = arith.constant 0 : i32
    return %c0_i32, %arg2 : i32, i32
  }
  func.func @transform_4(%arg0: i32, %arg1: i32, %arg2: i32) -> (i32, i32) {
    %c0_i32 = arith.constant 0 : i32
    %c0_i32_0 = arith.constant 0 : i32
    return %c0_i32, %arg2 : i32, i32
  }
  func.func @transform_5(%arg0: i32, %arg1: i32, %arg2: i32) -> (i32, i32) {
    %c0_i32 = arith.constant 0 : i32
    return %arg0, %arg1 : i32, i32
  }
}

module attributes {stable_mosaic.version = 11 : i64} {
  func.func @_affine_relu_kernel(%arg0: i32, %arg1: memref<32x16xf32, #tpu.memory_space<vmem>>, %arg2: memref<1x16xf32, #tpu.memory_space<vmem>>, %arg3: memref<1x16xf32, #tpu.memory_space<vmem>>, %arg4: memref<32x16xf32, #tpu.memory_space<vmem>>) attributes {dimension_semantics = [#tpu.dimension_semantics<parallel>], iteration_bounds = array<i64: 1>, scalar_prefetch = 0 : i64, scratch_operands = 0 : i64, tpu.core_type = #tpu.core_type<tc>, window_params = [{transform_indices = @transform_0, window_bounds = array<i64: 32, 16>}, {pipeline_mode = #tpu.pipeline_mode<synchronous>, transform_indices = @transform_1, window_bounds = array<i64: 1, 16>}, {pipeline_mode = #tpu.pipeline_mode<synchronous>, transform_indices = @transform_2, window_bounds = array<i64: 1, 16>}, {transform_indices = @transform_3, window_bounds = array<i64: 32, 16>}]} {
    %c0 = arith.constant 0 : index
    %c0_0 = arith.constant 0 : index
    %0 = vector.load %arg1[%c0, %c0_0] : memref<32x16xf32, #tpu.memory_space<vmem>>, vector<32x16xf32>
    %c0_1 = arith.constant 0 : index
    %c0_2 = arith.constant 0 : index
    %1 = vector.load %arg2[%c0_1, %c0_2] : memref<1x16xf32, #tpu.memory_space<vmem>>, vector<1x16xf32>
    %2 = vector.broadcast %1 : vector<1x16xf32> to vector<32x16xf32>
    %3 = arith.mulf %0, %2 : vector<32x16xf32>
    %c0_3 = arith.constant 0 : index
    %c0_4 = arith.constant 0 : index
    %4 = vector.load %arg3[%c0_3, %c0_4] : memref<1x16xf32, #tpu.memory_space<vmem>>, vector<1x16xf32>
    %5 = vector.broadcast %4 : vector<1x16xf32> to vector<32x16xf32>
    %6 = arith.addf %3, %5 : vector<32x16xf32>
    %cst = arith.constant 0.000000e+00 : f32
    %7 = vector.broadcast %cst : f32 to vector<32x16xf32>
    %8 = arith.maximumf %6, %7 : vector<32x16xf32>
    %c0_5 = arith.constant 0 : index
    %c0_6 = arith.constant 0 : index
    %9 = vector.load %arg4[%c0_5, %c0_6] : memref<32x16xf32, #tpu.memory_space<vmem>>, vector<32x16xf32>
    tpu.vector_store %arg4[%c0_5, %c0_6], %8 {strides = array<i32>} : memref<32x16xf32, #tpu.memory_space<vmem>>, vector<32x16xf32>,
    return
  }
  func.func @transform_0(%arg0: i32) -> (i32, i32) {
    %c0_i32 = arith.constant 0 : i32
    %c0_i32_0 = arith.constant 0 : i32
    return %arg0, %c0_i32 : i32, i32
  }
  func.func @transform_1(%arg0: i32) -> (i32, i32) {
    %c0_i32 = arith.constant 0 : i32
    %c0_i32_0 = arith.constant 0 : i32
    %c0_i32_1 = arith.constant 0 : i32
    return %c0_i32, %c0_i32_0 : i32, i32
  }
  func.func @transform_2(%arg0: i32) -> (i32, i32) {
    %c0_i32 = arith.constant 0 : i32
    %c0_i32_0 = arith.constant 0 : i32
    %c0_i32_1 = arith.constant 0 : i32
    return %c0_i32, %c0_i32_0 : i32, i32
  }
  func.func @transform_3(%arg0: i32) -> (i32, i32) {
    %c0_i32 = arith.constant 0 : i32
    %c0_i32_0 = arith.constant 0 : i32
    return %arg0, %c0_i32 : i32, i32
  }
}

module attributes {stable_mosaic.version = 11 : i64} {
  func.func @_matmul_kernel(%arg0: i32, %arg1: i32, %arg2: i32, %arg3: memref<32x144xf32, #tpu.memory_space<vmem>>, %arg4: memref<144x8xbf16, #tpu.memory_space<vmem>>, %arg5: memref<1x8xf32, #tpu.memory_space<vmem>>, %arg6: memref<1x144xf32, #tpu.memory_space<vmem>>, %arg7: memref<1x144xf32, #tpu.memory_space<vmem>>, %arg8: memref<32x8xf32, #tpu.memory_space<vmem>>, %arg9: memref<32x8xf32, #tpu.memory_space<vmem>>) attributes {dimension_semantics = [#tpu.dimension_semantics<parallel>, #tpu.dimension_semantics<parallel>, #tpu.dimension_semantics<arbitrary>], iteration_bounds = array<i64: 1, 1, 1>, scalar_prefetch = 0 : i64, scratch_operands = 1 : i64, tpu.core_type = #tpu.core_type<tc>, window_params = [{transform_indices = @transform_0, window_bounds = array<i64: 32, 144>}, {transform_indices = @transform_1, window_bounds = array<i64: 144, 8>}, {transform_indices = @transform_2, window_bounds = array<i64: 1, 8>}, {transform_indices = @transform_3, window_bounds = array<i64: 1, 144>}, {transform_indices = @transform_4, window_bounds = array<i64: 1, 144>}, {transform_indices = @transform_5, window_bounds = array<i64: 32, 8>}]} {
    %c0_i32 = arith.constant 0 : i32
    %0 = arith.cmpi eq, %arg2, %c0_i32 : i32
    %1 = arith.extui %0 : i1 to i32
    %c0_i32_0 = arith.constant 0 : i32
    %2 = arith.cmpi ne, %1, %c0_i32_0 : i32
    scf.if %2 {
      %cst_10 = arith.constant 0.000000e+00 : f32
      %13 = vector.broadcast %cst_10 : f32 to vector<32x8xf32>
      %c0_11 = arith.constant 0 : index
      %c0_12 = arith.constant 0 : index
      %14 = vector.load %arg9[%c0_11, %c0_12] : memref<32x8xf32, #tpu.memory_space<vmem>>, vector<32x8xf32>
      tpu.vector_store %arg9[%c0_11, %c0_12], %13 {strides = array<i32>} : memref<32x8xf32, #tpu.memory_space<vmem>>, vector<32x8xf32>,
    } else {
    }
    %c0 = arith.constant 0 : index
    %c0_1 = arith.constant 0 : index
    %3 = vector.load %arg3[%c0, %c0_1] : memref<32x144xf32, #tpu.memory_space<vmem>>, vector<32x144xf32>
    %c0_2 = arith.constant 0 : index
    %c0_3 = arith.constant 0 : index
    %4 = vector.load %arg9[%c0_2, %c0_3] : memref<32x8xf32, #tpu.memory_space<vmem>>, vector<32x8xf32>
    %5 = arith.truncf %3 : vector<32x144xf32> to vector<32x144xbf16>
    %c0_4 = arith.constant 0 : index
    %c0_5 = arith.constant 0 : index
    %6 = vector.load %arg4[%c0_4, %c0_5] : memref<144x8xbf16, #tpu.memory_space<vmem>>, vector<144x8xbf16>
    %cst = arith.constant dense<0.000000e+00> : vector<32x8xf32>
    %7 = tpu.matmul %5, %6, %cst {dimension_numbers = #tpu.dot_dimension_numbers<[1], [0], [0], [1], [0, 0, 1, 1], [], []>} : vector<32x144xbf16>, vector<144x8xbf16>, vector<32x8xf32> -> vector<32x8xf32>
    %8 = arith.addf %4, %7 : vector<32x8xf32>
    %c0_6 = arith.constant 0 : index
    %c0_7 = arith.constant 0 : index
    %9 = vector.load %arg9[%c0_6, %c0_7] : memref<32x8xf32, #tpu.memory_space<vmem>>, vector<32x8xf32>
    tpu.vector_store %arg9[%c0_6, %c0_7], %8 {strides = array<i32>} : memref<32x8xf32, #tpu.memory_space<vmem>>, vector<32x8xf32>,
    %c0_i32_8 = arith.constant 0 : i32
    %10 = arith.cmpi eq, %arg2, %c0_i32_8 : i32
    %11 = arith.extui %10 : i1 to i32
    %c0_i32_9 = arith.constant 0 : i32
    %12 = arith.cmpi ne, %11, %c0_i32_9 : i32
    scf.if %12 {
      %c0_10 = arith.constant 0 : index
      %c0_11 = arith.constant 0 : index
      %13 = vector.load %arg9[%c0_10, %c0_11] : memref<32x8xf32, #tpu.memory_space<vmem>>, vector<32x8xf32>
      %c0_12 = arith.constant 0 : index
      %c0_13 = arith.constant 0 : index
      %14 = vector.load %arg5[%c0_12, %c0_13] : memref<1x8xf32, #tpu.memory_space<vmem>>, vector<1x8xf32>
      %15 = vector.broadcast %14 : vector<1x8xf32> to vector<32x8xf32>
      %16 = arith.addf %13, %15 : vector<32x8xf32>
      %c0_14 = arith.constant 0 : index
      %c0_15 = arith.constant 0 : index
      %17 = vector.load %arg8[%c0_14, %c0_15] : memref<32x8xf32, #tpu.memory_space<vmem>>, vector<32x8xf32>
      tpu.vector_store %arg8[%c0_14, %c0_15], %16 {strides = array<i32>} : memref<32x8xf32, #tpu.memory_space<vmem>>, vector<32x8xf32>,
    } else {
    }
    return
  }
  func.func @transform_0(%arg0: i32, %arg1: i32, %arg2: i32) -> (i32, i32) {
    %c0_i32 = arith.constant 0 : i32
    return %arg0, %arg2 : i32, i32
  }
  func.func @transform_1(%arg0: i32, %arg1: i32, %arg2: i32) -> (i32, i32) {
    %c0_i32 = arith.constant 0 : i32
    return %arg2, %arg1 : i32, i32
  }
  func.func @transform_2(%arg0: i32, %arg1: i32, %arg2: i32) -> (i32, i32) {
    %c0_i32 = arith.constant 0 : i32
    %c0_i32_0 = arith.constant 0 : i32
    return %c0_i32, %arg1 : i32, i32
  }
  func.func @transform_3(%arg0: i32, %arg1: i32, %arg2: i32) -> (i32, i32) {
    %c0_i32 = arith.constant 0 : i32
    %c0_i32_0 = arith.constant 0 : i32
    return %c0_i32, %arg2 : i32, i32
  }
  func.func @transform_4(%arg0: i32, %arg1: i32, %arg2: i32) -> (i32, i32) {
    %c0_i32 = arith.constant 0 : i32
    %c0_i32_0 = arith.constant 0 : i32
    return %c0_i32, %arg2 : i32, i32
  }
  func.func @transform_5(%arg0: i32, %arg1: i32, %arg2: i32) -> (i32, i32) {
    %c0_i32 = arith.constant 0 : i32
    return %arg0, %arg1 : i32, i32
  }
}

module attributes {stable_mosaic.version = 11 : i64} {
  func.func @_bn_stats_kernel(%arg0: i32, %arg1: memref<32x24xf32, #tpu.memory_space<vmem>>, %arg2: memref<1x24xf32, #tpu.memory_space<vmem>>, %arg3: memref<1x24xf32, #tpu.memory_space<vmem>>, %arg4: memref<1x24xf32, #tpu.memory_space<vmem>>, %arg5: memref<1x24xf32, #tpu.memory_space<vmem>>, %arg6: memref<1x24xf32, #tpu.memory_space<vmem>>, %arg7: memref<1x24xf32, #tpu.memory_space<vmem>>) attributes {dimension_semantics = [#tpu.dimension_semantics<arbitrary>], iteration_bounds = array<i64: 1>, scalar_prefetch = 0 : i64, scratch_operands = 2 : i64, tpu.core_type = #tpu.core_type<tc>, window_params = [{transform_indices = @transform_0, window_bounds = array<i64: 32, 24>}, {pipeline_mode = #tpu.pipeline_mode<synchronous>, transform_indices = @transform_1, window_bounds = array<i64: 1, 24>}, {pipeline_mode = #tpu.pipeline_mode<synchronous>, transform_indices = @transform_2, window_bounds = array<i64: 1, 24>}, {pipeline_mode = #tpu.pipeline_mode<synchronous>, transform_indices = @transform_3, window_bounds = array<i64: 1, 24>}, {pipeline_mode = #tpu.pipeline_mode<synchronous>, transform_indices = @transform_4, window_bounds = array<i64: 1, 24>}]} {
    %c0_i32 = arith.constant 0 : i32
    %0 = arith.cmpi eq, %arg0, %c0_i32 : i32
    %1 = arith.extui %0 : i1 to i32
    %c0_i32_0 = arith.constant 0 : i32
    %2 = arith.cmpi ne, %1, %c0_i32_0 : i32
    scf.if %2 {
      %cst_13 = arith.constant 0.000000e+00 : f32
      %18 = vector.broadcast %cst_13 : f32 to vector<1x24xf32>
      %c0_14 = arith.constant 0 : index
      %c0_15 = arith.constant 0 : index
      %19 = vector.load %arg6[%c0_14, %c0_15] : memref<1x24xf32, #tpu.memory_space<vmem>>, vector<1x24xf32>
      tpu.vector_store %arg6[%c0_14, %c0_15], %18 {strides = array<i32>} : memref<1x24xf32, #tpu.memory_space<vmem>>, vector<1x24xf32>,
      %cst_16 = arith.constant 0.000000e+00 : f32
      %20 = vector.broadcast %cst_16 : f32 to vector<1x24xf32>
      %c0_17 = arith.constant 0 : index
      %c0_18 = arith.constant 0 : index
      %21 = vector.load %arg7[%c0_17, %c0_18] : memref<1x24xf32, #tpu.memory_space<vmem>>, vector<1x24xf32>
      tpu.vector_store %arg7[%c0_17, %c0_18], %20 {strides = array<i32>} : memref<1x24xf32, #tpu.memory_space<vmem>>, vector<1x24xf32>,
    } else {
    }
    %c0 = arith.constant 0 : index
    %c0_1 = arith.constant 0 : index
    %3 = vector.load %arg1[%c0, %c0_1] : memref<32x24xf32, #tpu.memory_space<vmem>>, vector<32x24xf32>
    %c0_2 = arith.constant 0 : index
    %c0_3 = arith.constant 0 : index
    %4 = vector.load %arg6[%c0_2, %c0_3] : memref<1x24xf32, #tpu.memory_space<vmem>>, vector<1x24xf32>
    %cst = arith.constant dense<0.000000e+00> : vector<24xf32>
    %5 = vector.multi_reduction <add>, %3, %cst [0] : vector<32x24xf32> to vector<24xf32>
    %6 = vector.shape_cast %5 : vector<24xf32> to vector<1x24xf32>
    %7 = arith.addf %4, %6 : vector<1x24xf32>
    %c0_4 = arith.constant 0 : index
    %c0_5 = arith.constant 0 : index
    %8 = vector.load %arg6[%c0_4, %c0_5] : memref<1x24xf32, #tpu.memory_space<vmem>>, vector<1x24xf32>
    tpu.vector_store %arg6[%c0_4, %c0_5], %7 {strides = array<i32>} : memref<1x24xf32, #tpu.memory_space<vmem>>, vector<1x24xf32>,
    %c0_6 = arith.constant 0 : index
    %c0_7 = arith.constant 0 : index
    %9 = vector.load %arg7[%c0_6, %c0_7] : memref<1x24xf32, #tpu.memory_space<vmem>>, vector<1x24xf32>
    %10 = arith.mulf %3, %3 : vector<32x24xf32>
    %cst_8 = arith.constant dense<0.000000e+00> : vector<24xf32>
    %11 = vector.multi_reduction <add>, %10, %cst_8 [0] : vector<32x24xf32> to vector<24xf32>
    %12 = vector.shape_cast %11 : vector<24xf32> to vector<1x24xf32>
    %13 = arith.addf %9, %12 : vector<1x24xf32>
    %c0_9 = arith.constant 0 : index
    %c0_10 = arith.constant 0 : index
    %14 = vector.load %arg7[%c0_9, %c0_10] : memref<1x24xf32, #tpu.memory_space<vmem>>, vector<1x24xf32>
    tpu.vector_store %arg7[%c0_9, %c0_10], %13 {strides = array<i32>} : memref<1x24xf32, #tpu.memory_space<vmem>>, vector<1x24xf32>,
    %c0_i32_11 = arith.constant 0 : i32
    %15 = arith.cmpi eq, %arg0, %c0_i32_11 : i32
    %16 = arith.extui %15 : i1 to i32
    %c0_i32_12 = arith.constant 0 : i32
    %17 = arith.cmpi ne, %16, %c0_i32_12 : i32
    scf.if %17 {
      %c0_13 = arith.constant 0 : index
      %c0_14 = arith.constant 0 : index
      %18 = vector.load %arg6[%c0_13, %c0_14] : memref<1x24xf32, #tpu.memory_space<vmem>>, vector<1x24xf32>
      %cst_15 = arith.constant 3.125000e-02 : f32
      %19 = vector.broadcast %cst_15 : f32 to vector<1x24xf32>
      %20 = arith.mulf %18, %19 : vector<1x24xf32>
      %c0_16 = arith.constant 0 : index
      %c0_17 = arith.constant 0 : index
      %21 = vector.load %arg7[%c0_16, %c0_17] : memref<1x24xf32, #tpu.memory_space<vmem>>, vector<1x24xf32>
      %cst_18 = arith.constant 3.125000e-02 : f32
      %22 = vector.broadcast %cst_18 : f32 to vector<1x24xf32>
      %23 = arith.mulf %21, %22 : vector<1x24xf32>
      %24 = arith.mulf %20, %20 : vector<1x24xf32>
      %25 = arith.subf %23, %24 : vector<1x24xf32>
      %cst_19 = arith.constant 0.000000e+00 : f32
      %26 = vector.broadcast %cst_19 : f32 to vector<1x24xf32>
      %27 = arith.maximumf %25, %26 : vector<1x24xf32>
      %cst_20 = arith.constant 9.99999974E-6 : f32
      %28 = vector.broadcast %cst_20 : f32 to vector<1x24xf32>
      %29 = arith.addf %27, %28 : vector<1x24xf32>
      %30 = math.rsqrt %29 : vector<1x24xf32>
      %c0_21 = arith.constant 0 : index
      %c0_22 = arith.constant 0 : index
      %31 = vector.load %arg2[%c0_21, %c0_22] : memref<1x24xf32, #tpu.memory_space<vmem>>, vector<1x24xf32>
      %32 = arith.mulf %31, %30 : vector<1x24xf32>
      %c0_23 = arith.constant 0 : index
      %c0_24 = arith.constant 0 : index
      %33 = vector.load %arg4[%c0_23, %c0_24] : memref<1x24xf32, #tpu.memory_space<vmem>>, vector<1x24xf32>
      tpu.vector_store %arg4[%c0_23, %c0_24], %32 {strides = array<i32>} : memref<1x24xf32, #tpu.memory_space<vmem>>, vector<1x24xf32>,
      %c0_25 = arith.constant 0 : index
      %c0_26 = arith.constant 0 : index
      %34 = vector.load %arg3[%c0_25, %c0_26] : memref<1x24xf32, #tpu.memory_space<vmem>>, vector<1x24xf32>
      %35 = arith.mulf %20, %32 : vector<1x24xf32>
      %36 = arith.subf %34, %35 : vector<1x24xf32>
      %c0_27 = arith.constant 0 : index
      %c0_28 = arith.constant 0 : index
      %37 = vector.load %arg5[%c0_27, %c0_28] : memref<1x24xf32, #tpu.memory_space<vmem>>, vector<1x24xf32>
      tpu.vector_store %arg5[%c0_27, %c0_28], %36 {strides = array<i32>} : memref<1x24xf32, #tpu.memory_space<vmem>>, vector<1x24xf32>,
    } else {
    }
    return
  }
  func.func @transform_0(%arg0: i32) -> (i32, i32) {
    %c0_i32 = arith.constant 0 : i32
    %c0_i32_0 = arith.constant 0 : i32
    return %arg0, %c0_i32 : i32, i32
  }
  func.func @transform_1(%arg0: i32) -> (i32, i32) {
    %c0_i32 = arith.constant 0 : i32
    %c0_i32_0 = arith.constant 0 : i32
    %c0_i32_1 = arith.constant 0 : i32
    return %c0_i32, %c0_i32_0 : i32, i32
  }
  func.func @transform_2(%arg0: i32) -> (i32, i32) {
    %c0_i32 = arith.constant 0 : i32
    %c0_i32_0 = arith.constant 0 : i32
    %c0_i32_1 = arith.constant 0 : i32
    return %c0_i32, %c0_i32_0 : i32, i32
  }
  func.func @transform_3(%arg0: i32) -> (i32, i32) {
    %c0_i32 = arith.constant 0 : i32
    %c0_i32_0 = arith.constant 0 : i32
    %c0_i32_1 = arith.constant 0 : i32
    return %c0_i32, %c0_i32_0 : i32, i32
  }
  func.func @transform_4(%arg0: i32) -> (i32, i32) {
    %c0_i32 = arith.constant 0 : i32
    %c0_i32_0 = arith.constant 0 : i32
    %c0_i32_1 = arith.constant 0 : i32
    return %c0_i32, %c0_i32_0 : i32, i32
  }
}

module attributes {stable_mosaic.version = 11 : i64} {
  func.func @_matmul_kernel(%arg0: i32, %arg1: i32, %arg2: i32, %arg3: memref<32x24xf32, #tpu.memory_space<vmem>>, %arg4: memref<24x16xbf16, #tpu.memory_space<vmem>>, %arg5: memref<1x16xf32, #tpu.memory_space<vmem>>, %arg6: memref<1x24xf32, #tpu.memory_space<vmem>>, %arg7: memref<1x24xf32, #tpu.memory_space<vmem>>, %arg8: memref<32x16xf32, #tpu.memory_space<vmem>>, %arg9: memref<32x16xf32, #tpu.memory_space<vmem>>) attributes {dimension_semantics = [#tpu.dimension_semantics<parallel>, #tpu.dimension_semantics<parallel>, #tpu.dimension_semantics<arbitrary>], iteration_bounds = array<i64: 1, 1, 1>, scalar_prefetch = 0 : i64, scratch_operands = 1 : i64, tpu.core_type = #tpu.core_type<tc>, window_params = [{transform_indices = @transform_0, window_bounds = array<i64: 32, 24>}, {transform_indices = @transform_1, window_bounds = array<i64: 24, 16>}, {transform_indices = @transform_2, window_bounds = array<i64: 1, 16>}, {transform_indices = @transform_3, window_bounds = array<i64: 1, 24>}, {transform_indices = @transform_4, window_bounds = array<i64: 1, 24>}, {transform_indices = @transform_5, window_bounds = array<i64: 32, 16>}]} {
    %c0_i32 = arith.constant 0 : i32
    %0 = arith.cmpi eq, %arg2, %c0_i32 : i32
    %1 = arith.extui %0 : i1 to i32
    %c0_i32_0 = arith.constant 0 : i32
    %2 = arith.cmpi ne, %1, %c0_i32_0 : i32
    scf.if %2 {
      %cst_15 = arith.constant 0.000000e+00 : f32
      %21 = vector.broadcast %cst_15 : f32 to vector<32x16xf32>
      %c0_16 = arith.constant 0 : index
      %c0_17 = arith.constant 0 : index
      %22 = vector.load %arg9[%c0_16, %c0_17] : memref<32x16xf32, #tpu.memory_space<vmem>>, vector<32x16xf32>
      tpu.vector_store %arg9[%c0_16, %c0_17], %21 {strides = array<i32>} : memref<32x16xf32, #tpu.memory_space<vmem>>, vector<32x16xf32>,
    } else {
    }
    %c0 = arith.constant 0 : index
    %c0_1 = arith.constant 0 : index
    %3 = vector.load %arg3[%c0, %c0_1] : memref<32x24xf32, #tpu.memory_space<vmem>>, vector<32x24xf32>
    %c0_2 = arith.constant 0 : index
    %c0_3 = arith.constant 0 : index
    %4 = vector.load %arg6[%c0_2, %c0_3] : memref<1x24xf32, #tpu.memory_space<vmem>>, vector<1x24xf32>
    %5 = vector.broadcast %4 : vector<1x24xf32> to vector<32x24xf32>
    %6 = arith.mulf %3, %5 : vector<32x24xf32>
    %c0_4 = arith.constant 0 : index
    %c0_5 = arith.constant 0 : index
    %7 = vector.load %arg7[%c0_4, %c0_5] : memref<1x24xf32, #tpu.memory_space<vmem>>, vector<1x24xf32>
    %8 = vector.broadcast %7 : vector<1x24xf32> to vector<32x24xf32>
    %9 = arith.addf %6, %8 : vector<32x24xf32>
    %cst = arith.constant 0.000000e+00 : f32
    %10 = vector.broadcast %cst : f32 to vector<32x24xf32>
    %11 = arith.maximumf %9, %10 : vector<32x24xf32>
    %c0_6 = arith.constant 0 : index
    %c0_7 = arith.constant 0 : index
    %12 = vector.load %arg9[%c0_6, %c0_7] : memref<32x16xf32, #tpu.memory_space<vmem>>, vector<32x16xf32>
    %13 = arith.truncf %11 : vector<32x24xf32> to vector<32x24xbf16>
    %c0_8 = arith.constant 0 : index
    %c0_9 = arith.constant 0 : index
    %14 = vector.load %arg4[%c0_8, %c0_9] : memref<24x16xbf16, #tpu.memory_space<vmem>>, vector<24x16xbf16>
    %cst_10 = arith.constant dense<0.000000e+00> : vector<32x16xf32>
    %15 = tpu.matmul %13, %14, %cst_10 {dimension_numbers = #tpu.dot_dimension_numbers<[1], [0], [0], [1], [0, 0, 1, 1], [], []>} : vector<32x24xbf16>, vector<24x16xbf16>, vector<32x16xf32> -> vector<32x16xf32>
    %16 = arith.addf %12, %15 : vector<32x16xf32>
    %c0_11 = arith.constant 0 : index
    %c0_12 = arith.constant 0 : index
    %17 = vector.load %arg9[%c0_11, %c0_12] : memref<32x16xf32, #tpu.memory_space<vmem>>, vector<32x16xf32>
    tpu.vector_store %arg9[%c0_11, %c0_12], %16 {strides = array<i32>} : memref<32x16xf32, #tpu.memory_space<vmem>>, vector<32x16xf32>,
    %c0_i32_13 = arith.constant 0 : i32
    %18 = arith.cmpi eq, %arg2, %c0_i32_13 : i32
    %19 = arith.extui %18 : i1 to i32
    %c0_i32_14 = arith.constant 0 : i32
    %20 = arith.cmpi ne, %19, %c0_i32_14 : i32
    scf.if %20 {
      %c0_15 = arith.constant 0 : index
      %c0_16 = arith.constant 0 : index
      %21 = vector.load %arg9[%c0_15, %c0_16] : memref<32x16xf32, #tpu.memory_space<vmem>>, vector<32x16xf32>
      %c0_17 = arith.constant 0 : index
      %c0_18 = arith.constant 0 : index
      %22 = vector.load %arg5[%c0_17, %c0_18] : memref<1x16xf32, #tpu.memory_space<vmem>>, vector<1x16xf32>
      %23 = vector.broadcast %22 : vector<1x16xf32> to vector<32x16xf32>
      %24 = arith.addf %21, %23 : vector<32x16xf32>
      %c0_19 = arith.constant 0 : index
      %c0_20 = arith.constant 0 : index
      %25 = vector.load %arg8[%c0_19, %c0_20] : memref<32x16xf32, #tpu.memory_space<vmem>>, vector<32x16xf32>
      tpu.vector_store %arg8[%c0_19, %c0_20], %24 {strides = array<i32>} : memref<32x16xf32, #tpu.memory_space<vmem>>, vector<32x16xf32>,
    } else {
    }
    return
  }
  func.func @transform_0(%arg0: i32, %arg1: i32, %arg2: i32) -> (i32, i32) {
    %c0_i32 = arith.constant 0 : i32
    return %arg0, %arg2 : i32, i32
  }
  func.func @transform_1(%arg0: i32, %arg1: i32, %arg2: i32) -> (i32, i32) {
    %c0_i32 = arith.constant 0 : i32
    return %arg2, %arg1 : i32, i32
  }
  func.func @transform_2(%arg0: i32, %arg1: i32, %arg2: i32) -> (i32, i32) {
    %c0_i32 = arith.constant 0 : i32
    %c0_i32_0 = arith.constant 0 : i32
    return %c0_i32, %arg1 : i32, i32
  }
  func.func @transform_3(%arg0: i32, %arg1: i32, %arg2: i32) -> (i32, i32) {
    %c0_i32 = arith.constant 0 : i32
    %c0_i32_0 = arith.constant 0 : i32
    return %c0_i32, %arg2 : i32, i32
  }
  func.func @transform_4(%arg0: i32, %arg1: i32, %arg2: i32) -> (i32, i32) {
    %c0_i32 = arith.constant 0 : i32
    %c0_i32_0 = arith.constant 0 : i32
    return %c0_i32, %arg2 : i32, i32
  }
  func.func @transform_5(%arg0: i32, %arg1: i32, %arg2: i32) -> (i32, i32) {
    %c0_i32 = arith.constant 0 : i32
    return %arg0, %arg1 : i32, i32
  }
}

module attributes {stable_mosaic.version = 11 : i64} {
  func.func @_se_kernel(%arg0: i32, %arg1: memref<2x16x32xf32, #tpu.memory_space<vmem>>, %arg2: memref<8x32xf32, #tpu.memory_space<vmem>>, %arg3: memref<32x2xf32, #tpu.memory_space<vmem>>, %arg4: memref<1x2xf32, #tpu.memory_space<vmem>>, %arg5: memref<2x32xf32, #tpu.memory_space<vmem>>, %arg6: memref<1x32xf32, #tpu.memory_space<vmem>>, %arg7: memref<2x16x32xf32, #tpu.memory_space<vmem>>) attributes {dimension_semantics = [#tpu.dimension_semantics<parallel>], iteration_bounds = array<i64: 1>, scalar_prefetch = 0 : i64, scratch_operands = 0 : i64, tpu.core_type = #tpu.core_type<tc>, window_params = [{transform_indices = @transform_0, window_bounds = array<i64: 2, 16, 32>}, {pipeline_mode = #tpu.pipeline_mode<synchronous>, transform_indices = @transform_1, window_bounds = array<i64: 8, 32>}, {pipeline_mode = #tpu.pipeline_mode<synchronous>, transform_indices = @transform_2, window_bounds = array<i64: 32, 2>}, {pipeline_mode = #tpu.pipeline_mode<synchronous>, transform_indices = @transform_3, window_bounds = array<i64: 1, 2>}, {pipeline_mode = #tpu.pipeline_mode<synchronous>, transform_indices = @transform_4, window_bounds = array<i64: 2, 32>}, {pipeline_mode = #tpu.pipeline_mode<synchronous>, transform_indices = @transform_5, window_bounds = array<i64: 1, 32>}, {transform_indices = @transform_6, window_bounds = array<i64: 2, 16, 32>}]} {
    %c0 = arith.constant 0 : index
    %c0_0 = arith.constant 0 : index
    %0 = vector.load %arg2[%c0, %c0_0] : memref<8x32xf32, #tpu.memory_space<vmem>>, vector<8x32xf32>
    %c0_1 = arith.constant 0 : index
    %c0_2 = arith.constant 0 : index
    %1 = vector.load %arg3[%c0_1, %c0_2] : memref<32x2xf32, #tpu.memory_space<vmem>>, vector<32x2xf32>
    %cst = arith.constant dense<0.000000e+00> : vector<8x2xf32>
    %2 = tpu.matmul %0, %1, %cst {dimension_numbers = #tpu.dot_dimension_numbers<[1], [0], [0], [1], [0, 0, 1, 1], [], []>} : vector<8x32xf32>, vector<32x2xf32>, vector<8x2xf32> -> vector<8x2xf32>
    %c0_3 = arith.constant 0 : index
    %c0_4 = arith.constant 0 : index
    %3 = vector.load %arg4[%c0_3, %c0_4] : memref<1x2xf32, #tpu.memory_space<vmem>>, vector<1x2xf32>
    %4 = vector.broadcast %3 : vector<1x2xf32> to vector<8x2xf32>
    %5 = arith.addf %2, %4 : vector<8x2xf32>
    %cst_5 = arith.constant 0.000000e+00 : f32
    %6 = vector.broadcast %cst_5 : f32 to vector<8x2xf32>
    %7 = arith.maximumf %5, %6 : vector<8x2xf32>
    %c0_6 = arith.constant 0 : index
    %c0_7 = arith.constant 0 : index
    %8 = vector.load %arg5[%c0_6, %c0_7] : memref<2x32xf32, #tpu.memory_space<vmem>>, vector<2x32xf32>
    %cst_8 = arith.constant dense<0.000000e+00> : vector<8x32xf32>
    %9 = tpu.matmul %7, %8, %cst_8 {dimension_numbers = #tpu.dot_dimension_numbers<[1], [0], [0], [1], [0, 0, 1, 1], [], []>} : vector<8x2xf32>, vector<2x32xf32>, vector<8x32xf32> -> vector<8x32xf32>
    %c0_9 = arith.constant 0 : index
    %c0_10 = arith.constant 0 : index
    %10 = vector.load %arg6[%c0_9, %c0_10] : memref<1x32xf32, #tpu.memory_space<vmem>>, vector<1x32xf32>
    %11 = vector.broadcast %10 : vector<1x32xf32> to vector<8x32xf32>
    %12 = arith.addf %9, %11 : vector<8x32xf32>
    %13 = arith.negf %12 : vector<8x32xf32>
    %14 = math.exp %13 : vector<8x32xf32>
    %cst_11 = arith.constant 1.000000e+00 : f32
    %15 = vector.broadcast %cst_11 : f32 to vector<8x32xf32>
    %16 = arith.addf %15, %14 : vector<8x32xf32>
    %17 = arith.divf %15, %16 : vector<8x32xf32>
    %c0_12 = arith.constant 0 : index
    %c0_13 = arith.constant 0 : index
    %c0_14 = arith.constant 0 : index
    %18 = vector.load %arg1[%c0_12, %c0_13, %c0_14] : memref<2x16x32xf32, #tpu.memory_space<vmem>>, vector<2x16x32xf32>
    %19 = vector.extract_strided_slice %18 {offsets = [0, 0, 0], sizes = [1, 16, 32], strides = [1, 1, 1]} : vector<2x16x32xf32> to vector<1x16x32xf32>
    %20 = vector.shape_cast %19 : vector<1x16x32xf32> to vector<16x32xf32>
    %21 = vector.extract_strided_slice %17 {offsets = [0, 0], sizes = [1, 32], strides = [1, 1]} : vector<8x32xf32> to vector<1x32xf32>
    %22 = vector.broadcast %21 : vector<1x32xf32> to vector<16x32xf32>
    %23 = arith.mulf %20, %22 : vector<16x32xf32>
    %c0_15 = arith.constant 0 : index
    %c0_16 = arith.constant 0 : index
    %c0_17 = arith.constant 0 : index
    %24 = vector.load %arg7[%c0_15, %c0_16, %c0_17] : memref<2x16x32xf32, #tpu.memory_space<vmem>>, vector<1x16x32xf32>
    %25 = vector.shape_cast %24 : vector<1x16x32xf32> to vector<16x32xf32>
    %26 = vector.shape_cast %23 : vector<16x32xf32> to vector<1x16x32xf32>
    tpu.vector_store %arg7[%c0_15, %c0_16, %c0_17], %26 {strides = array<i32>} : memref<2x16x32xf32, #tpu.memory_space<vmem>>, vector<1x16x32xf32>,
    %27 = vector.extract_strided_slice %18 {offsets = [1, 0, 0], sizes = [1, 16, 32], strides = [1, 1, 1]} : vector<2x16x32xf32> to vector<1x16x32xf32>
    %28 = vector.shape_cast %27 : vector<1x16x32xf32> to vector<16x32xf32>
    %29 = vector.extract_strided_slice %17 {offsets = [1, 0], sizes = [1, 32], strides = [1, 1]} : vector<8x32xf32> to vector<1x32xf32>
    %30 = vector.broadcast %29 : vector<1x32xf32> to vector<16x32xf32>
    %31 = arith.mulf %28, %30 : vector<16x32xf32>
    %c1 = arith.constant 1 : index
    %c0_18 = arith.constant 0 : index
    %c0_19 = arith.constant 0 : index
    %32 = vector.load %arg7[%c1, %c0_18, %c0_19] : memref<2x16x32xf32, #tpu.memory_space<vmem>>, vector<1x16x32xf32>
    %33 = vector.shape_cast %32 : vector<1x16x32xf32> to vector<16x32xf32>
    %34 = vector.shape_cast %31 : vector<16x32xf32> to vector<1x16x32xf32>
    tpu.vector_store %arg7[%c1, %c0_18, %c0_19], %34 {strides = array<i32>} : memref<2x16x32xf32, #tpu.memory_space<vmem>>, vector<1x16x32xf32>,
    return
  }
  func.func @transform_0(%arg0: i32) -> (i32, i32, i32) {
    %c0_i32 = arith.constant 0 : i32
    %c0_i32_0 = arith.constant 0 : i32
    %c0_i32_1 = arith.constant 0 : i32
    return %c0_i32, %arg0, %c0_i32_0 : i32, i32, i32
  }
  func.func @transform_1(%arg0: i32) -> (i32, i32) {
    %c0_i32 = arith.constant 0 : i32
    %c0_i32_0 = arith.constant 0 : i32
    %c0_i32_1 = arith.constant 0 : i32
    return %c0_i32, %c0_i32_0 : i32, i32
  }
  func.func @transform_2(%arg0: i32) -> (i32, i32) {
    %c0_i32 = arith.constant 0 : i32
    %c0_i32_0 = arith.constant 0 : i32
    %c0_i32_1 = arith.constant 0 : i32
    return %c0_i32, %c0_i32_0 : i32, i32
  }
  func.func @transform_3(%arg0: i32) -> (i32, i32) {
    %c0_i32 = arith.constant 0 : i32
    %c0_i32_0 = arith.constant 0 : i32
    %c0_i32_1 = arith.constant 0 : i32
    return %c0_i32, %c0_i32_0 : i32, i32
  }
  func.func @transform_4(%arg0: i32) -> (i32, i32) {
    %c0_i32 = arith.constant 0 : i32
    %c0_i32_0 = arith.constant 0 : i32
    %c0_i32_1 = arith.constant 0 : i32
    return %c0_i32, %c0_i32_0 : i32, i32
  }
  func.func @transform_5(%arg0: i32) -> (i32, i32) {
    %c0_i32 = arith.constant 0 : i32
    %c0_i32_0 = arith.constant 0 : i32
    %c0_i32_1 = arith.constant 0 : i32
    return %c0_i32, %c0_i32_0 : i32, i32
  }
  func.func @transform_6(%arg0: i32) -> (i32, i32, i32) {
    %c0_i32 = arith.constant 0 : i32
    %c0_i32_0 = arith.constant 0 : i32
    %c0_i32_1 = arith.constant 0 : i32
    return %c0_i32, %arg0, %c0_i32_0 : i32, i32, i32
  }
}

module attributes {stable_mosaic.version = 11 : i64} {
  func.func @_gap_kernel(%arg0: i32, %arg1: memref<2x16x32xf32, #tpu.memory_space<vmem>>, %arg2: memref<1x1x32xf32, #tpu.memory_space<vmem>>, %arg3: memref<1x1x32xf32, #tpu.memory_space<vmem>>, %arg4: memref<2x32xf32, #tpu.memory_space<vmem>>, %arg5: memref<2x32xf32, #tpu.memory_space<vmem>>) attributes {dimension_semantics = [#tpu.dimension_semantics<arbitrary>], iteration_bounds = array<i64: 1>, scalar_prefetch = 0 : i64, scratch_operands = 1 : i64, tpu.core_type = #tpu.core_type<tc>, window_params = [{transform_indices = @transform_0, window_bounds = array<i64: 2, 16, 32>}, {pipeline_mode = #tpu.pipeline_mode<synchronous>, transform_indices = @transform_1, window_bounds = array<i64: 1, 1, 32>}, {pipeline_mode = #tpu.pipeline_mode<synchronous>, transform_indices = @transform_2, window_bounds = array<i64: 1, 1, 32>}, {pipeline_mode = #tpu.pipeline_mode<synchronous>, transform_indices = @transform_3, window_bounds = array<i64: 2, 32>}]} {
    %c0_i32 = arith.constant 0 : i32
    %0 = arith.cmpi eq, %arg0, %c0_i32 : i32
    %1 = arith.extui %0 : i1 to i32
    %c0_i32_0 = arith.constant 0 : i32
    %2 = arith.cmpi ne, %1, %c0_i32_0 : i32
    scf.if %2 {
      %cst_9 = arith.constant 0.000000e+00 : f32
      %11 = vector.broadcast %cst_9 : f32 to vector<2x32xf32>
      %c0_10 = arith.constant 0 : index
      %c0_11 = arith.constant 0 : index
      %12 = vector.load %arg5[%c0_10, %c0_11] : memref<2x32xf32, #tpu.memory_space<vmem>>, vector<2x32xf32>
      tpu.vector_store %arg5[%c0_10, %c0_11], %11 {strides = array<i32>} : memref<2x32xf32, #tpu.memory_space<vmem>>, vector<2x32xf32>,
    } else {
    }
    %c0 = arith.constant 0 : index
    %c0_1 = arith.constant 0 : index
    %c0_2 = arith.constant 0 : index
    %3 = vector.load %arg1[%c0, %c0_1, %c0_2] : memref<2x16x32xf32, #tpu.memory_space<vmem>>, vector<2x16x32xf32>
    %c0_3 = arith.constant 0 : index
    %c0_4 = arith.constant 0 : index
    %4 = vector.load %arg5[%c0_3, %c0_4] : memref<2x32xf32, #tpu.memory_space<vmem>>, vector<2x32xf32>
    %cst = arith.constant dense<0.000000e+00> : vector<2x32xf32>
    %5 = vector.multi_reduction <add>, %3, %cst [1] : vector<2x16x32xf32> to vector<2x32xf32>
    %6 = arith.addf %4, %5 : vector<2x32xf32>
    %c0_5 = arith.constant 0 : index
    %c0_6 = arith.constant 0 : index
    %7 = vector.load %arg5[%c0_5, %c0_6] : memref<2x32xf32, #tpu.memory_space<vmem>>, vector<2x32xf32>
    tpu.vector_store %arg5[%c0_5, %c0_6], %6 {strides = array<i32>} : memref<2x32xf32, #tpu.memory_space<vmem>>, vector<2x32xf32>,
    %c0_i32_7 = arith.constant 0 : i32
    %8 = arith.cmpi eq, %arg0, %c0_i32_7 : i32
    %9 = arith.extui %8 : i1 to i32
    %c0_i32_8 = arith.constant 0 : i32
    %10 = arith.cmpi ne, %9, %c0_i32_8 : i32
    scf.if %10 {
      %c0_9 = arith.constant 0 : index
      %c0_10 = arith.constant 0 : index
      %11 = vector.load %arg5[%c0_9, %c0_10] : memref<2x32xf32, #tpu.memory_space<vmem>>, vector<2x32xf32>
      %cst_11 = arith.constant 6.250000e-02 : f32
      %12 = vector.broadcast %cst_11 : f32 to vector<2x32xf32>
      %13 = arith.mulf %11, %12 : vector<2x32xf32>
      %c0_12 = arith.constant 0 : index
      %c0_13 = arith.constant 0 : index
      %14 = vector.load %arg4[%c0_12, %c0_13] : memref<2x32xf32, #tpu.memory_space<vmem>>, vector<2x32xf32>
      tpu.vector_store %arg4[%c0_12, %c0_13], %13 {strides = array<i32>} : memref<2x32xf32, #tpu.memory_space<vmem>>, vector<2x32xf32>,
    } else {
    }
    return
  }
  func.func @transform_0(%arg0: i32) -> (i32, i32, i32) {
    %c0_i32 = arith.constant 0 : i32
    %c0_i32_0 = arith.constant 0 : i32
    %c0_i32_1 = arith.constant 0 : i32
    return %c0_i32, %arg0, %c0_i32_0 : i32, i32, i32
  }
  func.func @transform_1(%arg0: i32) -> (i32, i32, i32) {
    %c0_i32 = arith.constant 0 : i32
    %c0_i32_0 = arith.constant 0 : i32
    %c0_i32_1 = arith.constant 0 : i32
    %c0_i32_2 = arith.constant 0 : i32
    return %c0_i32, %c0_i32_0, %c0_i32_1 : i32, i32, i32
  }
  func.func @transform_2(%arg0: i32) -> (i32, i32, i32) {
    %c0_i32 = arith.constant 0 : i32
    %c0_i32_0 = arith.constant 0 : i32
    %c0_i32_1 = arith.constant 0 : i32
    %c0_i32_2 = arith.constant 0 : i32
    return %c0_i32, %c0_i32_0, %c0_i32_1 : i32, i32, i32
  }
  func.func @transform_3(%arg0: i32) -> (i32, i32) {
    %c0_i32 = arith.constant 0 : i32
    %c0_i32_0 = arith.constant 0 : i32
    %c0_i32_1 = arith.constant 0 : i32
    return %c0_i32, %c0_i32_0 : i32, i32
  }
}

module attributes {stable_mosaic.version = 11 : i64} {
  func.func @_bn_stats_kernel(%arg0: i32, %arg1: memref<32x32xf32, #tpu.memory_space<vmem>>, %arg2: memref<1x32xf32, #tpu.memory_space<vmem>>, %arg3: memref<1x32xf32, #tpu.memory_space<vmem>>, %arg4: memref<1x32xf32, #tpu.memory_space<vmem>>, %arg5: memref<1x32xf32, #tpu.memory_space<vmem>>, %arg6: memref<1x32xf32, #tpu.memory_space<vmem>>, %arg7: memref<1x32xf32, #tpu.memory_space<vmem>>) attributes {dimension_semantics = [#tpu.dimension_semantics<arbitrary>], iteration_bounds = array<i64: 1>, scalar_prefetch = 0 : i64, scratch_operands = 2 : i64, tpu.core_type = #tpu.core_type<tc>, window_params = [{transform_indices = @transform_0, window_bounds = array<i64: 32, 32>}, {pipeline_mode = #tpu.pipeline_mode<synchronous>, transform_indices = @transform_1, window_bounds = array<i64: 1, 32>}, {pipeline_mode = #tpu.pipeline_mode<synchronous>, transform_indices = @transform_2, window_bounds = array<i64: 1, 32>}, {pipeline_mode = #tpu.pipeline_mode<synchronous>, transform_indices = @transform_3, window_bounds = array<i64: 1, 32>}, {pipeline_mode = #tpu.pipeline_mode<synchronous>, transform_indices = @transform_4, window_bounds = array<i64: 1, 32>}]} {
    %c0_i32 = arith.constant 0 : i32
    %0 = arith.cmpi eq, %arg0, %c0_i32 : i32
    %1 = arith.extui %0 : i1 to i32
    %c0_i32_0 = arith.constant 0 : i32
    %2 = arith.cmpi ne, %1, %c0_i32_0 : i32
    scf.if %2 {
      %cst_13 = arith.constant 0.000000e+00 : f32
      %18 = vector.broadcast %cst_13 : f32 to vector<1x32xf32>
      %c0_14 = arith.constant 0 : index
      %c0_15 = arith.constant 0 : index
      %19 = vector.load %arg6[%c0_14, %c0_15] : memref<1x32xf32, #tpu.memory_space<vmem>>, vector<1x32xf32>
      tpu.vector_store %arg6[%c0_14, %c0_15], %18 {strides = array<i32>} : memref<1x32xf32, #tpu.memory_space<vmem>>, vector<1x32xf32>,
      %cst_16 = arith.constant 0.000000e+00 : f32
      %20 = vector.broadcast %cst_16 : f32 to vector<1x32xf32>
      %c0_17 = arith.constant 0 : index
      %c0_18 = arith.constant 0 : index
      %21 = vector.load %arg7[%c0_17, %c0_18] : memref<1x32xf32, #tpu.memory_space<vmem>>, vector<1x32xf32>
      tpu.vector_store %arg7[%c0_17, %c0_18], %20 {strides = array<i32>} : memref<1x32xf32, #tpu.memory_space<vmem>>, vector<1x32xf32>,
    } else {
    }
    %c0 = arith.constant 0 : index
    %c0_1 = arith.constant 0 : index
    %3 = vector.load %arg1[%c0, %c0_1] : memref<32x32xf32, #tpu.memory_space<vmem>>, vector<32x32xf32>
    %c0_2 = arith.constant 0 : index
    %c0_3 = arith.constant 0 : index
    %4 = vector.load %arg6[%c0_2, %c0_3] : memref<1x32xf32, #tpu.memory_space<vmem>>, vector<1x32xf32>
    %cst = arith.constant dense<0.000000e+00> : vector<32xf32>
    %5 = vector.multi_reduction <add>, %3, %cst [0] : vector<32x32xf32> to vector<32xf32>
    %6 = vector.shape_cast %5 : vector<32xf32> to vector<1x32xf32>
    %7 = arith.addf %4, %6 : vector<1x32xf32>
    %c0_4 = arith.constant 0 : index
    %c0_5 = arith.constant 0 : index
    %8 = vector.load %arg6[%c0_4, %c0_5] : memref<1x32xf32, #tpu.memory_space<vmem>>, vector<1x32xf32>
    tpu.vector_store %arg6[%c0_4, %c0_5], %7 {strides = array<i32>} : memref<1x32xf32, #tpu.memory_space<vmem>>, vector<1x32xf32>,
    %c0_6 = arith.constant 0 : index
    %c0_7 = arith.constant 0 : index
    %9 = vector.load %arg7[%c0_6, %c0_7] : memref<1x32xf32, #tpu.memory_space<vmem>>, vector<1x32xf32>
    %10 = arith.mulf %3, %3 : vector<32x32xf32>
    %cst_8 = arith.constant dense<0.000000e+00> : vector<32xf32>
    %11 = vector.multi_reduction <add>, %10, %cst_8 [0] : vector<32x32xf32> to vector<32xf32>
    %12 = vector.shape_cast %11 : vector<32xf32> to vector<1x32xf32>
    %13 = arith.addf %9, %12 : vector<1x32xf32>
    %c0_9 = arith.constant 0 : index
    %c0_10 = arith.constant 0 : index
    %14 = vector.load %arg7[%c0_9, %c0_10] : memref<1x32xf32, #tpu.memory_space<vmem>>, vector<1x32xf32>
    tpu.vector_store %arg7[%c0_9, %c0_10], %13 {strides = array<i32>} : memref<1x32xf32, #tpu.memory_space<vmem>>, vector<1x32xf32>,
    %c0_i32_11 = arith.constant 0 : i32
    %15 = arith.cmpi eq, %arg0, %c0_i32_11 : i32
    %16 = arith.extui %15 : i1 to i32
    %c0_i32_12 = arith.constant 0 : i32
    %17 = arith.cmpi ne, %16, %c0_i32_12 : i32
    scf.if %17 {
      %c0_13 = arith.constant 0 : index
      %c0_14 = arith.constant 0 : index
      %18 = vector.load %arg6[%c0_13, %c0_14] : memref<1x32xf32, #tpu.memory_space<vmem>>, vector<1x32xf32>
      %cst_15 = arith.constant 3.125000e-02 : f32
      %19 = vector.broadcast %cst_15 : f32 to vector<1x32xf32>
      %20 = arith.mulf %18, %19 : vector<1x32xf32>
      %c0_16 = arith.constant 0 : index
      %c0_17 = arith.constant 0 : index
      %21 = vector.load %arg7[%c0_16, %c0_17] : memref<1x32xf32, #tpu.memory_space<vmem>>, vector<1x32xf32>
      %cst_18 = arith.constant 3.125000e-02 : f32
      %22 = vector.broadcast %cst_18 : f32 to vector<1x32xf32>
      %23 = arith.mulf %21, %22 : vector<1x32xf32>
      %24 = arith.mulf %20, %20 : vector<1x32xf32>
      %25 = arith.subf %23, %24 : vector<1x32xf32>
      %cst_19 = arith.constant 0.000000e+00 : f32
      %26 = vector.broadcast %cst_19 : f32 to vector<1x32xf32>
      %27 = arith.maximumf %25, %26 : vector<1x32xf32>
      %cst_20 = arith.constant 9.99999974E-6 : f32
      %28 = vector.broadcast %cst_20 : f32 to vector<1x32xf32>
      %29 = arith.addf %27, %28 : vector<1x32xf32>
      %30 = math.rsqrt %29 : vector<1x32xf32>
      %c0_21 = arith.constant 0 : index
      %c0_22 = arith.constant 0 : index
      %31 = vector.load %arg2[%c0_21, %c0_22] : memref<1x32xf32, #tpu.memory_space<vmem>>, vector<1x32xf32>
      %32 = arith.mulf %31, %30 : vector<1x32xf32>
      %c0_23 = arith.constant 0 : index
      %c0_24 = arith.constant 0 : index
      %33 = vector.load %arg4[%c0_23, %c0_24] : memref<1x32xf32, #tpu.memory_space<vmem>>, vector<1x32xf32>
      tpu.vector_store %arg4[%c0_23, %c0_24], %32 {strides = array<i32>} : memref<1x32xf32, #tpu.memory_space<vmem>>, vector<1x32xf32>,
      %c0_25 = arith.constant 0 : index
      %c0_26 = arith.constant 0 : index
      %34 = vector.load %arg3[%c0_25, %c0_26] : memref<1x32xf32, #tpu.memory_space<vmem>>, vector<1x32xf32>
      %35 = arith.mulf %20, %32 : vector<1x32xf32>
      %36 = arith.subf %34, %35 : vector<1x32xf32>
      %c0_27 = arith.constant 0 : index
      %c0_28 = arith.constant 0 : index
      %37 = vector.load %arg5[%c0_27, %c0_28] : memref<1x32xf32, #tpu.memory_space<vmem>>, vector<1x32xf32>
      tpu.vector_store %arg5[%c0_27, %c0_28], %36 {strides = array<i32>} : memref<1x32xf32, #tpu.memory_space<vmem>>, vector<1x32xf32>,
    } else {
    }
    return
  }
  func.func @transform_0(%arg0: i32) -> (i32, i32) {
    %c0_i32 = arith.constant 0 : i32
    %c0_i32_0 = arith.constant 0 : i32
    return %arg0, %c0_i32 : i32, i32
  }
  func.func @transform_1(%arg0: i32) -> (i32, i32) {
    %c0_i32 = arith.constant 0 : i32
    %c0_i32_0 = arith.constant 0 : i32
    %c0_i32_1 = arith.constant 0 : i32
    return %c0_i32, %c0_i32_0 : i32, i32
  }
  func.func @transform_2(%arg0: i32) -> (i32, i32) {
    %c0_i32 = arith.constant 0 : i32
    %c0_i32_0 = arith.constant 0 : i32
    %c0_i32_1 = arith.constant 0 : i32
    return %c0_i32, %c0_i32_0 : i32, i32
  }
  func.func @transform_3(%arg0: i32) -> (i32, i32) {
    %c0_i32 = arith.constant 0 : i32
    %c0_i32_0 = arith.constant 0 : i32
    %c0_i32_1 = arith.constant 0 : i32
    return %c0_i32, %c0_i32_0 : i32, i32
  }
  func.func @transform_4(%arg0: i32) -> (i32, i32) {
    %c0_i32 = arith.constant 0 : i32
    %c0_i32_0 = arith.constant 0 : i32
    %c0_i32_1 = arith.constant 0 : i32
    return %c0_i32, %c0_i32_0 : i32, i32
  }
}

module attributes {stable_mosaic.version = 11 : i64} {
  func.func @_gap_kernel(%arg0: i32, %arg1: memref<2x16x32xf32, #tpu.memory_space<vmem>>, %arg2: memref<1x1x32xf32, #tpu.memory_space<vmem>>, %arg3: memref<1x1x32xf32, #tpu.memory_space<vmem>>, %arg4: memref<2x32xf32, #tpu.memory_space<vmem>>, %arg5: memref<2x32xf32, #tpu.memory_space<vmem>>) attributes {dimension_semantics = [#tpu.dimension_semantics<arbitrary>], iteration_bounds = array<i64: 1>, scalar_prefetch = 0 : i64, scratch_operands = 1 : i64, tpu.core_type = #tpu.core_type<tc>, window_params = [{transform_indices = @transform_0, window_bounds = array<i64: 2, 16, 32>}, {pipeline_mode = #tpu.pipeline_mode<synchronous>, transform_indices = @transform_1, window_bounds = array<i64: 1, 1, 32>}, {pipeline_mode = #tpu.pipeline_mode<synchronous>, transform_indices = @transform_2, window_bounds = array<i64: 1, 1, 32>}, {pipeline_mode = #tpu.pipeline_mode<synchronous>, transform_indices = @transform_3, window_bounds = array<i64: 2, 32>}]} {
    %c0_i32 = arith.constant 0 : i32
    %0 = arith.cmpi eq, %arg0, %c0_i32 : i32
    %1 = arith.extui %0 : i1 to i32
    %c0_i32_0 = arith.constant 0 : i32
    %2 = arith.cmpi ne, %1, %c0_i32_0 : i32
    scf.if %2 {
      %cst_16 = arith.constant 0.000000e+00 : f32
      %19 = vector.broadcast %cst_16 : f32 to vector<2x32xf32>
      %c0_17 = arith.constant 0 : index
      %c0_18 = arith.constant 0 : index
      %20 = vector.load %arg5[%c0_17, %c0_18] : memref<2x32xf32, #tpu.memory_space<vmem>>, vector<2x32xf32>
      tpu.vector_store %arg5[%c0_17, %c0_18], %19 {strides = array<i32>} : memref<2x32xf32, #tpu.memory_space<vmem>>, vector<2x32xf32>,
    } else {
    }
    %c0 = arith.constant 0 : index
    %c0_1 = arith.constant 0 : index
    %c0_2 = arith.constant 0 : index
    %3 = vector.load %arg1[%c0, %c0_1, %c0_2] : memref<2x16x32xf32, #tpu.memory_space<vmem>>, vector<2x16x32xf32>
    %c0_3 = arith.constant 0 : index
    %c0_4 = arith.constant 0 : index
    %c0_5 = arith.constant 0 : index
    %4 = vector.load %arg2[%c0_3, %c0_4, %c0_5] : memref<1x1x32xf32, #tpu.memory_space<vmem>>, vector<1x1x32xf32>
    %5 = vector.broadcast %4 : vector<1x1x32xf32> to vector<2x16x32xf32>
    %6 = arith.mulf %3, %5 : vector<2x16x32xf32>
    %c0_6 = arith.constant 0 : index
    %c0_7 = arith.constant 0 : index
    %c0_8 = arith.constant 0 : index
    %7 = vector.load %arg3[%c0_6, %c0_7, %c0_8] : memref<1x1x32xf32, #tpu.memory_space<vmem>>, vector<1x1x32xf32>
    %8 = vector.broadcast %7 : vector<1x1x32xf32> to vector<2x16x32xf32>
    %9 = arith.addf %6, %8 : vector<2x16x32xf32>
    %cst = arith.constant 0.000000e+00 : f32
    %10 = vector.broadcast %cst : f32 to vector<2x16x32xf32>
    %11 = arith.maximumf %9, %10 : vector<2x16x32xf32>
    %c0_9 = arith.constant 0 : index
    %c0_10 = arith.constant 0 : index
    %12 = vector.load %arg5[%c0_9, %c0_10] : memref<2x32xf32, #tpu.memory_space<vmem>>, vector<2x32xf32>
    %cst_11 = arith.constant dense<0.000000e+00> : vector<2x32xf32>
    %13 = vector.multi_reduction <add>, %11, %cst_11 [1] : vector<2x16x32xf32> to vector<2x32xf32>
    %14 = arith.addf %12, %13 : vector<2x32xf32>
    %c0_12 = arith.constant 0 : index
    %c0_13 = arith.constant 0 : index
    %15 = vector.load %arg5[%c0_12, %c0_13] : memref<2x32xf32, #tpu.memory_space<vmem>>, vector<2x32xf32>
    tpu.vector_store %arg5[%c0_12, %c0_13], %14 {strides = array<i32>} : memref<2x32xf32, #tpu.memory_space<vmem>>, vector<2x32xf32>,
    %c0_i32_14 = arith.constant 0 : i32
    %16 = arith.cmpi eq, %arg0, %c0_i32_14 : i32
    %17 = arith.extui %16 : i1 to i32
    %c0_i32_15 = arith.constant 0 : i32
    %18 = arith.cmpi ne, %17, %c0_i32_15 : i32
    scf.if %18 {
      %c0_16 = arith.constant 0 : index
      %c0_17 = arith.constant 0 : index
      %19 = vector.load %arg5[%c0_16, %c0_17] : memref<2x32xf32, #tpu.memory_space<vmem>>, vector<2x32xf32>
      %cst_18 = arith.constant 6.250000e-02 : f32
      %20 = vector.broadcast %cst_18 : f32 to vector<2x32xf32>
      %21 = arith.mulf %19, %20 : vector<2x32xf32>
      %c0_19 = arith.constant 0 : index
      %c0_20 = arith.constant 0 : index
      %22 = vector.load %arg4[%c0_19, %c0_20] : memref<2x32xf32, #tpu.memory_space<vmem>>, vector<2x32xf32>
      tpu.vector_store %arg4[%c0_19, %c0_20], %21 {strides = array<i32>} : memref<2x32xf32, #tpu.memory_space<vmem>>, vector<2x32xf32>,
    } else {
    }
    return
  }
  func.func @transform_0(%arg0: i32) -> (i32, i32, i32) {
    %c0_i32 = arith.constant 0 : i32
    %c0_i32_0 = arith.constant 0 : i32
    %c0_i32_1 = arith.constant 0 : i32
    return %c0_i32, %arg0, %c0_i32_0 : i32, i32, i32
  }
  func.func @transform_1(%arg0: i32) -> (i32, i32, i32) {
    %c0_i32 = arith.constant 0 : i32
    %c0_i32_0 = arith.constant 0 : i32
    %c0_i32_1 = arith.constant 0 : i32
    %c0_i32_2 = arith.constant 0 : i32
    return %c0_i32, %c0_i32_0, %c0_i32_1 : i32, i32, i32
  }
  func.func @transform_2(%arg0: i32) -> (i32, i32, i32) {
    %c0_i32 = arith.constant 0 : i32
    %c0_i32_0 = arith.constant 0 : i32
    %c0_i32_1 = arith.constant 0 : i32
    %c0_i32_2 = arith.constant 0 : i32
    return %c0_i32, %c0_i32_0, %c0_i32_1 : i32, i32, i32
  }
  func.func @transform_3(%arg0: i32) -> (i32, i32) {
    %c0_i32 = arith.constant 0 : i32
    %c0_i32_0 = arith.constant 0 : i32
    %c0_i32_1 = arith.constant 0 : i32
    return %c0_i32, %c0_i32_0 : i32, i32
  }
}

module attributes {stable_mosaic.version = 11 : i64} {
  func.func @_matmul_kernel(%arg0: i32, %arg1: i32, %arg2: i32, %arg3: memref<8x32xf32, #tpu.memory_space<vmem>>, %arg4: memref<32x10xbf16, #tpu.memory_space<vmem>>, %arg5: memref<1x10xf32, #tpu.memory_space<vmem>>, %arg6: memref<1x32xf32, #tpu.memory_space<vmem>>, %arg7: memref<1x32xf32, #tpu.memory_space<vmem>>, %arg8: memref<8x10xf32, #tpu.memory_space<vmem>>, %arg9: memref<8x10xf32, #tpu.memory_space<vmem>>) attributes {dimension_semantics = [#tpu.dimension_semantics<parallel>, #tpu.dimension_semantics<parallel>, #tpu.dimension_semantics<arbitrary>], iteration_bounds = array<i64: 1, 1, 1>, scalar_prefetch = 0 : i64, scratch_operands = 1 : i64, tpu.core_type = #tpu.core_type<tc>, window_params = [{transform_indices = @transform_0, window_bounds = array<i64: 8, 32>}, {transform_indices = @transform_1, window_bounds = array<i64: 32, 10>}, {transform_indices = @transform_2, window_bounds = array<i64: 1, 10>}, {transform_indices = @transform_3, window_bounds = array<i64: 1, 32>}, {transform_indices = @transform_4, window_bounds = array<i64: 1, 32>}, {transform_indices = @transform_5, window_bounds = array<i64: 8, 10>}]} {
    %c0_i32 = arith.constant 0 : i32
    %0 = arith.cmpi eq, %arg2, %c0_i32 : i32
    %1 = arith.extui %0 : i1 to i32
    %c0_i32_0 = arith.constant 0 : i32
    %2 = arith.cmpi ne, %1, %c0_i32_0 : i32
    scf.if %2 {
      %cst_10 = arith.constant 0.000000e+00 : f32
      %13 = vector.broadcast %cst_10 : f32 to vector<8x10xf32>
      %c0_11 = arith.constant 0 : index
      %c0_12 = arith.constant 0 : index
      %14 = vector.load %arg9[%c0_11, %c0_12] : memref<8x10xf32, #tpu.memory_space<vmem>>, vector<8x10xf32>
      tpu.vector_store %arg9[%c0_11, %c0_12], %13 {strides = array<i32>} : memref<8x10xf32, #tpu.memory_space<vmem>>, vector<8x10xf32>,
    } else {
    }
    %c0 = arith.constant 0 : index
    %c0_1 = arith.constant 0 : index
    %3 = vector.load %arg3[%c0, %c0_1] : memref<8x32xf32, #tpu.memory_space<vmem>>, vector<8x32xf32>
    %c0_2 = arith.constant 0 : index
    %c0_3 = arith.constant 0 : index
    %4 = vector.load %arg9[%c0_2, %c0_3] : memref<8x10xf32, #tpu.memory_space<vmem>>, vector<8x10xf32>
    %5 = arith.truncf %3 : vector<8x32xf32> to vector<8x32xbf16>
    %c0_4 = arith.constant 0 : index
    %c0_5 = arith.constant 0 : index
    %6 = vector.load %arg4[%c0_4, %c0_5] : memref<32x10xbf16, #tpu.memory_space<vmem>>, vector<32x10xbf16>
    %cst = arith.constant dense<0.000000e+00> : vector<8x10xf32>
    %7 = tpu.matmul %5, %6, %cst {dimension_numbers = #tpu.dot_dimension_numbers<[1], [0], [0], [1], [0, 0, 1, 1], [], []>} : vector<8x32xbf16>, vector<32x10xbf16>, vector<8x10xf32> -> vector<8x10xf32>
    %8 = arith.addf %4, %7 : vector<8x10xf32>
    %c0_6 = arith.constant 0 : index
    %c0_7 = arith.constant 0 : index
    %9 = vector.load %arg9[%c0_6, %c0_7] : memref<8x10xf32, #tpu.memory_space<vmem>>, vector<8x10xf32>
    tpu.vector_store %arg9[%c0_6, %c0_7], %8 {strides = array<i32>} : memref<8x10xf32, #tpu.memory_space<vmem>>, vector<8x10xf32>,
    %c0_i32_8 = arith.constant 0 : i32
    %10 = arith.cmpi eq, %arg2, %c0_i32_8 : i32
    %11 = arith.extui %10 : i1 to i32
    %c0_i32_9 = arith.constant 0 : i32
    %12 = arith.cmpi ne, %11, %c0_i32_9 : i32
    scf.if %12 {
      %c0_10 = arith.constant 0 : index
      %c0_11 = arith.constant 0 : index
      %13 = vector.load %arg9[%c0_10, %c0_11] : memref<8x10xf32, #tpu.memory_space<vmem>>, vector<8x10xf32>
      %c0_12 = arith.constant 0 : index
      %c0_13 = arith.constant 0 : index
      %14 = vector.load %arg5[%c0_12, %c0_13] : memref<1x10xf32, #tpu.memory_space<vmem>>, vector<1x10xf32>
      %15 = vector.broadcast %14 : vector<1x10xf32> to vector<8x10xf32>
      %16 = arith.addf %13, %15 : vector<8x10xf32>
      %c0_14 = arith.constant 0 : index
      %c0_15 = arith.constant 0 : index
      %17 = vector.load %arg8[%c0_14, %c0_15] : memref<8x10xf32, #tpu.memory_space<vmem>>, vector<8x10xf32>
      tpu.vector_store %arg8[%c0_14, %c0_15], %16 {strides = array<i32>} : memref<8x10xf32, #tpu.memory_space<vmem>>, vector<8x10xf32>,
    } else {
    }
    return
  }
  func.func @transform_0(%arg0: i32, %arg1: i32, %arg2: i32) -> (i32, i32) {
    %c0_i32 = arith.constant 0 : i32
    return %arg0, %arg2 : i32, i32
  }
  func.func @transform_1(%arg0: i32, %arg1: i32, %arg2: i32) -> (i32, i32) {
    %c0_i32 = arith.constant 0 : i32
    return %arg2, %arg1 : i32, i32
  }
  func.func @transform_2(%arg0: i32, %arg1: i32, %arg2: i32) -> (i32, i32) {
    %c0_i32 = arith.constant 0 : i32
    %c0_i32_0 = arith.constant 0 : i32
    return %c0_i32, %arg1 : i32, i32
  }
  func.func @transform_3(%arg0: i32, %arg1: i32, %arg2: i32) -> (i32, i32) {
    %c0_i32 = arith.constant 0 : i32
    %c0_i32_0 = arith.constant 0 : i32
    return %c0_i32, %arg2 : i32, i32
  }
  func.func @transform_4(%arg0: i32, %arg1: i32, %arg2: i32) -> (i32, i32) {
    %c0_i32 = arith.constant 0 : i32
    %c0_i32_0 = arith.constant 0 : i32
    return %c0_i32, %arg2 : i32, i32
  }
  func.func @transform_5(%arg0: i32, %arg1: i32, %arg2: i32) -> (i32, i32) {
    %c0_i32 = arith.constant 0 : i32
    return %arg0, %arg1 : i32, i32
  }
}

</mosaic_0001>

<bundles_post_ra>
// kernel: densenet_forward.35
= control target key start
LH: loop header
LB: loop body
LE: loop exit
PB: predicated region body
PF: predicated region fallthrough
CT: control target
= control target key end

     0   :  { %vm20_vm0 = vcmask 122880   ;;  %vm88_vm1 = vcmask 130048   ;;  %v464_v0 = vmov 0.0   ;;  %s828_s0 = inlined_call_operand.vmem [shape: f32[512,16], index: 0, kind: input, shape index: {}]   ;;  %s829_s1 = inlined_call_operand.vmem [shape: f32[1,16], index: 1, kind: input, shape index: {}]   ;;  %s830_s2 = inlined_call_operand.vmem [shape: f32[1,16], index: 2, kind: input, shape index: {}]   ;;  %s831_s3 = inlined_call_operand.vmem [shape: f32[1,16], index: 3, kind: output, shape index: {0}]   ;;  %s832_s4 = inlined_call_operand.vmem [shape: f32[1,16], index: 4, kind: output, shape index: {1}]  }
   0x1   :  { %21 = vst.msk [vmem:[#allocation2] sm:$0x1] %vm20_vm0, %v464_v0  ;;  %v23_v1 = vld [vmem:[%s828_s0] sm:$0xff]  ;;  %v24_v2 = vld [vmem:[%s828_s0 + $0x8] sm:$0xff]  ;;  %v25_v3 = vld [vmem:[%s828_s0 + $0x10] sm:$0xff] }
   0x2   :  { %22 = vst.msk [vmem:[#allocation3] sm:$0x1] %vm20_vm0, %v464_v0  ;;  %v26_v4 = vld [vmem:[%s828_s0 + $0x18] sm:$0xff]  ;;  %v89_v5 = vsel %vm88_vm1, %v23_v1, 0.0  ;;  %v90_v6 = vsel %vm88_vm1, %v24_v2, 0.0  ;;  %v92_v7 = vsel %vm88_vm1, %v25_v3, 0.0  ;;  %v226_v20 = vmul.f32 %v23_v1, %v23_v1 }
   0x3   :  { %v27_v8 = vld [vmem:[%s828_s0 + $0x20] sm:$0xff]  ;;  %v91_v9 = vadd.f32 %v90_v6, %v89_v5  ;;  %v94_v10 = vsel %vm88_vm1, %v26_v4, 0.0  ;;  %v28_v11 = vld [vmem:[%s828_s0 + $0x28] sm:$0xff]  ;;  %v29_v14 = vld [vmem:[%s828_s0 + $0x30] sm:$0xff]  ;;  %v227_v21 = vmul.f32 %v24_v2, %v24_v2  ;;  %v228_v24 = vmul.f32 %v25_v3, %v25_v3 }
   0x4   :  { %v96_v13 = vsel %vm88_vm1, %v27_v8, 0.0  ;;  %v98_v16 = vsel %vm88_vm1, %v28_v11, 0.0  ;;  %v30_v17 = vld [vmem:[%s828_s0 + $0x38] sm:$0xff]  ;;  %v100_v19 = vsel %vm88_vm1, %v29_v14, 0.0  ;;  %v31_v22 = vld [vmem:[%s828_s0 + $0x40] sm:$0xff]  ;;  %v229_v26 = vmul.f32 %v26_v4, %v26_v4  ;;  %v32_v27 = vld [vmem:[%s828_s0 + $0x48] sm:$0xff] }
   0x5   :  { %v93_v12 = vadd.f32 %v92_v7, %v91_v9  ;;  %v102_v25 = vsel %vm88_vm1, %v30_v17, 0.0  ;;  %v104_v29 = vsel %vm88_vm1, %v31_v22, 0.0  ;;  %v230_v30 = vmul.f32 %v27_v8, %v27_v8  ;;  %v33_v33 = vld [vmem:[%s828_s0 + $0x50] sm:$0xff]  ;;  %v34_v40 = vld [vmem:[%s828_s0 + $0x58] sm:$0xff]  ;;  %v35_v46 = vld [vmem:[%s828_s0 + $0x60] sm:$0xff] }
   0x6   :  { %v290_v31 = vsel %vm88_vm1, %v226_v20, 0.0  ;;  %v291_v32 = vsel %vm88_vm1, %v227_v21, 0.0  ;;  %v293_v36 = vsel %vm88_vm1, %v228_v24, 0.0  ;;  %v106_v37 = vsel %vm88_vm1, %v32_v27, 0.0  ;;  %v36_v52 = vld [vmem:[%s828_s0 + $0x68] sm:$0xff]  ;;  %v37_v58 = vld [vmem:[%s828_s0 + $0x70] sm:$0xff] }
   0x7   :  { %v95_v15 = vadd.f32 %v94_v10, %v93_v12  ;;  %v292_v35 = vadd.f32 %v291_v32, %v290_v31  ;;  %v231_v38 = vmul.f32 %v28_v11, %v28_v11  ;;  %v295_v39 = vsel %vm88_vm1, %v229_v26, 0.0  ;;  %v38_v0 = vld [vmem:[%s828_s0 + $0x78] sm:$0xff]  ;;  %v39_v6 = vld [vmem:[%s828_s0 + $0x80] sm:$0xff]  ;;  %v40_v12 = vld [vmem:[%s828_s0 + $0x88] sm:$0xff] }
   0x8   :  { %v108_v43 = vsel %vm88_vm1, %v33_v33, 0.0  ;;  %v232_v44 = vmul.f32 %v29_v14, %v29_v14  ;;  %v297_v45 = vsel %vm88_vm1, %v230_v30, 0.0  ;;  %v110_v49 = vsel %vm88_vm1, %v34_v40, 0.0  ;;  %v42_v24 = vld [vmem:[%s828_s0 + $0x98] sm:$0xff]  ;;  %v43_v30 = vld [vmem:[%s828_s0 + $0xa0] sm:$0xff] }
   0x9   :  { %v97_v18 = vadd.f32 %v96_v13, %v95_v15  ;;  %v294_v42 = vadd.f32 %v293_v36, %v292_v35  ;;  %v233_v50 = vmul.f32 %v30_v17, %v30_v17  ;;  %v299_v51 = vsel %vm88_vm1, %v231_v38, 0.0  ;;  %v44_v36 = vld [vmem:[%s828_s0 + $0xa8] sm:$0xff] }
   0xa   :  { %v112_v55 = vsel %vm88_vm1, %v35_v46, 0.0  ;;  %v234_v56 = vmul.f32 %v31_v22, %v31_v22  ;;  %v301_v57 = vsel %vm88_vm1, %v232_v44, 0.0  ;;  %v114_v61 = vsel %vm88_vm1, %v36_v52, 0.0 }
   0xb   :  { %v99_v23 = vadd.f32 %v98_v16, %v97_v18  ;;  %v296_v48 = vadd.f32 %v295_v39, %v294_v42  ;;  %v235_v62 = vmul.f32 %v32_v27, %v32_v27  ;;  %v303_v63 = vsel %vm88_vm1, %v233_v50, 0.0  ;;  %v41_v18 = vld [vmem:[%s828_s0 + $0x90] sm:$0xff] }
   0xc   :  { %v116_v3 = vsel %vm88_vm1, %v37_v58, 0.0  ;;  %v236_v4 = vmul.f32 %v33_v33, %v33_v33  ;;  %v305_v5 = vsel %vm88_vm1, %v234_v56, 0.0  ;;  %v118_v9 = vsel %vm88_vm1, %v38_v0, 0.0  ;;  %v45_v42 = vld [vmem:[%s828_s0 + $0xb0] sm:$0xff] }
   0xd   :  { %v101_v28 = vadd.f32 %v100_v19, %v99_v23  ;;  %v298_v54 = vadd.f32 %v297_v45, %v296_v48  ;;  %v237_v10 = vmul.f32 %v34_v40, %v34_v40  ;;  %v307_v11 = vsel %vm88_vm1, %v235_v62, 0.0  ;;  %v46_v48 = vld [vmem:[%s828_s0 + $0xb8] sm:$0xff] }
   0xe   :  { %v120_v15 = vsel %vm88_vm1, %v39_v6, 0.0  ;;  %v238_v16 = vmul.f32 %v35_v46, %v35_v46  ;;  %v309_v17 = vsel %vm88_vm1, %v236_v4, 0.0  ;;  %v122_v21 = vsel %vm88_vm1, %v40_v12, 0.0 }
   0xf   :  { %v103_v34 = vadd.f32 %v102_v25, %v101_v28  ;;  %v300_v60 = vadd.f32 %v299_v51, %v298_v54  ;;  %v239_v22 = vmul.f32 %v36_v52, %v36_v52  ;;  %v311_v23 = vsel %vm88_vm1, %v237_v10, 0.0  ;;  %v47_v54 = vld [vmem:[%s828_s0 + $0xc0] sm:$0xff] }
  0x10   :  { %v124_v27 = vsel %vm88_vm1, %v41_v18, 0.0  ;;  %v240_v28 = vmul.f32 %v37_v58, %v37_v58  ;;  %v126_v33 = vsel %vm88_vm1, %v42_v24, 0.0  ;;  %v128_v39 = vsel %vm88_vm1, %v43_v30, 0.0 }
  0x11   :  { %v105_v41 = vadd.f32 %v104_v29, %v103_v34  ;;  %v302_v2 = vadd.f32 %v301_v57, %v300_v60  ;;  %v313_v29 = vsel %vm88_vm1, %v238_v16, 0.0  ;;  %v241_v34 = vmul.f32 %v38_v0, %v38_v0  ;;  %v48_v60 = vld [vmem:[%s828_s0 + $0xc8] sm:$0xff] }
  0x12   :  { %v315_v35 = vsel %vm88_vm1, %v239_v22, 0.0  ;;  %v242_v40 = vmul.f32 %v39_v6, %v39_v6  ;;  %v130_v45 = vsel %vm88_vm1, %v44_v36, 0.0  ;;  %v243_v46 = vmul.f32 %v40_v12, %v40_v12 }
  0x13   :  { %v107_v47 = vadd.f32 %v106_v37, %v105_v41  ;;  %v304_v8 = vadd.f32 %v303_v63, %v302_v2  ;;  %v317_v41 = vsel %vm88_vm1, %v240_v28, 0.0  ;;  %v132_v51 = vsel %vm88_vm1, %v45_v42, 0.0  ;;  %v49_v2 = vld [vmem:[%s828_s0 + $0xd0] sm:$0xff] }
  0x14   :  { %v244_v52 = vmul.f32 %v41_v18, %v41_v18  ;;  %v134_v57 = vsel %vm88_vm1, %v46_v48, 0.0  ;;  %v245_v58 = vmul.f32 %v42_v24, %v42_v24  ;;  %v136_v63 = vsel %vm88_vm1, %v47_v54, 0.0 }
  0x15   :  { %v109_v53 = vadd.f32 %v108_v43, %v107_v47  ;;  %v306_v14 = vadd.f32 %v305_v5, %v304_v8  ;;  %v319_v47 = vsel %vm88_vm1, %v241_v34, 0.0  ;;  %v246_v0 = vmul.f32 %v43_v30, %v43_v30  ;;  %v50_v8 = vld [vmem:[%s828_s0 + $0xd8] sm:$0xff] }
  0x16   :  { %v138_v5 = vsel %vm88_vm1, %v48_v60, 0.0  ;;  %v247_v6 = vmul.f32 %v44_v36, %v44_v36  ;;  %v248_v12 = vmul.f32 %v45_v42, %v45_v42  ;;  %v249_v18 = vmul.f32 %v46_v48, %v46_v48 }
  0x17   :  { %v111_v59 = vadd.f32 %v110_v49, %v109_v53  ;;  %v308_v20 = vadd.f32 %v307_v11, %v306_v14  ;;  %v321_v53 = vsel %vm88_vm1, %v242_v40, 0.0  ;;  %v140_v11 = vsel %vm88_vm1, %v49_v2, 0.0  ;;  %v51_v14 = vld [vmem:[%s828_s0 + $0xe0] sm:$0xff] }
  0x18   :  { %v250_v24 = vmul.f32 %v47_v54, %v47_v54  ;;  %v251_v30 = vmul.f32 %v48_v60, %v48_v60  ;;  %v252_v36 = vmul.f32 %v49_v2, %v49_v2  ;;  %v253_v42 = vmul.f32 %v50_v8, %v50_v8 }
  0x19   :  { %v113_v1 = vadd.f32 %v112_v55, %v111_v59  ;;  %v310_v26 = vadd.f32 %v309_v17, %v308_v20  ;;  %v323_v59 = vsel %vm88_vm1, %v243_v46, 0.0  ;;  %v142_v17 = vsel %vm88_vm1, %v50_v8, 0.0  ;;  %v52_v20 = vld [vmem:[%s828_s0 + $0xe8] sm:$0xff] }
  0x1a   :  { %v254_v48 = vmul.f32 %v51_v14, %v51_v14  ;;  %v255_v54 = vmul.f32 %v52_v20, %v52_v20 }
  0x1b   :  { %v115_v7 = vadd.f32 %v114_v61, %v113_v1  ;;  %v312_v32 = vadd.f32 %v311_v23, %v310_v26  ;;  %v325_v1 = vsel %vm88_vm1, %v244_v52, 0.0  ;;  %v144_v23 = vsel %vm88_vm1, %v51_v14, 0.0  ;;  %v53_v26 = vld [vmem:[%s828_s0 + $0xf0] sm:$0xff] }
  0x1c   :  { %v256_v60 = vmul.f32 %v53_v26, %v53_v26 }
  0x1d   :  { %v117_v13 = vadd.f32 %v116_v3, %v115_v7  ;;  %v314_v38 = vadd.f32 %v313_v29, %v312_v32  ;;  %v327_v7 = vsel %vm88_vm1, %v245_v58, 0.0  ;;  %v146_v29 = vsel %vm88_vm1, %v52_v20, 0.0  ;;  %v54_v32 = vld [vmem:[%s828_s0 + $0xf8] sm:$0xff] }
  0x1e   :  { %v257_v2 = vmul.f32 %v54_v32, %v54_v32 }
  0x1f   :  { %v119_v19 = vadd.f32 %v118_v9, %v117_v13  ;;  %v316_v44 = vadd.f32 %v315_v35, %v314_v38  ;;  %v329_v13 = vsel %vm88_vm1, %v246_v0, 0.0  ;;  %v148_v35 = vsel %vm88_vm1, %v53_v26, 0.0  ;;  %v55_v38 = vld [vmem:[%s828_s0 + $0x100] sm:$0xff] }
  0x20   :  { %v258_v8 = vmul.f32 %v55_v38, %v55_v38 }
  0x21   :  { %v121_v25 = vadd.f32 %v120_v15, %v119_v19  ;;  %v318_v50 = vadd.f32 %v317_v41, %v316_v44  ;;  %v331_v19 = vsel %vm88_vm1, %v247_v6, 0.0  ;;  %v150_v41 = vsel %vm88_vm1, %v54_v32, 0.0  ;;  %v56_v44 = vld [vmem:[%s828_s0 + $0x108] sm:$0xff] }
  0x22   :  { %v259_v14 = vmul.f32 %v56_v44, %v56_v44 }
  0x23   :  { %v123_v31 = vadd.f32 %v122_v21, %v121_v25  ;;  %v320_v56 = vadd.f32 %v319_v47, %v318_v50  ;;  %v333_v25 = vsel %vm88_vm1, %v248_v12, 0.0  ;;  %v152_v47 = vsel %vm88_vm1, %v55_v38, 0.0  ;;  %v57_v50 = vld [vmem:[%s828_s0 + $0x110] sm:$0xff] }
  0x24   :  { %v260_v20 = vmul.f32 %v57_v50, %v57_v50 }
  0x25   :  { %v125_v37 = vadd.f32 %v124_v27, %v123_v31  ;;  %v322_v62 = vadd.f32 %v321_v53, %v320_v56  ;;  %v335_v31 = vsel %vm88_vm1, %v249_v18, 0.0  ;;  %v154_v53 = vsel %vm88_vm1, %v56_v44, 0.0  ;;  %v58_v56 = vld [vmem:[%s828_s0 + $0x118] sm:$0xff] }
  0x26   :  { %v261_v26 = vmul.f32 %v58_v56, %v58_v56 }
  0x27   :  { %v127_v43 = vadd.f32 %v126_v33, %v125_v37  ;;  %v324_v4 = vadd.f32 %v323_v59, %v322_v62  ;;  %v337_v37 = vsel %vm88_vm1, %v250_v24, 0.0  ;;  %v156_v59 = vsel %vm88_vm1, %v57_v50, 0.0  ;;  %v59_v62 = vld [vmem:[%s828_s0 + $0x120] sm:$0xff] }
  0x28   :  { %v262_v32 = vmul.f32 %v59_v62, %v59_v62 }
  0x29   :  { %v129_v49 = vadd.f32 %v128_v39, %v127_v43  ;;  %v326_v10 = vadd.f32 %v325_v1, %v324_v4  ;;  %v339_v43 = vsel %vm88_vm1, %v251_v30, 0.0  ;;  %v158_v1 = vsel %vm88_vm1, %v58_v56, 0.0  ;;  %v60_v4 = vld [vmem:[%s828_s0 + $0x128] sm:$0xff] }
  0x2a   :  { %v263_v38 = vmul.f32 %v60_v4, %v60_v4 }
  0x2b   :  { %v131_v55 = vadd.f32 %v130_v45, %v129_v49  ;;  %v328_v16 = vadd.f32 %v327_v7, %v326_v10  ;;  %v341_v49 = vsel %vm88_vm1, %v252_v36, 0.0  ;;  %v160_v7 = vsel %vm88_vm1, %v59_v62, 0.0  ;;  %v61_v10 = vld [vmem:[%s828_s0 + $0x130] sm:$0xff] }
  0x2c   :  { %v264_v44 = vmul.f32 %v61_v10, %v61_v10 }
  0x2d   :  { %v133_v61 = vadd.f32 %v132_v51, %v131_v55  ;;  %v330_v22 = vadd.f32 %v329_v13, %v328_v16  ;;  %v343_v55 = vsel %vm88_vm1, %v253_v42, 0.0  ;;  %v162_v13 = vsel %vm88_vm1, %v60_v4, 0.0  ;;  %v62_v16 = vld [vmem:[%s828_s0 + $0x138] sm:$0xff] }
  0x2e   :  { %v265_v50 = vmul.f32 %v62_v16, %v62_v16 }
  0x2f   :  { %v135_v3 = vadd.f32 %v134_v57, %v133_v61  ;;  %v332_v28 = vadd.f32 %v331_v19, %v330_v22  ;;  %v345_v61 = vsel %vm88_vm1, %v254_v48, 0.0  ;;  %v164_v19 = vsel %vm88_vm1, %v61_v10, 0.0  ;;  %v63_v22 = vld [vmem:[%s828_s0 + $0x140] sm:$0xff] }
  0x30   :  { %v266_v56 = vmul.f32 %v63_v22, %v63_v22 }
  0x31   :  { %v137_v9 = vadd.f32 %v136_v63, %v135_v3  ;;  %v334_v34 = vadd.f32 %v333_v25, %v332_v28  ;;  %v347_v3 = vsel %vm88_vm1, %v255_v54, 0.0  ;;  %v166_v25 = vsel %vm88_vm1, %v62_v16, 0.0  ;;  %v64_v28 = vld [vmem:[%s828_s0 + $0x148] sm:$0xff] }
  0x32   :  { %v267_v62 = vmul.f32 %v64_v28, %v64_v28 }
  0x33   :  { %v139_v15 = vadd.f32 %v138_v5, %v137_v9  ;;  %v336_v40 = vadd.f32 %v335_v31, %v334_v34  ;;  %v349_v9 = vsel %vm88_vm1, %v256_v60, 0.0  ;;  %v168_v31 = vsel %vm88_vm1, %v63_v22, 0.0  ;;  %v65_v34 = vld [vmem:[%s828_s0 + $0x150] sm:$0xff] }
  0x34   :  { %v268_v4 = vmul.f32 %v65_v34, %v65_v34 }
  0x35   :  { %v141_v21 = vadd.f32 %v140_v11, %v139_v15  ;;  %v338_v46 = vadd.f32 %v337_v37, %v336_v40  ;;  %v351_v15 = vsel %vm88_vm1, %v257_v2, 0.0  ;;  %v170_v37 = vsel %vm88_vm1, %v64_v28, 0.0  ;;  %v66_v40 = vld [vmem:[%s828_s0 + $0x158] sm:$0xff] }
  0x36   :  { %v269_v10 = vmul.f32 %v66_v40, %v66_v40 }
  0x37   :  { %v143_v27 = vadd.f32 %v142_v17, %v141_v21  ;;  %v340_v52 = vadd.f32 %v339_v43, %v338_v46  ;;  %v353_v21 = vsel %vm88_vm1, %v258_v8, 0.0  ;;  %v172_v43 = vsel %vm88_vm1, %v65_v34, 0.0  ;;  %v67_v46 = vld [vmem:[%s828_s0 + $0x160] sm:$0xff] }
  0x38   :  { %v270_v16 = vmul.f32 %v67_v46, %v67_v46 }
  0x39   :  { %v145_v33 = vadd.f32 %v144_v23, %v143_v27  ;;  %v342_v58 = vadd.f32 %v341_v49, %v340_v52  ;;  %v355_v27 = vsel %vm88_vm1, %v259_v14, 0.0  ;;  %v174_v49 = vsel %vm88_vm1, %v66_v40, 0.0  ;;  %v68_v52 = vld [vmem:[%s828_s0 + $0x168] sm:$0xff] }
  0x3a   :  { %v271_v22 = vmul.f32 %v68_v52, %v68_v52 }
  0x3b   :  { %v147_v39 = vadd.f32 %v146_v29, %v145_v33  ;;  %v344_v0 = vadd.f32 %v343_v55, %v342_v58  ;;  %v357_v33 = vsel %vm88_vm1, %v260_v20, 0.0  ;;  %v176_v55 = vsel %vm88_vm1, %v67_v46, 0.0  ;;  %v69_v58 = vld [vmem:[%s828_s0 + $0x170] sm:$0xff] }
  0x3c   :  { %v272_v28 = vmul.f32 %v69_v58, %v69_v58 }
  0x3d   :  { %v149_v45 = vadd.f32 %v148_v35, %v147_v39  ;;  %v346_v6 = vadd.f32 %v345_v61, %v344_v0  ;;  %v359_v39 = vsel %vm88_vm1, %v261_v26, 0.0  ;;  %v178_v61 = vsel %vm88_vm1, %v68_v52, 0.0  ;;  %v70_v0 = vld [vmem:[%s828_s0 + $0x178] sm:$0xff] }
  0x3e   :  { %v273_v34 = vmul.f32 %v70_v0, %v70_v0 }
  0x3f   :  { %v151_v51 = vadd.f32 %v150_v41, %v149_v45  ;;  %v348_v12 = vadd.f32 %v347_v3, %v346_v6  ;;  %v361_v45 = vsel %vm88_vm1, %v262_v32, 0.0  ;;  %v180_v3 = vsel %vm88_vm1, %v69_v58, 0.0  ;;  %v71_v6 = vld [vmem:[%s828_s0 + $0x180] sm:$0xff] }
  0x40   :  { %v274_v40 = vmul.f32 %v71_v6, %v71_v6 }
  0x41   :  { %v153_v57 = vadd.f32 %v152_v47, %v151_v51  ;;  %v350_v18 = vadd.f32 %v349_v9, %v348_v12  ;;  %v363_v51 = vsel %vm88_vm1, %v263_v38, 0.0  ;;  %v182_v9 = vsel %vm88_vm1, %v70_v0, 0.0  ;;  %v72_v12 = vld [vmem:[%s828_s0 + $0x188] sm:$0xff] }
  0x42   :  { %v275_v46 = vmul.f32 %v72_v12, %v72_v12 }
  0x43   :  { %v155_v63 = vadd.f32 %v154_v53, %v153_v57  ;;  %v352_v24 = vadd.f32 %v351_v15, %v350_v18  ;;  %v365_v57 = vsel %vm88_vm1, %v264_v44, 0.0  ;;  %v184_v15 = vsel %vm88_vm1, %v71_v6, 0.0  ;;  %v73_v18 = vld [vmem:[%s828_s0 + $0x190] sm:$0xff] }
  0x44   :  { %v276_v52 = vmul.f32 %v73_v18, %v73_v18 }
  0x45   :  { %v157_v5 = vadd.f32 %v156_v59, %v155_v63  ;;  %v354_v30 = vadd.f32 %v353_v21, %v352_v24  ;;  %v367_v63 = vsel %vm88_vm1, %v265_v50, 0.0  ;;  %v186_v21 = vsel %vm88_vm1, %v72_v12, 0.0  ;;  %v74_v24 = vld [vmem:[%s828_s0 + $0x198] sm:$0xff] }
  0x46   :  { %v277_v58 = vmul.f32 %v74_v24, %v74_v24 }
  0x47   :  { %v159_v11 = vadd.f32 %v158_v1, %v157_v5  ;;  %v356_v36 = vadd.f32 %v355_v27, %v354_v30  ;;  %v369_v5 = vsel %vm88_vm1, %v266_v56, 0.0  ;;  %v188_v27 = vsel %vm88_vm1, %v73_v18, 0.0  ;;  %v75_v30 = vld [vmem:[%s828_s0 + $0x1a0] sm:$0xff] }
  0x48   :  { %v278_v0 = vmul.f32 %v75_v30, %v75_v30 }
  0x49   :  { %v161_v17 = vadd.f32 %v160_v7, %v159_v11  ;;  %v358_v42 = vadd.f32 %v357_v33, %v356_v36  ;;  %v371_v11 = vsel %vm88_vm1, %v267_v62, 0.0  ;;  %v190_v33 = vsel %vm88_vm1, %v74_v24, 0.0  ;;  %v76_v36 = vld [vmem:[%s828_s0 + $0x1a8] sm:$0xff] }
  0x4a   :  { %v279_v6 = vmul.f32 %v76_v36, %v76_v36 }
  0x4b   :  { %v163_v23 = vadd.f32 %v162_v13, %v161_v17  ;;  %v360_v48 = vadd.f32 %v359_v39, %v358_v42  ;;  %v373_v17 = vsel %vm88_vm1, %v268_v4, 0.0  ;;  %v192_v39 = vsel %vm88_vm1, %v75_v30, 0.0  ;;  %v77_v42 = vld [vmem:[%s828_s0 + $0x1b0] sm:$0xff] }
  0x4c   :  { %v280_v12 = vmul.f32 %v77_v42, %v77_v42 }
  0x4d   :  { %v165_v29 = vadd.f32 %v164_v19, %v163_v23  ;;  %v362_v54 = vadd.f32 %v361_v45, %v360_v48  ;;  %v375_v23 = vsel %vm88_vm1, %v269_v10, 0.0  ;;  %v194_v45 = vsel %vm88_vm1, %v76_v36, 0.0  ;;  %v78_v48 = vld [vmem:[%s828_s0 + $0x1b8] sm:$0xff] }
  0x4e   :  { %v281_v18 = vmul.f32 %v78_v48, %v78_v48 }
  0x4f   :  { %v167_v35 = vadd.f32 %v166_v25, %v165_v29  ;;  %v364_v60 = vadd.f32 %v363_v51, %v362_v54  ;;  %v377_v29 = vsel %vm88_vm1, %v270_v16, 0.0  ;;  %v196_v51 = vsel %vm88_vm1, %v77_v42, 0.0  ;;  %v79_v54 = vld [vmem:[%s828_s0 + $0x1c0] sm:$0xff] }
  0x50   :  { %v282_v24 = vmul.f32 %v79_v54, %v79_v54 }
  0x51   :  { %v169_v41 = vadd.f32 %v168_v31, %v167_v35  ;;  %v366_v2 = vadd.f32 %v365_v57, %v364_v60  ;;  %v379_v35 = vsel %vm88_vm1, %v271_v22, 0.0  ;;  %v198_v57 = vsel %vm88_vm1, %v78_v48, 0.0  ;;  %v80_v60 = vld [vmem:[%s828_s0 + $0x1c8] sm:$0xff] }
  0x52   :  { %v283_v30 = vmul.f32 %v80_v60, %v80_v60 }
  0x53   :  { %v171_v47 = vadd.f32 %v170_v37, %v169_v41  ;;  %v368_v8 = vadd.f32 %v367_v63, %v366_v2  ;;  %v381_v41 = vsel %vm88_vm1, %v272_v28, 0.0  ;;  %v200_v63 = vsel %vm88_vm1, %v79_v54, 0.0  ;;  %v81_v2 = vld [vmem:[%s828_s0 + $0x1d0] sm:$0xff] }
  0x54   :  { %v284_v36 = vmul.f32 %v81_v2, %v81_v2  ;;  %v403_v42 = vsel %vm88_vm1, %v283_v30, 0.0 }
  0x55   :  { %v173_v53 = vadd.f32 %v172_v43, %v171_v47  ;;  %v370_v14 = vadd.f32 %v369_v5, %v368_v8  ;;  %v383_v47 = vsel %vm88_vm1, %v273_v34, 0.0  ;;  %v202_v5 = vsel %vm88_vm1, %v80_v60, 0.0  ;;  %v82_v8 = vld [vmem:[%s828_s0 + $0x1d8] sm:$0xff] }
  0x57   :  { %v175_v59 = vadd.f32 %v174_v49, %v173_v53  ;;  %v372_v20 = vadd.f32 %v371_v11, %v370_v14  ;;  %v385_v53 = vsel %vm88_vm1, %v274_v40, 0.0  ;;  %v204_v11 = vsel %vm88_vm1, %v81_v2, 0.0  ;;  %v83_v14 = vld [vmem:[%s828_s0 + $0x1e0] sm:$0xff] }
  0x59   :  { %v177_v1 = vadd.f32 %v176_v55, %v175_v59  ;;  %v374_v26 = vadd.f32 %v373_v17, %v372_v20  ;;  %v387_v59 = vsel %vm88_vm1, %v275_v46, 0.0  ;;  %v206_v17 = vsel %vm88_vm1, %v82_v8, 0.0  ;;  %v84_v20 = vld [vmem:[%s828_s0 + $0x1e8] sm:$0xff] }
  0x5a   :  { %v405_v46 = vsel %vm88_vm1, %v284_v36, 0.0 }
  0x5b   :  { %v179_v7 = vadd.f32 %v178_v61, %v177_v1  ;;  %v376_v32 = vadd.f32 %v375_v23, %v374_v26  ;;  %v389_v1 = vsel %vm88_vm1, %v276_v52, 0.0  ;;  %v208_v23 = vsel %vm88_vm1, %v83_v14, 0.0  ;;  %v85_v26 = vld [vmem:[%s828_s0 + $0x1f0] sm:$0xff] }
  0x5d   :  { %v181_v13 = vadd.f32 %v180_v3, %v179_v7  ;;  %v378_v38 = vadd.f32 %v377_v29, %v376_v32  ;;  %v391_v7 = vsel %vm88_vm1, %v277_v58, 0.0  ;;  %v210_v29 = vsel %vm88_vm1, %v84_v20, 0.0  ;;  %v86_v32 = vld [vmem:[%s828_s0 + $0x1f8] sm:$0xff] }
  0x5e   :  { %v214_v40 = vsel %vm88_vm1, %v86_v32, 0.0 }
  0x5f   :  { %v183_v19 = vadd.f32 %v182_v9, %v181_v13  ;;  %v380_v44 = vadd.f32 %v379_v35, %v378_v38  ;;  %v393_v13 = vsel %vm88_vm1, %v278_v0, 0.0  ;;  %v212_v35 = vsel %vm88_vm1, %v85_v26, 0.0 }
  0x61   :  { %v185_v25 = vadd.f32 %v184_v15, %v183_v19  ;;  %v382_v50 = vadd.f32 %v381_v41, %v380_v44  ;;  %v395_v19 = vsel %vm88_vm1, %v279_v6, 0.0  ;;  %v285_v41 = vmul.f32 %v82_v8, %v82_v8 }
  0x63   :  { %v187_v31 = vadd.f32 %v186_v21, %v185_v25  ;;  %v384_v56 = vadd.f32 %v383_v47, %v382_v50  ;;  %v397_v25 = vsel %vm88_vm1, %v280_v12, 0.0  ;;  %v407_v50 = vsel %vm88_vm1, %v285_v41, 0.0  ;;  %v225_v12 = vld [vmem:[#allocation3] sm:$0x1] }
  0x65   :  { %v189_v37 = vadd.f32 %v188_v27, %v187_v31  ;;  %v386_v62 = vadd.f32 %v385_v53, %v384_v56  ;;  %v399_v31 = vsel %vm88_vm1, %v281_v18, 0.0  ;;  %v288_v53 = vmul.f32 %v85_v26, %v85_v26 }
  0x67   :  { %v191_v43 = vadd.f32 %v190_v33, %v189_v37  ;;  %v388_v4 = vadd.f32 %v387_v59, %v386_v62  ;;  %v401_v37 = vsel %vm88_vm1, %v282_v24, 0.0 }
  0x69   :  { %v193_v49 = vadd.f32 %v192_v39, %v191_v43  ;;  %v390_v10 = vadd.f32 %v389_v1, %v388_v4 }
  0x6b   :  { %v195_v55 = vadd.f32 %v194_v45, %v193_v49  ;;  %v392_v16 = vadd.f32 %v391_v7, %v390_v10  ;;  %v286_v45 = vmul.f32 %v83_v14, %v83_v14  ;;  %v287_v49 = vmul.f32 %v84_v20, %v84_v20 }
  0x6d   :  { %v197_v61 = vadd.f32 %v196_v51, %v195_v55  ;;  %v394_v22 = vadd.f32 %v393_v13, %v392_v16  ;;  %v409_v54 = vsel %vm88_vm1, %v286_v45, 0.0  ;;  %v411_v58 = vsel %vm88_vm1, %v287_v49, 0.0 }
  0x6f   :  { %v199_v3 = vadd.f32 %v198_v57, %v197_v61  ;;  %v396_v28 = vadd.f32 %v395_v19, %v394_v22  ;;  %v289_v57 = vmul.f32 %v86_v32, %v86_v32  ;;  %v413_v61 = vsel %vm88_vm1, %v288_v53, 0.0  ;;  %v449_v32 = vld [vmem:[%s830_s2] sm:$0x1] }
  0x71   :  { %v201_v9 = vadd.f32 %v200_v63, %v199_v3  ;;  %v398_v34 = vadd.f32 %v397_v25, %v396_v28  ;;  %v415_v0 = vsel %vm88_vm1, %v289_v57, 0.0  ;;  %v87_v3 = vld [vmem:[#allocation2] sm:$0x1] }
  0x73   :  { %v203_v15 = vadd.f32 %v202_v5, %v201_v9  ;;  %v400_v39 = vadd.f32 %v399_v31, %v398_v34 }
  0x75   :  { %v205_v21 = vadd.f32 %v204_v11, %v203_v15  ;;  %v402_v44 = vadd.f32 %v401_v37, %v400_v39 }
  0x77   :  { %v207_v27 = vadd.f32 %v206_v17, %v205_v21  ;;  %v404_v48 = vadd.f32 %v403_v42, %v402_v44 }
  0x79   :  { %v209_v33 = vadd.f32 %v208_v23, %v207_v27  ;;  %v406_v52 = vadd.f32 %v405_v46, %v404_v48 }
  0x7b   :  { %v211_v38 = vadd.f32 %v210_v29, %v209_v33  ;;  %v408_v56 = vadd.f32 %v407_v50, %v406_v52  ;;  %v446_v29 = vld [vmem:[%s829_s1] sm:$0x1] }
  0x7d   :  { %v213_v43 = vadd.f32 %v212_v35, %v211_v38  ;;  %v410_v60 = vadd.f32 %v409_v54, %v408_v56 }
  0x7f   :  { %v215_v47 = vadd.f32 %v214_v40, %v213_v43  ;;  %v412_v63 = vadd.f32 %v411_v58, %v410_v60 }
  0x81   :  { %v216_v51 = vrot.slane %v215_v47, 4  ;;  %v414_v2 = vadd.f32 %v413_v61, %v412_v63 }
  0x83   :  { %v217_v55 = vadd.f32 %v216_v51, %v215_v47  ;;  %v416_v5 = vadd.f32 %v415_v0, %v414_v2 }
  0x85   :  { %v218_v59 = vrot.slane %v217_v55, 2  ;;  %v417_v7 = vrot.slane %v416_v5, 4 }
  0x87   :  { %v219_v62 = vadd.f32 %v218_v59, %v217_v55  ;;  %v418_v8 = vadd.f32 %v417_v7, %v416_v5 }
  0x89   :  { %v220_v1 = vrot.slane %v219_v62, 1  ;;  %v419_v9 = vrot.slane %v418_v8, 2 }
  0x8b   :  { %v221_v4 = vadd.f32 %v220_v1, %v219_v62  ;;  %v420_v10 = vadd.f32 %v419_v9, %v418_v8 }
  0x8d   :  { %v222_v6 = vadd.f32 %v221_v4, %v87_v3  ;;  %v421_v11 = vrot.slane %v420_v10, 1 }
  0x8f   :  { %224 = vst.msk [vmem:[#allocation2] sm:$0x1] %vm20_vm0, %v222_v6  ;;  %v422_v13 = vadd.f32 %v421_v11, %v420_v10 }
  0x91   :  { %v423_v14 = vadd.f32 %v422_v13, %v225_v12 }
  0x93   :  { %424 = vst.msk [vmem:[#allocation3] sm:$0x1] %vm20_vm0, %v423_v14 }
  0x96   :  { %v428_v15 = vld [vmem:[#allocation2] sm:$0x1] }
  0x97   :  { %v429_v16 = vmul.f32 0.001953125, %v428_v15 }
  0x99   :  { %v432_v17 = vmul.f32 %v429_v16, %v429_v16 }
  0x9a   :  { %v430_v18 = vld [vmem:[#allocation3] sm:$0x1] }
  0x9b   :  { %v431_v19 = vmul.f32 0.001953125, %v430_v18 }
  0x9d   :  { %v433_v20 = vsub.f32 %v431_v19, %v432_v17 }
  0x9f   :  { %v434_v21 = vmax.f32 %v433_v20, 0.0 }
  0xa1   :  { %v435_v22 = vadd.f32 1e-05, %v434_v21 }
  0xa3   :  { %462 = vrsqrt.f32 %v435_v22  ;;  %vm442_vm3 = vweird.f32 %v435_v22 }
  0xa9   :  { %v463_v23 = vpop.eup %462 }
  0xaa   :  { %v437_v24 = vmul.f32 %v463_v23, %v435_v22  ;;  %vm443_vm2 = vweird.f32 %v463_v23 }
  0xab   :  { %vm444_vm4 = vmor %vm442_vm3, %vm443_vm2 }
  0xac   :  { %v438_v25 = vmul.f32 %v463_v23, %v437_v24 }
  0xae   :  { %v439_v26 = vmul.f32 0.5, %v438_v25 }
  0xb0   :  { %v440_v27 = vsub.f32 1.5, %v439_v26 }
  0xb2   :  { %v441_v28 = vmul.f32 %v463_v23, %v440_v27 }
  0xb4   :  { %v445_v30 = vsel %vm444_vm4, %v463_v23, %v441_v28 }
  0xb5   :  { %v447_v31 = vmul.f32 %v446_v29, %v445_v30 }
  0xb7   :  { %448 = vst.msk [vmem:[%s831_s3] sm:$0x1] %vm20_vm0, %v447_v31  ;;  %v450_v33 = vmul.f32 %v447_v31, %v429_v16 }
  0xb9   :  { %v451_v34 = vsub.f32 %v449_v32, %v450_v33 }
  0xbb   :  { %452 = vst.msk [vmem:[%s832_s4] sm:$0x1] %vm20_vm0, %v451_v34 }

// kernel: densenet_forward.36
= control target key start
LH: loop header
LB: loop body
LE: loop exit
PB: predicated region body
PF: predicated region fallthrough
CT: control target
= control target key end

     0   :  { %vm278_vm0 = vcmask 130048   ;;  %s958_s0 = inlined_call_operand.vmem [shape: f32[512,16], index: 0, kind: input, shape index: {}]   ;;  %s959_s1 = inlined_call_operand.vmem [shape: f32[1,16], index: 1, kind: input, shape index: {}]   ;;  %s960_s2 = inlined_call_operand.vmem [shape: f32[1,16], index: 2, kind: input, shape index: {}]   ;;  %s961_s3 = inlined_call_operand.vmem [shape: f32[512,16], index: 3, kind: output, shape index: {}]  }
   0x1   :  { %v14_v0 = vld [vmem:[%s958_s0] sm:$0xff]  ;;  %v15_v3 = vld [vmem:[%s958_s0 + $0x8] sm:$0xff]  ;;  %v16_v6 = vld [vmem:[%s958_s0 + $0x10] sm:$0xff] }
   0x2   :  { %v375_v1 = vld [vmem:[%s959_s1] ss:$0 sm:$0xff]  ;;  %v17_v7 = vld [vmem:[%s958_s0 + $0x18] sm:$0xff]  ;;  %v19_v12 = vld [vmem:[%s958_s0 + $0x28] sm:$0xff] }
   0x3   :  { %v380_v2 = vld [vmem:[%s960_s2] ss:$0 sm:$0xff]  ;;  %v82_v4 = vmul.f32 %v375_v1, %v14_v0  ;;  %v83_v5 = vmul.f32 %v375_v1, %v15_v3  ;;  %v84_v9 = vmul.f32 %v375_v1, %v16_v6  ;;  %v85_v10 = vmul.f32 %v375_v1, %v17_v7  ;;  %v20_v13 = vld [vmem:[%s958_s0 + $0x30] sm:$0xff]  ;;  %v21_v14 = vld [vmem:[%s958_s0 + $0x38] sm:$0xff] }
   0x4   :  { %v18_v8 = vld [vmem:[%s958_s0 + $0x20] sm:$0xff]  ;;  %v87_v17 = vmul.f32 %v375_v1, %v19_v12  ;;  %v88_v18 = vmul.f32 %v375_v1, %v20_v13  ;;  %v89_v22 = vmul.f32 %v375_v1, %v21_v14  ;;  %v23_v24 = vld [vmem:[%s958_s0 + $0x48] sm:$0xff]  ;;  %v24_v29 = vld [vmem:[%s958_s0 + $0x50] sm:$0xff] }
   0x5   :  { %v86_v11 = vmul.f32 %v375_v1, %v18_v8  ;;  %v150_v15 = vadd.f32 %v380_v2, %v82_v4  ;;  %v151_v16 = vadd.f32 %v380_v2, %v83_v5  ;;  %v152_v19 = vadd.f32 %v380_v2, %v84_v9  ;;  %v22_v23 = vld [vmem:[%s958_s0 + $0x40] sm:$0xff]  ;;  %v25_v30 = vld [vmem:[%s958_s0 + $0x58] sm:$0xff]  ;;  %v27_v35 = vld [vmem:[%s958_s0 + $0x68] sm:$0xff] }
   0x6   :  { %v153_v20 = vadd.f32 %v380_v2, %v85_v10  ;;  %v155_v27 = vadd.f32 %v380_v2, %v87_v17  ;;  %v156_v28 = vadd.f32 %v380_v2, %v88_v18  ;;  %v26_v31 = vld [vmem:[%s958_s0 + $0x60] sm:$0xff]  ;;  %v157_v34 = vadd.f32 %v380_v2, %v89_v22  ;;  %v28_v36 = vld [vmem:[%s958_s0 + $0x70] sm:$0xff]  ;;  %v29_v41 = vld [vmem:[%s958_s0 + $0x78] sm:$0xff] }
   0x7   :  { %v154_v21 = vadd.f32 %v380_v2, %v86_v11  ;;  %v214_v25 = vmax.f32 %v150_v15, 0.0  ;;  %v215_v26 = vmax.f32 %v151_v16, 0.0  ;;  %v216_v32 = vmax.f32 %v152_v19, 0.0  ;;  %v30_v54 = vld [vmem:[%s958_s0 + $0x80] sm:$0xff]  ;;  %v31_v55 = vld [vmem:[%s958_s0 + $0x88] sm:$0xff]  ;;  %v32_v58 = vld [vmem:[%s958_s0 + $0x90] sm:$0xff] }
   0x8   :  { %v217_v33 = vmax.f32 %v153_v20, 0.0  ;;  %v219_v38 = vmax.f32 %v155_v27, 0.0  ;;  %v90_v39 = vmul.f32 %v375_v1, %v22_v23  ;;  %v91_v40 = vmul.f32 %v375_v1, %v23_v24  ;;  %v33_v59 = vld [vmem:[%s958_s0 + $0x98] sm:$0xff]  ;;  %v34_v62 = vld [vmem:[%s958_s0 + $0xa0] sm:$0xff]  ;;  %v35_v5 = vld [vmem:[%s958_s0 + $0xa8] sm:$0xff] }
   0x9   :  { %279 = vst.msk [vmem:[%s961_s3] sm:$0xff] %vm278_vm0, %v214_v25  ;;  %v218_v37 = vmax.f32 %v154_v21, 0.0  ;;  %v220_v42 = vmax.f32 %v156_v28, 0.0  ;;  %v92_v43 = vmul.f32 %v375_v1, %v24_v29  ;;  %v93_v44 = vmul.f32 %v375_v1, %v25_v30  ;;  %v36_v10 = vld [vmem:[%s958_s0 + $0xb0] sm:$0xff]  ;;  %v37_v14 = vld [vmem:[%s958_s0 + $0xb8] sm:$0xff]  ;;  %v38_v18 = vld [vmem:[%s958_s0 + $0xc0] sm:$0xff] }
   0xa   :  { %280 = vst.msk [vmem:[%s961_s3 + $0x8] sm:$0xff] %vm278_vm0, %v215_v26  ;;  %v94_v45 = vmul.f32 %v375_v1, %v26_v31  ;;  %v158_v46 = vadd.f32 %v380_v2, %v90_v39  ;;  %v159_v47 = vadd.f32 %v380_v2, %v91_v40  ;;  %v95_v48 = vmul.f32 %v375_v1, %v27_v35  ;;  %v39_v22 = vld [vmem:[%s958_s0 + $0xc8] sm:$0xff]  ;;  %v40_v26 = vld [vmem:[%s958_s0 + $0xd0] sm:$0xff]  ;;  %v41_v30 = vld [vmem:[%s958_s0 + $0xd8] sm:$0xff] }
   0xb   :  { %281 = vst.msk [vmem:[%s961_s3 + $0x10] sm:$0xff] %vm278_vm0, %v216_v32  ;;  %v96_v49 = vmul.f32 %v375_v1, %v28_v36  ;;  %v221_v50 = vmax.f32 %v157_v34, 0.0  ;;  %v160_v51 = vadd.f32 %v380_v2, %v92_v43  ;;  %v161_v52 = vadd.f32 %v380_v2, %v93_v44  ;;  %v42_v34 = vld [vmem:[%s958_s0 + $0xe0] sm:$0xff] }
   0xc   :  { %282 = vst.msk [vmem:[%s961_s3 + $0x18] sm:$0xff] %vm278_vm0, %v217_v33  ;;  %v97_v53 = vmul.f32 %v375_v1, %v29_v41  ;;  %v222_v56 = vmax.f32 %v158_v46, 0.0  ;;  %v162_v57 = vadd.f32 %v380_v2, %v94_v45  ;;  %v223_v60 = vmax.f32 %v159_v47, 0.0  ;;  %v45_v46 = vld [vmem:[%s958_s0 + $0xf8] sm:$0xff] }
   0xd   :  { %283 = vst.msk [vmem:[%s961_s3 + $0x20] sm:$0xff] %vm278_vm0, %v218_v37  ;;  %v163_v61 = vadd.f32 %v380_v2, %v95_v48  ;;  %v224_v63 = vmax.f32 %v160_v51, 0.0  ;;  %v164_v0 = vadd.f32 %v380_v2, %v96_v49  ;;  %v98_v3 = vmul.f32 %v375_v1, %v30_v54  ;;  %v47_v54 = vld [vmem:[%s958_s0 + $0x108] sm:$0xff] }
   0xe   :  { %284 = vst.msk [vmem:[%s961_s3 + $0x28] sm:$0xff] %vm278_vm0, %v219_v38  ;;  %v99_v4 = vmul.f32 %v375_v1, %v31_v55  ;;  %v225_v6 = vmax.f32 %v161_v52, 0.0  ;;  %v165_v7 = vadd.f32 %v380_v2, %v97_v53  ;;  %v100_v8 = vmul.f32 %v375_v1, %v32_v58  ;;  %v43_v38 = vld [vmem:[%s958_s0 + $0xe8] sm:$0xff]  ;;  %v48_v58 = vld [vmem:[%s958_s0 + $0x110] sm:$0xff] }
   0xf   :  { %285 = vst.msk [vmem:[%s961_s3 + $0x30] sm:$0xff] %vm278_vm0, %v220_v42  ;;  %v101_v9 = vmul.f32 %v375_v1, %v33_v59  ;;  %v226_v11 = vmax.f32 %v162_v57, 0.0  ;;  %v166_v12 = vadd.f32 %v380_v2, %v98_v3  ;;  %v102_v13 = vmul.f32 %v375_v1, %v34_v62  ;;  %v44_v42 = vld [vmem:[%s958_s0 + $0xf0] sm:$0xff]  ;;  %v49_v62 = vld [vmem:[%s958_s0 + $0x118] sm:$0xff] }
  0x10   :  { %286 = vst.msk [vmem:[%s961_s3 + $0x38] sm:$0xff] %vm278_vm0, %v221_v50  ;;  %v227_v15 = vmax.f32 %v163_v61, 0.0  ;;  %v167_v16 = vadd.f32 %v380_v2, %v99_v4  ;;  %v103_v17 = vmul.f32 %v375_v1, %v35_v5  ;;  %v228_v19 = vmax.f32 %v164_v0, 0.0  ;;  %v46_v50 = vld [vmem:[%s958_s0 + $0x100] sm:$0xff] }
  0x11   :  { %287 = vst.msk [vmem:[%s961_s3 + $0x40] sm:$0xff] %vm278_vm0, %v222_v56  ;;  %v168_v20 = vadd.f32 %v380_v2, %v100_v8  ;;  %v104_v21 = vmul.f32 %v375_v1, %v36_v10  ;;  %v229_v23 = vmax.f32 %v165_v7, 0.0  ;;  %v169_v24 = vadd.f32 %v380_v2, %v101_v9  ;;  %v50_v4 = vld [vmem:[%s958_s0 + $0x120] sm:$0xff]  ;;  %v51_v8 = vld [vmem:[%s958_s0 + $0x128] sm:$0xff] }
  0x12   :  { %288 = vst.msk [vmem:[%s961_s3 + $0x48] sm:$0xff] %vm278_vm0, %v223_v60  ;;  %v105_v25 = vmul.f32 %v375_v1, %v37_v14  ;;  %v230_v27 = vmax.f32 %v166_v12, 0.0  ;;  %v170_v28 = vadd.f32 %v380_v2, %v102_v13  ;;  %v106_v29 = vmul.f32 %v375_v1, %v38_v18  ;;  %v52_v12 = vld [vmem:[%s958_s0 + $0x130] sm:$0xff] }
  0x13   :  { %289 = vst.msk [vmem:[%s961_s3 + $0x50] sm:$0xff] %vm278_vm0, %v224_v63  ;;  %v231_v31 = vmax.f32 %v167_v16, 0.0  ;;  %v171_v32 = vadd.f32 %v380_v2, %v103_v17  ;;  %v107_v33 = vmul.f32 %v375_v1, %v39_v22  ;;  %v232_v35 = vmax.f32 %v168_v20, 0.0  ;;  %v53_v16 = vld [vmem:[%s958_s0 + $0x138] sm:$0xff]  ;;  %v54_v20 = vld [vmem:[%s958_s0 + $0x140] sm:$0xff] }
  0x14   :  { %290 = vst.msk [vmem:[%s961_s3 + $0x58] sm:$0xff] %vm278_vm0, %v225_v6  ;;  %v172_v36 = vadd.f32 %v380_v2, %v104_v21  ;;  %v108_v37 = vmul.f32 %v375_v1, %v40_v26  ;;  %v233_v39 = vmax.f32 %v169_v24, 0.0  ;;  %v173_v40 = vadd.f32 %v380_v2, %v105_v25  ;;  %v55_v24 = vld [vmem:[%s958_s0 + $0x148] sm:$0xff] }
  0x15   :  { %291 = vst.msk [vmem:[%s961_s3 + $0x60] sm:$0xff] %vm278_vm0, %v226_v11  ;;  %v109_v41 = vmul.f32 %v375_v1, %v41_v30  ;;  %v234_v43 = vmax.f32 %v170_v28, 0.0  ;;  %v174_v44 = vadd.f32 %v380_v2, %v106_v29  ;;  %v110_v45 = vmul.f32 %v375_v1, %v42_v34  ;;  %v56_v28 = vld [vmem:[%s958_s0 + $0x150] sm:$0xff] }
  0x16   :  { %292 = vst.msk [vmem:[%s961_s3 + $0x68] sm:$0xff] %vm278_vm0, %v227_v15  ;;  %v235_v47 = vmax.f32 %v171_v32, 0.0  ;;  %v175_v48 = vadd.f32 %v380_v2, %v107_v33  ;;  %v111_v49 = vmul.f32 %v375_v1, %v43_v38  ;;  %v236_v51 = vmax.f32 %v172_v36, 0.0  ;;  %v57_v32 = vld [vmem:[%s958_s0 + $0x158] sm:$0xff]  ;;  %v58_v36 = vld [vmem:[%s958_s0 + $0x160] sm:$0xff] }
  0x17   :  { %293 = vst.msk [vmem:[%s961_s3 + $0x70] sm:$0xff] %vm278_vm0, %v228_v19  ;;  %v176_v52 = vadd.f32 %v380_v2, %v108_v37  ;;  %v112_v53 = vmul.f32 %v375_v1, %v44_v42  ;;  %v237_v55 = vmax.f32 %v173_v40, 0.0  ;;  %v177_v56 = vadd.f32 %v380_v2, %v109_v41  ;;  %v59_v40 = vld [vmem:[%s958_s0 + $0x168] sm:$0xff] }
  0x18   :  { %294 = vst.msk [vmem:[%s961_s3 + $0x78] sm:$0xff] %vm278_vm0, %v229_v23  ;;  %v113_v57 = vmul.f32 %v375_v1, %v45_v46  ;;  %v238_v59 = vmax.f32 %v174_v44, 0.0  ;;  %v178_v60 = vadd.f32 %v380_v2, %v110_v45  ;;  %v114_v61 = vmul.f32 %v375_v1, %v46_v50  ;;  %v60_v44 = vld [vmem:[%s958_s0 + $0x170] sm:$0xff] }
  0x19   :  { %295 = vst.msk [vmem:[%s961_s3 + $0x80] sm:$0xff] %vm278_vm0, %v230_v27  ;;  %v239_v63 = vmax.f32 %v175_v48, 0.0  ;;  %v179_v0 = vadd.f32 %v380_v2, %v111_v49  ;;  %v115_v3 = vmul.f32 %v375_v1, %v47_v54  ;;  %v240_v5 = vmax.f32 %v176_v52, 0.0  ;;  %v61_v48 = vld [vmem:[%s958_s0 + $0x178] sm:$0xff]  ;;  %v62_v52 = vld [vmem:[%s958_s0 + $0x180] sm:$0xff] }
  0x1a   :  { %296 = vst.msk [vmem:[%s961_s3 + $0x88] sm:$0xff] %vm278_vm0, %v231_v31  ;;  %v180_v6 = vadd.f32 %v380_v2, %v112_v53  ;;  %v116_v7 = vmul.f32 %v375_v1, %v48_v58  ;;  %v241_v9 = vmax.f32 %v177_v56, 0.0  ;;  %v181_v10 = vadd.f32 %v380_v2, %v113_v57  ;;  %v63_v56 = vld [vmem:[%s958_s0 + $0x188] sm:$0xff] }
  0x1b   :  { %297 = vst.msk [vmem:[%s961_s3 + $0x90] sm:$0xff] %vm278_vm0, %v232_v35  ;;  %v117_v11 = vmul.f32 %v375_v1, %v49_v62  ;;  %v242_v13 = vmax.f32 %v178_v60, 0.0  ;;  %v182_v14 = vadd.f32 %v380_v2, %v114_v61  ;;  %v118_v15 = vmul.f32 %v375_v1, %v50_v4  ;;  %v64_v60 = vld [vmem:[%s958_s0 + $0x190] sm:$0xff] }
  0x1c   :  { %298 = vst.msk [vmem:[%s961_s3 + $0x98] sm:$0xff] %vm278_vm0, %v233_v39  ;;  %v243_v17 = vmax.f32 %v179_v0, 0.0  ;;  %v183_v18 = vadd.f32 %v380_v2, %v115_v3  ;;  %v119_v19 = vmul.f32 %v375_v1, %v51_v8  ;;  %v244_v21 = vmax.f32 %v180_v6, 0.0  ;;  %v65_v0 = vld [vmem:[%s958_s0 + $0x198] sm:$0xff] }
  0x1d   :  { %299 = vst.msk [vmem:[%s961_s3 + $0xa0] sm:$0xff] %vm278_vm0, %v234_v43  ;;  %v184_v22 = vadd.f32 %v380_v2, %v116_v7  ;;  %v120_v23 = vmul.f32 %v375_v1, %v52_v12  ;;  %v245_v25 = vmax.f32 %v181_v10, 0.0  ;;  %v185_v26 = vadd.f32 %v380_v2, %v117_v11  ;;  %v77_v3 = vld [vmem:[%s958_s0 + $0x1f8] sm:$0xff]  ;;  %v66_v7 = vld [vmem:[%s958_s0 + $0x1a0] sm:$0xff]  ;;  %v67_v11 = vld [vmem:[%s958_s0 + $0x1a8] sm:$0xff] }
  0x1e   :  { %300 = vst.msk [vmem:[%s961_s3 + $0xa8] sm:$0xff] %vm278_vm0, %v235_v47  ;;  %v121_v27 = vmul.f32 %v375_v1, %v53_v16  ;;  %v246_v29 = vmax.f32 %v182_v14, 0.0  ;;  %v186_v30 = vadd.f32 %v380_v2, %v118_v15  ;;  %v122_v31 = vmul.f32 %v375_v1, %v54_v20  ;;  %v68_v15 = vld [vmem:[%s958_s0 + $0x1b0] sm:$0xff]  ;;  %v69_v20 = vld [vmem:[%s958_s0 + $0x1b8] sm:$0xff] }
  0x1f   :  { %301 = vst.msk [vmem:[%s961_s3 + $0xb0] sm:$0xff] %vm278_vm0, %v236_v51  ;;  %v247_v33 = vmax.f32 %v183_v18, 0.0  ;;  %v187_v34 = vadd.f32 %v380_v2, %v119_v19  ;;  %v123_v35 = vmul.f32 %v375_v1, %v55_v24  ;;  %v248_v37 = vmax.f32 %v184_v22, 0.0  ;;  %v70_v24 = vld [vmem:[%s958_s0 + $0x1c0] sm:$0xff] }
  0x20   :  { %302 = vst.msk [vmem:[%s961_s3 + $0xb8] sm:$0xff] %vm278_vm0, %v237_v55  ;;  %v188_v38 = vadd.f32 %v380_v2, %v120_v23  ;;  %v124_v39 = vmul.f32 %v375_v1, %v56_v28  ;;  %v249_v41 = vmax.f32 %v185_v26, 0.0  ;;  %v189_v42 = vadd.f32 %v380_v2, %v121_v27 }
  0x21   :  { %303 = vst.msk [vmem:[%s961_s3 + $0xc0] sm:$0xff] %vm278_vm0, %v238_v59  ;;  %v125_v43 = vmul.f32 %v375_v1, %v57_v32  ;;  %v250_v45 = vmax.f32 %v186_v30, 0.0  ;;  %v190_v46 = vadd.f32 %v380_v2, %v122_v31  ;;  %v126_v47 = vmul.f32 %v375_v1, %v58_v36 }
  0x22   :  { %304 = vst.msk [vmem:[%s961_s3 + $0xc8] sm:$0xff] %vm278_vm0, %v239_v63  ;;  %v251_v49 = vmax.f32 %v187_v34, 0.0  ;;  %v191_v50 = vadd.f32 %v380_v2, %v123_v35  ;;  %v127_v51 = vmul.f32 %v375_v1, %v59_v40  ;;  %v252_v53 = vmax.f32 %v188_v38, 0.0 }
  0x23   :  { %305 = vst.msk [vmem:[%s961_s3 + $0xd0] sm:$0xff] %vm278_vm0, %v240_v5  ;;  %v192_v54 = vadd.f32 %v380_v2, %v124_v39  ;;  %v128_v55 = vmul.f32 %v375_v1, %v60_v44  ;;  %v253_v57 = vmax.f32 %v189_v42, 0.0  ;;  %v193_v58 = vadd.f32 %v380_v2, %v125_v43 }
  0x24   :  { %306 = vst.msk [vmem:[%s961_s3 + $0xd8] sm:$0xff] %vm278_vm0, %v241_v9  ;;  %v129_v59 = vmul.f32 %v375_v1, %v61_v48  ;;  %v254_v61 = vmax.f32 %v190_v46, 0.0  ;;  %v194_v62 = vadd.f32 %v380_v2, %v126_v47  ;;  %v130_v63 = vmul.f32 %v375_v1, %v62_v52 }
  0x25   :  { %307 = vst.msk [vmem:[%s961_s3 + $0xe0] sm:$0xff] %vm278_vm0, %v242_v13  ;;  %v255_v4 = vmax.f32 %v191_v50, 0.0  ;;  %v195_v5 = vadd.f32 %v380_v2, %v127_v51  ;;  %v131_v6 = vmul.f32 %v375_v1, %v63_v56  ;;  %v256_v8 = vmax.f32 %v192_v54, 0.0 }
  0x26   :  { %308 = vst.msk [vmem:[%s961_s3 + $0xe8] sm:$0xff] %vm278_vm0, %v243_v17  ;;  %v196_v9 = vadd.f32 %v380_v2, %v128_v55  ;;  %v132_v10 = vmul.f32 %v375_v1, %v64_v60  ;;  %v257_v12 = vmax.f32 %v193_v58, 0.0  ;;  %v197_v13 = vadd.f32 %v380_v2, %v129_v59 }
  0x27   :  { %309 = vst.msk [vmem:[%s961_s3 + $0xf0] sm:$0xff] %vm278_vm0, %v244_v21  ;;  %v133_v14 = vmul.f32 %v375_v1, %v65_v0  ;;  %v145_v16 = vmul.f32 %v375_v1, %v77_v3  ;;  %v258_v17 = vmax.f32 %v194_v62, 0.0  ;;  %v198_v18 = vadd.f32 %v380_v2, %v130_v63 }
  0x28   :  { %310 = vst.msk [vmem:[%s961_s3 + $0xf8] sm:$0xff] %vm278_vm0, %v245_v25  ;;  %v134_v19 = vmul.f32 %v375_v1, %v66_v7  ;;  %v259_v21 = vmax.f32 %v195_v5, 0.0  ;;  %v199_v22 = vadd.f32 %v380_v2, %v131_v6  ;;  %v135_v23 = vmul.f32 %v375_v1, %v67_v11 }
  0x29   :  { %311 = vst.msk [vmem:[%s961_s3 + $0x100] sm:$0xff] %vm278_vm0, %v246_v29  ;;  %v827_v25 = vadd.f32 %v380_v2, %v145_v16  ;;  %v260_v26 = vmax.f32 %v196_v9, 0.0  ;;  %v200_v27 = vadd.f32 %v380_v2, %v132_v10  ;;  %v136_v28 = vmul.f32 %v375_v1, %v68_v15  ;;  %v71_v29 = vld [vmem:[%s958_s0 + $0x1c8] sm:$0xff] }
  0x2a   :  { %312 = vst.msk [vmem:[%s961_s3 + $0x108] sm:$0xff] %vm278_vm0, %v247_v33  ;;  %v261_v30 = vmax.f32 %v197_v13, 0.0  ;;  %v201_v31 = vadd.f32 %v380_v2, %v133_v14  ;;  %v137_v32 = vmul.f32 %v375_v1, %v69_v20  ;;  %v72_v33 = vld [vmem:[%s958_s0 + $0x1d0] sm:$0xff]  ;;  %v262_v34 = vmax.f32 %v198_v18, 0.0 }
  0x2b   :  { %313 = vst.msk [vmem:[%s961_s3 + $0x110] sm:$0xff] %vm278_vm0, %v248_v37  ;;  %v202_v35 = vadd.f32 %v380_v2, %v134_v19  ;;  %v138_v36 = vmul.f32 %v375_v1, %v70_v24  ;;  %v73_v37 = vld [vmem:[%s958_s0 + $0x1d8] sm:$0xff]  ;;  %v263_v38 = vmax.f32 %v199_v22, 0.0  ;;  %v203_v39 = vadd.f32 %v380_v2, %v135_v23 }
  0x2c   :  { %314 = vst.msk [vmem:[%s961_s3 + $0x118] sm:$0xff] %vm278_vm0, %v249_v41  ;;  %v139_v40 = vmul.f32 %v375_v1, %v71_v29  ;;  %v74_v41 = vld [vmem:[%s958_s0 + $0x1e0] sm:$0xff]  ;;  %v264_v42 = vmax.f32 %v200_v27, 0.0  ;;  %v204_v43 = vadd.f32 %v380_v2, %v136_v28  ;;  %v140_v44 = vmul.f32 %v375_v1, %v72_v33 }
  0x2d   :  { %315 = vst.msk [vmem:[%s961_s3 + $0x120] sm:$0xff] %vm278_vm0, %v250_v45  ;;  %v75_v45 = vld [vmem:[%s958_s0 + $0x1e8] sm:$0xff]  ;;  %v265_v46 = vmax.f32 %v201_v31, 0.0  ;;  %v205_v47 = vadd.f32 %v380_v2, %v137_v32  ;;  %v141_v48 = vmul.f32 %v375_v1, %v73_v37  ;;  %v266_v50 = vmax.f32 %v202_v35, 0.0 }
  0x2e   :  { %316 = vst.msk [vmem:[%s961_s3 + $0x128] sm:$0xff] %vm278_vm0, %v251_v49  ;;  %v76_v49 = vld [vmem:[%s958_s0 + $0x1f0] sm:$0xff]  ;;  %v206_v51 = vadd.f32 %v380_v2, %v138_v36  ;;  %v142_v52 = vmul.f32 %v375_v1, %v74_v41  ;;  %v207_v54 = vadd.f32 %v380_v2, %v139_v40  ;;  %v143_v55 = vmul.f32 %v375_v1, %v75_v45 }
  0x2f   :  { %317 = vst.msk [vmem:[%s961_s3 + $0x130] sm:$0xff] %vm278_vm0, %v252_v53  ;;  %v267_v53 = vmax.f32 %v203_v39, 0.0  ;;  %v268_v56 = vmax.f32 %v204_v43, 0.0  ;;  %v144_v58 = vmul.f32 %v375_v1, %v76_v49  ;;  %v269_v59 = vmax.f32 %v205_v47, 0.0 }
  0x30   :  { %318 = vst.msk [vmem:[%s961_s3 + $0x138] sm:$0xff] %vm278_vm0, %v253_v57  ;;  %v208_v57 = vadd.f32 %v380_v2, %v140_v44  ;;  %v209_v60 = vadd.f32 %v380_v2, %v141_v48  ;;  %v210_v62 = vadd.f32 %v380_v2, %v142_v52  ;;  %v271_v1 = vmax.f32 %v207_v54, 0.0 }
  0x31   :  { %319 = vst.msk [vmem:[%s961_s3 + $0x140] sm:$0xff] %vm278_vm0, %v254_v61  ;;  %v270_v61 = vmax.f32 %v206_v51, 0.0  ;;  %v211_v63 = vadd.f32 %v380_v2, %v143_v55  ;;  %v212_v3 = vadd.f32 %v380_v2, %v144_v58  ;;  %v277_v7 = vmax.f32 %v827_v25, 0.0 }
  0x32   :  { %320 = vst.msk [vmem:[%s961_s3 + $0x148] sm:$0xff] %vm278_vm0, %v255_v4  ;;  %v272_v0 = vmax.f32 %v208_v57, 0.0  ;;  %v273_v4 = vmax.f32 %v209_v60, 0.0  ;;  %v274_v5 = vmax.f32 %v210_v62, 0.0 }
  0x33   :  { %321 = vst.msk [vmem:[%s961_s3 + $0x150] sm:$0xff] %vm278_vm0, %v256_v8  ;;  %v275_v6 = vmax.f32 %v211_v63, 0.0  ;;  %v276_v2 = vmax.f32 %v212_v3, 0.0 }
  0x34   :  { %322 = vst.msk [vmem:[%s961_s3 + $0x158] sm:$0xff] %vm278_vm0, %v257_v12 }
  0x35   :  { %323 = vst.msk [vmem:[%s961_s3 + $0x160] sm:$0xff] %vm278_vm0, %v258_v17 }
  0x36   :  { %324 = vst.msk [vmem:[%s961_s3 + $0x168] sm:$0xff] %vm278_vm0, %v259_v21 }
  0x37   :  { %325 = vst.msk [vmem:[%s961_s3 + $0x170] sm:$0xff] %vm278_vm0, %v260_v26 }
  0x38   :  { %326 = vst.msk [vmem:[%s961_s3 + $0x178] sm:$0xff] %vm278_vm0, %v261_v30 }
  0x39   :  { %327 = vst.msk [vmem:[%s961_s3 + $0x180] sm:$0xff] %vm278_vm0, %v262_v34 }
  0x3a   :  { %328 = vst.msk [vmem:[%s961_s3 + $0x188] sm:$0xff] %vm278_vm0, %v263_v38 }
  0x3b   :  { %329 = vst.msk [vmem:[%s961_s3 + $0x190] sm:$0xff] %vm278_vm0, %v264_v42 }
  0x3c   :  { %330 = vst.msk [vmem:[%s961_s3 + $0x198] sm:$0xff] %vm278_vm0, %v265_v46 }
  0x3d   :  { %331 = vst.msk [vmem:[%s961_s3 + $0x1a0] sm:$0xff] %vm278_vm0, %v266_v50 }
  0x3e   :  { %332 = vst.msk [vmem:[%s961_s3 + $0x1a8] sm:$0xff] %vm278_vm0, %v267_v53 }
  0x3f   :  { %333 = vst.msk [vmem:[%s961_s3 + $0x1b0] sm:$0xff] %vm278_vm0, %v268_v56 }
  0x40   :  { %334 = vst.msk [vmem:[%s961_s3 + $0x1b8] sm:$0xff] %vm278_vm0, %v269_v59 }
  0x41   :  { %335 = vst.msk [vmem:[%s961_s3 + $0x1c0] sm:$0xff] %vm278_vm0, %v270_v61 }
  0x42   :  { %336 = vst.msk [vmem:[%s961_s3 + $0x1c8] sm:$0xff] %vm278_vm0, %v271_v1 }
  0x43   :  { %337 = vst.msk [vmem:[%s961_s3 + $0x1d0] sm:$0xff] %vm278_vm0, %v272_v0 }
  0x44   :  { %338 = vst.msk [vmem:[%s961_s3 + $0x1d8] sm:$0xff] %vm278_vm0, %v273_v4 }
  0x45   :  { %339 = vst.msk [vmem:[%s961_s3 + $0x1e0] sm:$0xff] %vm278_vm0, %v274_v5 }
  0x46   :  { %340 = vst.msk [vmem:[%s961_s3 + $0x1e8] sm:$0xff] %vm278_vm0, %v275_v6 }
  0x47   :  { %341 = vst.msk [vmem:[%s961_s3 + $0x1f0] sm:$0xff] %vm278_vm0, %v276_v2 }
  0x48   :  { %342 = vst.msk [vmem:[%s961_s3 + $0x1f8] sm:$0xff] %vm278_vm0, %v277_v7 }

// kernel: densenet_forward.34
= control target key start
LH: loop header
LB: loop body
LE: loop exit
PB: predicated region body
PF: predicated region fallthrough
CT: control target
= control target key end

     0   :  { %vm519_vm0 = vcmask 1040384   ;;  %vm520_vm1 = vcmask 1041408   ;;  %v1287_v2 = vmov 65535   ;;  %vm422_vm2 = vcmask 154624   ;;  %s2368_s1 = inlined_call_operand.vmem [shape: bf16[147,16], index: 1, kind: input, shape index: {}]   ;;  %s2369_s3 = inlined_call_operand.vmem [shape: f32[1,147], index: 3, kind: input, shape index: {}]   ;;  %s2370_s4 = inlined_call_operand.vmem [shape: f32[1,147], index: 4, kind: input, shape index: {}]   ;;  %s2371_s0 = inlined_call_operand.vmem [shape: f32[512,147], index: 0, kind: input, shape index: {}]   ;;  %s2372_s2 = inlined_call_operand.vmem [shape: f32[1,16], index: 2, kind: input, shape index: {}]   ;;  %s2373_s5 = inlined_call_operand.vmem [shape: f32[512,16], index: 5, kind: output, shape index: {}]  }
   0x1   :  { %v1271_v0 = vld [vmem:[%s2368_s1 + $0x38] sm:$0xff]  ;;  %v364_v1 = vld [vmem:[%s2368_s1 + $0x48] sm:$0x3]  ;;  %v521_v3 = vsel %vm519_vm0, 4294967295, %v1287_v2  ;;  %v1270_v5 = vld [vmem:[%s2368_s1 + $0x30] sm:$0xff]  ;;  %vm25_vm3 = vcmask 130048  }
   0x2   :  { %v402_v4 = vunpack.c.l.b16 %v364_v1  ;;  %526 = vmatpush.bf16.msra.mxu0 %v1271_v0  ;;  %1273 = vmatpush.bf16.msra.mxu2 %v1271_v0  ;;  %v522_v6 = vsel %vm520_vm1, %v521_v3, 0  ;;  %v1269_v9 = vld [vmem:[%s2368_s1 + $0x28] sm:$0xff]  ;;  %v1272_v10 = vld [vmem:[%s2368_s1 + $0x40] sm:$0xff]  ;;  %v93_v12 = vld [vmem:[%s2371_s0 + $0x18] sm:$0xff] }
   0x3   :  { %v91_v11 = vld [vmem:[%s2371_s0 + $0x8] sm:$0xff]  ;;  %v161_v14 = vld [vmem:[%s2371_s0 + $0x238] sm:$0xff]  ;;  %v1268_v16 = vld [vmem:[%s2368_s1 + $0x20] sm:$0xff] }
   0x4   :  { %v412_v7 = vpack.c.b16 %v402_v4, %v402_v4  ;;  %v159_v13 = vld [vmem:[%s2371_s0 + $0x228] sm:$0xff]  ;;  %v283_v15 = vpack.c.bf16 %v93_v12, %v91_v11  ;;  %v1267_v18 = vld [vmem:[%s2368_s1 + $0x18] sm:$0xff]  ;;  %v1266_v19 = vld [vmem:[%s2368_s1 + $0x10] sm:$0xff] }
   0x5   :  { %v317_v17 = vpack.c.bf16 %v161_v14, %v159_v13  ;;  %v1265_v20 = vld [vmem:[%s2368_s1 + $0x8] sm:$0xff]  ;;  %v97_v22 = vld [vmem:[%s2371_s0 + $0x38] sm:$0xff]  ;;  %v1264_v26 = vld [vmem:[%s2368_s1] sm:$0xff] }
   0x6   :  { %v524_v8 = vand.u32 %v522_v6, %v412_v7  ;;  %527 = vmatpush.bf16.msra.mxu0 %v1270_v5  ;;  %1274 = vmatpush.bf16.msra.mxu2 %v1270_v5  ;;  %v95_v21 = vld [vmem:[%s2371_s0 + $0x28] sm:$0xff]  ;;  %v165_v24 = vld [vmem:[%s2371_s0 + $0x258] sm:$0xff]  ;;  %v90_v27 = vld [vmem:[%s2371_s0] sm:$0xff] }
   0x7   :  { %v163_v23 = vld [vmem:[%s2371_s0 + $0x248] sm:$0xff]  ;;  %v285_v25 = vpack.c.bf16 %v97_v22, %v95_v21  ;;  %v92_v28 = vld [vmem:[%s2371_s0 + $0x10] sm:$0xff]  ;;  %v154_v29 = vld [vmem:[%s2371_s0 + $0x200] sm:$0xff] }
   0x8   :  { %701 = vmatpush.bf16.msra.mxu1 %v524_v8  ;;  %1281 = vmatpush.bf16.msra.mxu3 %v524_v8  ;;  %v156_v30 = vld [vmem:[%s2371_s0 + $0x210] sm:$0xff]  ;;  %v319_v31 = vpack.c.bf16 %v165_v24, %v163_v23  ;;  %v282_v32 = vpack.c.bf16 %v92_v28, %v90_v27  ;;  %v99_v34 = vld [vmem:[%s2371_s0 + $0x48] sm:$0xff]  ;;  %v101_v35 = vld [vmem:[%s2371_s0 + $0x58] sm:$0xff] }
   0x9   :  { %v314_v33 = vpack.c.bf16 %v156_v30, %v154_v29  ;;  %v167_v36 = vld [vmem:[%s2371_s0 + $0x268] sm:$0xff]  ;;  %v169_v37 = vld [vmem:[%s2371_s0 + $0x278] sm:$0xff]  ;;  %v287_v38 = vpack.c.bf16 %v101_v35, %v99_v34  ;;  %v94_v39 = vld [vmem:[%s2371_s0 + $0x20] sm:$0xff] }
   0xa   :  { %528 = vmatpush.bf16.msra.mxu0 %v1269_v9  ;;  %1275 = vmatpush.bf16.msra.mxu2 %v1269_v9  ;;  %v96_v40 = vld [vmem:[%s2371_s0 + $0x30] sm:$0xff]  ;;  %v158_v41 = vld [vmem:[%s2371_s0 + $0x220] sm:$0xff]  ;;  %v321_v43 = vpack.c.bf16 %v169_v37, %v167_v36  ;;  %v103_v46 = vld [vmem:[%s2371_s0 + $0x68] sm:$0xff]  ;;  %v1288_v37 = vmov 0.0  }
   0xb   :  { %v160_v42 = vld [vmem:[%s2371_s0 + $0x230] sm:$0xff]  ;;  %v284_v44 = vpack.c.bf16 %v96_v40, %v94_v39  ;;  %v105_v47 = vld [vmem:[%s2371_s0 + $0x78] sm:$0xff]  ;;  %v171_v48 = vld [vmem:[%s2371_s0 + $0x288] sm:$0xff]  ;;  %26 = vst.msk [vmem:[#allocation2] sm:$0xff] %vm25_vm3, %v1288_v37 }
   0xc   :  { %702 = vmatpush.bf16.msra.mxu1 %v1272_v10  ;;  %1282 = vmatpush.bf16.msra.mxu3 %v1272_v10  ;;  %v316_v45 = vpack.c.bf16 %v160_v42, %v158_v41  ;;  %v173_v49 = vld [vmem:[%s2371_s0 + $0x298] sm:$0xff]  ;;  %v289_v50 = vpack.c.bf16 %v105_v47, %v103_v46  ;;  %v98_v51 = vld [vmem:[%s2371_s0 + $0x40] sm:$0xff]  ;;  %v100_v52 = vld [vmem:[%s2371_s0 + $0x50] sm:$0xff]  ;;  %27 = vst.msk [vmem:[#allocation2 + $0x8] sm:$0xff] %vm25_vm3, %v1288_v37 }
   0xd   :  { %v162_v53 = vld [vmem:[%s2371_s0 + $0x240] sm:$0xff]  ;;  %v164_v54 = vld [vmem:[%s2371_s0 + $0x250] sm:$0xff]  ;;  %v323_v55 = vpack.c.bf16 %v173_v49, %v171_v48  ;;  %v286_v56 = vpack.c.bf16 %v100_v52, %v98_v51  ;;  %v107_v58 = vld [vmem:[%s2371_s0 + $0x88] sm:$0xff]  ;;  %28 = vst.msk [vmem:[#allocation2 + $0x10] sm:$0xff] %vm25_vm3, %v1288_v37 }
   0xe   :  { %529 = vmatpush.bf16.msra.mxu0 %v1268_v16  ;;  %1276 = vmatpush.bf16.msra.mxu2 %v1268_v16  ;;  %v318_v57 = vpack.c.bf16 %v164_v54, %v162_v53  ;;  %v109_v59 = vld [vmem:[%s2371_s0 + $0x98] sm:$0xff]  ;;  %v175_v60 = vld [vmem:[%s2371_s0 + $0x2a8] sm:$0xff]  ;;  %v102_v63 = vld [vmem:[%s2371_s0 + $0x60] sm:$0xff]  ;;  %29 = vst.msk [vmem:[#allocation2 + $0x18] sm:$0xff] %vm25_vm3, %v1288_v37 }
   0xf   :  { %1232 = vmatmul.msk.bf16.vlgmr.msra.gmra.mxu1 %vm422_vm2, %v283_v15  ;;  %1249 = vmatmul.msk.bf16.vlgmr.msra.gmra.mxu3 %vm422_vm2, %v317_v17  ;;  %v177_v61 = vld [vmem:[%s2371_s0 + $0x2b8] sm:$0xff]  ;;  %v291_v62 = vpack.c.bf16 %v109_v59, %v107_v58  ;;  %v104_v0 = vld [vmem:[%s2371_s0 + $0x70] sm:$0xff]  ;;  %v166_v1 = vld [vmem:[%s2371_s0 + $0x260] sm:$0xff]  ;;  %30 = vst.msk [vmem:[#allocation2 + $0x20] sm:$0xff] %vm25_vm3, %v1288_v37 }
  0x10   :  { %v168_v2 = vld [vmem:[%s2371_s0 + $0x270] sm:$0xff]  ;;  %v325_v3 = vpack.c.bf16 %v177_v61, %v175_v60  ;;  %v288_v4 = vpack.c.bf16 %v104_v0, %v102_v63  ;;  %v111_v6 = vld [vmem:[%s2371_s0 + $0xa8] sm:$0xff]  ;;  %v113_v7 = vld [vmem:[%s2371_s0 + $0xb8] sm:$0xff]  ;;  %31 = vst.msk [vmem:[#allocation2 + $0x28] sm:$0xff] %vm25_vm3, %v1288_v37 }
  0x11   :  { %v320_v5 = vpack.c.bf16 %v168_v2, %v166_v1  ;;  %v179_v8 = vld [vmem:[%s2371_s0 + $0x2c8] sm:$0xff]  ;;  %v181_v9 = vld [vmem:[%s2371_s0 + $0x2d8] sm:$0xff]  ;;  %v293_v10 = vpack.c.bf16 %v113_v7, %v111_v6  ;;  %v106_v11 = vld [vmem:[%s2371_s0 + $0x80] sm:$0xff]  ;;  %32 = vst.msk [vmem:[#allocation2 + $0x30] sm:$0xff] %vm25_vm3, %v1288_v37 }
  0x12   :  { %530 = vmatpush.bf16.msra.mxu0 %v1267_v18  ;;  %1277 = vmatpush.bf16.msra.mxu2 %v1267_v18  ;;  %v108_v12 = vld [vmem:[%s2371_s0 + $0x90] sm:$0xff]  ;;  %v170_v13 = vld [vmem:[%s2371_s0 + $0x280] sm:$0xff]  ;;  %v327_v15 = vpack.c.bf16 %v181_v9, %v179_v8  ;;  %v115_v18 = vld [vmem:[%s2371_s0 + $0xc8] sm:$0xff]  ;;  %33 = vst.msk [vmem:[#allocation2 + $0x38] sm:$0xff] %vm25_vm3, %v1288_v37 }
  0x13   :  { %v172_v14 = vld [vmem:[%s2371_s0 + $0x290] sm:$0xff]  ;;  %v290_v16 = vpack.c.bf16 %v108_v12, %v106_v11  ;;  %v185_v21 = vld [vmem:[%s2371_s0 + $0x2f8] sm:$0xff]  ;;  %v110_v23 = vld [vmem:[%s2371_s0 + $0xa0] sm:$0xff]  ;;  %34 = vst.msk [vmem:[#allocation2 + $0x40] sm:$0xff] %vm25_vm3, %v1288_v37 }
  0x14   :  { %v322_v17 = vpack.c.bf16 %v172_v14, %v170_v13  ;;  %v112_v24 = vld [vmem:[%s2371_s0 + $0xb0] sm:$0xff]  ;;  %v119_v30 = vld [vmem:[%s2371_s0 + $0xe8] sm:$0xff]  ;;  %v114_v35 = vld [vmem:[%s2371_s0 + $0xc0] sm:$0xff]  ;;  %35 = vst.msk [vmem:[#allocation2 + $0x48] sm:$0xff] %vm25_vm3, %v1288_v37 }
  0x15   :  { %v292_v28 = vpack.c.bf16 %v112_v24, %v110_v23  ;;  %v116_v36 = vld [vmem:[%s2371_s0 + $0xd0] sm:$0xff]  ;;  %36 = vst.msk [vmem:[#allocation2 + $0x50] sm:$0xff] %vm25_vm3, %v1288_v37  ;;  %v118_v46 = vld [vmem:[%s2371_s0 + $0xe0] sm:$0xff]  ;;  %v127_v54 = vld [vmem:[%s2371_s0 + $0x128] sm:$0xff] }
  0x16   :  { %531 = vmatpush.bf16.msra.mxu0 %v1266_v19  ;;  %1278 = vmatpush.bf16.msra.mxu2 %v1266_v19  ;;  %v117_v19 = vld [vmem:[%s2371_s0 + $0xd8] sm:$0xff]  ;;  %v180_v39 = vld [vmem:[%s2371_s0 + $0x2d0] sm:$0xff]  ;;  %v294_v41 = vpack.c.bf16 %v116_v36, %v114_v35  ;;  %37 = vst.msk [vmem:[#allocation2 + $0x58] sm:$0xff] %vm25_vm3, %v1288_v37  ;;  %v182_v49 = vld [vmem:[%s2371_s0 + $0x2e0] sm:$0xff] }
  0x17   :  { %v295_v22 = vpack.c.bf16 %v117_v19, %v115_v18  ;;  %38 = vst.msk [vmem:[#allocation2 + $0x60] sm:$0xff] %vm25_vm3, %v1288_v37  ;;  %v120_v47 = vld [vmem:[%s2371_s0 + $0xf0] sm:$0xff]  ;;  %v122_v60 = vld [vmem:[%s2371_s0 + $0x100] sm:$0xff]  ;;  %v131_v13 = vld [vmem:[%s2371_s0 + $0x148] sm:$0xff] }
  0x18   :  { %39 = vst.msk [vmem:[#allocation2 + $0x68] sm:$0xff] %vm25_vm3, %v1288_v37  ;;  %v296_v51 = vpack.c.bf16 %v120_v47, %v118_v46  ;;  %v124_v61 = vld [vmem:[%s2371_s0 + $0x110] sm:$0xff]  ;;  %v186_v63 = vld [vmem:[%s2371_s0 + $0x300] sm:$0xff]  ;;  %v133_v14 = vld [vmem:[%s2371_s0 + $0x158] sm:$0xff] }
  0x19   :  { %40 = vst.msk [vmem:[#allocation2 + $0x70] sm:$0xff] %vm25_vm3, %v1288_v37  ;;  %v188_v0 = vld [vmem:[%s2371_s0 + $0x310] sm:$0xff]  ;;  %v298_v1 = vpack.c.bf16 %v124_v61, %v122_v60  ;;  %v1690_v11 = vld [vmem:[%s2372_s2] ss:$0 sm:$0xff]  ;;  %v303_v19 = vpack.c.bf16 %v133_v14, %v131_v13  ;;  %v135_v46 = vld [vmem:[%s2371_s0 + $0x168] sm:$0xff] }
  0x1a   :  { %532 = vmatpush.bf16.msra.mxu0 %v1265_v20  ;;  %1279 = vmatpush.bf16.msra.mxu2 %v1265_v20  ;;  %v183_v20 = vld [vmem:[%s2371_s0 + $0x2e8] sm:$0xff]  ;;  %41 = vst.msk [vmem:[#allocation2 + $0x78] sm:$0xff] %vm25_vm3, %v1288_v37  ;;  %v190_v24 = vld [vmem:[%s2371_s0 + $0x320] sm:$0xff]  ;;  %v137_v47 = vld [vmem:[%s2371_s0 + $0x178] sm:$0xff] }
  0x1b   :  { %v329_v27 = vpack.c.bf16 %v185_v21, %v183_v20  ;;  %42 = vst.msk [vmem:[#allocation2 + $0x80] sm:$0xff] %vm25_vm3, %v1288_v37  ;;  %v126_v20 = vld [vmem:[%s2371_s0 + $0x120] sm:$0xff]  ;;  %v128_v21 = vld [vmem:[%s2371_s0 + $0x130] sm:$0xff] }
  0x1c   :  { %43 = vst.msk [vmem:[#allocation2 + $0x88] sm:$0xff] %vm25_vm3, %v1288_v37 }
  0x1d   :  { %44 = vst.msk [vmem:[#allocation2 + $0x90] sm:$0xff] %vm25_vm3, %v1288_v37 }
  0x1e   :  { %533 = vmatpush.bf16.msra.mxu0 %v1264_v26  ;;  %1280 = vmatpush.bf16.msra.mxu2 %v1264_v26  ;;  %v176_v26 = vld [vmem:[%s2371_s0 + $0x2b0] sm:$0xff]  ;;  %45 = vst.msk [vmem:[#allocation2 + $0x98] sm:$0xff] %vm25_vm3, %v1288_v37 }
  0x1f   :  { %1233 = vmatmul.msk.bf16.gmra.mxu1 %vm422_vm2, %v285_v25  ;;  %1250 = vmatmul.msk.bf16.gmra.mxu3 %vm422_vm2, %v319_v31  ;;  %v174_v25 = vld [vmem:[%s2371_s0 + $0x2a0] sm:$0xff]  ;;  %v121_v31 = vld [vmem:[%s2371_s0 + $0xf8] sm:$0xff]  ;;  %46 = vst.msk [vmem:[#allocation2 + $0xa0] sm:$0xff] %vm25_vm3, %v1288_v37 }
  0x20   :  { %v324_v29 = vpack.c.bf16 %v176_v26, %v174_v25  ;;  %v297_v34 = vpack.c.bf16 %v121_v31, %v119_v30  ;;  %47 = vst.msk [vmem:[#allocation2 + $0xa8] sm:$0xff] %vm25_vm3, %v1288_v37  ;;  %v192_v25 = vld [vmem:[%s2371_s0 + $0x330] sm:$0xff] }
  0x21   :  { %534 = vmatmul.bf16.vlgmr.msra.gmra.mxu0 %v282_v32  ;;  %614 = vmatmul.bf16.vlgmr.msra.gmra.mxu2 %v314_v33  ;;  %v187_v32 = vld [vmem:[%s2371_s0 + $0x308] sm:$0xff]  ;;  %v189_v33 = vld [vmem:[%s2371_s0 + $0x318] sm:$0xff]  ;;  %48 = vst.msk [vmem:[#allocation2 + $0xb0] sm:$0xff] %vm25_vm3, %v1288_v37  ;;  %v332_v30 = vpack.c.bf16 %v192_v25, %v190_v24 }
  0x22   :  { %v331_v40 = vpack.c.bf16 %v189_v33, %v187_v32  ;;  %49 = vst.msk [vmem:[#allocation2 + $0xb8] sm:$0xff] %vm25_vm3, %v1288_v37  ;;  %v219_v33 = vld [vmem:[#allocation2 + $0x8] sm:$0xff] }
  0x23   :  { %50 = vst.msk [vmem:[#allocation2 + $0xc0] sm:$0xff] %vm25_vm3, %v1288_v37 }
  0x24   :  { %51 = vst.msk [vmem:[#allocation2 + $0xc8] sm:$0xff] %vm25_vm3, %v1288_v37 }
  0x25   :  { %52 = vst.msk [vmem:[#allocation2 + $0xd0] sm:$0xff] %vm25_vm3, %v1288_v37 }
  0x26   :  { %53 = vst.msk [vmem:[#allocation2 + $0xd8] sm:$0xff] %vm25_vm3, %v1288_v37 }
  0x27   :  { %54 = vst.msk [vmem:[#allocation2 + $0xe0] sm:$0xff] %vm25_vm3, %v1288_v37 }
  0x28   :  { %55 = vst.msk [vmem:[#allocation2 + $0xe8] sm:$0xff] %vm25_vm3, %v1288_v37 }
  0x29   :  { %56 = vst.msk [vmem:[#allocation2 + $0xf0] sm:$0xff] %vm25_vm3, %v1288_v37 }
  0x2a   :  { %57 = vst.msk [vmem:[#allocation2 + $0xf8] sm:$0xff] %vm25_vm3, %v1288_v37 }
  0x2b   :  { %58 = vst.msk [vmem:[#allocation2 + $0x100] sm:$0xff] %vm25_vm3, %v1288_v37 }
  0x2c   :  { %59 = vst.msk [vmem:[#allocation2 + $0x108] sm:$0xff] %vm25_vm3, %v1288_v37 }
  0x2d   :  { %60 = vst.msk [vmem:[#allocation2 + $0x110] sm:$0xff] %vm25_vm3, %v1288_v37 }
  0x2e   :  { %61 = vst.msk [vmem:[#allocation2 + $0x118] sm:$0xff] %vm25_vm3, %v1288_v37 }
  0x2f   :  { %1234 = vmatmul.msk.bf16.gmra.mxu1 %vm422_vm2, %v287_v38  ;;  %1251 = vmatmul.msk.bf16.gmra.mxu3 %vm422_vm2, %v321_v43  ;;  %v178_v38 = vld [vmem:[%s2371_s0 + $0x2c0] sm:$0xff]  ;;  %v123_v43 = vld [vmem:[%s2371_s0 + $0x108] sm:$0xff]  ;;  %62 = vst.msk [vmem:[#allocation2 + $0x120] sm:$0xff] %vm25_vm3, %v1288_v37 }
  0x30   :  { %v326_v42 = vpack.c.bf16 %v180_v39, %v178_v38  ;;  %63 = vst.msk [vmem:[#allocation2 + $0x128] sm:$0xff] %vm25_vm3, %v1288_v37  ;;  %v199_v38 = vld [vmem:[%s2371_s0 + $0x368] sm:$0xff]  ;;  %v201_v39 = vld [vmem:[%s2371_s0 + $0x378] sm:$0xff] }
  0x31   :  { %539 = vmatmul.bf16.gmra.mxu0 %v284_v44  ;;  %619 = vmatmul.bf16.gmra.mxu2 %v316_v45  ;;  %v125_v44 = vld [vmem:[%s2371_s0 + $0x118] sm:$0xff]  ;;  %64 = vst.msk [vmem:[#allocation2 + $0x130] sm:$0xff] %vm25_vm3, %v1288_v37 }
  0x32   :  { %v299_v45 = vpack.c.bf16 %v125_v44, %v123_v43  ;;  %65 = vst.msk [vmem:[#allocation2 + $0x138] sm:$0xff] %vm25_vm3, %v1288_v37  ;;  %v337_v43 = vpack.c.bf16 %v201_v39, %v199_v38  ;;  %v136_v38 = vld [vmem:[%s2371_s0 + $0x170] sm:$0xff] }
  0x33   :  { %66 = vst.msk [vmem:[#allocation2 + $0x140] sm:$0xff] %vm25_vm3, %v1288_v37 }
  0x34   :  { %67 = vst.msk [vmem:[#allocation2 + $0x148] sm:$0xff] %vm25_vm3, %v1288_v37  ;;  %v252_v44 = vld [vmem:[#allocation2 + $0x110] sm:$0xff] }
  0x35   :  { %68 = vst.msk [vmem:[#allocation2 + $0x150] sm:$0xff] %vm25_vm3, %v1288_v37 }
  0x36   :  { %69 = vst.msk [vmem:[#allocation2 + $0x158] sm:$0xff] %vm25_vm3, %v1288_v37 }
  0x37   :  { %70 = vst.msk [vmem:[#allocation2 + $0x160] sm:$0xff] %vm25_vm3, %v1288_v37 }
  0x38   :  { %71 = vst.msk [vmem:[#allocation2 + $0x168] sm:$0xff] %vm25_vm3, %v1288_v37 }
  0x39   :  { %72 = vst.msk [vmem:[#allocation2 + $0x170] sm:$0xff] %vm25_vm3, %v1288_v37 }
  0x3a   :  { %73 = vst.msk [vmem:[#allocation2 + $0x178] sm:$0xff] %vm25_vm3, %v1288_v37 }
  0x3b   :  { %74 = vst.msk [vmem:[#allocation2 + $0x180] sm:$0xff] %vm25_vm3, %v1288_v37 }
  0x3c   :  { %75 = vst.msk [vmem:[#allocation2 + $0x188] sm:$0xff] %vm25_vm3, %v1288_v37 }
  0x3d   :  { %76 = vst.msk [vmem:[#allocation2 + $0x190] sm:$0xff] %vm25_vm3, %v1288_v37 }
  0x3e   :  { %77 = vst.msk [vmem:[#allocation2 + $0x198] sm:$0xff] %vm25_vm3, %v1288_v37 }
  0x3f   :  { %1235 = vmatmul.msk.bf16.gmra.mxu1 %vm422_vm2, %v289_v50  ;;  %1252 = vmatmul.msk.bf16.gmra.mxu3 %vm422_vm2, %v323_v55  ;;  %v184_v50 = vld [vmem:[%s2371_s0 + $0x2f0] sm:$0xff]  ;;  %v129_v55 = vld [vmem:[%s2371_s0 + $0x138] sm:$0xff]  ;;  %78 = vst.msk [vmem:[#allocation2 + $0x1a0] sm:$0xff] %vm25_vm3, %v1288_v37 }
  0x40   :  { %v328_v52 = vpack.c.bf16 %v184_v50, %v182_v49  ;;  %v301_v59 = vpack.c.bf16 %v129_v55, %v127_v54  ;;  %79 = vst.msk [vmem:[#allocation2 + $0x1a8] sm:$0xff] %vm25_vm3, %v1288_v37  ;;  %v221_v49 = vld [vmem:[#allocation2 + $0x18] sm:$0xff]  ;;  %v132_v54 = vld [vmem:[%s2371_s0 + $0x150] sm:$0xff] }
  0x41   :  { %544 = vmatmul.bf16.gmra.mxu0 %v286_v56  ;;  %624 = vmatmul.bf16.gmra.mxu2 %v318_v57  ;;  %v191_v56 = vld [vmem:[%s2371_s0 + $0x328] sm:$0xff]  ;;  %v193_v57 = vld [vmem:[%s2371_s0 + $0x338] sm:$0xff]  ;;  %80 = vst.msk [vmem:[#allocation2 + $0x1b0] sm:$0xff] %vm25_vm3, %v1288_v37 }
  0x42   :  { %v333_v58 = vpack.c.bf16 %v193_v57, %v191_v56  ;;  %81 = vst.msk [vmem:[#allocation2 + $0x1b8] sm:$0xff] %vm25_vm3, %v1288_v37  ;;  %v194_v57 = vld [vmem:[%s2371_s0 + $0x340] sm:$0xff] }
  0x43   :  { %82 = vst.msk [vmem:[#allocation2 + $0x1c0] sm:$0xff] %vm25_vm3, %v1288_v37 }
  0x44   :  { %83 = vst.msk [vmem:[#allocation2 + $0x1c8] sm:$0xff] %vm25_vm3, %v1288_v37 }
  0x45   :  { %84 = vst.msk [vmem:[#allocation2 + $0x1d0] sm:$0xff] %vm25_vm3, %v1288_v37 }
  0x46   :  { %85 = vst.msk [vmem:[#allocation2 + $0x1d8] sm:$0xff] %vm25_vm3, %v1288_v37 }
  0x47   :  { %86 = vst.msk [vmem:[#allocation2 + $0x1e0] sm:$0xff] %vm25_vm3, %v1288_v37 }
  0x48   :  { %87 = vst.msk [vmem:[#allocation2 + $0x1e8] sm:$0xff] %vm25_vm3, %v1288_v37 }
  0x49   :  { %88 = vst.msk [vmem:[#allocation2 + $0x1f0] sm:$0xff] %vm25_vm3, %v1288_v37 }
  0x4a   :  { %89 = vst.msk [vmem:[#allocation2 + $0x1f8] sm:$0xff] %vm25_vm3, %v1288_v37 }
  0x4f   :  { %1236 = vmatmul.msk.bf16.gmra.mxu1 %vm422_vm2, %v291_v62  ;;  %1253 = vmatmul.msk.bf16.gmra.mxu3 %vm422_vm2, %v325_v3  ;;  %v218_v3 = vld [vmem:[#allocation2] sm:$0xff] }
  0x51   :  { %549 = vmatmul.bf16.gmra.mxu0 %v288_v4  ;;  %629 = vmatmul.bf16.gmra.mxu2 %v320_v5  ;;  %v330_v5 = vpack.c.bf16 %v188_v0, %v186_v63  ;;  %v222_v63 = vld [vmem:[#allocation2 + $0x20] sm:$0xff] }
  0x5f   :  { %1237 = vmatmul.msk.bf16.gmra.mxu1 %vm422_vm2, %v293_v10  ;;  %1254 = vmatmul.msk.bf16.gmra.mxu3 %vm422_vm2, %v327_v15  ;;  %v195_v15 = vld [vmem:[%s2371_s0 + $0x348] sm:$0xff] }
  0x61   :  { %554 = vmatmul.bf16.gmra.mxu0 %v290_v16  ;;  %634 = vmatmul.bf16.gmra.mxu2 %v322_v17  ;;  %v197_v16 = vld [vmem:[%s2371_s0 + $0x358] sm:$0xff] }
  0x62   :  { %v335_v17 = vpack.c.bf16 %v197_v16, %v195_v15  ;;  %v203_v16 = vld [vmem:[%s2371_s0 + $0x388] sm:$0xff] }
  0x6f   :  { %1238 = vmatmul.msk.bf16.gmra.mxu1 %vm422_vm2, %v295_v22  ;;  %1255 = vmatmul.msk.bf16.gmra.mxu3 %vm422_vm2, %v329_v27  ;;  %v300_v27 = vpack.c.bf16 %v128_v21, %v126_v20  ;;  %v223_v21 = vld [vmem:[#allocation2 + $0x28] sm:$0xff] }
  0x71   :  { %559 = vmatmul.bf16.gmra.mxu0 %v292_v28  ;;  %639 = vmatmul.bf16.gmra.mxu2 %v324_v29 }
  0x7f   :  { %1239 = vmatmul.msk.bf16.gmra.mxu1 %vm422_vm2, %v297_v34  ;;  %1256 = vmatmul.msk.bf16.gmra.mxu3 %vm422_vm2, %v331_v40  ;;  %v220_v40 = vld [vmem:[#allocation2 + $0x10] sm:$0xff] }
  0x81   :  { %564 = vmatmul.bf16.gmra.mxu0 %v294_v41  ;;  %644 = vmatmul.bf16.gmra.mxu2 %v326_v42 }
  0x8c   :  { %v704_v48 = vpop.f32.mrf.mxu1 }
  0x8f   :  { %1240 = vmatmul.msk.bf16.gmra.mxu1 %vm422_vm2, %v299_v45  ;;  %1257 = vmatmul.msk.bf16.gmra.mxu3 %vm422_vm2, %v333_v58  ;;  %v196_v58 = vld [vmem:[%s2371_s0 + $0x350] sm:$0xff] }
  0x91   :  { %569 = vmatmul.bf16.gmra.mxu0 %v296_v51  ;;  %649 = vmatmul.bf16.gmra.mxu2 %v328_v52  ;;  %v305_v52 = vpack.c.bf16 %v137_v47, %v135_v46 }
  0x92   :  { %v1665_v2 = vpop.f32.mrf.mxu3 }
  0x94   :  { %v1614_v53 = vpop.f32.mrf.mxu1 }
  0x9a   :  { %v1685_v10 = vpop.f32.mrf.mxu3 }
  0x9c   :  { %v1651_v62 = vpop.f32.mrf.mxu1 }
  0x9e   :  { %v535_v4 = vpop.f32.mrf.mxu0 }
  0x9f   :  { %1241 = vmatmul.msk.bf16.gmra.mxu1 %vm422_vm2, %v301_v59  ;;  %v705_v6 = vadd.f32 %v704_v48, %v535_v4  ;;  %1258 = vmatmul.msk.bf16.gmra.mxu3 %vm422_vm2, %v335_v17  ;;  %v253_v59 = vld [vmem:[#allocation2 + $0x118] sm:$0xff] }
  0xa0   :  { %v205_v17 = vld [vmem:[%s2371_s0 + $0x398] sm:$0xff] }
  0xa1   :  { %v864_v7 = vadd.f32 %v705_v6, %v218_v3  ;;  %574 = vmatmul.bf16.gmra.mxu0 %v298_v1  ;;  %654 = vmatmul.bf16.gmra.mxu2 %v330_v5  ;;  %v334_v1 = vpack.c.bf16 %v196_v58, %v194_v57 }
  0xa2   :  { %v1740_v28 = vpop.f32.mrf.mxu3 }
  0xa3   :  { %929 = vst.msk [vmem:[#allocation2] sm:$0xff] %vm25_vm3, %v864_v7 }
  0xa4   :  { %v711_v8 = vpop.f32.mrf.mxu1  ;;  %v1683_v9 = vpop.f32.mrf.mxu2 }
  0xa6   :  { %v537_v12 = vpop.f32.mrf.mxu0 }
  0xa7   :  { %v707_v32 = vadd.f32 %v1614_v53, %v537_v12  ;;  %v130_v53 = vld [vmem:[%s2371_s0 + $0x140] sm:$0xff] }
  0xa8   :  { %v302_v61 = vpack.c.bf16 %v132_v54, %v130_v53 }
  0xa9   :  { %v865_v48 = vadd.f32 %v707_v32, %v219_v33 }
  0xaa   :  { %v996_v18 = vld [vmem:[#allocation2] sm:$0xff]  ;;  %v1763_v36 = vpop.f32.mrf.mxu3 }
  0xab   :  { %v1064_v22 = vadd.f32 %v1690_v11, %v996_v18  ;;  %930 = vst.msk [vmem:[#allocation2 + $0x8] sm:$0xff] %vm25_vm3, %v865_v48  ;;  %v224_v48 = vld [vmem:[#allocation2 + $0x30] sm:$0xff] }
  0xac   :  { %v1724_v23 = vpop.f32.mrf.mxu1  ;;  %v1738_v26 = vpop.f32.mrf.mxu2 }
  0xad   :  { %1128 = vst.msk [vmem:[%s2373_s5] sm:$0xff] %vm25_vm3, %v1064_v22 }
  0xae   :  { %v540_v29 = vpop.f32.mrf.mxu0 }
  0xaf   :  { %1242 = vmatmul.msk.bf16.gmra.mxu1 %vm422_vm2, %v303_v19  ;;  %v710_v34 = vadd.f32 %v1651_v62, %v540_v29  ;;  %1259 = vmatmul.msk.bf16.gmra.mxu3 %vm422_vm2, %v337_v43  ;;  %v255_v43 = vld [vmem:[#allocation2 + $0x128] sm:$0xff] }
  0xb1   :  { %579 = vmatmul.bf16.gmra.mxu0 %v300_v27  ;;  %659 = vmatmul.bf16.gmra.mxu2 %v332_v30  ;;  %v866_v50 = vadd.f32 %v710_v34, %v220_v40  ;;  %v139_v27 = vld [vmem:[%s2371_s0 + $0x188] sm:$0xff] }
  0xb2   :  { %v1807_v62 = vpop.f32.mrf.mxu3  ;;  %v997_v5 = vld [vmem:[#allocation2 + $0x8] sm:$0xff] }
  0xb3   :  { %931 = vst.msk [vmem:[#allocation2 + $0x10] sm:$0xff] %vm25_vm3, %v866_v50  ;;  %v1065_v7 = vadd.f32 %v1690_v11, %v997_v5  ;;  %v145_v5 = vld [vmem:[%s2371_s0 + $0x1b8] sm:$0xff] }
  0xb4   :  { %v1755_v31 = vpop.f32.mrf.mxu1  ;;  %v620_v35 = vpop.f32.mrf.mxu2 }
  0xb5   :  { %v790_v41 = vadd.f32 %v1665_v2, %v620_v35  ;;  %1129 = vst.msk [vmem:[%s2373_s5 + $0x8] sm:$0xff] %vm25_vm3, %v1065_v7  ;;  %v134_v35 = vld [vmem:[%s2371_s0 + $0x160] sm:$0xff] }
  0xb6   :  { %v542_v42 = vpop.f32.mrf.mxu0 }
  0xb7   :  { %v712_v45 = vadd.f32 %v711_v8, %v542_v42  ;;  %v898_v51 = vadd.f32 %v790_v41, %v252_v44  ;;  %v198_v41 = vld [vmem:[%s2371_s0 + $0x360] sm:$0xff]  ;;  %v200_v42 = vld [vmem:[%s2371_s0 + $0x370] sm:$0xff] }
  0xb8   :  { %v336_v50 = vpack.c.bf16 %v200_v42, %v198_v41  ;;  %v211_v41 = vld [vmem:[%s2371_s0 + $0x3c8] sm:$0xff]  ;;  %v213_v42 = vld [vmem:[%s2371_s0 + $0x3d8] sm:$0xff] }
  0xb9   :  { %v867_v55 = vadd.f32 %v712_v45, %v221_v49  ;;  %963 = vst.msk [vmem:[#allocation2 + $0x110] sm:$0xff] %vm25_vm3, %v898_v51  ;;  %v304_v45 = vpack.c.bf16 %v136_v38, %v134_v35  ;;  %v258_v38 = vld [vmem:[#allocation2 + $0x140] sm:$0xff] }
  0xba   :  { %v998_v8 = vld [vmem:[#allocation2 + $0x10] sm:$0xff]  ;;  %v1820_v15 = vpop.f32.mrf.mxu3 }
  0xbb   :  { %932 = vst.msk [vmem:[#allocation2 + $0x18] sm:$0xff] %vm25_vm3, %v867_v55  ;;  %v1066_v12 = vadd.f32 %v1690_v11, %v998_v8 }
  0xbc   :  { %v1797_v56 = vpop.f32.mrf.mxu1  ;;  %v622_v60 = vpop.f32.mrf.mxu2 }
  0xbd   :  { %v792_v37 = vadd.f32 %v1685_v10, %v622_v60  ;;  %v254_v10 = vld [vmem:[#allocation2 + $0x120] sm:$0xff]  ;;  %1130 = vst.msk [vmem:[%s2373_s5 + $0x10] sm:$0xff] %vm25_vm3, %v1066_v12 }
  0xbe   :  { %v545_v0 = vpop.f32.mrf.mxu0 }
  0xbf   :  { %1243 = vmatmul.msk.bf16.gmra.mxu1 %vm422_vm2, %v305_v52  ;;  %v715_v2 = vadd.f32 %v1724_v23, %v545_v0  ;;  %v899_v3 = vadd.f32 %v792_v37, %v253_v59  ;;  %v339_v23 = vpack.c.bf16 %v205_v17, %v203_v16  ;;  %v209_v37 = vld [vmem:[%s2371_s0 + $0x3b8] sm:$0xff] }
  0xc0   :  { %v1030_v13 = vld [vmem:[#allocation2 + $0x110] sm:$0xff]  ;;  %v225_v0 = vld [vmem:[#allocation2 + $0x38] sm:$0xff] }
  0xc1   :  { %v868_v4 = vadd.f32 %v715_v2, %v222_v63  ;;  %584 = vmatmul.bf16.gmra.mxu0 %v302_v61  ;;  %964 = vst.msk [vmem:[#allocation2 + $0x118] sm:$0xff] %vm25_vm3, %v899_v3  ;;  %664 = vmatmul.bf16.gmra.mxu2 %v334_v1  ;;  %v1098_v18 = vadd.f32 %v1690_v11, %v1030_v13  ;;  %v207_v61 = vld [vmem:[%s2371_s0 + $0x3a8] sm:$0xff] }
  0xc2   :  { %v999_v19 = vld [vmem:[#allocation2 + $0x18] sm:$0xff]  ;;  %1260 = vmatmul.msk.bf16.gmra.mxu3 %vm422_vm2, %v339_v23  ;;  %v1881_v46 = vpop.f32.mrf.mxu3  ;;  %v341_v2 = vpack.c.bf16 %v209_v37, %v207_v61  ;;  %v208_v61 = vld [vmem:[%s2371_s0 + $0x3b0] sm:$0xff]  ;;  %v259_v37 = vld [vmem:[#allocation2 + $0x148] sm:$0xff] }
  0xc3   :  { %933 = vst.msk [vmem:[#allocation2 + $0x20] sm:$0xff] %vm25_vm3, %v868_v4  ;;  %v1067_v24 = vadd.f32 %v1690_v11, %v999_v19  ;;  %v143_v4 = vld [vmem:[%s2371_s0 + $0x1a8] sm:$0xff]  ;;  %v204_v19 = vld [vmem:[%s2371_s0 + $0x390] sm:$0xff] }
  0xc4   :  { %v1816_v6 = vpop.f32.mrf.mxu1  ;;  %v625_v14 = vpop.f32.mrf.mxu2  ;;  %1162 = vst.msk [vmem:[%s2373_s5 + $0x110] sm:$0xff] %vm25_vm3, %v1098_v18  ;;  %v202_v18 = vld [vmem:[%s2371_s0 + $0x380] sm:$0xff] }
  0xc5   :  { %v795_v20 = vadd.f32 %v1740_v28, %v625_v14  ;;  %v141_v28 = vld [vmem:[%s2371_s0 + $0x198] sm:$0xff]  ;;  %1131 = vst.msk [vmem:[%s2373_s5 + $0x18] sm:$0xff] %vm25_vm3, %v1067_v24  ;;  %v140_v14 = vld [vmem:[%s2371_s0 + $0x190] sm:$0xff] }
  0xc6   :  { %v547_v22 = vpop.f32.mrf.mxu0  ;;  %v307_v34 = vpack.c.bf16 %v141_v28, %v139_v27  ;;  %v338_v28 = vpack.c.bf16 %v204_v19, %v202_v18  ;;  %v215_v18 = vld [vmem:[%s2371_s0 + $0x3e8] sm:$0xff]  ;;  %v217_v19 = vld [vmem:[%s2371_s0 + $0x3f8] sm:$0xff] }
  0xc7   :  { %v717_v25 = vadd.f32 %v1755_v31, %v547_v22  ;;  %v900_v29 = vadd.f32 %v795_v20, %v254_v10  ;;  %v257_v20 = vld [vmem:[#allocation2 + $0x138] sm:$0xff] }
  0xc8   :  { %v1031_v30 = vld [vmem:[#allocation2 + $0x118] sm:$0xff] }
  0xc9   :  { %v869_v31 = vadd.f32 %v717_v25, %v223_v21  ;;  %v1099_v32 = vadd.f32 %v1690_v11, %v1031_v30  ;;  %965 = vst.msk [vmem:[#allocation2 + $0x120] sm:$0xff] %vm25_vm3, %v900_v29  ;;  %v226_v25 = vld [vmem:[#allocation2 + $0x40] sm:$0xff] }
  0xca   :  { %v1000_v33 = vld [vmem:[#allocation2 + $0x20] sm:$0xff]  ;;  %v1900_v60 = vpop.f32.mrf.mxu3 }
  0xcb   :  { %v1068_v39 = vadd.f32 %v1690_v11, %v1000_v33  ;;  %934 = vst.msk [vmem:[#allocation2 + $0x28] sm:$0xff] %vm25_vm3, %v869_v31 }
  0xcc   :  { %v1865_v40 = vpop.f32.mrf.mxu1  ;;  %1163 = vst.msk [vmem:[%s2373_s5 + $0x118] sm:$0xff] %vm25_vm3, %v1099_v32  ;;  %v627_v44 = vpop.f32.mrf.mxu2 }
  0xcd   :  { %1132 = vst.msk [vmem:[%s2373_s5 + $0x20] sm:$0xff] %vm25_vm3, %v1068_v39  ;;  %v797_v47 = vadd.f32 %v1763_v36, %v627_v44  ;;  %v227_v44 = vld [vmem:[#allocation2 + $0x48] sm:$0xff] }
  0xce   :  { %v550_v49 = vpop.f32.mrf.mxu0 }
  0xcf   :  { %1244 = vmatmul.msk.bf16.gmra.mxu1 %vm422_vm2, %v307_v34  ;;  %v720_v51 = vadd.f32 %v1797_v56, %v550_v49  ;;  %v901_v52 = vadd.f32 %v797_v47, %v255_v43  ;;  %v256_v56 = vld [vmem:[#allocation2 + $0x130] sm:$0xff]  ;;  %v343_v47 = vpack.c.bf16 %v213_v42, %v211_v41  ;;  %v147_v49 = vld [vmem:[%s2371_s0 + $0x1c8] sm:$0xff]  ;;  %v261_v42 = vld [vmem:[#allocation2 + $0x158] sm:$0xff] }
  0xd0   :  { %v1032_v53 = vld [vmem:[#allocation2 + $0x120] sm:$0xff]  ;;  %v212_v41 = vld [vmem:[%s2371_s0 + $0x3d0] sm:$0xff] }
  0xd1   :  { %v870_v54 = vadd.f32 %v720_v51, %v224_v48  ;;  %589 = vmatmul.bf16.gmra.mxu0 %v304_v45  ;;  %v1100_v55 = vadd.f32 %v1690_v11, %v1032_v53  ;;  %966 = vst.msk [vmem:[#allocation2 + $0x128] sm:$0xff] %vm25_vm3, %v901_v52  ;;  %669 = vmatmul.bf16.gmra.mxu2 %v336_v50  ;;  %v149_v50 = vld [vmem:[%s2371_s0 + $0x1d8] sm:$0xff] }
  0xd2   :  { %v1001_v57 = vld [vmem:[#allocation2 + $0x28] sm:$0xff]  ;;  %1261 = vmatmul.msk.bf16.gmra.mxu3 %vm422_vm2, %v341_v2  ;;  %v1943_v23 = vpop.f32.mrf.mxu3 }
  0xd3   :  { %v1069_v58 = vadd.f32 %v1690_v11, %v1001_v57  ;;  %935 = vst.msk [vmem:[#allocation2 + $0x30] sm:$0xff] %vm25_vm3, %v870_v54  ;;  %v142_v57 = vld [vmem:[%s2371_s0 + $0x1a0] sm:$0xff] }
  0xd4   :  { %v1890_v36 = vpop.f32.mrf.mxu1  ;;  %1164 = vst.msk [vmem:[%s2373_s5 + $0x120] sm:$0xff] %vm25_vm3, %v1100_v55  ;;  %v630_v59 = vpop.f32.mrf.mxu2 }
  0xd5   :  { %1133 = vst.msk [vmem:[%s2373_s5 + $0x28] sm:$0xff] %vm25_vm3, %v1069_v58  ;;  %v800_v63 = vadd.f32 %v1807_v62, %v630_v59  ;;  %v309_v62 = vpack.c.bf16 %v145_v5, %v143_v4  ;;  %v144_v58 = vld [vmem:[%s2371_s0 + $0x1b0] sm:$0xff]  ;;  %v206_v59 = vld [vmem:[%s2371_s0 + $0x3a0] sm:$0xff] }
  0xd6   :  { %v552_v1 = vpop.f32.mrf.mxu0  ;;  %v340_v5 = vpack.c.bf16 %v208_v61, %v206_v59  ;;  %v231_v61 = vld [vmem:[#allocation2 + $0x68] sm:$0xff] }
  0xd7   :  { %v722_v3 = vadd.f32 %v1816_v6, %v552_v1  ;;  %v902_v7 = vadd.f32 %v800_v63, %v256_v56  ;;  %v138_v6 = vld [vmem:[%s2371_s0 + $0x180] sm:$0xff] }
  0xd8   :  { %v1033_v8 = vld [vmem:[#allocation2 + $0x128] sm:$0xff]  ;;  %v306_v22 = vpack.c.bf16 %v140_v14, %v138_v6  ;;  %v260_v14 = vld [vmem:[#allocation2 + $0x150] sm:$0xff] }
  0xd9   :  { %v871_v10 = vadd.f32 %v722_v3, %v225_v0  ;;  %v1101_v12 = vadd.f32 %v1690_v11, %v1033_v8  ;;  %967 = vst.msk [vmem:[#allocation2 + $0x130] sm:$0xff] %vm25_vm3, %v902_v7  ;;  %v308_v0 = vpack.c.bf16 %v144_v58, %v142_v57  ;;  %v228_v3 = vld [vmem:[#allocation2 + $0x50] sm:$0xff]  ;;  %v262_v58 = vld [vmem:[#allocation2 + $0x160] sm:$0xff] }
  0xda   :  { %v1002_v13 = vld [vmem:[#allocation2 + $0x30] sm:$0xff] }
  0xdb   :  { %v1070_v16 = vadd.f32 %v1690_v11, %v1002_v13  ;;  %936 = vst.msk [vmem:[#allocation2 + $0x38] sm:$0xff] %vm25_vm3, %v871_v10 }
  0xdc   :  { %v1927_v17 = vpop.f32.mrf.mxu1  ;;  %1165 = vst.msk [vmem:[%s2373_s5 + $0x128] sm:$0xff] %vm25_vm3, %v1101_v12  ;;  %v632_v21 = vpop.f32.mrf.mxu2 }
  0xdd   :  { %1134 = vst.msk [vmem:[%s2373_s5 + $0x30] sm:$0xff] %vm25_vm3, %v1070_v16  ;;  %v802_v24 = vadd.f32 %v1820_v15, %v632_v21  ;;  %v229_v21 = vld [vmem:[#allocation2 + $0x58] sm:$0xff] }
  0xde   :  { %v555_v27 = vpop.f32.mrf.mxu0 }
  0xdf   :  { %1245 = vmatmul.msk.bf16.gmra.mxu1 %vm422_vm2, %v309_v62  ;;  %v725_v29 = vadd.f32 %v1865_v40, %v555_v27  ;;  %v903_v30 = vadd.f32 %v802_v24, %v257_v20  ;;  %v1962_v40 = vpop.f32.mrf.mxu3  ;;  %v345_v24 = vpack.c.bf16 %v217_v19, %v215_v18  ;;  %v151_v27 = vld [vmem:[%s2371_s0 + $0x1e8] sm:$0xff] }
  0xe0   :  { %v1034_v31 = vld [vmem:[#allocation2 + $0x130] sm:$0xff] }
  0xe1   :  { %v872_v32 = vadd.f32 %v725_v29, %v226_v25  ;;  %594 = vmatmul.bf16.gmra.mxu0 %v306_v22  ;;  %v1102_v33 = vadd.f32 %v1690_v11, %v1034_v31  ;;  %968 = vst.msk [vmem:[#allocation2 + $0x138] sm:$0xff] %vm25_vm3, %v903_v30  ;;  %674 = vmatmul.bf16.gmra.mxu2 %v338_v28  ;;  %v153_v28 = vld [vmem:[%s2371_s0 + $0x1f8] sm:$0xff] }
  0xe2   :  { %v1003_v34 = vld [vmem:[#allocation2 + $0x38] sm:$0xff]  ;;  %1262 = vmatmul.msk.bf16.gmra.mxu3 %vm422_vm2, %v343_v47 }
  0xe3   :  { %v1071_v35 = vadd.f32 %v1690_v11, %v1003_v34  ;;  %937 = vst.msk [vmem:[#allocation2 + $0x40] sm:$0xff] %vm25_vm3, %v872_v32  ;;  %v146_v34 = vld [vmem:[%s2371_s0 + $0x1c0] sm:$0xff] }
  0xe4   :  { %v1952_v15 = vpop.f32.mrf.mxu1  ;;  %1166 = vst.msk [vmem:[%s2373_s5 + $0x130] sm:$0xff] %vm25_vm3, %v1102_v33  ;;  %v635_v39 = vpop.f32.mrf.mxu2 }
  0xe5   :  { %1135 = vst.msk [vmem:[%s2373_s5 + $0x38] sm:$0xff] %vm25_vm3, %v1071_v35  ;;  %v805_v43 = vadd.f32 %v1881_v46, %v635_v39  ;;  %v311_v46 = vpack.c.bf16 %v149_v50, %v147_v49  ;;  %v148_v35 = vld [vmem:[%s2371_s0 + $0x1d0] sm:$0xff]  ;;  %v210_v39 = vld [vmem:[%s2371_s0 + $0x3c0] sm:$0xff] }
  0xe6   :  { %v557_v45 = vpop.f32.mrf.mxu0  ;;  %v342_v50 = vpack.c.bf16 %v212_v41, %v210_v39 }
  0xe7   :  { %v727_v48 = vadd.f32 %v1890_v36, %v557_v45  ;;  %v904_v51 = vadd.f32 %v805_v43, %v258_v38  ;;  %v2005_v1 = vpop.f32.mrf.mxu3 }
  0xe8   :  { %v1035_v52 = vld [vmem:[#allocation2 + $0x138] sm:$0xff] }
  0xe9   :  { %v873_v53 = vadd.f32 %v727_v48, %v227_v44  ;;  %v1103_v54 = vadd.f32 %v1690_v11, %v1035_v52  ;;  %969 = vst.msk [vmem:[#allocation2 + $0x140] sm:$0xff] %vm25_vm3, %v904_v51  ;;  %v310_v44 = vpack.c.bf16 %v148_v35, %v146_v34  ;;  %v230_v48 = vld [vmem:[#allocation2 + $0x60] sm:$0xff] }
  0xea   :  { %v1004_v55 = vld [vmem:[#allocation2 + $0x40] sm:$0xff] }
  0xeb   :  { %v1072_v36 = vadd.f32 %v1690_v11, %v1004_v55  ;;  %938 = vst.msk [vmem:[#allocation2 + $0x48] sm:$0xff] %vm25_vm3, %v873_v53 }
  0xec   :  { %v1989_v56 = vpop.f32.mrf.mxu1  ;;  %1167 = vst.msk [vmem:[%s2373_s5 + $0x138] sm:$0xff] %vm25_vm3, %v1103_v54  ;;  %v637_v63 = vpop.f32.mrf.mxu2 }
  0xed   :  { %1136 = vst.msk [vmem:[%s2373_s5 + $0x40] sm:$0xff] %vm25_vm3, %v1072_v36  ;;  %v807_v2 = vadd.f32 %v1900_v60, %v637_v63 }
  0xee   :  { %v560_v4 = vpop.f32.mrf.mxu0 }
  0xef   :  { %1246 = vmatmul.msk.bf16.gmra.mxu1 %vm422_vm2, %v311_v46  ;;  %v730_v7 = vadd.f32 %v1927_v17, %v560_v4  ;;  %v905_v8 = vadd.f32 %v807_v2, %v259_v37  ;;  %v2022_v17 = vpop.f32.mrf.mxu3  ;;  %v157_v2 = vld [vmem:[%s2371_s0 + $0x218] sm:$0xff] }
  0xf0   :  { %v1036_v10 = vld [vmem:[#allocation2 + $0x140] sm:$0xff] }
  0xf1   :  { %v874_v12 = vadd.f32 %v730_v7, %v228_v3  ;;  %599 = vmatmul.bf16.gmra.mxu0 %v308_v0  ;;  %v1104_v13 = vadd.f32 %v1690_v11, %v1036_v10  ;;  %970 = vst.msk [vmem:[#allocation2 + $0x148] sm:$0xff] %vm25_vm3, %v905_v8  ;;  %679 = vmatmul.bf16.gmra.mxu2 %v340_v5  ;;  %v155_v0 = vld [vmem:[%s2371_s0 + $0x208] sm:$0xff]  ;;  %v150_v10 = vld [vmem:[%s2371_s0 + $0x1e0] sm:$0xff] }
  0xf2   :  { %v1005_v62 = vld [vmem:[#allocation2 + $0x48] sm:$0xff]  ;;  %1263 = vmatmul.msk.bf16.gmra.mxu3 %vm422_vm2, %v345_v24 }
  0xf3   :  { %v1073_v6 = vadd.f32 %v1690_v11, %v1005_v62  ;;  %939 = vst.msk [vmem:[#allocation2 + $0x50] sm:$0xff] %vm25_vm3, %v874_v12  ;;  %v152_v12 = vld [vmem:[%s2371_s0 + $0x1f0] sm:$0xff] }
  0xf4   :  { %v736_v60 = vpop.f32.mrf.mxu1  ;;  %1168 = vst.msk [vmem:[%s2373_s5 + $0x140] sm:$0xff] %vm25_vm3, %v1104_v13  ;;  %v640_v16 = vpop.f32.mrf.mxu2  ;;  %v312_v18 = vpack.c.bf16 %v152_v12, %v150_v10 }
  0xf5   :  { %1137 = vst.msk [vmem:[%s2373_s5 + $0x48] sm:$0xff] %vm25_vm3, %v1073_v6  ;;  %v810_v20 = vadd.f32 %v1943_v23, %v640_v16  ;;  %v313_v23 = vpack.c.bf16 %v153_v28, %v151_v27  ;;  %v214_v6 = vld [vmem:[%s2371_s0 + $0x3e0] sm:$0xff] }
  0xf6   :  { %v562_v22 = vpop.f32.mrf.mxu0 }
  0xf7   :  { %v732_v25 = vadd.f32 %v1952_v15, %v562_v22  ;;  %v906_v29 = vadd.f32 %v810_v20, %v260_v14  ;;  %v2063_v45 = vpop.f32.mrf.mxu3  ;;  %v263_v14 = vld [vmem:[#allocation2 + $0x168] sm:$0xff] }
  0xf8   :  { %v1037_v30 = vld [vmem:[#allocation2 + $0x148] sm:$0xff] }
  0xf9   :  { %v875_v31 = vadd.f32 %v732_v25, %v229_v21  ;;  %v1105_v32 = vadd.f32 %v1690_v11, %v1037_v30  ;;  %971 = vst.msk [vmem:[#allocation2 + $0x150] sm:$0xff] %vm25_vm3, %v906_v29  ;;  %v232_v21 = vld [vmem:[#allocation2 + $0x70] sm:$0xff] }
  0xfa   :  { %v1006_v33 = vld [vmem:[#allocation2 + $0x50] sm:$0xff] }
  0xfb   :  { %v1074_v15 = vadd.f32 %v1690_v11, %v1006_v33  ;;  %940 = vst.msk [vmem:[#allocation2 + $0x58] sm:$0xff] %vm25_vm3, %v875_v31  ;;  %v264_v33 = vld [vmem:[#allocation2 + $0x170] sm:$0xff] }
  0xfc   :  { %v739_v38 = vpop.f32.mrf.mxu1  ;;  %1169 = vst.msk [vmem:[%s2373_s5 + $0x148] sm:$0xff] %vm25_vm3, %v1105_v32  ;;  %v642_v43 = vpop.f32.mrf.mxu2 }
  0xfd   :  { %1138 = vst.msk [vmem:[%s2373_s5 + $0x50] sm:$0xff] %vm25_vm3, %v1074_v15  ;;  %v812_v47 = vadd.f32 %v1962_v40, %v642_v43  ;;  %v233_v15 = vld [vmem:[#allocation2 + $0x78] sm:$0xff] }
  0xfe   :  { %v565_v49 = vpop.f32.mrf.mxu0 }
  0xff   :  { %1247 = vmatmul.msk.bf16.gmra.mxu1 %vm422_vm2, %v313_v23  ;;  %v735_v51 = vadd.f32 %v1989_v56, %v565_v49  ;;  %v907_v52 = vadd.f32 %v812_v47, %v261_v42  ;;  %v2080_v56 = vpop.f32.mrf.mxu3 }
 0x100   :  { %v1038_v53 = vld [vmem:[#allocation2 + $0x150] sm:$0xff] }
 0x101   :  { %v876_v54 = vadd.f32 %v735_v51, %v230_v48  ;;  %604 = vmatmul.bf16.gmra.mxu0 %v310_v44  ;;  %v1106_v55 = vadd.f32 %v1690_v11, %v1038_v53  ;;  %972 = vst.msk [vmem:[#allocation2 + $0x158] sm:$0xff] %vm25_vm3, %v907_v52  ;;  %684 = vmatmul.bf16.gmra.mxu2 %v342_v50  ;;  %v234_v53 = vld [vmem:[#allocation2 + $0x80] sm:$0xff] }
 0x102   :  { %v1007_v46 = vld [vmem:[#allocation2 + $0x58] sm:$0xff] }
 0x103   :  { %v1075_v57 = vadd.f32 %v1690_v11, %v1007_v46  ;;  %941 = vst.msk [vmem:[#allocation2 + $0x60] sm:$0xff] %vm25_vm3, %v876_v54 }
 0x104   :  { %v741_v40 = vpop.f32.mrf.mxu1  ;;  %1170 = vst.msk [vmem:[%s2373_s5 + $0x150] sm:$0xff] %vm25_vm3, %v1106_v55  ;;  %v645_v36 = vpop.f32.mrf.mxu2 }
 0x105   :  { %1139 = vst.msk [vmem:[%s2373_s5 + $0x58] sm:$0xff] %vm25_vm3, %v1075_v57  ;;  %v815_v59 = vadd.f32 %v2005_v1, %v645_v36  ;;  %v315_v1 = vpack.c.bf16 %v157_v2, %v155_v0  ;;  %v235_v2 = vld [vmem:[#allocation2 + $0x88] sm:$0xff] }
 0x106   :  { %v567_v37 = vpop.f32.mrf.mxu0 }
 0x107   :  { %v737_v63 = vadd.f32 %v736_v60, %v567_v37  ;;  %v908_v3 = vadd.f32 %v815_v59, %v262_v58  ;;  %v216_v60 = vld [vmem:[%s2371_s0 + $0x3f0] sm:$0xff]  ;;  %v824_v19 = vpop.f32.mrf.mxu3 }
 0x108   :  { %v1039_v4 = vld [vmem:[#allocation2 + $0x158] sm:$0xff]  ;;  %v344_v24 = vpack.c.bf16 %v216_v60, %v214_v6 }
 0x109   :  { %v877_v5 = vadd.f32 %v737_v63, %v231_v61  ;;  %v1107_v7 = vadd.f32 %v1690_v11, %v1039_v4  ;;  %973 = vst.msk [vmem:[#allocation2 + $0x160] sm:$0xff] %vm25_vm3, %v908_v3 }
 0x10a   :  { %v1008_v8 = vld [vmem:[#allocation2 + $0x60] sm:$0xff] }
 0x10b   :  { %v1076_v13 = vadd.f32 %v1690_v11, %v1008_v8  ;;  %942 = vst.msk [vmem:[#allocation2 + $0x68] sm:$0xff] %vm25_vm3, %v877_v5 }
 0x10c   :  { %v744_v62 = vpop.f32.mrf.mxu1  ;;  %1171 = vst.msk [vmem:[%s2373_s5 + $0x158] sm:$0xff] %vm25_vm3, %v1107_v7  ;;  %v647_v16 = vpop.f32.mrf.mxu2 }
 0x10d   :  { %1140 = vst.msk [vmem:[%s2373_s5 + $0x60] sm:$0xff] %vm25_vm3, %v1076_v13  ;;  %v817_v20 = vadd.f32 %v2022_v17, %v647_v16 }
 0x10e   :  { %v570_v22 = vpop.f32.mrf.mxu0 }
 0x10f   :  { %1248 = vmatmul.msk.bf16.gmra.mxu1 %vm422_vm2, %v315_v1  ;;  %v740_v25 = vadd.f32 %v739_v38, %v570_v22  ;;  %v909_v27 = vadd.f32 %v817_v20, %v263_v14  ;;  %v826_v34 = vpop.f32.mrf.mxu3  ;;  %v236_v14 = vld [vmem:[#allocation2 + $0x90] sm:$0xff] }
 0x110   :  { %v1040_v28 = vld [vmem:[#allocation2 + $0x160] sm:$0xff] }
 0x111   :  { %v878_v29 = vadd.f32 %v740_v25, %v232_v21  ;;  %609 = vmatmul.bf16.gmra.mxu0 %v312_v18  ;;  %v1108_v30 = vadd.f32 %v1690_v11, %v1040_v28  ;;  %974 = vst.msk [vmem:[#allocation2 + $0x168] sm:$0xff] %vm25_vm3, %v909_v27  ;;  %689 = vmatmul.bf16.gmra.mxu2 %v344_v24 }
 0x112   :  { %v1009_v31 = vld [vmem:[#allocation2 + $0x68] sm:$0xff] }
 0x113   :  { %v1077_v32 = vadd.f32 %v1690_v11, %v1009_v31  ;;  %943 = vst.msk [vmem:[#allocation2 + $0x70] sm:$0xff] %vm25_vm3, %v878_v29  ;;  %v268_v29 = vld [vmem:[#allocation2 + $0x190] sm:$0xff] }
 0x114   :  { %v746_v17 = vpop.f32.mrf.mxu1  ;;  %1172 = vst.msk [vmem:[%s2373_s5 + $0x160] sm:$0xff] %vm25_vm3, %v1108_v30  ;;  %v650_v23 = vpop.f32.mrf.mxu2 }
 0x115   :  { %1141 = vst.msk [vmem:[%s2373_s5 + $0x68] sm:$0xff] %vm25_vm3, %v1077_v32  ;;  %v820_v35 = vadd.f32 %v2063_v45, %v650_v23  ;;  %v265_v45 = vld [vmem:[#allocation2 + $0x178] sm:$0xff] }
 0x116   :  { %v572_v38 = vpop.f32.mrf.mxu0  ;;  %v237_v32 = vld [vmem:[#allocation2 + $0x98] sm:$0xff] }
 0x117   :  { %v742_v39 = vadd.f32 %v741_v40, %v572_v38  ;;  %v910_v41 = vadd.f32 %v820_v35, %v264_v33  ;;  %v829_v51 = vpop.f32.mrf.mxu3 }
 0x118   :  { %v1041_v42 = vld [vmem:[#allocation2 + $0x168] sm:$0xff] }
 0x119   :  { %v879_v43 = vadd.f32 %v742_v39, %v233_v15  ;;  %v1109_v44 = vadd.f32 %v1690_v11, %v1041_v42  ;;  %975 = vst.msk [vmem:[#allocation2 + $0x170] sm:$0xff] %vm25_vm3, %v910_v41 }
 0x11a   :  { %v1010_v47 = vld [vmem:[#allocation2 + $0x70] sm:$0xff] }
 0x11b   :  { %v1078_v48 = vadd.f32 %v1690_v11, %v1010_v47  ;;  %944 = vst.msk [vmem:[#allocation2 + $0x78] sm:$0xff] %vm25_vm3, %v879_v43  ;;  %v269_v43 = vld [vmem:[#allocation2 + $0x198] sm:$0xff] }
 0x11c   :  { %v749_v49 = vpop.f32.mrf.mxu1  ;;  %1173 = vst.msk [vmem:[%s2373_s5 + $0x168] sm:$0xff] %vm25_vm3, %v1109_v44  ;;  %v652_v50 = vpop.f32.mrf.mxu2 }
 0x11d   :  { %1142 = vst.msk [vmem:[%s2373_s5 + $0x70] sm:$0xff] %vm25_vm3, %v1078_v48  ;;  %v822_v52 = vadd.f32 %v2080_v56, %v652_v50  ;;  %v266_v56 = vld [vmem:[#allocation2 + $0x180] sm:$0xff] }
 0x11e   :  { %v575_v54 = vpop.f32.mrf.mxu0  ;;  %v238_v48 = vld [vmem:[#allocation2 + $0xa0] sm:$0xff] }
 0x11f   :  { %v745_v55 = vadd.f32 %v744_v62, %v575_v54  ;;  %v911_v46 = vadd.f32 %v822_v52, %v265_v45  ;;  %v831_v63 = vpop.f32.mrf.mxu3  ;;  %v267_v62 = vld [vmem:[#allocation2 + $0x188] sm:$0xff] }
 0x120   :  { %v1042_v57 = vld [vmem:[#allocation2 + $0x170] sm:$0xff] }
 0x121   :  { %v880_v40 = vadd.f32 %v745_v55, %v234_v53  ;;  %v1110_v58 = vadd.f32 %v1690_v11, %v1042_v57  ;;  %976 = vst.msk [vmem:[#allocation2 + $0x178] sm:$0xff] %vm25_vm3, %v911_v46 }
 0x122   :  { %v1011_v36 = vld [vmem:[#allocation2 + $0x78] sm:$0xff] }
 0x123   :  { %v1079_v59 = vadd.f32 %v1690_v11, %v1011_v36  ;;  %945 = vst.msk [vmem:[#allocation2 + $0x80] sm:$0xff] %vm25_vm3, %v880_v40  ;;  %v270_v40 = vld [vmem:[#allocation2 + $0x1a0] sm:$0xff] }
 0x124   :  { %v751_v61 = vpop.f32.mrf.mxu1  ;;  %1174 = vst.msk [vmem:[%s2373_s5 + $0x170] sm:$0xff] %vm25_vm3, %v1110_v58  ;;  %v655_v37 = vpop.f32.mrf.mxu2 }
 0x125   :  { %1143 = vst.msk [vmem:[%s2373_s5 + $0x78] sm:$0xff] %vm25_vm3, %v1079_v59  ;;  %v825_v0 = vadd.f32 %v824_v19, %v655_v37  ;;  %v239_v59 = vld [vmem:[#allocation2 + $0xa8] sm:$0xff] }
 0x126   :  { %v577_v3 = vpop.f32.mrf.mxu0 }
 0x127   :  { %v747_v4 = vadd.f32 %v746_v17, %v577_v3  ;;  %v912_v5 = vadd.f32 %v825_v0, %v266_v56  ;;  %v834_v19 = vpop.f32.mrf.mxu3 }
 0x128   :  { %v1043_v7 = vld [vmem:[#allocation2 + $0x178] sm:$0xff] }
 0x129   :  { %v881_v8 = vadd.f32 %v747_v4, %v235_v2  ;;  %v1111_v1 = vadd.f32 %v1690_v11, %v1043_v7  ;;  %977 = vst.msk [vmem:[#allocation2 + $0x180] sm:$0xff] %vm25_vm3, %v912_v5  ;;  %v271_v7 = vld [vmem:[#allocation2 + $0x1a8] sm:$0xff] }
 0x12a   :  { %v1012_v10 = vld [vmem:[#allocation2 + $0x80] sm:$0xff] }
 0x12b   :  { %v1080_v12 = vadd.f32 %v1690_v11, %v1012_v10  ;;  %946 = vst.msk [vmem:[#allocation2 + $0x88] sm:$0xff] %vm25_vm3, %v881_v8 }
 0x12c   :  { %v754_v13 = vpop.f32.mrf.mxu1  ;;  %1175 = vst.msk [vmem:[%s2373_s5 + $0x178] sm:$0xff] %vm25_vm3, %v1111_v1  ;;  %v657_v6 = vpop.f32.mrf.mxu2 }
 0x12d   :  { %1144 = vst.msk [vmem:[%s2373_s5 + $0x80] sm:$0xff] %vm25_vm3, %v1080_v12  ;;  %v827_v60 = vadd.f32 %v826_v34, %v657_v6  ;;  %v240_v12 = vld [vmem:[#allocation2 + $0xb0] sm:$0xff] }
 0x12e   :  { %v580_v16 = vpop.f32.mrf.mxu0 }
 0x12f   :  { %v750_v18 = vadd.f32 %v749_v49, %v580_v16  ;;  %v913_v20 = vadd.f32 %v827_v60, %v267_v62  ;;  %v836_v15 = vpop.f32.mrf.mxu3 }
 0x130   :  { %v1044_v21 = vld [vmem:[#allocation2 + $0x180] sm:$0xff] }
 0x131   :  { %v882_v22 = vadd.f32 %v750_v18, %v236_v14  ;;  %v1112_v24 = vadd.f32 %v1690_v11, %v1044_v21  ;;  %978 = vst.msk [vmem:[#allocation2 + $0x188] sm:$0xff] %vm25_vm3, %v913_v20  ;;  %v272_v21 = vld [vmem:[#allocation2 + $0x1b0] sm:$0xff] }
 0x132   :  { %v1013_v25 = vld [vmem:[#allocation2 + $0x88] sm:$0xff] }
 0x133   :  { %v1081_v27 = vadd.f32 %v1690_v11, %v1013_v25  ;;  %947 = vst.msk [vmem:[#allocation2 + $0x90] sm:$0xff] %vm25_vm3, %v882_v22  ;;  %v241_v25 = vld [vmem:[#allocation2 + $0xb8] sm:$0xff] }
 0x134   :  { %v756_v28 = vpop.f32.mrf.mxu1  ;;  %1176 = vst.msk [vmem:[%s2373_s5 + $0x180] sm:$0xff] %vm25_vm3, %v1112_v24  ;;  %v660_v30 = vpop.f32.mrf.mxu2 }
 0x135   :  { %1145 = vst.msk [vmem:[%s2373_s5 + $0x88] sm:$0xff] %vm25_vm3, %v1081_v27  ;;  %v830_v31 = vadd.f32 %v829_v51, %v660_v30 }
 0x136   :  { %v582_v17 = vpop.f32.mrf.mxu0 }
 0x137   :  { %v752_v33 = vadd.f32 %v751_v61, %v582_v17  ;;  %v914_v23 = vadd.f32 %v830_v31, %v268_v29  ;;  %v839_v57 = vpop.f32.mrf.mxu3 }
 0x138   :  { %v1045_v34 = vld [vmem:[#allocation2 + $0x188] sm:$0xff] }
 0x139   :  { %v883_v35 = vadd.f32 %v752_v33, %v237_v32  ;;  %v1113_v38 = vadd.f32 %v1690_v11, %v1045_v34  ;;  %979 = vst.msk [vmem:[#allocation2 + $0x190] sm:$0xff] %vm25_vm3, %v914_v23  ;;  %v2228_v32 = vld [vmem:[%s2372_s2] ss:$0 sm:$0xff] }
 0x13a   :  { %v1014_v39 = vld [vmem:[#allocation2 + $0x90] sm:$0xff] }
 0x13b   :  { %v1082_v41 = vadd.f32 %v1690_v11, %v1014_v39  ;;  %948 = vst.msk [vmem:[#allocation2 + $0x98] sm:$0xff] %vm25_vm3, %v883_v35  ;;  %v273_v35 = vld [vmem:[#allocation2 + $0x1b8] sm:$0xff]  ;;  %v242_v39 = vld [vmem:[#allocation2 + $0xc0] sm:$0xff] }
 0x13c   :  { %v759_v42 = vpop.f32.mrf.mxu1  ;;  %1177 = vst.msk [vmem:[%s2373_s5 + $0x188] sm:$0xff] %vm25_vm3, %v1113_v38  ;;  %v662_v44 = vpop.f32.mrf.mxu2 }
 0x13d   :  { %1146 = vst.msk [vmem:[%s2373_s5 + $0x90] sm:$0xff] %vm25_vm3, %v1082_v41  ;;  %v832_v47 = vadd.f32 %v831_v63, %v662_v44 }
 0x13e   :  { %v585_v49 = vpop.f32.mrf.mxu0 }
 0x13f   :  { %v755_v45 = vadd.f32 %v754_v13, %v585_v49  ;;  %v915_v50 = vadd.f32 %v832_v47, %v269_v43  ;;  %v841_v1 = vpop.f32.mrf.mxu3 }
 0x140   :  { %v1046_v51 = vld [vmem:[#allocation2 + $0x190] sm:$0xff] }
 0x141   :  { %v884_v52 = vadd.f32 %v755_v45, %v238_v48  ;;  %v1114_v53 = vadd.f32 %v1690_v11, %v1046_v51  ;;  %980 = vst.msk [vmem:[#allocation2 + $0x198] sm:$0xff] %vm25_vm3, %v915_v50 }
 0x142   :  { %v1015_v54 = vld [vmem:[#allocation2 + $0x98] sm:$0xff] }
 0x143   :  { %v1083_v55 = vadd.f32 %v1690_v11, %v1015_v54  ;;  %949 = vst.msk [vmem:[#allocation2 + $0xa0] sm:$0xff] %vm25_vm3, %v884_v52  ;;  %v274_v52 = vld [vmem:[#allocation2 + $0x1c0] sm:$0xff] }
 0x144   :  { %v761_v46 = vpop.f32.mrf.mxu1  ;;  %1178 = vst.msk [vmem:[%s2373_s5 + $0x190] sm:$0xff] %vm25_vm3, %v1114_v53  ;;  %v665_v58 = vpop.f32.mrf.mxu2 }
 0x145   :  { %1147 = vst.msk [vmem:[%s2373_s5 + $0x98] sm:$0xff] %vm25_vm3, %v1083_v55  ;;  %v835_v36 = vadd.f32 %v834_v19, %v665_v58  ;;  %v243_v55 = vld [vmem:[#allocation2 + $0xc8] sm:$0xff] }
 0x146   :  { %v587_v61 = vpop.f32.mrf.mxu0 }
 0x147   :  { %v757_v56 = vadd.f32 %v756_v28, %v587_v61  ;;  %v916_v37 = vadd.f32 %v835_v36, %v270_v40 }
 0x148   :  { %v1047_v63 = vld [vmem:[#allocation2 + $0x198] sm:$0xff] }
 0x149   :  { %v885_v0 = vadd.f32 %v757_v56, %v239_v59  ;;  %v1115_v2 = vadd.f32 %v1690_v11, %v1047_v63  ;;  %981 = vst.msk [vmem:[#allocation2 + $0x1a0] sm:$0xff] %vm25_vm3, %v916_v37 }
 0x14a   :  { %v1016_v3 = vld [vmem:[#allocation2 + $0xa0] sm:$0xff] }
 0x14b   :  { %v1084_v4 = vadd.f32 %v1690_v11, %v1016_v3  ;;  %950 = vst.msk [vmem:[#allocation2 + $0xa8] sm:$0xff] %vm25_vm3, %v885_v0  ;;  %v275_v0 = vld [vmem:[#allocation2 + $0x1c8] sm:$0xff] }
 0x14c   :  { %v764_v5 = vpop.f32.mrf.mxu1  ;;  %1179 = vst.msk [vmem:[%s2373_s5 + $0x198] sm:$0xff] %vm25_vm3, %v1115_v2  ;;  %v667_v8 = vpop.f32.mrf.mxu2 }
 0x14d   :  { %1148 = vst.msk [vmem:[%s2373_s5 + $0xa0] sm:$0xff] %vm25_vm3, %v1084_v4  ;;  %v837_v10 = vadd.f32 %v836_v15, %v667_v8  ;;  %v244_v4 = vld [vmem:[#allocation2 + $0xd0] sm:$0xff] }
 0x14e   :  { %v590_v13 = vpop.f32.mrf.mxu0 }
 0x14f   :  { %v760_v62 = vadd.f32 %v759_v42, %v590_v13  ;;  %v917_v6 = vadd.f32 %v837_v10, %v271_v7 }
 0x150   :  { %v1048_v60 = vld [vmem:[#allocation2 + $0x1a0] sm:$0xff] }
 0x151   :  { %v886_v14 = vadd.f32 %v760_v62, %v240_v12  ;;  %v1116_v16 = vadd.f32 %v1690_v11, %v1048_v60  ;;  %982 = vst.msk [vmem:[#allocation2 + $0x1a8] sm:$0xff] %vm25_vm3, %v917_v6  ;;  %v276_v60 = vld [vmem:[#allocation2 + $0x1d0] sm:$0xff] }
 0x152   :  { %v1017_v18 = vld [vmem:[#allocation2 + $0xa8] sm:$0xff] }
 0x153   :  { %v1085_v19 = vadd.f32 %v1690_v11, %v1017_v18  ;;  %951 = vst.msk [vmem:[#allocation2 + $0xb0] sm:$0xff] %vm25_vm3, %v886_v14  ;;  %v844_v11 = vpop.f32.mrf.mxu3 }
 0x154   :  { %v766_v20 = vpop.f32.mrf.mxu1  ;;  %1180 = vst.msk [vmem:[%s2373_s5 + $0x1a0] sm:$0xff] %vm25_vm3, %v1116_v16  ;;  %v670_v22 = vpop.f32.mrf.mxu2 }
 0x155   :  { %1149 = vst.msk [vmem:[%s2373_s5 + $0xa8] sm:$0xff] %vm25_vm3, %v1085_v19  ;;  %v840_v24 = vadd.f32 %v839_v57, %v670_v22  ;;  %v245_v19 = vld [vmem:[#allocation2 + $0xd8] sm:$0xff] }
 0x156   :  { %v592_v27 = vpop.f32.mrf.mxu0 }
 0x157   :  { %v762_v28 = vadd.f32 %v761_v46, %v592_v27  ;;  %v918_v29 = vadd.f32 %v840_v24, %v272_v21 }
 0x158   :  { %v1049_v30 = vld [vmem:[#allocation2 + $0x1a8] sm:$0xff] }
 0x159   :  { %v887_v31 = vadd.f32 %v762_v28, %v241_v25  ;;  %v1117_v17 = vadd.f32 %v2228_v32, %v1049_v30  ;;  %983 = vst.msk [vmem:[#allocation2 + $0x1b0] sm:$0xff] %vm25_vm3, %v918_v29  ;;  %v277_v30 = vld [vmem:[#allocation2 + $0x1d8] sm:$0xff] }
 0x15a   :  { %v1018_v33 = vld [vmem:[#allocation2 + $0xb0] sm:$0xff] }
 0x15b   :  { %v1086_v23 = vadd.f32 %v2228_v32, %v1018_v33  ;;  %952 = vst.msk [vmem:[#allocation2 + $0xb8] sm:$0xff] %vm25_vm3, %v887_v31  ;;  %v846_v48 = vpop.f32.mrf.mxu3  ;;  %v246_v33 = vld [vmem:[#allocation2 + $0xe0] sm:$0xff] }
 0x15c   :  { %v769_v34 = vpop.f32.mrf.mxu1  ;;  %1181 = vst.msk [vmem:[%s2373_s5 + $0x1a8] sm:$0xff] %vm25_vm3, %v1117_v17  ;;  %v672_v15 = vpop.f32.mrf.mxu2 }
 0x15d   :  { %1150 = vst.msk [vmem:[%s2373_s5 + $0xb0] sm:$0xff] %vm25_vm3, %v1086_v23  ;;  %v842_v38 = vadd.f32 %v841_v1, %v672_v15 }
 0x15e   :  { %v595_v41 = vpop.f32.mrf.mxu0 }
 0x15f   :  { %v765_v42 = vadd.f32 %v764_v5, %v595_v41  ;;  %v919_v43 = vadd.f32 %v842_v38, %v273_v35 }
 0x160   :  { %v1050_v44 = vld [vmem:[#allocation2 + $0x1b0] sm:$0xff] }
 0x161   :  { %v888_v47 = vadd.f32 %v765_v42, %v242_v39  ;;  %v1118_v49 = vadd.f32 %v2228_v32, %v1050_v44  ;;  %984 = vst.msk [vmem:[#allocation2 + $0x1b8] sm:$0xff] %vm25_vm3, %v919_v43 }
 0x162   :  { %v1019_v45 = vld [vmem:[#allocation2 + $0xb8] sm:$0xff] }
 0x163   :  { %v1087_v50 = vadd.f32 %v2228_v32, %v1019_v45  ;;  %953 = vst.msk [vmem:[#allocation2 + $0xc0] sm:$0xff] %vm25_vm3, %v888_v47  ;;  %v849_v63 = vpop.f32.mrf.mxu3  ;;  %v278_v47 = vld [vmem:[#allocation2 + $0x1e0] sm:$0xff]  ;;  %v247_v45 = vld [vmem:[#allocation2 + $0xe8] sm:$0xff] }
 0x164   :  { %v771_v51 = vpop.f32.mrf.mxu1  ;;  %1182 = vst.msk [vmem:[%s2373_s5 + $0x1b0] sm:$0xff] %vm25_vm3, %v1118_v49  ;;  %v675_v53 = vpop.f32.mrf.mxu2 }
 0x165   :  { %1151 = vst.msk [vmem:[%s2373_s5 + $0xb8] sm:$0xff] %vm25_vm3, %v1087_v50  ;;  %v845_v54 = vadd.f32 %v844_v11, %v675_v53 }
 0x166   :  { %v597_v46 = vpop.f32.mrf.mxu0 }
 0x167   :  { %v767_v57 = vadd.f32 %v766_v20, %v597_v46  ;;  %v920_v40 = vadd.f32 %v845_v54, %v274_v52 }
 0x168   :  { %v1051_v58 = vld [vmem:[#allocation2 + $0x1b8] sm:$0xff] }
 0x169   :  { %v889_v36 = vadd.f32 %v767_v57, %v243_v55  ;;  %v1119_v59 = vadd.f32 %v2228_v32, %v1051_v58  ;;  %985 = vst.msk [vmem:[#allocation2 + $0x1c0] sm:$0xff] %vm25_vm3, %v920_v40  ;;  %v250_v58 = vld [vmem:[#allocation2 + $0x100] sm:$0xff] }
 0x16a   :  { %v1020_v61 = vld [vmem:[#allocation2 + $0xc0] sm:$0xff] }
 0x16b   :  { %v1088_v56 = vadd.f32 %v2228_v32, %v1020_v61  ;;  %954 = vst.msk [vmem:[#allocation2 + $0xc8] sm:$0xff] %vm25_vm3, %v889_v36  ;;  %v851_v16 = vpop.f32.mrf.mxu3  ;;  %v279_v61 = vld [vmem:[#allocation2 + $0x1e8] sm:$0xff] }
 0x16c   :  { %v774_v37 = vpop.f32.mrf.mxu1  ;;  %1183 = vst.msk [vmem:[%s2373_s5 + $0x1b8] sm:$0xff] %vm25_vm3, %v1119_v59  ;;  %v677_v2 = vpop.f32.mrf.mxu2 }
 0x16d   :  { %1152 = vst.msk [vmem:[%s2373_s5 + $0xc0] sm:$0xff] %vm25_vm3, %v1088_v56  ;;  %v847_v3 = vadd.f32 %v846_v48, %v677_v2 }
 0x16e   :  { %v600_v5 = vpop.f32.mrf.mxu0 }
 0x16f   :  { %v770_v7 = vadd.f32 %v769_v34, %v600_v5  ;;  %v921_v8 = vadd.f32 %v847_v3, %v275_v0  ;;  %v248_v0 = vld [vmem:[#allocation2 + $0xf0] sm:$0xff] }
 0x170   :  { %v1052_v1 = vld [vmem:[#allocation2 + $0x1c0] sm:$0xff] }
 0x171   :  { %v890_v10 = vadd.f32 %v770_v7, %v244_v4  ;;  %v1120_v12 = vadd.f32 %v2228_v32, %v1052_v1  ;;  %986 = vst.msk [vmem:[#allocation2 + $0x1c8] sm:$0xff] %vm25_vm3, %v921_v8 }
 0x172   :  { %v1021_v13 = vld [vmem:[#allocation2 + $0xc8] sm:$0xff] }
 0x173   :  { %v1089_v62 = vadd.f32 %v2228_v32, %v1021_v13  ;;  %955 = vst.msk [vmem:[#allocation2 + $0xd0] sm:$0xff] %vm25_vm3, %v890_v10  ;;  %v854_v34 = vpop.f32.mrf.mxu3 }
 0x174   :  { %v776_v6 = vpop.f32.mrf.mxu1  ;;  %1184 = vst.msk [vmem:[%s2373_s5 + $0x1c0] sm:$0xff] %vm25_vm3, %v1120_v12  ;;  %v680_v14 = vpop.f32.mrf.mxu2  ;;  %v251_v12 = vld [vmem:[#allocation2 + $0x108] sm:$0xff] }
 0x175   :  { %1153 = vst.msk [vmem:[%s2373_s5 + $0xc8] sm:$0xff] %vm25_vm3, %v1089_v62  ;;  %v850_v18 = vadd.f32 %v849_v63, %v680_v14 }
 0x176   :  { %v602_v20 = vpop.f32.mrf.mxu0 }
 0x177   :  { %v772_v21 = vadd.f32 %v771_v51, %v602_v20  ;;  %v922_v22 = vadd.f32 %v850_v18, %v276_v60  ;;  %v249_v20 = vld [vmem:[#allocation2 + $0xf8] sm:$0xff] }
 0x178   :  { %v1053_v24 = vld [vmem:[#allocation2 + $0x1c8] sm:$0xff] }
 0x179   :  { %v891_v25 = vadd.f32 %v772_v21, %v245_v19  ;;  %v1121_v27 = vadd.f32 %v2228_v32, %v1053_v24  ;;  %987 = vst.msk [vmem:[#allocation2 + $0x1d0] sm:$0xff] %vm25_vm3, %v922_v22 }
 0x17a   :  { %v1022_v28 = vld [vmem:[#allocation2 + $0xd0] sm:$0xff] }
 0x17b   :  { %v1090_v11 = vadd.f32 %v2228_v32, %v1022_v28  ;;  %956 = vst.msk [vmem:[#allocation2 + $0xd8] sm:$0xff] %vm25_vm3, %v891_v25  ;;  %v856_v54 = vpop.f32.mrf.mxu3 }
 0x17c   :  { %v779_v29 = vpop.f32.mrf.mxu1  ;;  %1185 = vst.msk [vmem:[%s2373_s5 + $0x1c8] sm:$0xff] %vm25_vm3, %v1121_v27  ;;  %v682_v31 = vpop.f32.mrf.mxu2 }
 0x17d   :  { %1154 = vst.msk [vmem:[%s2373_s5 + $0xd0] sm:$0xff] %vm25_vm3, %v1090_v11  ;;  %v852_v17 = vadd.f32 %v851_v16, %v682_v31 }
 0x17e   :  { %v605_v23 = vpop.f32.mrf.mxu0 }
 0x17f   :  { %v775_v35 = vadd.f32 %v774_v37, %v605_v23  ;;  %v923_v15 = vadd.f32 %v852_v17, %v277_v30  ;;  %v281_v30 = vld [vmem:[#allocation2 + $0x1f8] sm:$0xff] }
 0x180   :  { %v1054_v38 = vld [vmem:[#allocation2 + $0x1d0] sm:$0xff] }
 0x181   :  { %v892_v39 = vadd.f32 %v775_v35, %v246_v33  ;;  %v1122_v41 = vadd.f32 %v2228_v32, %v1054_v38  ;;  %988 = vst.msk [vmem:[#allocation2 + $0x1d8] sm:$0xff] %vm25_vm3, %v923_v15 }
 0x182   :  { %v1023_v42 = vld [vmem:[#allocation2 + $0xd8] sm:$0xff] }
 0x183   :  { %v1091_v43 = vadd.f32 %v2228_v32, %v1023_v42  ;;  %957 = vst.msk [vmem:[#allocation2 + $0xe0] sm:$0xff] %vm25_vm3, %v892_v39  ;;  %v859_v10 = vpop.f32.mrf.mxu3 }
 0x184   :  { %v781_v44 = vpop.f32.mrf.mxu1  ;;  %1186 = vst.msk [vmem:[%s2373_s5 + $0x1d0] sm:$0xff] %vm25_vm3, %v1122_v41  ;;  %v685_v48 = vpop.f32.mrf.mxu2 }
 0x185   :  { %1155 = vst.msk [vmem:[%s2373_s5 + $0xd8] sm:$0xff] %vm25_vm3, %v1091_v43  ;;  %v855_v49 = vadd.f32 %v854_v34, %v685_v48 }
 0x186   :  { %v607_v50 = vpop.f32.mrf.mxu0 }
 0x187   :  { %v777_v51 = vadd.f32 %v776_v6, %v607_v50  ;;  %v924_v52 = vadd.f32 %v855_v49, %v278_v47  ;;  %v280_v6 = vld [vmem:[#allocation2 + $0x1f0] sm:$0xff] }
 0x188   :  { %v1055_v53 = vld [vmem:[#allocation2 + $0x1d8] sm:$0xff] }
 0x189   :  { %v893_v55 = vadd.f32 %v777_v51, %v247_v45  ;;  %v1123_v46 = vadd.f32 %v2228_v32, %v1055_v53  ;;  %989 = vst.msk [vmem:[#allocation2 + $0x1e0] sm:$0xff] %vm25_vm3, %v924_v52 }
 0x18a   :  { %v1024_v57 = vld [vmem:[#allocation2 + $0xe0] sm:$0xff] }
 0x18b   :  { %v1092_v40 = vadd.f32 %v2228_v32, %v1024_v57  ;;  %958 = vst.msk [vmem:[#allocation2 + $0xe8] sm:$0xff] %vm25_vm3, %v893_v55 }
 0x18c   :  { %v784_v36 = vpop.f32.mrf.mxu1  ;;  %1187 = vst.msk [vmem:[%s2373_s5 + $0x1d8] sm:$0xff] %vm25_vm3, %v1123_v46  ;;  %v687_v56 = vpop.f32.mrf.mxu2 }
 0x18d   :  { %v785_v59 = vadd.f32 %v784_v36, %v1683_v9  ;;  %1156 = vst.msk [vmem:[%s2373_s5 + $0xe0] sm:$0xff] %vm25_vm3, %v1092_v40  ;;  %v857_v63 = vadd.f32 %v856_v54, %v687_v56 }
 0x18e   :  { %v610_v2 = vpop.f32.mrf.mxu0 }
 0x18f   :  { %v896_v37 = vadd.f32 %v785_v59, %v250_v58  ;;  %v780_v3 = vadd.f32 %v779_v29, %v610_v2  ;;  %v925_v4 = vadd.f32 %v857_v63, %v279_v61  ;;  %v861_v29 = vpop.f32.mrf.mxu3 }
 0x190   :  { %v1056_v5 = vld [vmem:[#allocation2 + $0x1e0] sm:$0xff] }
 0x191   :  { %961 = vst.msk [vmem:[#allocation2 + $0x100] sm:$0xff] %vm25_vm3, %v896_v37  ;;  %v894_v7 = vadd.f32 %v780_v3, %v248_v0  ;;  %v1124_v8 = vadd.f32 %v2228_v32, %v1056_v5 }
 0x192   :  { %v1025_v9 = vld [vmem:[#allocation2 + $0xe8] sm:$0xff]  ;;  %990 = vst.msk [vmem:[#allocation2 + $0x1e8] sm:$0xff] %vm25_vm3, %v925_v4 }
 0x193   :  { %v1093_v1 = vadd.f32 %v2228_v32, %v1025_v9  ;;  %959 = vst.msk [vmem:[#allocation2 + $0xf0] sm:$0xff] %vm25_vm3, %v894_v7 }
 0x194   :  { %v786_v13 = vpop.f32.mrf.mxu1  ;;  %1188 = vst.msk [vmem:[%s2373_s5 + $0x1e0] sm:$0xff] %vm25_vm3, %v1124_v8  ;;  %v690_v60 = vpop.f32.mrf.mxu2 }
 0x195   :  { %v787_v62 = vadd.f32 %v786_v13, %v1738_v26  ;;  %1157 = vst.msk [vmem:[%s2373_s5 + $0xe8] sm:$0xff] %vm25_vm3, %v1093_v1  ;;  %v860_v16 = vadd.f32 %v859_v10, %v690_v60 }
 0x196   :  { %v612_v18 = vpop.f32.mrf.mxu0 }
 0x197   :  { %v897_v14 = vadd.f32 %v787_v62, %v251_v12  ;;  %v782_v21 = vadd.f32 %v781_v44, %v612_v18  ;;  %v926_v24 = vadd.f32 %v860_v16, %v280_v6 }
 0x198   :  { %v1028_v19 = vld [vmem:[#allocation2 + $0x100] sm:$0xff] }
 0x199   :  { %v1096_v22 = vadd.f32 %v2228_v32, %v1028_v19  ;;  %962 = vst.msk [vmem:[#allocation2 + $0x108] sm:$0xff] %vm25_vm3, %v897_v14  ;;  %v1057_v25 = vld [vmem:[#allocation2 + $0x1e8] sm:$0xff]  ;;  %v895_v28 = vadd.f32 %v782_v21, %v249_v20 }
 0x19a   :  { %v1125_v26 = vadd.f32 %v2228_v32, %v1057_v25  ;;  %v1026_v27 = vld [vmem:[#allocation2 + $0xf0] sm:$0xff]  ;;  %991 = vst.msk [vmem:[#allocation2 + $0x1f0] sm:$0xff] %vm25_vm3, %v926_v24 }
 0x19b   :  { %1160 = vst.msk [vmem:[%s2373_s5 + $0x100] sm:$0xff] %vm25_vm3, %v1096_v22  ;;  %v1094_v11 = vadd.f32 %v2228_v32, %v1026_v27 }
 0x19c   :  { %1189 = vst.msk [vmem:[%s2373_s5 + $0x1e8] sm:$0xff] %vm25_vm3, %v1125_v26  ;;  %v692_v31 = vpop.f32.mrf.mxu2 }
 0x19d   :  { %1158 = vst.msk [vmem:[%s2373_s5 + $0xf0] sm:$0xff] %vm25_vm3, %v1094_v11  ;;  %v862_v17 = vadd.f32 %v861_v29, %v692_v31 }
 0x19e   :  { %960 = vst.msk [vmem:[#allocation2 + $0xf8] sm:$0xff] %vm25_vm3, %v895_v28 }
 0x19f   :  { %v927_v34 = vadd.f32 %v862_v17, %v281_v30 }
 0x1a0   :  { %v1029_v33 = vld [vmem:[#allocation2 + $0x108] sm:$0xff] }
 0x1a1   :  { %v1097_v23 = vadd.f32 %v2228_v32, %v1029_v33  ;;  %v1058_v35 = vld [vmem:[#allocation2 + $0x1f0] sm:$0xff]  ;;  %992 = vst.msk [vmem:[#allocation2 + $0x1f8] sm:$0xff] %vm25_vm3, %v927_v34 }
 0x1a2   :  { %v1126_v15 = vadd.f32 %v2228_v32, %v1058_v35 }
 0x1a3   :  { %1161 = vst.msk [vmem:[%s2373_s5 + $0x108] sm:$0xff] %vm25_vm3, %v1097_v23 }
 0x1a4   :  { %1190 = vst.msk [vmem:[%s2373_s5 + $0x1f0] sm:$0xff] %vm25_vm3, %v1126_v15 }
 0x1a5   :  { %v1027_v38 = vld [vmem:[#allocation2 + $0xf8] sm:$0xff] }
 0x1a6   :  { %v1095_v39 = vadd.f32 %v2228_v32, %v1027_v38 }
 0x1a8   :  { %1159 = vst.msk [vmem:[%s2373_s5 + $0xf8] sm:$0xff] %vm25_vm3, %v1095_v39  ;;  %v1059_v41 = vld [vmem:[#allocation2 + $0x1f8] sm:$0xff] }
 0x1a9   :  { %v1127_v42 = vadd.f32 %v2228_v32, %v1059_v41 }
 0x1ab   :  { %1191 = vst.msk [vmem:[%s2373_s5 + $0x1f8] sm:$0xff] %vm25_vm3, %v1127_v42 }

// kernel: densenet_forward.38
= control target key start
LH: loop header
LB: loop body
LE: loop exit
PB: predicated region body
PF: predicated region fallthrough
CT: control target
= control target key end

     0   :  { %vm20_vm0 = vcmask 122880   ;;  %vm40_vm1 = vcmask 130048   ;;  %v176_v0 = vmov 0.0   ;;  %s300_s0 = inlined_call_operand.vmem [shape: f32[128,16], index: 0, kind: input, shape index: {}]   ;;  %s301_s1 = inlined_call_operand.vmem [shape: f32[1,16], index: 1, kind: input, shape index: {}]   ;;  %s302_s2 = inlined_call_operand.vmem [shape: f32[1,16], index: 2, kind: input, shape index: {}]   ;;  %s303_s3 = inlined_call_operand.vmem [shape: f32[1,16], index: 3, kind: output, shape index: {0}]   ;;  %s304_s4 = inlined_call_operand.vmem [shape: f32[1,16], index: 4, kind: output, shape index: {1}]  }
   0x1   :  { %21 = vst.msk [vmem:[#allocation2] sm:$0x1] %vm20_vm0, %v176_v0  ;;  %v23_v1 = vld [vmem:[%s300_s0] sm:$0xff]  ;;  %v24_v2 = vld [vmem:[%s300_s0 + $0x8] sm:$0xff]  ;;  %v25_v3 = vld [vmem:[%s300_s0 + $0x10] sm:$0xff] }
   0x2   :  { %22 = vst.msk [vmem:[#allocation3] sm:$0x1] %vm20_vm0, %v176_v0  ;;  %v26_v4 = vld [vmem:[%s300_s0 + $0x18] sm:$0xff]  ;;  %v41_v5 = vsel %vm40_vm1, %v23_v1, 0.0  ;;  %v42_v6 = vsel %vm40_vm1, %v24_v2, 0.0  ;;  %v44_v7 = vsel %vm40_vm1, %v25_v3, 0.0  ;;  %v82_v15 = vmul.f32 %v23_v1, %v23_v1 }
   0x3   :  { %v27_v8 = vld [vmem:[%s300_s0 + $0x20] sm:$0xff]  ;;  %v43_v9 = vadd.f32 %v42_v6, %v41_v5  ;;  %v46_v10 = vsel %vm40_vm1, %v26_v4, 0.0  ;;  %v28_v11 = vld [vmem:[%s300_s0 + $0x28] sm:$0xff]  ;;  %v29_v13 = vld [vmem:[%s300_s0 + $0x30] sm:$0xff]  ;;  %v83_v16 = vmul.f32 %v24_v2, %v24_v2  ;;  %v84_v17 = vmul.f32 %v25_v3, %v25_v3 }
   0x4   :  { %v48_v14 = vsel %vm40_vm1, %v27_v8, 0.0  ;;  %v50_v19 = vsel %vm40_vm1, %v28_v11, 0.0  ;;  %v85_v20 = vmul.f32 %v26_v4, %v26_v4  ;;  %v30_v21 = vld [vmem:[%s300_s0 + $0x38] sm:$0xff]  ;;  %v52_v23 = vsel %vm40_vm1, %v29_v13, 0.0  ;;  %v31_v28 = vld [vmem:[%s300_s0 + $0x40] sm:$0xff]  ;;  %v32_v34 = vld [vmem:[%s300_s0 + $0x48] sm:$0xff] }
   0x5   :  { %v45_v12 = vadd.f32 %v44_v7, %v43_v9  ;;  %v86_v24 = vmul.f32 %v27_v8, %v27_v8  ;;  %v98_v25 = vsel %vm40_vm1, %v82_v15, 0.0  ;;  %v99_v26 = vsel %vm40_vm1, %v83_v16, 0.0  ;;  %v33_v40 = vld [vmem:[%s300_s0 + $0x50] sm:$0xff]  ;;  %v34_v46 = vld [vmem:[%s300_s0 + $0x58] sm:$0xff]  ;;  %v35_v52 = vld [vmem:[%s300_s0 + $0x60] sm:$0xff] }
   0x6   :  { %v101_v27 = vsel %vm40_vm1, %v84_v17, 0.0  ;;  %v100_v30 = vadd.f32 %v99_v26, %v98_v25  ;;  %v54_v31 = vsel %vm40_vm1, %v30_v21, 0.0  ;;  %v87_v32 = vmul.f32 %v28_v11, %v28_v11  ;;  %v36_v58 = vld [vmem:[%s300_s0 + $0x68] sm:$0xff]  ;;  %v37_v0 = vld [vmem:[%s300_s0 + $0x70] sm:$0xff]  ;;  %v38_v6 = vld [vmem:[%s300_s0 + $0x78] sm:$0xff] }
   0x7   :  { %v47_v18 = vadd.f32 %v46_v10, %v45_v12  ;;  %v103_v33 = vsel %vm40_vm1, %v85_v20, 0.0  ;;  %v56_v37 = vsel %vm40_vm1, %v31_v28, 0.0  ;;  %v88_v38 = vmul.f32 %v29_v13, %v29_v13 }
   0x8   :  { %v102_v36 = vadd.f32 %v101_v27, %v100_v30  ;;  %v105_v39 = vsel %vm40_vm1, %v86_v24, 0.0  ;;  %v58_v43 = vsel %vm40_vm1, %v32_v34, 0.0  ;;  %v89_v44 = vmul.f32 %v30_v21, %v30_v21 }
   0x9   :  { %v49_v22 = vadd.f32 %v48_v14, %v47_v18  ;;  %v107_v45 = vsel %vm40_vm1, %v87_v32, 0.0  ;;  %v60_v49 = vsel %vm40_vm1, %v33_v40, 0.0  ;;  %v90_v50 = vmul.f32 %v31_v28, %v31_v28 }
   0xa   :  { %v104_v42 = vadd.f32 %v103_v33, %v102_v36  ;;  %v109_v51 = vsel %vm40_vm1, %v88_v38, 0.0  ;;  %v62_v55 = vsel %vm40_vm1, %v34_v46, 0.0  ;;  %v91_v56 = vmul.f32 %v32_v34, %v32_v34 }
   0xb   :  { %v51_v29 = vadd.f32 %v50_v19, %v49_v22  ;;  %v111_v57 = vsel %vm40_vm1, %v89_v44, 0.0  ;;  %v64_v61 = vsel %vm40_vm1, %v35_v52, 0.0  ;;  %v92_v62 = vmul.f32 %v33_v40, %v33_v40  ;;  %v81_v44 = vld [vmem:[#allocation3] sm:$0x1] }
   0xc   :  { %v106_v48 = vadd.f32 %v105_v39, %v104_v42  ;;  %v113_v63 = vsel %vm40_vm1, %v90_v50, 0.0  ;;  %v66_v3 = vsel %vm40_vm1, %v36_v58, 0.0  ;;  %v93_v4 = vmul.f32 %v34_v46, %v34_v46 }
   0xd   :  { %v53_v35 = vadd.f32 %v52_v23, %v51_v29  ;;  %v115_v5 = vsel %vm40_vm1, %v91_v56, 0.0  ;;  %v68_v9 = vsel %vm40_vm1, %v37_v0, 0.0  ;;  %v94_v10 = vmul.f32 %v35_v52, %v35_v52 }
   0xe   :  { %v108_v54 = vadd.f32 %v107_v45, %v106_v48  ;;  %v117_v11 = vsel %vm40_vm1, %v92_v62, 0.0  ;;  %v70_v14 = vsel %vm40_vm1, %v38_v6, 0.0  ;;  %v95_v15 = vmul.f32 %v36_v58, %v36_v58 }
   0xf   :  { %v55_v41 = vadd.f32 %v54_v31, %v53_v35  ;;  %v119_v16 = vsel %vm40_vm1, %v93_v4, 0.0  ;;  %v96_v19 = vmul.f32 %v37_v0, %v37_v0  ;;  %v121_v20 = vsel %vm40_vm1, %v94_v10, 0.0  ;;  %v161_v0 = vld [vmem:[%s302_s2] sm:$0x1] }
  0x10   :  { %v110_v60 = vadd.f32 %v109_v51, %v108_v54  ;;  %v97_v23 = vmul.f32 %v38_v6, %v38_v6  ;;  %v123_v24 = vsel %vm40_vm1, %v95_v15, 0.0 }
  0x11   :  { %v57_v47 = vadd.f32 %v56_v37, %v55_v41  ;;  %v125_v27 = vsel %vm40_vm1, %v96_v19, 0.0  ;;  %v39_v37 = vld [vmem:[#allocation2] sm:$0x1] }
  0x12   :  { %v112_v2 = vadd.f32 %v111_v57, %v110_v60  ;;  %v127_v30 = vsel %vm40_vm1, %v97_v23, 0.0 }
  0x13   :  { %v59_v53 = vadd.f32 %v58_v43, %v57_v47 }
  0x14   :  { %v114_v8 = vadd.f32 %v113_v63, %v112_v2 }
  0x15   :  { %v61_v59 = vadd.f32 %v60_v49, %v59_v53 }
  0x16   :  { %v116_v13 = vadd.f32 %v115_v5, %v114_v8 }
  0x17   :  { %v63_v1 = vadd.f32 %v62_v55, %v61_v59 }
  0x18   :  { %v118_v18 = vadd.f32 %v117_v11, %v116_v13 }
  0x19   :  { %v65_v7 = vadd.f32 %v64_v61, %v63_v1  ;;  %v158_v61 = vld [vmem:[%s301_s1] sm:$0x1] }
  0x1a   :  { %v120_v22 = vadd.f32 %v119_v16, %v118_v18 }
  0x1b   :  { %v67_v12 = vadd.f32 %v66_v3, %v65_v7 }
  0x1c   :  { %v122_v26 = vadd.f32 %v121_v20, %v120_v22 }
  0x1d   :  { %v69_v17 = vadd.f32 %v68_v9, %v67_v12 }
  0x1e   :  { %v124_v29 = vadd.f32 %v123_v24, %v122_v26 }
  0x1f   :  { %v71_v21 = vadd.f32 %v70_v14, %v69_v17 }
  0x20   :  { %v126_v32 = vadd.f32 %v125_v27, %v124_v29 }
  0x21   :  { %v72_v25 = vrot.slane %v71_v21, 4 }
  0x22   :  { %v128_v34 = vadd.f32 %v127_v30, %v126_v32 }
  0x23   :  { %v73_v28 = vadd.f32 %v72_v25, %v71_v21 }
  0x24   :  { %v129_v36 = vrot.slane %v128_v34, 4 }
  0x25   :  { %v74_v31 = vrot.slane %v73_v28, 2 }
  0x26   :  { %v130_v39 = vadd.f32 %v129_v36, %v128_v34 }
  0x27   :  { %v75_v33 = vadd.f32 %v74_v31, %v73_v28 }
  0x28   :  { %v131_v41 = vrot.slane %v130_v39, 2 }
  0x29   :  { %v76_v35 = vrot.slane %v75_v33, 1 }
  0x2a   :  { %v132_v42 = vadd.f32 %v131_v41, %v130_v39 }
  0x2b   :  { %v77_v38 = vadd.f32 %v76_v35, %v75_v33 }
  0x2c   :  { %v133_v43 = vrot.slane %v132_v42, 1 }
  0x2d   :  { %v78_v40 = vadd.f32 %v77_v38, %v39_v37 }
  0x2e   :  { %v134_v45 = vadd.f32 %v133_v43, %v132_v42 }
  0x2f   :  { %80 = vst.msk [vmem:[#allocation2] sm:$0x1] %vm20_vm0, %v78_v40 }
  0x30   :  { %v135_v46 = vadd.f32 %v134_v45, %v81_v44 }
  0x32   :  { %136 = vst.msk [vmem:[#allocation3] sm:$0x1] %vm20_vm0, %v135_v46 }
  0x36   :  { %v140_v47 = vld [vmem:[#allocation2] sm:$0x1] }
  0x37   :  { %v141_v48 = vmul.f32 0.0078125, %v140_v47 }
  0x39   :  { %v144_v49 = vmul.f32 %v141_v48, %v141_v48  ;;  %v142_v50 = vld [vmem:[#allocation3] sm:$0x1] }
  0x3a   :  { %v143_v51 = vmul.f32 0.0078125, %v142_v50 }
  0x3c   :  { %v145_v52 = vsub.f32 %v143_v51, %v144_v49 }
  0x3e   :  { %v146_v53 = vmax.f32 %v145_v52, 0.0 }
  0x40   :  { %v147_v54 = vadd.f32 1e-05, %v146_v53 }
  0x42   :  { %174 = vrsqrt.f32 %v147_v54  ;;  %vm154_vm3 = vweird.f32 %v147_v54 }
  0x48   :  { %v175_v55 = vpop.eup %174 }
  0x49   :  { %v149_v56 = vmul.f32 %v175_v55, %v147_v54  ;;  %vm155_vm2 = vweird.f32 %v175_v55 }
  0x4a   :  { %vm156_vm4 = vmor %vm154_vm3, %vm155_vm2 }
  0x4b   :  { %v150_v57 = vmul.f32 %v175_v55, %v149_v56 }
  0x4d   :  { %v151_v58 = vmul.f32 0.5, %v150_v57 }
  0x4f   :  { %v152_v59 = vsub.f32 1.5, %v151_v58 }
  0x51   :  { %v153_v60 = vmul.f32 %v175_v55, %v152_v59 }
  0x53   :  { %v157_v62 = vsel %vm156_vm4, %v175_v55, %v153_v60 }
  0x54   :  { %v159_v63 = vmul.f32 %v158_v61, %v157_v62 }
  0x56   :  { %160 = vst.msk [vmem:[%s303_s3] sm:$0x1] %vm20_vm0, %v159_v63  ;;  %v162_v1 = vmul.f32 %v159_v63, %v141_v48 }
  0x58   :  { %v163_v2 = vsub.f32 %v161_v0, %v162_v1 }
  0x5a   :  { %164 = vst.msk [vmem:[%s304_s4] sm:$0x1] %vm20_vm0, %v163_v2 }

// kernel: densenet_forward.37
= control target key start
LH: loop header
LB: loop body
LE: loop exit
PB: predicated region body
PF: predicated region fallthrough
CT: control target
= control target key end

     0   :  { %vm288_vm0 = vcmask 130048   ;;  %s943_s0 = inlined_call_operand.vmem [shape: f32[9,128,16], index: 0, kind: input, shape index: {}]   ;;  %s944_s1 = inlined_call_operand.vmem [shape: f32[128,16], index: 1, kind: output, shape index: {}]  }
   0x1   :  { %v8_v0 = vld [vmem:[%s943_s0] sm:$0xff]  ;;  %v9_v6 = vld [vmem:[%s943_s0 + $0x8] sm:$0xff]  ;;  %v10_v15 = vld [vmem:[%s943_s0 + $0x10] sm:$0xff] }
   0x2   :  { %v309_v1 = vld [vmem:[%s943_s0 + $0x80] sm:$0xff]  ;;  %v310_v7 = vld [vmem:[%s943_s0 + $0x88] sm:$0xff]  ;;  %v311_v16 = vld [vmem:[%s943_s0 + $0x90] sm:$0xff] }
   0x3   :  { %v325_v2 = vld [vmem:[%s943_s0 + $0x100] sm:$0xff]  ;;  %v41_v3 = vmax.f32 %v8_v0, %v309_v1  ;;  %v326_v8 = vld [vmem:[%s943_s0 + $0x108] sm:$0xff]  ;;  %v42_v10 = vmax.f32 %v9_v6, %v310_v7  ;;  %v327_v17 = vld [vmem:[%s943_s0 + $0x110] sm:$0xff]  ;;  %v43_v20 = vmax.f32 %v10_v15, %v311_v16 }
   0x4   :  { %v341_v4 = vld [vmem:[%s943_s0 + $0x180] sm:$0xff]  ;;  %v342_v13 = vld [vmem:[%s943_s0 + $0x188] sm:$0xff]  ;;  %v343_v24 = vld [vmem:[%s943_s0 + $0x190] sm:$0xff] }
   0x5   :  { %v74_v5 = vmax.f32 %v41_v3, %v325_v2  ;;  %v357_v9 = vld [vmem:[%s943_s0 + $0x200] sm:$0xff]  ;;  %v75_v14 = vmax.f32 %v42_v10, %v326_v8  ;;  %v358_v19 = vld [vmem:[%s943_s0 + $0x208] sm:$0xff]  ;;  %v76_v26 = vmax.f32 %v43_v20, %v327_v17  ;;  %v11_v27 = vld [vmem:[%s943_s0 + $0x18] sm:$0xff] }
   0x6   :  { %v373_v12 = vld [vmem:[%s943_s0 + $0x280] sm:$0xff]  ;;  %v374_v23 = vld [vmem:[%s943_s0 + $0x288] sm:$0xff]  ;;  %v312_v28 = vld [vmem:[%s943_s0 + $0x98] sm:$0xff] }
   0x7   :  { %v107_v11 = vmax.f32 %v74_v5, %v341_v4  ;;  %v389_v21 = vld [vmem:[%s943_s0 + $0x300] sm:$0xff]  ;;  %v108_v22 = vmax.f32 %v75_v14, %v342_v13  ;;  %v328_v29 = vld [vmem:[%s943_s0 + $0x118] sm:$0xff]  ;;  %v359_v33 = vld [vmem:[%s943_s0 + $0x210] sm:$0xff]  ;;  %v44_v34 = vmax.f32 %v11_v27, %v312_v28  ;;  %v109_v37 = vmax.f32 %v76_v26, %v343_v24 }
   0x8   :  { %v405_v30 = vld [vmem:[%s943_s0 + $0x380] sm:$0xff]  ;;  %v390_v36 = vld [vmem:[%s943_s0 + $0x308] sm:$0xff]  ;;  %v375_v38 = vld [vmem:[%s943_s0 + $0x290] sm:$0xff] }
   0x9   :  { %v140_v18 = vmax.f32 %v107_v11, %v357_v9  ;;  %v421_v31 = vld [vmem:[%s943_s0 + $0x400] sm:$0xff]  ;;  %v141_v32 = vmax.f32 %v108_v22, %v358_v19  ;;  %v344_v39 = vld [vmem:[%s943_s0 + $0x198] sm:$0xff]  ;;  %v77_v41 = vmax.f32 %v44_v34, %v328_v29  ;;  %v406_v46 = vld [vmem:[%s943_s0 + $0x388] sm:$0xff]  ;;  %v142_v48 = vmax.f32 %v109_v37, %v359_v33 }
   0xa   :  { %v12_v42 = vld [vmem:[%s943_s0 + $0x20] sm:$0xff]  ;;  %v422_v47 = vld [vmem:[%s943_s0 + $0x408] sm:$0xff]  ;;  %v360_v49 = vld [vmem:[%s943_s0 + $0x218] sm:$0xff] }
   0xb   :  { %v173_v25 = vmax.f32 %v140_v18, %v373_v12  ;;  %v174_v40 = vmax.f32 %v141_v32, %v374_v23  ;;  %v313_v43 = vld [vmem:[%s943_s0 + $0xa0] sm:$0xff]  ;;  %v391_v52 = vld [vmem:[%s943_s0 + $0x310] sm:$0xff]  ;;  %v110_v53 = vmax.f32 %v77_v41, %v344_v39  ;;  %v376_v54 = vld [vmem:[%s943_s0 + $0x298] sm:$0xff]  ;;  %v175_v57 = vmax.f32 %v142_v48, %v375_v38 }
   0xc   :  { %v329_v44 = vld [vmem:[%s943_s0 + $0x120] sm:$0xff]  ;;  %v45_v50 = vmax.f32 %v12_v42, %v313_v43  ;;  %v13_v59 = vld [vmem:[%s943_s0 + $0x28] sm:$0xff]  ;;  %v407_v63 = vld [vmem:[%s943_s0 + $0x390] sm:$0xff] }
   0xd   :  { %v206_v35 = vmax.f32 %v173_v25, %v389_v21  ;;  %v207_v51 = vmax.f32 %v174_v40, %v390_v36  ;;  %v345_v55 = vld [vmem:[%s943_s0 + $0x1a0] sm:$0xff]  ;;  %v314_v60 = vld [vmem:[%s943_s0 + $0xa8] sm:$0xff]  ;;  %v423_v0 = vld [vmem:[%s943_s0 + $0x410] sm:$0xff]  ;;  %v143_v1 = vmax.f32 %v110_v53, %v360_v49  ;;  %v208_v4 = vmax.f32 %v175_v57, %v391_v52 }
   0xe   :  { %v78_v58 = vmax.f32 %v45_v50, %v329_v44  ;;  %v330_v61 = vld [vmem:[%s943_s0 + $0x128] sm:$0xff]  ;;  %v361_v2 = vld [vmem:[%s943_s0 + $0x220] sm:$0xff]  ;;  %v46_v3 = vmax.f32 %v13_v59, %v314_v60  ;;  %v392_v5 = vld [vmem:[%s943_s0 + $0x318] sm:$0xff] }
   0xf   :  { %v239_v45 = vmax.f32 %v206_v35, %v405_v30  ;;  %v240_v62 = vmax.f32 %v207_v51, %v406_v46  ;;  %v377_v7 = vld [vmem:[%s943_s0 + $0x2a0] sm:$0xff]  ;;  %v346_v8 = vld [vmem:[%s943_s0 + $0x1a8] sm:$0xff]  ;;  %v176_v10 = vmax.f32 %v143_v1, %v376_v54  ;;  %v14_v12 = vld [vmem:[%s943_s0 + $0x30] sm:$0xff]  ;;  %v241_v15 = vmax.f32 %v208_v4, %v407_v63 }
  0x10   :  { %v111_v6 = vmax.f32 %v78_v58, %v345_v55  ;;  %v79_v11 = vmax.f32 %v46_v3, %v330_v61  ;;  %v315_v13 = vld [vmem:[%s943_s0 + $0xb0] sm:$0xff]  ;;  %v408_v16 = vld [vmem:[%s943_s0 + $0x398] sm:$0xff]  ;;  %v362_v19 = vld [vmem:[%s943_s0 + $0x228] sm:$0xff] }
  0x11   :  { %v272_v56 = vmax.f32 %v239_v45, %v421_v31  ;;  %v273_v9 = vmax.f32 %v240_v62, %v422_v47  ;;  %v331_v14 = vld [vmem:[%s943_s0 + $0x130] sm:$0xff]  ;;  %v424_v17 = vld [vmem:[%s943_s0 + $0x418] sm:$0xff]  ;;  %v47_v20 = vmax.f32 %v14_v12, %v315_v13  ;;  %v209_v21 = vmax.f32 %v176_v10, %v392_v5  ;;  %v393_v22 = vld [vmem:[%s943_s0 + $0x320] sm:$0xff] }
  0x12   :  { %v144_v18 = vmax.f32 %v111_v6, %v361_v2  ;;  %v112_v23 = vmax.f32 %v79_v11, %v346_v8  ;;  %v378_v24 = vld [vmem:[%s943_s0 + $0x2a8] sm:$0xff]  ;;  %v347_v25 = vld [vmem:[%s943_s0 + $0x1b0] sm:$0xff]  ;;  %v274_v26 = vmax.f32 %v241_v15, %v423_v0  ;;  %v15_v29 = vld [vmem:[%s943_s0 + $0x38] sm:$0xff] }
  0x13   :  { %289 = vst.msk [vmem:[%s944_s1] sm:$0xff] %vm288_vm0, %v272_v56  ;;  %v80_v28 = vmax.f32 %v47_v20, %v331_v14  ;;  %v316_v30 = vld [vmem:[%s943_s0 + $0xb8] sm:$0xff]  ;;  %v242_v32 = vmax.f32 %v209_v21, %v408_v16  ;;  %v409_v33 = vld [vmem:[%s943_s0 + $0x3a0] sm:$0xff]  ;;  %v363_v36 = vld [vmem:[%s943_s0 + $0x230] sm:$0xff] }
  0x14   :  { %290 = vst.msk [vmem:[%s944_s1 + $0x8] sm:$0xff] %vm288_vm0, %v273_v9  ;;  %v177_v27 = vmax.f32 %v144_v18, %v377_v7  ;;  %v332_v31 = vld [vmem:[%s943_s0 + $0x138] sm:$0xff]  ;;  %v425_v34 = vld [vmem:[%s943_s0 + $0x420] sm:$0xff]  ;;  %v145_v35 = vmax.f32 %v112_v23, %v362_v19  ;;  %v48_v37 = vmax.f32 %v15_v29, %v316_v30  ;;  %v394_v39 = vld [vmem:[%s943_s0 + $0x328] sm:$0xff] }
  0x15   :  { %291 = vst.msk [vmem:[%s944_s1 + $0x10] sm:$0xff] %vm288_vm0, %v274_v26  ;;  %v113_v40 = vmax.f32 %v80_v28, %v347_v25  ;;  %v379_v41 = vld [vmem:[%s943_s0 + $0x2b0] sm:$0xff]  ;;  %v348_v42 = vld [vmem:[%s943_s0 + $0x1b8] sm:$0xff]  ;;  %v275_v43 = vmax.f32 %v242_v32, %v424_v17  ;;  %v16_v46 = vld [vmem:[%s943_s0 + $0x40] sm:$0xff] }
  0x16   :  { %v210_v38 = vmax.f32 %v177_v27, %v393_v22  ;;  %v178_v44 = vmax.f32 %v145_v35, %v378_v24  ;;  %v81_v45 = vmax.f32 %v48_v37, %v332_v31  ;;  %v317_v47 = vld [vmem:[%s943_s0 + $0xc0] sm:$0xff]  ;;  %v410_v50 = vld [vmem:[%s943_s0 + $0x3a8] sm:$0xff]  ;;  %v364_v53 = vld [vmem:[%s943_s0 + $0x238] sm:$0xff] }
  0x17   :  { %v333_v48 = vld [vmem:[%s943_s0 + $0x140] sm:$0xff]  ;;  %v426_v51 = vld [vmem:[%s943_s0 + $0x428] sm:$0xff]  ;;  %v146_v52 = vmax.f32 %v113_v40, %v363_v36  ;;  %v49_v54 = vmax.f32 %v16_v46, %v317_v47  ;;  %292 = vst.msk [vmem:[%s944_s1 + $0x18] sm:$0xff] %vm288_vm0, %v275_v43  ;;  %v395_v56 = vld [vmem:[%s943_s0 + $0x330] sm:$0xff] }
  0x18   :  { %v243_v49 = vmax.f32 %v210_v38, %v409_v33  ;;  %v211_v55 = vmax.f32 %v178_v44, %v394_v39  ;;  %v114_v57 = vmax.f32 %v81_v45, %v348_v42  ;;  %v380_v58 = vld [vmem:[%s943_s0 + $0x2b8] sm:$0xff]  ;;  %v349_v59 = vld [vmem:[%s943_s0 + $0x1c0] sm:$0xff]  ;;  %v17_v63 = vld [vmem:[%s943_s0 + $0x48] sm:$0xff] }
  0x19   :  { %v179_v61 = vmax.f32 %v146_v52, %v379_v41  ;;  %v82_v62 = vmax.f32 %v49_v54, %v333_v48  ;;  %v318_v0 = vld [vmem:[%s943_s0 + $0xc8] sm:$0xff]  ;;  %v411_v3 = vld [vmem:[%s943_s0 + $0x3b0] sm:$0xff]  ;;  %v365_v6 = vld [vmem:[%s943_s0 + $0x240] sm:$0xff] }
  0x1a   :  { %v276_v60 = vmax.f32 %v243_v49, %v425_v34  ;;  %v334_v1 = vld [vmem:[%s943_s0 + $0x148] sm:$0xff]  ;;  %v244_v2 = vmax.f32 %v211_v55, %v410_v50  ;;  %v427_v4 = vld [vmem:[%s943_s0 + $0x430] sm:$0xff]  ;;  %v147_v5 = vmax.f32 %v114_v57, %v364_v53  ;;  %v50_v7 = vmax.f32 %v17_v63, %v318_v0  ;;  %v396_v9 = vld [vmem:[%s943_s0 + $0x338] sm:$0xff] }
  0x1b   :  { %v212_v8 = vmax.f32 %v179_v61, %v395_v56  ;;  %v115_v10 = vmax.f32 %v82_v62, %v349_v59  ;;  %v381_v11 = vld [vmem:[%s943_s0 + $0x2c0] sm:$0xff]  ;;  %v350_v12 = vld [vmem:[%s943_s0 + $0x1c8] sm:$0xff]  ;;  %v18_v16 = vld [vmem:[%s943_s0 + $0x50] sm:$0xff] }
  0x1c   :  { %293 = vst.msk [vmem:[%s944_s1 + $0x20] sm:$0xff] %vm288_vm0, %v276_v60  ;;  %v277_v13 = vmax.f32 %v244_v2, %v426_v51  ;;  %v180_v14 = vmax.f32 %v147_v5, %v380_v58  ;;  %v83_v15 = vmax.f32 %v50_v7, %v334_v1  ;;  %v319_v17 = vld [vmem:[%s943_s0 + $0xd0] sm:$0xff]  ;;  %v412_v20 = vld [vmem:[%s943_s0 + $0x3b8] sm:$0xff]  ;;  %v366_v23 = vld [vmem:[%s943_s0 + $0x248] sm:$0xff] }
  0x1d   :  { %v335_v18 = vld [vmem:[%s943_s0 + $0x150] sm:$0xff]  ;;  %v245_v19 = vmax.f32 %v212_v8, %v411_v3  ;;  %v428_v21 = vld [vmem:[%s943_s0 + $0x438] sm:$0xff]  ;;  %v148_v22 = vmax.f32 %v115_v10, %v365_v6  ;;  %v51_v24 = vmax.f32 %v18_v16, %v319_v17  ;;  %v397_v26 = vld [vmem:[%s943_s0 + $0x340] sm:$0xff] }
  0x1e   :  { %294 = vst.msk [vmem:[%s944_s1 + $0x28] sm:$0xff] %vm288_vm0, %v277_v13  ;;  %v213_v25 = vmax.f32 %v180_v14, %v396_v9  ;;  %v116_v27 = vmax.f32 %v83_v15, %v350_v12  ;;  %v382_v28 = vld [vmem:[%s943_s0 + $0x2c8] sm:$0xff]  ;;  %v351_v29 = vld [vmem:[%s943_s0 + $0x1d0] sm:$0xff]  ;;  %v19_v33 = vld [vmem:[%s943_s0 + $0x58] sm:$0xff] }
  0x1f   :  { %v278_v30 = vmax.f32 %v245_v19, %v427_v4  ;;  %v181_v31 = vmax.f32 %v148_v22, %v381_v11  ;;  %v84_v32 = vmax.f32 %v51_v24, %v335_v18  ;;  %v320_v34 = vld [vmem:[%s943_s0 + $0xd8] sm:$0xff]  ;;  %v413_v37 = vld [vmem:[%s943_s0 + $0x3c0] sm:$0xff]  ;;  %v367_v40 = vld [vmem:[%s943_s0 + $0x250] sm:$0xff] }
  0x20   :  { %v336_v35 = vld [vmem:[%s943_s0 + $0x158] sm:$0xff]  ;;  %v246_v36 = vmax.f32 %v213_v25, %v412_v20  ;;  %v429_v38 = vld [vmem:[%s943_s0 + $0x440] sm:$0xff]  ;;  %v149_v39 = vmax.f32 %v116_v27, %v366_v23  ;;  %v52_v41 = vmax.f32 %v19_v33, %v320_v34  ;;  %v398_v43 = vld [vmem:[%s943_s0 + $0x348] sm:$0xff] }
  0x21   :  { %295 = vst.msk [vmem:[%s944_s1 + $0x30] sm:$0xff] %vm288_vm0, %v278_v30  ;;  %v214_v42 = vmax.f32 %v181_v31, %v397_v26  ;;  %v117_v44 = vmax.f32 %v84_v32, %v351_v29  ;;  %v383_v45 = vld [vmem:[%s943_s0 + $0x2d0] sm:$0xff]  ;;  %v352_v46 = vld [vmem:[%s943_s0 + $0x1d8] sm:$0xff]  ;;  %v20_v50 = vld [vmem:[%s943_s0 + $0x60] sm:$0xff] }
  0x22   :  { %v279_v47 = vmax.f32 %v246_v36, %v428_v21  ;;  %v182_v48 = vmax.f32 %v149_v39, %v382_v28  ;;  %v85_v49 = vmax.f32 %v52_v41, %v336_v35  ;;  %v321_v51 = vld [vmem:[%s943_s0 + $0xe0] sm:$0xff]  ;;  %v414_v54 = vld [vmem:[%s943_s0 + $0x3c8] sm:$0xff]  ;;  %v368_v57 = vld [vmem:[%s943_s0 + $0x258] sm:$0xff] }
  0x23   :  { %v337_v52 = vld [vmem:[%s943_s0 + $0x160] sm:$0xff]  ;;  %v247_v53 = vmax.f32 %v214_v42, %v413_v37  ;;  %v430_v55 = vld [vmem:[%s943_s0 + $0x448] sm:$0xff]  ;;  %v150_v56 = vmax.f32 %v117_v44, %v367_v40  ;;  %v53_v58 = vmax.f32 %v20_v50, %v321_v51  ;;  %v399_v60 = vld [vmem:[%s943_s0 + $0x350] sm:$0xff] }
  0x24   :  { %296 = vst.msk [vmem:[%s944_s1 + $0x38] sm:$0xff] %vm288_vm0, %v279_v47  ;;  %v215_v59 = vmax.f32 %v182_v48, %v398_v43  ;;  %v118_v61 = vmax.f32 %v85_v49, %v352_v46  ;;  %v384_v62 = vld [vmem:[%s943_s0 + $0x2d8] sm:$0xff]  ;;  %v353_v63 = vld [vmem:[%s943_s0 + $0x1e0] sm:$0xff]  ;;  %v21_v3 = vld [vmem:[%s943_s0 + $0x68] sm:$0xff] }
  0x25   :  { %v280_v0 = vmax.f32 %v247_v53, %v429_v38  ;;  %v183_v1 = vmax.f32 %v150_v56, %v383_v45  ;;  %v86_v2 = vmax.f32 %v53_v58, %v337_v52  ;;  %v322_v4 = vld [vmem:[%s943_s0 + $0xe8] sm:$0xff]  ;;  %v415_v7 = vld [vmem:[%s943_s0 + $0x3d0] sm:$0xff]  ;;  %v369_v10 = vld [vmem:[%s943_s0 + $0x260] sm:$0xff] }
  0x26   :  { %v338_v5 = vld [vmem:[%s943_s0 + $0x168] sm:$0xff]  ;;  %v248_v6 = vmax.f32 %v215_v59, %v414_v54  ;;  %v431_v8 = vld [vmem:[%s943_s0 + $0x450] sm:$0xff]  ;;  %v151_v9 = vmax.f32 %v118_v61, %v368_v57  ;;  %v54_v11 = vmax.f32 %v21_v3, %v322_v4  ;;  %v400_v13 = vld [vmem:[%s943_s0 + $0x358] sm:$0xff] }
  0x27   :  { %297 = vst.msk [vmem:[%s944_s1 + $0x40] sm:$0xff] %vm288_vm0, %v280_v0  ;;  %v216_v12 = vmax.f32 %v183_v1, %v399_v60  ;;  %v119_v14 = vmax.f32 %v86_v2, %v353_v63  ;;  %v385_v15 = vld [vmem:[%s943_s0 + $0x2e0] sm:$0xff]  ;;  %v354_v16 = vld [vmem:[%s943_s0 + $0x1e8] sm:$0xff]  ;;  %v22_v20 = vld [vmem:[%s943_s0 + $0x70] sm:$0xff] }
  0x28   :  { %v281_v17 = vmax.f32 %v248_v6, %v430_v55  ;;  %v184_v18 = vmax.f32 %v151_v9, %v384_v62  ;;  %v87_v19 = vmax.f32 %v54_v11, %v338_v5  ;;  %v323_v21 = vld [vmem:[%s943_s0 + $0xf0] sm:$0xff]  ;;  %v416_v24 = vld [vmem:[%s943_s0 + $0x3d8] sm:$0xff]  ;;  %v370_v27 = vld [vmem:[%s943_s0 + $0x268] sm:$0xff] }
  0x29   :  { %v339_v22 = vld [vmem:[%s943_s0 + $0x170] sm:$0xff]  ;;  %v249_v23 = vmax.f32 %v216_v12, %v415_v7  ;;  %v432_v25 = vld [vmem:[%s943_s0 + $0x458] sm:$0xff]  ;;  %v152_v26 = vmax.f32 %v119_v14, %v369_v10  ;;  %v55_v28 = vmax.f32 %v22_v20, %v323_v21  ;;  %v401_v30 = vld [vmem:[%s943_s0 + $0x360] sm:$0xff] }
  0x2a   :  { %298 = vst.msk [vmem:[%s944_s1 + $0x48] sm:$0xff] %vm288_vm0, %v281_v17  ;;  %v217_v29 = vmax.f32 %v184_v18, %v400_v13  ;;  %v120_v31 = vmax.f32 %v87_v19, %v354_v16  ;;  %v386_v32 = vld [vmem:[%s943_s0 + $0x2e8] sm:$0xff]  ;;  %v355_v33 = vld [vmem:[%s943_s0 + $0x1f0] sm:$0xff]  ;;  %v23_v37 = vld [vmem:[%s943_s0 + $0x78] sm:$0xff] }
  0x2b   :  { %v282_v34 = vmax.f32 %v249_v23, %v431_v8  ;;  %v185_v35 = vmax.f32 %v152_v26, %v385_v15  ;;  %v88_v36 = vmax.f32 %v55_v28, %v339_v22  ;;  %v324_v38 = vld [vmem:[%s943_s0 + $0xf8] sm:$0xff]  ;;  %v417_v41 = vld [vmem:[%s943_s0 + $0x3e0] sm:$0xff]  ;;  %v371_v43 = vld [vmem:[%s943_s0 + $0x270] sm:$0xff] }
  0x2c   :  { %v340_v39 = vld [vmem:[%s943_s0 + $0x178] sm:$0xff]  ;;  %v250_v40 = vmax.f32 %v217_v29, %v416_v24  ;;  %v153_v42 = vmax.f32 %v120_v31, %v370_v27  ;;  %v56_v44 = vmax.f32 %v23_v37, %v324_v38  ;;  %v402_v46 = vld [vmem:[%s943_s0 + $0x368] sm:$0xff]  ;;  %v433_v50 = vld [vmem:[%s943_s0 + $0x460] sm:$0xff] }
  0x2d   :  { %299 = vst.msk [vmem:[%s944_s1 + $0x50] sm:$0xff] %vm288_vm0, %v282_v34  ;;  %v218_v45 = vmax.f32 %v185_v35, %v401_v30  ;;  %v121_v47 = vmax.f32 %v88_v36, %v355_v33  ;;  %v356_v48 = vld [vmem:[%s943_s0 + $0x1f8] sm:$0xff]  ;;  %v387_v52 = vld [vmem:[%s943_s0 + $0x2f0] sm:$0xff]  ;;  %v418_v55 = vld [vmem:[%s943_s0 + $0x3e8] sm:$0xff] }
  0x2e   :  { %v283_v49 = vmax.f32 %v250_v40, %v432_v25  ;;  %v186_v51 = vmax.f32 %v153_v42, %v386_v32  ;;  %v89_v53 = vmax.f32 %v56_v44, %v340_v39  ;;  %v372_v57 = vld [vmem:[%s943_s0 + $0x278] sm:$0xff]  ;;  %v403_v59 = vld [vmem:[%s943_s0 + $0x370] sm:$0xff]  ;;  %v434_v62 = vld [vmem:[%s943_s0 + $0x468] sm:$0xff] }
  0x2f   :  { %v251_v54 = vmax.f32 %v218_v45, %v417_v41  ;;  %v154_v56 = vmax.f32 %v121_v47, %v371_v43  ;;  %v388_v0 = vld [vmem:[%s943_s0 + $0x2f8] sm:$0xff]  ;;  %v419_v2 = vld [vmem:[%s943_s0 + $0x3f0] sm:$0xff] }
  0x30   :  { %300 = vst.msk [vmem:[%s944_s1 + $0x58] sm:$0xff] %vm288_vm0, %v283_v49  ;;  %v219_v58 = vmax.f32 %v186_v51, %v402_v46  ;;  %v122_v60 = vmax.f32 %v89_v53, %v356_v48  ;;  %v404_v5 = vld [vmem:[%s943_s0 + $0x378] sm:$0xff]  ;;  %v435_v7 = vld [vmem:[%s943_s0 + $0x470] sm:$0xff] }
  0x31   :  { %v284_v61 = vmax.f32 %v251_v54, %v433_v50  ;;  %v187_v63 = vmax.f32 %v154_v56, %v387_v52  ;;  %v420_v10 = vld [vmem:[%s943_s0 + $0x3f8] sm:$0xff] }
  0x32   :  { %v252_v1 = vmax.f32 %v219_v58, %v418_v55  ;;  %v155_v3 = vmax.f32 %v122_v60, %v372_v57  ;;  %v436_v13 = vld [vmem:[%s943_s0 + $0x478] sm:$0xff] }
  0x33   :  { %301 = vst.msk [vmem:[%s944_s1 + $0x60] sm:$0xff] %vm288_vm0, %v284_v61  ;;  %v220_v4 = vmax.f32 %v187_v63, %v403_v59 }
  0x34   :  { %v285_v6 = vmax.f32 %v252_v1, %v434_v62  ;;  %v188_v8 = vmax.f32 %v155_v3, %v388_v0 }
  0x35   :  { %v253_v9 = vmax.f32 %v220_v4, %v419_v2 }
  0x36   :  { %302 = vst.msk [vmem:[%s944_s1 + $0x68] sm:$0xff] %vm288_vm0, %v285_v6  ;;  %v221_v11 = vmax.f32 %v188_v8, %v404_v5 }
  0x37   :  { %v286_v12 = vmax.f32 %v253_v9, %v435_v7 }
  0x38   :  { %v254_v14 = vmax.f32 %v221_v11, %v420_v10 }
  0x39   :  { %303 = vst.msk [vmem:[%s944_s1 + $0x70] sm:$0xff] %vm288_vm0, %v286_v12 }
  0x3a   :  { %v287_v15 = vmax.f32 %v254_v14, %v436_v13 }
  0x3c   :  { %304 = vst.msk [vmem:[%s944_s1 + $0x78] sm:$0xff] %vm288_vm0, %v287_v15 }

// kernel: densenet_forward.41
= control target key start
LH: loop header
LB: loop body
LE: loop exit
PB: predicated region body
PF: predicated region fallthrough
CT: control target
= control target key end

     0   :  { %vm86_vm0 = vcmask 130048   ;;  %s265_s0 = inlined_call_operand.vmem [shape: f32[128,16], index: 0, kind: input, shape index: {}]   ;;  %s266_s1 = inlined_call_operand.vmem [shape: f32[1,16], index: 1, kind: input, shape index: {}]   ;;  %s267_s2 = inlined_call_operand.vmem [shape: f32[1,16], index: 2, kind: input, shape index: {}]   ;;  %s268_s3 = inlined_call_operand.vmem [shape: f32[128,16], index: 3, kind: output, shape index: {}]  }
   0x1   :  { %v14_v0 = vld [vmem:[%s265_s0] sm:$0xff]  ;;  %v15_v3 = vld [vmem:[%s265_s0 + $0x8] sm:$0xff]  ;;  %v16_v6 = vld [vmem:[%s265_s0 + $0x10] sm:$0xff] }
   0x2   :  { %v107_v1 = vld [vmem:[%s266_s1] ss:$0 sm:$0xff]  ;;  %v17_v7 = vld [vmem:[%s265_s0 + $0x18] sm:$0xff]  ;;  %v19_v12 = vld [vmem:[%s265_s0 + $0x28] sm:$0xff] }
   0x3   :  { %v138_v2 = vld [vmem:[%s267_s2] ss:$0 sm:$0xff]  ;;  %v34_v4 = vmul.f32 %v107_v1, %v14_v0  ;;  %v35_v5 = vmul.f32 %v107_v1, %v15_v3  ;;  %v36_v9 = vmul.f32 %v107_v1, %v16_v6  ;;  %v37_v10 = vmul.f32 %v107_v1, %v17_v7  ;;  %v20_v13 = vld [vmem:[%s265_s0 + $0x30] sm:$0xff]  ;;  %v21_v14 = vld [vmem:[%s265_s0 + $0x38] sm:$0xff] }
   0x4   :  { %v18_v8 = vld [vmem:[%s265_s0 + $0x20] sm:$0xff]  ;;  %v39_v17 = vmul.f32 %v107_v1, %v19_v12  ;;  %v40_v18 = vmul.f32 %v107_v1, %v20_v13  ;;  %v41_v22 = vmul.f32 %v107_v1, %v21_v14  ;;  %v23_v24 = vld [vmem:[%s265_s0 + $0x48] sm:$0xff]  ;;  %v24_v29 = vld [vmem:[%s265_s0 + $0x50] sm:$0xff] }
   0x5   :  { %v38_v11 = vmul.f32 %v107_v1, %v18_v8  ;;  %v54_v15 = vadd.f32 %v138_v2, %v34_v4  ;;  %v55_v16 = vadd.f32 %v138_v2, %v35_v5  ;;  %v56_v19 = vadd.f32 %v138_v2, %v36_v9  ;;  %v22_v23 = vld [vmem:[%s265_s0 + $0x40] sm:$0xff]  ;;  %v25_v30 = vld [vmem:[%s265_s0 + $0x58] sm:$0xff]  ;;  %v27_v35 = vld [vmem:[%s265_s0 + $0x68] sm:$0xff] }
   0x6   :  { %v57_v20 = vadd.f32 %v138_v2, %v37_v10  ;;  %v59_v27 = vadd.f32 %v138_v2, %v39_v17  ;;  %v60_v28 = vadd.f32 %v138_v2, %v40_v18  ;;  %v26_v31 = vld [vmem:[%s265_s0 + $0x60] sm:$0xff]  ;;  %v61_v34 = vadd.f32 %v138_v2, %v41_v22  ;;  %v28_v36 = vld [vmem:[%s265_s0 + $0x70] sm:$0xff]  ;;  %v29_v41 = vld [vmem:[%s265_s0 + $0x78] sm:$0xff] }
   0x7   :  { %v58_v21 = vadd.f32 %v138_v2, %v38_v11  ;;  %v70_v25 = vmax.f32 %v54_v15, 0.0  ;;  %v71_v26 = vmax.f32 %v55_v16, 0.0  ;;  %v72_v32 = vmax.f32 %v56_v19, 0.0 }
   0x8   :  { %v73_v33 = vmax.f32 %v57_v20, 0.0  ;;  %v75_v38 = vmax.f32 %v59_v27, 0.0  ;;  %v42_v39 = vmul.f32 %v107_v1, %v22_v23  ;;  %v43_v40 = vmul.f32 %v107_v1, %v23_v24 }
   0x9   :  { %87 = vst.msk [vmem:[%s268_s3] sm:$0xff] %vm86_vm0, %v70_v25  ;;  %v74_v37 = vmax.f32 %v58_v21, 0.0  ;;  %v76_v42 = vmax.f32 %v60_v28, 0.0  ;;  %v44_v43 = vmul.f32 %v107_v1, %v24_v29  ;;  %v45_v44 = vmul.f32 %v107_v1, %v25_v30 }
   0xa   :  { %88 = vst.msk [vmem:[%s268_s3 + $0x8] sm:$0xff] %vm86_vm0, %v71_v26  ;;  %v46_v45 = vmul.f32 %v107_v1, %v26_v31  ;;  %v62_v46 = vadd.f32 %v138_v2, %v42_v39  ;;  %v63_v47 = vadd.f32 %v138_v2, %v43_v40  ;;  %v47_v48 = vmul.f32 %v107_v1, %v27_v35 }
   0xb   :  { %89 = vst.msk [vmem:[%s268_s3 + $0x10] sm:$0xff] %vm86_vm0, %v72_v32  ;;  %v48_v49 = vmul.f32 %v107_v1, %v28_v36  ;;  %v77_v50 = vmax.f32 %v61_v34, 0.0  ;;  %v64_v51 = vadd.f32 %v138_v2, %v44_v43  ;;  %v65_v52 = vadd.f32 %v138_v2, %v45_v44 }
   0xc   :  { %90 = vst.msk [vmem:[%s268_s3 + $0x18] sm:$0xff] %vm86_vm0, %v73_v33  ;;  %v49_v53 = vmul.f32 %v107_v1, %v29_v41  ;;  %v78_v54 = vmax.f32 %v62_v46, 0.0  ;;  %v66_v55 = vadd.f32 %v138_v2, %v46_v45  ;;  %v79_v56 = vmax.f32 %v63_v47, 0.0 }
   0xd   :  { %91 = vst.msk [vmem:[%s268_s3 + $0x20] sm:$0xff] %vm86_vm0, %v74_v37  ;;  %v67_v57 = vadd.f32 %v138_v2, %v47_v48  ;;  %v80_v58 = vmax.f32 %v64_v51, 0.0  ;;  %v68_v59 = vadd.f32 %v138_v2, %v48_v49  ;;  %v81_v60 = vmax.f32 %v65_v52, 0.0 }
   0xe   :  { %92 = vst.msk [vmem:[%s268_s3 + $0x28] sm:$0xff] %vm86_vm0, %v75_v38  ;;  %v69_v61 = vadd.f32 %v138_v2, %v49_v53  ;;  %v82_v62 = vmax.f32 %v66_v55, 0.0 }
   0xf   :  { %93 = vst.msk [vmem:[%s268_s3 + $0x30] sm:$0xff] %vm86_vm0, %v76_v42  ;;  %v83_v63 = vmax.f32 %v67_v57, 0.0  ;;  %v84_v0 = vmax.f32 %v68_v59, 0.0 }
  0x10   :  { %94 = vst.msk [vmem:[%s268_s3 + $0x38] sm:$0xff] %vm86_vm0, %v77_v50  ;;  %v85_v1 = vmax.f32 %v69_v61, 0.0 }
  0x11   :  { %95 = vst.msk [vmem:[%s268_s3 + $0x40] sm:$0xff] %vm86_vm0, %v78_v54 }
  0x12   :  { %96 = vst.msk [vmem:[%s268_s3 + $0x48] sm:$0xff] %vm86_vm0, %v79_v56 }
  0x13   :  { %97 = vst.msk [vmem:[%s268_s3 + $0x50] sm:$0xff] %vm86_vm0, %v80_v58 }
  0x14   :  { %98 = vst.msk [vmem:[%s268_s3 + $0x58] sm:$0xff] %vm86_vm0, %v81_v60 }
  0x15   :  { %99 = vst.msk [vmem:[%s268_s3 + $0x60] sm:$0xff] %vm86_vm0, %v82_v62 }
  0x16   :  { %100 = vst.msk [vmem:[%s268_s3 + $0x68] sm:$0xff] %vm86_vm0, %v83_v63 }
  0x17   :  { %101 = vst.msk [vmem:[%s268_s3 + $0x70] sm:$0xff] %vm86_vm0, %v84_v0 }
  0x18   :  { %102 = vst.msk [vmem:[%s268_s3 + $0x78] sm:$0xff] %vm86_vm0, %v85_v1 }

// kernel: densenet_forward.39
= control target key start
LH: loop header
LB: loop body
LE: loop exit
PB: predicated region body
PF: predicated region fallthrough
CT: control target
= control target key end

     0   :  { %vm25_vm0 = vcmask 130048   ;;  %v331_v3 = vmov 0.0   ;;  %s596_s1 = inlined_call_operand.vmem [shape: bf16[16,16], index: 1, kind: input, shape index: {}]   ;;  %s597_s0 = inlined_call_operand.vmem [shape: f32[128,16], index: 0, kind: input, shape index: {}]   ;;  %s598_s3 = inlined_call_operand.vmem [shape: f32[1,16], index: 3, kind: input, shape index: {}]   ;;  %s599_s4 = inlined_call_operand.vmem [shape: f32[1,16], index: 4, kind: input, shape index: {}]   ;;  %s600_s2 = inlined_call_operand.vmem [shape: f32[1,16], index: 2, kind: input, shape index: {}]   ;;  %s601_s5 = inlined_call_operand.vmem [shape: f32[128,16], index: 5, kind: output, shape index: {}]  }
   0x1   :  { %v323_v0 = vld [vmem:[%s596_s1] sm:$0xff]  ;;  %v43_v2 = vld [vmem:[%s597_s0 + $0x8] sm:$0xff]  ;;  %26 = vst.msk [vmem:[#allocation2] sm:$0xff] %vm25_vm0, %v331_v3  ;;  %v44_v27 = vld [vmem:[%s597_s0 + $0x10] sm:$0xff] }
   0x2   :  { %v42_v1 = vld [vmem:[%s597_s0] sm:$0xff]  ;;  %178 = vmatpush.bf16.msra.mxu0 %v323_v0  ;;  %324 = vmatpush.bf16.msra.mxu1 %v323_v0  ;;  %v47_v7 = vld [vmem:[%s597_s0 + $0x28] sm:$0xff]  ;;  %27 = vst.msk [vmem:[#allocation2 + $0x8] sm:$0xff] %vm25_vm0, %v331_v3  ;;  %v45_v32 = vld [vmem:[%s597_s0 + $0x18] sm:$0xff] }
   0x3   :  { %v376_v4 = vld [vmem:[%s598_s3] ss:$0 sm:$0xff]  ;;  %325 = vmatpush.bf16.msra.mxu2 %v323_v0  ;;  %326 = vmatpush.bf16.msra.mxu3 %v323_v0  ;;  %v51_v12 = vld [vmem:[%s597_s0 + $0x48] sm:$0xff]  ;;  %28 = vst.msk [vmem:[#allocation2 + $0x10] sm:$0xff] %vm25_vm0, %v331_v3  ;;  %v48_v37 = vld [vmem:[%s597_s0 + $0x30] sm:$0xff] }
   0x4   :  { %v381_v5 = vld [vmem:[%s599_s4] ss:$0 sm:$0xff]  ;;  %v62_v8 = vmul.f32 %v376_v4, %v42_v1  ;;  %v63_v9 = vmul.f32 %v376_v4, %v43_v2  ;;  %v67_v14 = vmul.f32 %v376_v4, %v47_v7  ;;  %v71_v16 = vmul.f32 %v376_v4, %v51_v12  ;;  %v55_v17 = vld [vmem:[%s597_s0 + $0x68] sm:$0xff]  ;;  %29 = vst.msk [vmem:[#allocation2 + $0x18] sm:$0xff] %vm25_vm0, %v331_v3  ;;  %v49_v40 = vld [vmem:[%s597_s0 + $0x38] sm:$0xff] }
   0x5   :  { %v46_v6 = vld [vmem:[%s597_s0 + $0x20] sm:$0xff]  ;;  %v75_v22 = vmul.f32 %v376_v4, %v55_v17  ;;  %30 = vst.msk [vmem:[#allocation2 + $0x20] sm:$0xff] %vm25_vm0, %v331_v3  ;;  %v52_v41 = vld [vmem:[%s597_s0 + $0x50] sm:$0xff]  ;;  %v53_v42 = vld [vmem:[%s597_s0 + $0x58] sm:$0xff]  ;;  %v64_v47 = vmul.f32 %v376_v4, %v44_v27  ;;  %v65_v48 = vmul.f32 %v376_v4, %v45_v32  ;;  %v68_v49 = vmul.f32 %v376_v4, %v48_v37 }
   0x6   :  { %v66_v10 = vmul.f32 %v376_v4, %v46_v6  ;;  %v50_v11 = vld [vmem:[%s597_s0 + $0x40] sm:$0xff]  ;;  %v82_v19 = vadd.f32 %v381_v5, %v62_v8  ;;  %v83_v20 = vadd.f32 %v381_v5, %v63_v9  ;;  %v87_v23 = vadd.f32 %v381_v5, %v67_v14  ;;  %31 = vst.msk [vmem:[#allocation2 + $0x28] sm:$0xff] %vm25_vm0, %v331_v3  ;;  %v56_v45 = vld [vmem:[%s597_s0 + $0x70] sm:$0xff]  ;;  %v57_v50 = vld [vmem:[%s597_s0 + $0x78] sm:$0xff] }
   0x7   :  { %v54_v13 = vld [vmem:[%s597_s0 + $0x60] sm:$0xff]  ;;  %v70_v15 = vmul.f32 %v376_v4, %v50_v11  ;;  %v91_v25 = vadd.f32 %v381_v5, %v71_v16  ;;  %v95_v31 = vadd.f32 %v381_v5, %v75_v22  ;;  %32 = vst.msk [vmem:[#allocation2 + $0x30] sm:$0xff] %vm25_vm0, %v331_v3  ;;  %v69_v51 = vmul.f32 %v376_v4, %v49_v40 }
   0x8   :  { %v74_v18 = vmul.f32 %v376_v4, %v54_v13  ;;  %v86_v21 = vadd.f32 %v381_v5, %v66_v10  ;;  %v98_v28 = vmax.f32 %v82_v19, 0.0  ;;  %v99_v29 = vmax.f32 %v83_v20, 0.0  ;;  %33 = vst.msk [vmem:[#allocation2 + $0x38] sm:$0xff] %vm25_vm0, %v331_v3 }
   0x9   :  { %v90_v24 = vadd.f32 %v381_v5, %v70_v15  ;;  %v103_v33 = vmax.f32 %v87_v23, 0.0  ;;  %v107_v35 = vmax.f32 %v91_v25, 0.0  ;;  %v111_v39 = vmax.f32 %v95_v31, 0.0  ;;  %34 = vst.msk [vmem:[#allocation2 + $0x40] sm:$0xff] %vm25_vm0, %v331_v3  ;;  %v115_v20 = vld [vmem:[#allocation2 + $0x8] sm:$0xff] }
   0xa   :  { %v94_v26 = vadd.f32 %v381_v5, %v74_v18  ;;  %v102_v30 = vmax.f32 %v86_v21, 0.0  ;;  %v130_v38 = vpack.c.bf16 %v99_v29, %v98_v28  ;;  %v72_v52 = vmul.f32 %v376_v4, %v52_v41  ;;  %35 = vst.msk [vmem:[#allocation2 + $0x48] sm:$0xff] %vm25_vm0, %v331_v3  ;;  %v500_v21 = vld [vmem:[%s600_s2] ss:$0 sm:$0xff]  ;;  %v116_v40 = vld [vmem:[#allocation2 + $0x10] sm:$0xff] }
   0xb   :  { %v106_v34 = vmax.f32 %v90_v24, 0.0  ;;  %v73_v53 = vmul.f32 %v376_v4, %v53_v42  ;;  %v76_v54 = vmul.f32 %v376_v4, %v56_v45  ;;  %36 = vst.msk [vmem:[#allocation2 + $0x50] sm:$0xff] %vm25_vm0, %v331_v3  ;;  %v77_v55 = vmul.f32 %v376_v4, %v57_v50 }
   0xc   :  { %v110_v36 = vmax.f32 %v94_v26, 0.0  ;;  %v132_v43 = vpack.c.bf16 %v103_v33, %v102_v30  ;;  %315 = vmatmul.msk.bf16.vlgmr.msra.gmra.mxu0 %vm25_vm0, %v130_v38  ;;  %37 = vst.msk [vmem:[#allocation2 + $0x58] sm:$0xff] %vm25_vm0, %v331_v3  ;;  %v84_v56 = vadd.f32 %v381_v5, %v64_v47  ;;  %v85_v57 = vadd.f32 %v381_v5, %v65_v48 }
   0xd   :  { %v134_v44 = vpack.c.bf16 %v107_v35, %v106_v34  ;;  %38 = vst.msk [vmem:[#allocation2 + $0x60] sm:$0xff] %vm25_vm0, %v331_v3  ;;  %v88_v58 = vadd.f32 %v381_v5, %v68_v49  ;;  %v89_v59 = vadd.f32 %v381_v5, %v69_v51  ;;  %v92_v60 = vadd.f32 %v381_v5, %v72_v52  ;;  %v119_v26 = vld [vmem:[#allocation2 + $0x28] sm:$0xff] }
   0xe   :  { %v136_v46 = vpack.c.bf16 %v111_v39, %v110_v36  ;;  %317 = vmatmul.msk.bf16.vlgmr.msra.gmra.mxu1 %vm25_vm0, %v132_v43  ;;  %v93_v61 = vadd.f32 %v381_v5, %v73_v53  ;;  %39 = vst.msk [vmem:[#allocation2 + $0x68] sm:$0xff] %vm25_vm0, %v331_v3  ;;  %v96_v62 = vadd.f32 %v381_v5, %v76_v54  ;;  %v100_v0 = vmax.f32 %v84_v56, 0.0 }
   0xf   :  { %319 = vmatmul.msk.bf16.vlgmr.msra.gmra.mxu2 %vm25_vm0, %v134_v44  ;;  %v97_v63 = vadd.f32 %v381_v5, %v77_v55  ;;  %40 = vst.msk [vmem:[#allocation2 + $0x70] sm:$0xff] %vm25_vm0, %v331_v3  ;;  %v101_v1 = vmax.f32 %v85_v57, 0.0  ;;  %v104_v2 = vmax.f32 %v88_v58, 0.0  ;;  %v105_v4 = vmax.f32 %v89_v59, 0.0  ;;  %v118_v5 = vld [vmem:[#allocation2 + $0x20] sm:$0xff]  ;;  %v120_v44 = vld [vmem:[#allocation2 + $0x30] sm:$0xff] }
  0x10   :  { %321 = vmatmul.msk.bf16.vlgmr.msra.gmra.mxu3 %vm25_vm0, %v136_v46  ;;  %41 = vst.msk [vmem:[#allocation2 + $0x78] sm:$0xff] %vm25_vm0, %v331_v3  ;;  %v108_v6 = vmax.f32 %v92_v60, 0.0  ;;  %v109_v7 = vmax.f32 %v93_v61, 0.0  ;;  %v112_v8 = vmax.f32 %v96_v62, 0.0  ;;  %v114_v3 = vld [vmem:[#allocation2] sm:$0xff]  ;;  %v117_v58 = vld [vmem:[#allocation2 + $0x18] sm:$0xff] }
  0x11   :  { %v113_v9 = vmax.f32 %v97_v63, 0.0  ;;  %v131_v10 = vpack.c.bf16 %v101_v1, %v100_v0  ;;  %v133_v11 = vpack.c.bf16 %v105_v4, %v104_v2  ;;  %v122_v18 = vld [vmem:[#allocation2 + $0x40] sm:$0xff]  ;;  %v123_v35 = vld [vmem:[#allocation2 + $0x48] sm:$0xff]  ;;  %v121_v62 = vld [vmem:[#allocation2 + $0x38] sm:$0xff] }
  0x12   :  { %v135_v12 = vpack.c.bf16 %v109_v7, %v108_v6  ;;  %v124_v53 = vld [vmem:[#allocation2 + $0x50] sm:$0xff] }
  0x13   :  { %v137_v13 = vpack.c.bf16 %v113_v9, %v112_v8  ;;  %v125_v9 = vld [vmem:[#allocation2 + $0x58] sm:$0xff] }
  0x14   :  { %v126_v19 = vld [vmem:[#allocation2 + $0x60] sm:$0xff] }
  0x15   :  { %v127_v36 = vld [vmem:[#allocation2 + $0x68] sm:$0xff] }
  0x16   :  { %v128_v55 = vld [vmem:[#allocation2 + $0x70] sm:$0xff] }
  0x1c   :  { %316 = vmatmul.msk.bf16.gmra.mxu0 %vm25_vm0, %v131_v10 }
  0x1e   :  { %318 = vmatmul.msk.bf16.gmra.mxu1 %vm25_vm0, %v133_v11 }
  0x1f   :  { %320 = vmatmul.msk.bf16.gmra.mxu2 %vm25_vm0, %v135_v12 }
  0x20   :  { %322 = vmatmul.msk.bf16.gmra.mxu3 %vm25_vm0, %v137_v13 }
  0x89   :  { %v180_v14 = vpop.f32.mrf.mxu0 }
  0x8a   :  { %v220_v15 = vadd.f32 %v180_v14, %v114_v3  ;;  %v129_v3 = vld [vmem:[#allocation2 + $0x78] sm:$0xff] }
  0x8b   :  { %v190_v16 = vpop.f32.mrf.mxu1 }
  0x8c   :  { %v224_v17 = vadd.f32 %v190_v16, %v118_v5  ;;  %236 = vst.msk [vmem:[#allocation2] sm:$0xff] %vm25_vm0, %v220_v15 }
  0x8e   :  { %240 = vst.msk [vmem:[#allocation2 + $0x20] sm:$0xff] %vm25_vm0, %v224_v17 }
  0x91   :  { %v182_v25 = vpop.f32.mrf.mxu0 }
  0x92   :  { %v200_v22 = vpop.f32.mrf.mxu2  ;;  %v221_v28 = vadd.f32 %v182_v25, %v115_v20 }
  0x93   :  { %v228_v23 = vadd.f32 %v200_v22, %v122_v18  ;;  %v210_v24 = vpop.f32.mrf.mxu3  ;;  %v192_v29 = vpop.f32.mrf.mxu1  ;;  %v255_v30 = vld [vmem:[#allocation2] sm:$0xff] }
  0x94   :  { %v232_v27 = vadd.f32 %v210_v24, %v126_v19  ;;  %v275_v31 = vadd.f32 %v500_v21, %v255_v30  ;;  %v225_v33 = vadd.f32 %v192_v29, %v119_v26  ;;  %237 = vst.msk [vmem:[#allocation2 + $0x8] sm:$0xff] %vm25_vm0, %v221_v28 }
  0x95   :  { %244 = vst.msk [vmem:[#allocation2 + $0x40] sm:$0xff] %vm25_vm0, %v228_v23  ;;  %v259_v32 = vld [vmem:[#allocation2 + $0x20] sm:$0xff] }
  0x96   :  { %248 = vst.msk [vmem:[#allocation2 + $0x60] sm:$0xff] %vm25_vm0, %v232_v27  ;;  %v279_v34 = vadd.f32 %v500_v21, %v259_v32 }
  0x97   :  { %291 = vst.msk [vmem:[%s601_s5] sm:$0xff] %vm25_vm0, %v275_v31 }
  0x98   :  { %295 = vst.msk [vmem:[%s601_s5 + $0x20] sm:$0xff] %vm25_vm0, %v279_v34 }
  0x99   :  { %241 = vst.msk [vmem:[#allocation2 + $0x28] sm:$0xff] %vm25_vm0, %v225_v33  ;;  %v185_v41 = vpop.f32.mrf.mxu0 }
  0x9a   :  { %v202_v37 = vpop.f32.mrf.mxu2  ;;  %v222_v50 = vadd.f32 %v185_v41, %v116_v40 }
  0x9b   :  { %v229_v38 = vadd.f32 %v202_v37, %v123_v35  ;;  %v212_v39 = vpop.f32.mrf.mxu3  ;;  %v195_v45 = vpop.f32.mrf.mxu1  ;;  %v256_v49 = vld [vmem:[#allocation2 + $0x8] sm:$0xff] }
  0x9c   :  { %v263_v42 = vld [vmem:[#allocation2 + $0x40] sm:$0xff]  ;;  %v233_v43 = vadd.f32 %v212_v39, %v127_v36  ;;  %v276_v51 = vadd.f32 %v500_v21, %v256_v49  ;;  %v226_v52 = vadd.f32 %v195_v45, %v120_v44  ;;  %238 = vst.msk [vmem:[#allocation2 + $0x10] sm:$0xff] %vm25_vm0, %v222_v50 }
  0x9d   :  { %v283_v46 = vadd.f32 %v500_v21, %v263_v42  ;;  %v267_v47 = vld [vmem:[#allocation2 + $0x60] sm:$0xff]  ;;  %245 = vst.msk [vmem:[#allocation2 + $0x48] sm:$0xff] %vm25_vm0, %v229_v38 }
  0x9e   :  { %v287_v48 = vadd.f32 %v500_v21, %v267_v47  ;;  %249 = vst.msk [vmem:[#allocation2 + $0x68] sm:$0xff] %vm25_vm0, %v233_v43 }
  0x9f   :  { %299 = vst.msk [vmem:[%s601_s5 + $0x40] sm:$0xff] %vm25_vm0, %v283_v46 }
  0xa0   :  { %303 = vst.msk [vmem:[%s601_s5 + $0x60] sm:$0xff] %vm25_vm0, %v287_v48  ;;  %v260_v54 = vld [vmem:[#allocation2 + $0x28] sm:$0xff] }
  0xa1   :  { %292 = vst.msk [vmem:[%s601_s5 + $0x8] sm:$0xff] %vm25_vm0, %v276_v51  ;;  %v280_v56 = vadd.f32 %v500_v21, %v260_v54  ;;  %v187_v61 = vpop.f32.mrf.mxu0 }
  0xa2   :  { %v205_v57 = vpop.f32.mrf.mxu2  ;;  %242 = vst.msk [vmem:[#allocation2 + $0x30] sm:$0xff] %vm25_vm0, %v226_v52  ;;  %v223_v6 = vadd.f32 %v187_v61, %v117_v58 }
  0xa3   :  { %v230_v59 = vadd.f32 %v205_v57, %v124_v53  ;;  %v215_v60 = vpop.f32.mrf.mxu3  ;;  %296 = vst.msk [vmem:[%s601_s5 + $0x28] sm:$0xff] %vm25_vm0, %v280_v56  ;;  %v197_v1 = vpop.f32.mrf.mxu1  ;;  %v257_v10 = vld [vmem:[#allocation2 + $0x10] sm:$0xff] }
  0xa4   :  { %v264_v63 = vld [vmem:[#allocation2 + $0x48] sm:$0xff]  ;;  %v234_v0 = vadd.f32 %v215_v60, %v128_v55  ;;  %v227_v8 = vadd.f32 %v197_v1, %v121_v62  ;;  %239 = vst.msk [vmem:[#allocation2 + $0x18] sm:$0xff] %vm25_vm0, %v223_v6  ;;  %v277_v11 = vadd.f32 %v500_v21, %v257_v10 }
  0xa5   :  { %v284_v2 = vadd.f32 %v500_v21, %v264_v63  ;;  %v268_v4 = vld [vmem:[#allocation2 + $0x68] sm:$0xff]  ;;  %246 = vst.msk [vmem:[#allocation2 + $0x50] sm:$0xff] %vm25_vm0, %v230_v59 }
  0xa6   :  { %v288_v7 = vadd.f32 %v500_v21, %v268_v4  ;;  %250 = vst.msk [vmem:[#allocation2 + $0x70] sm:$0xff] %vm25_vm0, %v234_v0 }
  0xa7   :  { %300 = vst.msk [vmem:[%s601_s5 + $0x48] sm:$0xff] %vm25_vm0, %v284_v2 }
  0xa8   :  { %304 = vst.msk [vmem:[%s601_s5 + $0x68] sm:$0xff] %vm25_vm0, %v288_v7 }
  0xa9   :  { %v261_v12 = vld [vmem:[#allocation2 + $0x30] sm:$0xff]  ;;  %243 = vst.msk [vmem:[#allocation2 + $0x38] sm:$0xff] %vm25_vm0, %v227_v8 }
  0xaa   :  { %v207_v13 = vpop.f32.mrf.mxu2  ;;  %v281_v5 = vadd.f32 %v500_v21, %v261_v12  ;;  %293 = vst.msk [vmem:[%s601_s5 + $0x10] sm:$0xff] %vm25_vm0, %v277_v11 }
  0xab   :  { %v231_v14 = vadd.f32 %v207_v13, %v125_v9  ;;  %v217_v15 = vpop.f32.mrf.mxu3  ;;  %v258_v22 = vld [vmem:[#allocation2 + $0x18] sm:$0xff] }
  0xac   :  { %v265_v16 = vld [vmem:[#allocation2 + $0x50] sm:$0xff]  ;;  %297 = vst.msk [vmem:[%s601_s5 + $0x30] sm:$0xff] %vm25_vm0, %v281_v5  ;;  %v235_v19 = vadd.f32 %v217_v15, %v129_v3  ;;  %v278_v23 = vadd.f32 %v500_v21, %v258_v22 }
  0xad   :  { %v285_v17 = vadd.f32 %v500_v21, %v265_v16  ;;  %v269_v18 = vld [vmem:[#allocation2 + $0x70] sm:$0xff]  ;;  %247 = vst.msk [vmem:[#allocation2 + $0x58] sm:$0xff] %vm25_vm0, %v231_v14 }
  0xae   :  { %v289_v20 = vadd.f32 %v500_v21, %v269_v18  ;;  %251 = vst.msk [vmem:[#allocation2 + $0x78] sm:$0xff] %vm25_vm0, %v235_v19 }
  0xaf   :  { %301 = vst.msk [vmem:[%s601_s5 + $0x50] sm:$0xff] %vm25_vm0, %v285_v17 }
  0xb0   :  { %305 = vst.msk [vmem:[%s601_s5 + $0x70] sm:$0xff] %vm25_vm0, %v289_v20  ;;  %v262_v24 = vld [vmem:[#allocation2 + $0x38] sm:$0xff] }
  0xb1   :  { %v282_v25 = vadd.f32 %v500_v21, %v262_v24  ;;  %294 = vst.msk [vmem:[%s601_s5 + $0x18] sm:$0xff] %vm25_vm0, %v278_v23 }
  0xb3   :  { %298 = vst.msk [vmem:[%s601_s5 + $0x38] sm:$0xff] %vm25_vm0, %v282_v25 }
  0xb4   :  { %v266_v26 = vld [vmem:[#allocation2 + $0x58] sm:$0xff] }
  0xb5   :  { %v286_v27 = vadd.f32 %v500_v21, %v266_v26  ;;  %v270_v28 = vld [vmem:[#allocation2 + $0x78] sm:$0xff] }
  0xb6   :  { %v290_v29 = vadd.f32 %v500_v21, %v270_v28 }
  0xb7   :  { %302 = vst.msk [vmem:[%s601_s5 + $0x58] sm:$0xff] %vm25_vm0, %v286_v27 }
  0xb8   :  { %306 = vst.msk [vmem:[%s601_s5 + $0x78] sm:$0xff] %vm25_vm0, %v290_v29 }

// kernel: densenet_forward.42
= control target key start
LH: loop header
LB: loop body
LE: loop exit
PB: predicated region body
PF: predicated region fallthrough
CT: control target
= control target key end

     0   :  { %vm178_vm0 = vcmask 130048   ;;  %vm25_vm1 = vcmask 64512   ;;  %v457_v57 = vmov 0.0   ;;  %s745_s1 = inlined_call_operand.vmem [shape: bf16[144,8], index: 1, kind: input, shape index: {}]   ;;  %s746_s3 = inlined_call_operand.vmem [shape: f32[1,144], index: 3, kind: input, shape index: {}]   ;;  %s747_s4 = inlined_call_operand.vmem [shape: f32[1,144], index: 4, kind: input, shape index: {}]   ;;  %s748_s0 = inlined_call_operand.vmem [shape: f32[128,144], index: 0, kind: input, shape index: {}]   ;;  %s749_s2 = inlined_call_operand.vmem [shape: f32[1,8], index: 2, kind: input, shape index: {}]   ;;  %s750_s5 = inlined_call_operand.vmem [shape: f32[128,8], index: 5, kind: output, shape index: {}]  }
   0x1   :  { %v444_v0 = vld [vmem:[%s745_s1 + $0x38] sm:$0xff]  ;;  %v445_v1 = vld [vmem:[%s745_s1 + $0x40] sm:$0xff]  ;;  %v43_v2 = vld [vmem:[%s748_s0 + $0x8] sm:$0xff]  ;;  %26 = vst.msk [vmem:[#allocation2] sm:$0xff] %vm25_vm1, %v457_v57 }
   0x2   :  { %v45_v3 = vld [vmem:[%s748_s0 + $0x18] sm:$0xff]  ;;  %203 = vmatpush.bf16.msra.mxu0 %v444_v0  ;;  %446 = vmatpush.bf16.msra.mxu2 %v444_v0  ;;  %v443_v5 = vld [vmem:[%s745_s1 + $0x30] sm:$0xff]  ;;  %v442_v6 = vld [vmem:[%s745_s1 + $0x28] sm:$0xff]  ;;  %27 = vst.msk [vmem:[#allocation2 + $0x8] sm:$0xff] %vm25_vm1, %v457_v57 }
   0x3   :  { %v91_v4 = vpack.c.bf16 %v45_v3, %v43_v2  ;;  %259 = vmatpush.bf16.msra.mxu1 %v445_v1  ;;  %454 = vmatpush.bf16.msra.mxu3 %v445_v1  ;;  %v63_v7 = vld [vmem:[%s748_s0 + $0xa8] sm:$0xff]  ;;  %v65_v8 = vld [vmem:[%s748_s0 + $0xb8] sm:$0xff]  ;;  %v441_v10 = vld [vmem:[%s745_s1 + $0x20] sm:$0xff]  ;;  %28 = vst.msk [vmem:[#allocation2 + $0x10] sm:$0xff] %vm25_vm1, %v457_v57 }
   0x4   :  { %v101_v9 = vpack.c.bf16 %v65_v8, %v63_v7  ;;  %v440_v11 = vld [vmem:[%s745_s1 + $0x18] sm:$0xff]  ;;  %v47_v12 = vld [vmem:[%s748_s0 + $0x28] sm:$0xff]  ;;  %v439_v15 = vld [vmem:[%s745_s1 + $0x10] sm:$0xff]  ;;  %29 = vst.msk [vmem:[#allocation2 + $0x18] sm:$0xff] %vm25_vm1, %v457_v57 }
   0x5   :  { %v49_v13 = vld [vmem:[%s748_s0 + $0x38] sm:$0xff]  ;;  %v438_v16 = vld [vmem:[%s745_s1 + $0x8] sm:$0xff]  ;;  %v437_v20 = vld [vmem:[%s745_s1] sm:$0xff]  ;;  %30 = vst.msk [vmem:[#allocation2 + $0x20] sm:$0xff] %vm25_vm1, %v457_v57 }
   0x6   :  { %429 = vmatmul.msk.bf16.vlgmr.msra.gmra.mxu1 %vm178_vm0, %v91_v4  ;;  %204 = vmatpush.bf16.msra.mxu0 %v443_v5  ;;  %v93_v14 = vpack.c.bf16 %v49_v13, %v47_v12  ;;  %v67_v17 = vld [vmem:[%s748_s0 + $0xc8] sm:$0xff]  ;;  %v69_v18 = vld [vmem:[%s748_s0 + $0xd8] sm:$0xff]  ;;  %v42_v21 = vld [vmem:[%s748_s0] sm:$0xff]  ;;  %31 = vst.msk [vmem:[#allocation2 + $0x28] sm:$0xff] %vm25_vm1, %v457_v57 }
   0x7   :  { %447 = vmatpush.bf16.msra.mxu2 %v443_v5  ;;  %434 = vmatmul.msk.bf16.vlgmr.msra.gmra.mxu3 %vm178_vm0, %v101_v9  ;;  %v103_v19 = vpack.c.bf16 %v69_v18, %v67_v17  ;;  %v44_v22 = vld [vmem:[%s748_s0 + $0x10] sm:$0xff]  ;;  %v58_v23 = vld [vmem:[%s748_s0 + $0x80] sm:$0xff]  ;;  %v51_v27 = vld [vmem:[%s748_s0 + $0x48] sm:$0xff]  ;;  %32 = vst.msk [vmem:[#allocation2 + $0x30] sm:$0xff] %vm25_vm1, %v457_v57 }
   0x8   :  { %v60_v24 = vld [vmem:[%s748_s0 + $0x90] sm:$0xff]  ;;  %v90_v25 = vpack.c.bf16 %v44_v22, %v42_v21  ;;  %v53_v28 = vld [vmem:[%s748_s0 + $0x58] sm:$0xff]  ;;  %v71_v30 = vld [vmem:[%s748_s0 + $0xe8] sm:$0xff]  ;;  %33 = vst.msk [vmem:[#allocation2 + $0x38] sm:$0xff] %vm25_vm1, %v457_v57 }
   0x9   :  { %v98_v26 = vpack.c.bf16 %v60_v24, %v58_v23  ;;  %v95_v29 = vpack.c.bf16 %v53_v28, %v51_v27  ;;  %v73_v31 = vld [vmem:[%s748_s0 + $0xf8] sm:$0xff]  ;;  %v46_v33 = vld [vmem:[%s748_s0 + $0x20] sm:$0xff]  ;;  %v48_v34 = vld [vmem:[%s748_s0 + $0x30] sm:$0xff]  ;;  %34 = vst.msk [vmem:[#allocation2 + $0x40] sm:$0xff] %vm25_vm1, %v457_v57 }
   0xa   :  { %205 = vmatpush.bf16.msra.mxu0 %v442_v6  ;;  %v105_v32 = vpack.c.bf16 %v73_v31, %v71_v30  ;;  %v62_v35 = vld [vmem:[%s748_s0 + $0xa0] sm:$0xff]  ;;  %v64_v36 = vld [vmem:[%s748_s0 + $0xb0] sm:$0xff]  ;;  %v92_v37 = vpack.c.bf16 %v48_v34, %v46_v33  ;;  %v55_v39 = vld [vmem:[%s748_s0 + $0x68] sm:$0xff]  ;;  %35 = vst.msk [vmem:[#allocation2 + $0x48] sm:$0xff] %vm25_vm1, %v457_v57 }
   0xb   :  { %448 = vmatpush.bf16.msra.mxu2 %v442_v6  ;;  %v100_v38 = vpack.c.bf16 %v64_v36, %v62_v35  ;;  %v57_v40 = vld [vmem:[%s748_s0 + $0x78] sm:$0xff]  ;;  %v50_v42 = vld [vmem:[%s748_s0 + $0x40] sm:$0xff]  ;;  %v52_v43 = vld [vmem:[%s748_s0 + $0x50] sm:$0xff]  ;;  %36 = vst.msk [vmem:[#allocation2 + $0x50] sm:$0xff] %vm25_vm1, %v457_v57 }
   0xc   :  { %v97_v41 = vpack.c.bf16 %v57_v40, %v55_v39  ;;  %v66_v44 = vld [vmem:[%s748_s0 + $0xc0] sm:$0xff]  ;;  %v68_v45 = vld [vmem:[%s748_s0 + $0xd0] sm:$0xff]  ;;  %v94_v46 = vpack.c.bf16 %v52_v43, %v50_v42  ;;  %v59_v48 = vld [vmem:[%s748_s0 + $0x88] sm:$0xff]  ;;  %37 = vst.msk [vmem:[#allocation2 + $0x58] sm:$0xff] %vm25_vm1, %v457_v57 }
   0xd   :  { %v102_v47 = vpack.c.bf16 %v68_v45, %v66_v44  ;;  %v61_v49 = vld [vmem:[%s748_s0 + $0x98] sm:$0xff]  ;;  %v54_v51 = vld [vmem:[%s748_s0 + $0x60] sm:$0xff]  ;;  %v56_v52 = vld [vmem:[%s748_s0 + $0x70] sm:$0xff]  ;;  %38 = vst.msk [vmem:[#allocation2 + $0x60] sm:$0xff] %vm25_vm1, %v457_v57 }
   0xe   :  { %206 = vmatpush.bf16.msra.mxu0 %v441_v10  ;;  %v99_v50 = vpack.c.bf16 %v61_v49, %v59_v48  ;;  %v70_v53 = vld [vmem:[%s748_s0 + $0xe0] sm:$0xff]  ;;  %v72_v54 = vld [vmem:[%s748_s0 + $0xf0] sm:$0xff]  ;;  %v96_v55 = vpack.c.bf16 %v56_v52, %v54_v51  ;;  %39 = vst.msk [vmem:[#allocation2 + $0x68] sm:$0xff] %vm25_vm1, %v457_v57  ;;  %v75_v4 = vld [vmem:[#allocation2 + $0x8] sm:$0xff] }
   0xf   :  { %449 = vmatpush.bf16.msra.mxu2 %v441_v10  ;;  %v104_v56 = vpack.c.bf16 %v72_v54, %v70_v53  ;;  %40 = vst.msk [vmem:[#allocation2 + $0x70] sm:$0xff] %vm25_vm1, %v457_v57  ;;  %v74_v62 = vld [vmem:[#allocation2] sm:$0xff]  ;;  %v79_v53 = vld [vmem:[#allocation2 + $0x28] sm:$0xff] }
  0x10   :  { %41 = vst.msk [vmem:[#allocation2 + $0x78] sm:$0xff] %vm25_vm1, %v457_v57  ;;  %v639_v6 = vld [vmem:[%s749_s2] ss:$0 sm:$0xff] }
  0x11   :  { %v78_v36 = vld [vmem:[#allocation2 + $0x20] sm:$0xff] }
  0x12   :  { %207 = vmatpush.bf16.msra.mxu0 %v440_v11  ;;  %v84_v21 = vld [vmem:[#allocation2 + $0x50] sm:$0xff] }
  0x13   :  { %450 = vmatpush.bf16.msra.mxu2 %v440_v11  ;;  %v85_v33 = vld [vmem:[#allocation2 + $0x58] sm:$0xff] }
  0x14   :  { %v86_v49 = vld [vmem:[#allocation2 + $0x60] sm:$0xff] }
  0x16   :  { %430 = vmatmul.msk.bf16.gmra.mxu1 %vm178_vm0, %v93_v14  ;;  %208 = vmatpush.bf16.msra.mxu0 %v439_v15  ;;  %v76_v14 = vld [vmem:[#allocation2 + $0x10] sm:$0xff] }
  0x17   :  { %451 = vmatpush.bf16.msra.mxu2 %v439_v15  ;;  %435 = vmatmul.msk.bf16.gmra.mxu3 %vm178_vm0, %v103_v19 }
  0x1a   :  { %209 = vmatpush.bf16.msra.mxu0 %v438_v16 }
  0x1b   :  { %452 = vmatpush.bf16.msra.mxu2 %v438_v16 }
  0x1e   :  { %210 = vmatpush.bf16.msra.mxu0 %v437_v20 }
  0x1f   :  { %453 = vmatpush.bf16.msra.mxu2 %v437_v20 }
  0x21   :  { %211 = vmatmul.bf16.vlgmr.msra.gmra.mxu0 %v90_v25  ;;  %v77_v25 = vld [vmem:[#allocation2 + $0x18] sm:$0xff] }
  0x22   :  { %231 = vmatmul.bf16.vlgmr.msra.gmra.mxu2 %v98_v26 }
  0x26   :  { %431 = vmatmul.msk.bf16.gmra.mxu1 %vm178_vm0, %v95_v29 }
  0x27   :  { %436 = vmatmul.msk.bf16.gmra.mxu3 %vm178_vm0, %v105_v32 }
  0x31   :  { %216 = vmatmul.bf16.gmra.mxu0 %v92_v37 }
  0x32   :  { %236 = vmatmul.bf16.gmra.mxu2 %v100_v38 }
  0x36   :  { %432 = vmatmul.msk.bf16.gmra.mxu1 %vm178_vm0, %v97_v41 }
  0x41   :  { %221 = vmatmul.bf16.gmra.mxu0 %v94_v46  ;;  %v82_v46 = vld [vmem:[#allocation2 + $0x40] sm:$0xff] }
  0x42   :  { %241 = vmatmul.bf16.gmra.mxu2 %v102_v47 }
  0x46   :  { %433 = vmatmul.msk.bf16.gmra.mxu1 %vm178_vm0, %v99_v50 }
  0x51   :  { %226 = vmatmul.bf16.gmra.mxu0 %v96_v55 }
  0x52   :  { %246 = vmatmul.bf16.gmra.mxu2 %v104_v56 }
  0x83   :  { %v261_v58 = vpop.f32.mrf.mxu1 }
  0x8a   :  { %v286_v12 = vpop.f32.mrf.mxu3 }
  0x8b   :  { %v263_v59 = vpop.f32.mrf.mxu1 }
  0x92   :  { %v288_v23 = vpop.f32.mrf.mxu3 }
  0x93   :  { %v266_v60 = vpop.f32.mrf.mxu1 }
  0x9a   :  { %v291_v38 = vpop.f32.mrf.mxu3 }
  0x9b   :  { %v268_v61 = vpop.f32.mrf.mxu1 }
  0x9e   :  { %v212_v63 = vpop.f32.mrf.mxu0 }
  0x9f   :  { %v262_v0 = vadd.f32 %v261_v58, %v212_v63  ;;  %v83_v63 = vld [vmem:[#allocation2 + $0x48] sm:$0xff] }
  0xa1   :  { %v301_v1 = vadd.f32 %v262_v0, %v74_v62 }
  0xa2   :  { %v293_v58 = vpop.f32.mrf.mxu3 }
  0xa3   :  { %318 = vst.msk [vmem:[#allocation2] sm:$0xff] %vm25_vm1, %v301_v1  ;;  %v271_v2 = vpop.f32.mrf.mxu1 }
  0xa5   :  { %v232_v3 = vpop.f32.mrf.mxu2 }
  0xa6   :  { %v214_v5 = vpop.f32.mrf.mxu0 }
  0xa7   :  { %v264_v7 = vadd.f32 %v263_v59, %v214_v5 }
  0xa9   :  { %v302_v8 = vadd.f32 %v264_v7, %v75_v4 }
  0xaa   :  { %v337_v9 = vld [vmem:[#allocation2] sm:$0xff] }
  0xab   :  { %v357_v10 = vadd.f32 %v639_v6, %v337_v9  ;;  %319 = vst.msk [vmem:[#allocation2 + $0x8] sm:$0xff] %vm25_vm1, %v302_v8  ;;  %v273_v11 = vpop.f32.mrf.mxu1  ;;  %v80_v9 = vld [vmem:[#allocation2 + $0x30] sm:$0xff] }
  0xad   :  { %373 = vst.msk [vmem:[%s750_s5] sm:$0xff] %vm25_vm1, %v357_v10  ;;  %v647_v13 = vpop.f32.mrf.mxu2 }
  0xae   :  { %v217_v15 = vpop.f32.mrf.mxu0 }
  0xaf   :  { %v267_v16 = vadd.f32 %v266_v60, %v217_v15 }
  0xb1   :  { %v303_v17 = vadd.f32 %v267_v16, %v76_v14 }
  0xb2   :  { %v338_v18 = vld [vmem:[#allocation2 + $0x8] sm:$0xff] }
  0xb3   :  { %v358_v19 = vadd.f32 %v639_v6, %v338_v18  ;;  %320 = vst.msk [vmem:[#allocation2 + $0x10] sm:$0xff] %vm25_vm1, %v303_v17  ;;  %v651_v20 = vpop.f32.mrf.mxu1  ;;  %v296_v18 = vpop.f32.mrf.mxu3 }
  0xb5   :  { %374 = vst.msk [vmem:[%s750_s5 + $0x8] sm:$0xff] %vm25_vm1, %v358_v19  ;;  %v237_v22 = vpop.f32.mrf.mxu2  ;;  %v88_v19 = vld [vmem:[#allocation2 + $0x70] sm:$0xff] }
  0xb6   :  { %v287_v24 = vadd.f32 %v286_v12, %v237_v22  ;;  %v219_v26 = vpop.f32.mrf.mxu0  ;;  %v81_v22 = vld [vmem:[#allocation2 + $0x38] sm:$0xff] }
  0xb7   :  { %v269_v27 = vadd.f32 %v268_v61, %v219_v26 }
  0xb8   :  { %v311_v28 = vadd.f32 %v287_v24, %v84_v21 }
  0xb9   :  { %v304_v29 = vadd.f32 %v269_v27, %v77_v25 }
  0xba   :  { %v339_v30 = vld [vmem:[#allocation2 + $0x10] sm:$0xff]  ;;  %328 = vst.msk [vmem:[#allocation2 + $0x50] sm:$0xff] %vm25_vm1, %v311_v28 }
  0xbb   :  { %v359_v31 = vadd.f32 %v639_v6, %v339_v30  ;;  %321 = vst.msk [vmem:[#allocation2 + $0x18] sm:$0xff] %vm25_vm1, %v304_v29  ;;  %v660_v32 = vpop.f32.mrf.mxu1 }
  0xbd   :  { %375 = vst.msk [vmem:[%s750_s5 + $0x10] sm:$0xff] %vm25_vm1, %v359_v31  ;;  %v239_v34 = vpop.f32.mrf.mxu2 }
  0xbe   :  { %v289_v35 = vadd.f32 %v288_v23, %v239_v34  ;;  %v222_v37 = vpop.f32.mrf.mxu0 }
  0xbf   :  { %v272_v39 = vadd.f32 %v271_v2, %v222_v37  ;;  %v87_v2 = vld [vmem:[#allocation2 + $0x68] sm:$0xff] }
  0xc0   :  { %v312_v40 = vadd.f32 %v289_v35, %v85_v33  ;;  %v89_v33 = vld [vmem:[#allocation2 + $0x78] sm:$0xff] }
  0xc1   :  { %v347_v41 = vld [vmem:[#allocation2 + $0x50] sm:$0xff]  ;;  %v305_v42 = vadd.f32 %v272_v39, %v78_v36 }
  0xc2   :  { %v367_v43 = vadd.f32 %v639_v6, %v347_v41  ;;  %v340_v44 = vld [vmem:[#allocation2 + $0x18] sm:$0xff]  ;;  %329 = vst.msk [vmem:[#allocation2 + $0x58] sm:$0xff] %vm25_vm1, %v312_v40 }
  0xc3   :  { %v360_v45 = vadd.f32 %v639_v6, %v340_v44  ;;  %322 = vst.msk [vmem:[#allocation2 + $0x20] sm:$0xff] %vm25_vm1, %v305_v42  ;;  %v281_v47 = vpop.f32.mrf.mxu1 }
  0xc4   :  { %383 = vst.msk [vmem:[%s750_s5 + $0x50] sm:$0xff] %vm25_vm1, %v367_v43  ;;  %v282_v48 = vadd.f32 %v281_v47, %v232_v3 }
  0xc5   :  { %376 = vst.msk [vmem:[%s750_s5 + $0x18] sm:$0xff] %vm25_vm1, %v360_v45  ;;  %v242_v50 = vpop.f32.mrf.mxu2 }
  0xc6   :  { %v309_v51 = vadd.f32 %v282_v48, %v82_v46  ;;  %v292_v52 = vadd.f32 %v291_v38, %v242_v50  ;;  %v224_v54 = vpop.f32.mrf.mxu0 }
  0xc7   :  { %v274_v55 = vadd.f32 %v273_v11, %v224_v54 }
  0xc8   :  { %326 = vst.msk [vmem:[#allocation2 + $0x40] sm:$0xff] %vm25_vm1, %v309_v51  ;;  %v313_v56 = vadd.f32 %v292_v52, %v86_v49 }
  0xc9   :  { %v348_v57 = vld [vmem:[#allocation2 + $0x58] sm:$0xff]  ;;  %v306_v59 = vadd.f32 %v274_v55, %v79_v53 }
  0xca   :  { %v368_v60 = vadd.f32 %v639_v6, %v348_v57  ;;  %v341_v61 = vld [vmem:[#allocation2 + $0x20] sm:$0xff]  ;;  %330 = vst.msk [vmem:[#allocation2 + $0x60] sm:$0xff] %vm25_vm1, %v313_v56 }
  0xcb   :  { %v361_v62 = vadd.f32 %v639_v6, %v341_v61  ;;  %323 = vst.msk [vmem:[#allocation2 + $0x28] sm:$0xff] %vm25_vm1, %v306_v59  ;;  %v283_v0 = vpop.f32.mrf.mxu1 }
  0xcc   :  { %384 = vst.msk [vmem:[%s750_s5 + $0x58] sm:$0xff] %vm25_vm1, %v368_v60  ;;  %v284_v1 = vadd.f32 %v283_v0, %v647_v13 }
  0xcd   :  { %377 = vst.msk [vmem:[%s750_s5 + $0x20] sm:$0xff] %vm25_vm1, %v361_v62  ;;  %v244_v3 = vpop.f32.mrf.mxu2 }
  0xce   :  { %v310_v4 = vadd.f32 %v284_v1, %v83_v63  ;;  %v294_v5 = vadd.f32 %v293_v58, %v244_v3  ;;  %v227_v7 = vpop.f32.mrf.mxu0 }
  0xcf   :  { %v345_v8 = vld [vmem:[#allocation2 + $0x40] sm:$0xff]  ;;  %v277_v10 = vadd.f32 %v651_v20, %v227_v7 }
  0xd0   :  { %v365_v11 = vadd.f32 %v639_v6, %v345_v8  ;;  %327 = vst.msk [vmem:[#allocation2 + $0x48] sm:$0xff] %vm25_vm1, %v310_v4  ;;  %v314_v12 = vadd.f32 %v294_v5, %v87_v2 }
  0xd1   :  { %v349_v13 = vld [vmem:[#allocation2 + $0x60] sm:$0xff]  ;;  %v307_v16 = vadd.f32 %v277_v10, %v80_v9 }
  0xd2   :  { %381 = vst.msk [vmem:[%s750_s5 + $0x40] sm:$0xff] %vm25_vm1, %v365_v11  ;;  %v369_v14 = vadd.f32 %v639_v6, %v349_v13  ;;  %v342_v15 = vld [vmem:[#allocation2 + $0x28] sm:$0xff] }
  0xd3   :  { %v362_v17 = vadd.f32 %v639_v6, %v342_v15  ;;  %331 = vst.msk [vmem:[#allocation2 + $0x68] sm:$0xff] %vm25_vm1, %v314_v12 }
  0xd4   :  { %385 = vst.msk [vmem:[%s750_s5 + $0x60] sm:$0xff] %vm25_vm1, %v369_v14 }
  0xd5   :  { %378 = vst.msk [vmem:[%s750_s5 + $0x28] sm:$0xff] %vm25_vm1, %v362_v17  ;;  %v247_v20 = vpop.f32.mrf.mxu2 }
  0xd6   :  { %324 = vst.msk [vmem:[#allocation2 + $0x30] sm:$0xff] %vm25_vm1, %v307_v16  ;;  %v297_v21 = vadd.f32 %v296_v18, %v247_v20  ;;  %v229_v23 = vpop.f32.mrf.mxu0 }
  0xd7   :  { %v346_v24 = vld [vmem:[#allocation2 + $0x48] sm:$0xff]  ;;  %v279_v25 = vadd.f32 %v660_v32, %v229_v23  ;;  %v298_v32 = vpop.f32.mrf.mxu3 }
  0xd8   :  { %v366_v26 = vadd.f32 %v639_v6, %v346_v24  ;;  %v315_v27 = vadd.f32 %v297_v21, %v88_v19 }
  0xd9   :  { %v308_v28 = vadd.f32 %v279_v25, %v81_v22 }
  0xda   :  { %382 = vst.msk [vmem:[%s750_s5 + $0x48] sm:$0xff] %vm25_vm1, %v366_v26  ;;  %v350_v29 = vld [vmem:[#allocation2 + $0x68] sm:$0xff] }
  0xdb   :  { %v370_v30 = vadd.f32 %v639_v6, %v350_v29  ;;  %332 = vst.msk [vmem:[#allocation2 + $0x70] sm:$0xff] %vm25_vm1, %v315_v27 }
  0xdc   :  { %325 = vst.msk [vmem:[#allocation2 + $0x38] sm:$0xff] %vm25_vm1, %v308_v28 }
  0xdd   :  { %386 = vst.msk [vmem:[%s750_s5 + $0x68] sm:$0xff] %vm25_vm1, %v370_v30  ;;  %v343_v31 = vld [vmem:[#allocation2 + $0x30] sm:$0xff]  ;;  %v249_v34 = vpop.f32.mrf.mxu2 }
  0xde   :  { %v363_v35 = vadd.f32 %v639_v6, %v343_v31  ;;  %v299_v36 = vadd.f32 %v298_v32, %v249_v34 }
  0xe0   :  { %379 = vst.msk [vmem:[%s750_s5 + $0x30] sm:$0xff] %vm25_vm1, %v363_v35  ;;  %v316_v37 = vadd.f32 %v299_v36, %v89_v33 }
  0xe2   :  { %v351_v38 = vld [vmem:[#allocation2 + $0x70] sm:$0xff]  ;;  %333 = vst.msk [vmem:[#allocation2 + $0x78] sm:$0xff] %vm25_vm1, %v316_v37 }
  0xe3   :  { %v371_v39 = vadd.f32 %v639_v6, %v351_v38  ;;  %v344_v40 = vld [vmem:[#allocation2 + $0x38] sm:$0xff] }
  0xe4   :  { %v364_v41 = vadd.f32 %v639_v6, %v344_v40 }
  0xe5   :  { %387 = vst.msk [vmem:[%s750_s5 + $0x70] sm:$0xff] %vm25_vm1, %v371_v39 }
  0xe6   :  { %380 = vst.msk [vmem:[%s750_s5 + $0x38] sm:$0xff] %vm25_vm1, %v364_v41 }
  0xe9   :  { %v352_v42 = vld [vmem:[#allocation2 + $0x78] sm:$0xff] }
  0xea   :  { %v372_v43 = vadd.f32 %v639_v6, %v352_v42 }
  0xec   :  { %388 = vst.msk [vmem:[%s750_s5 + $0x78] sm:$0xff] %vm25_vm1, %v372_v43 }

// kernel: densenet_forward.43
= control target key start
LH: loop header
LB: loop body
LE: loop exit
PB: predicated region body
PF: predicated region fallthrough
CT: control target
= control target key end

     0   :  { %vm20_vm0 = vcmask 188416   ;;  %vm40_vm1 = vcmask 195584   ;;  %v176_v0 = vmov 0.0   ;;  %s300_s0 = inlined_call_operand.vmem [shape: f32[128,24], index: 0, kind: input, shape index: {}]   ;;  %s301_s1 = inlined_call_operand.vmem [shape: f32[1,24], index: 1, kind: input, shape index: {}]   ;;  %s302_s2 = inlined_call_operand.vmem [shape: f32[1,24], index: 2, kind: input, shape index: {}]   ;;  %s303_s3 = inlined_call_operand.vmem [shape: f32[1,24], index: 3, kind: output, shape index: {0}]   ;;  %s304_s4 = inlined_call_operand.vmem [shape: f32[1,24], index: 4, kind: output, shape index: {1}]  }
   0x1   :  { %21 = vst.msk [vmem:[#allocation2] sm:$0x1] %vm20_vm0, %v176_v0  ;;  %v23_v1 = vld [vmem:[%s300_s0] sm:$0xff]  ;;  %v24_v2 = vld [vmem:[%s300_s0 + $0x8] sm:$0xff]  ;;  %v25_v3 = vld [vmem:[%s300_s0 + $0x10] sm:$0xff] }
   0x2   :  { %22 = vst.msk [vmem:[#allocation3] sm:$0x1] %vm20_vm0, %v176_v0  ;;  %v26_v4 = vld [vmem:[%s300_s0 + $0x18] sm:$0xff]  ;;  %v41_v5 = vsel %vm40_vm1, %v23_v1, 0.0  ;;  %v42_v6 = vsel %vm40_vm1, %v24_v2, 0.0  ;;  %v44_v7 = vsel %vm40_vm1, %v25_v3, 0.0  ;;  %v82_v15 = vmul.f32 %v23_v1, %v23_v1 }
   0x3   :  { %v27_v8 = vld [vmem:[%s300_s0 + $0x20] sm:$0xff]  ;;  %v43_v9 = vadd.f32 %v42_v6, %v41_v5  ;;  %v46_v10 = vsel %vm40_vm1, %v26_v4, 0.0  ;;  %v28_v11 = vld [vmem:[%s300_s0 + $0x28] sm:$0xff]  ;;  %v29_v13 = vld [vmem:[%s300_s0 + $0x30] sm:$0xff]  ;;  %v83_v16 = vmul.f32 %v24_v2, %v24_v2  ;;  %v84_v17 = vmul.f32 %v25_v3, %v25_v3 }
   0x4   :  { %v48_v14 = vsel %vm40_vm1, %v27_v8, 0.0  ;;  %v50_v19 = vsel %vm40_vm1, %v28_v11, 0.0  ;;  %v85_v20 = vmul.f32 %v26_v4, %v26_v4  ;;  %v30_v21 = vld [vmem:[%s300_s0 + $0x38] sm:$0xff]  ;;  %v52_v23 = vsel %vm40_vm1, %v29_v13, 0.0  ;;  %v31_v28 = vld [vmem:[%s300_s0 + $0x40] sm:$0xff]  ;;  %v32_v34 = vld [vmem:[%s300_s0 + $0x48] sm:$0xff] }
   0x5   :  { %v45_v12 = vadd.f32 %v44_v7, %v43_v9  ;;  %v86_v24 = vmul.f32 %v27_v8, %v27_v8  ;;  %v98_v25 = vsel %vm40_vm1, %v82_v15, 0.0  ;;  %v99_v26 = vsel %vm40_vm1, %v83_v16, 0.0  ;;  %v33_v40 = vld [vmem:[%s300_s0 + $0x50] sm:$0xff]  ;;  %v34_v46 = vld [vmem:[%s300_s0 + $0x58] sm:$0xff]  ;;  %v35_v52 = vld [vmem:[%s300_s0 + $0x60] sm:$0xff] }
   0x6   :  { %v101_v27 = vsel %vm40_vm1, %v84_v17, 0.0  ;;  %v100_v30 = vadd.f32 %v99_v26, %v98_v25  ;;  %v54_v31 = vsel %vm40_vm1, %v30_v21, 0.0  ;;  %v87_v32 = vmul.f32 %v28_v11, %v28_v11  ;;  %v36_v58 = vld [vmem:[%s300_s0 + $0x68] sm:$0xff]  ;;  %v37_v0 = vld [vmem:[%s300_s0 + $0x70] sm:$0xff]  ;;  %v38_v6 = vld [vmem:[%s300_s0 + $0x78] sm:$0xff] }
   0x7   :  { %v47_v18 = vadd.f32 %v46_v10, %v45_v12  ;;  %v103_v33 = vsel %vm40_vm1, %v85_v20, 0.0  ;;  %v56_v37 = vsel %vm40_vm1, %v31_v28, 0.0  ;;  %v88_v38 = vmul.f32 %v29_v13, %v29_v13 }
   0x8   :  { %v102_v36 = vadd.f32 %v101_v27, %v100_v30  ;;  %v105_v39 = vsel %vm40_vm1, %v86_v24, 0.0  ;;  %v58_v43 = vsel %vm40_vm1, %v32_v34, 0.0  ;;  %v89_v44 = vmul.f32 %v30_v21, %v30_v21 }
   0x9   :  { %v49_v22 = vadd.f32 %v48_v14, %v47_v18  ;;  %v107_v45 = vsel %vm40_vm1, %v87_v32, 0.0  ;;  %v60_v49 = vsel %vm40_vm1, %v33_v40, 0.0  ;;  %v90_v50 = vmul.f32 %v31_v28, %v31_v28 }
   0xa   :  { %v104_v42 = vadd.f32 %v103_v33, %v102_v36  ;;  %v109_v51 = vsel %vm40_vm1, %v88_v38, 0.0  ;;  %v62_v55 = vsel %vm40_vm1, %v34_v46, 0.0  ;;  %v91_v56 = vmul.f32 %v32_v34, %v32_v34 }
   0xb   :  { %v51_v29 = vadd.f32 %v50_v19, %v49_v22  ;;  %v111_v57 = vsel %vm40_vm1, %v89_v44, 0.0  ;;  %v64_v61 = vsel %vm40_vm1, %v35_v52, 0.0  ;;  %v92_v62 = vmul.f32 %v33_v40, %v33_v40  ;;  %v81_v44 = vld [vmem:[#allocation3] sm:$0x1] }
   0xc   :  { %v106_v48 = vadd.f32 %v105_v39, %v104_v42  ;;  %v113_v63 = vsel %vm40_vm1, %v90_v50, 0.0  ;;  %v66_v3 = vsel %vm40_vm1, %v36_v58, 0.0  ;;  %v93_v4 = vmul.f32 %v34_v46, %v34_v46 }
   0xd   :  { %v53_v35 = vadd.f32 %v52_v23, %v51_v29  ;;  %v115_v5 = vsel %vm40_vm1, %v91_v56, 0.0  ;;  %v68_v9 = vsel %vm40_vm1, %v37_v0, 0.0  ;;  %v94_v10 = vmul.f32 %v35_v52, %v35_v52 }
   0xe   :  { %v108_v54 = vadd.f32 %v107_v45, %v106_v48  ;;  %v117_v11 = vsel %vm40_vm1, %v92_v62, 0.0  ;;  %v70_v14 = vsel %vm40_vm1, %v38_v6, 0.0  ;;  %v95_v15 = vmul.f32 %v36_v58, %v36_v58 }
   0xf   :  { %v55_v41 = vadd.f32 %v54_v31, %v53_v35  ;;  %v119_v16 = vsel %vm40_vm1, %v93_v4, 0.0  ;;  %v96_v19 = vmul.f32 %v37_v0, %v37_v0  ;;  %v121_v20 = vsel %vm40_vm1, %v94_v10, 0.0  ;;  %v161_v0 = vld [vmem:[%s302_s2] sm:$0x1] }
  0x10   :  { %v110_v60 = vadd.f32 %v109_v51, %v108_v54  ;;  %v97_v23 = vmul.f32 %v38_v6, %v38_v6  ;;  %v123_v24 = vsel %vm40_vm1, %v95_v15, 0.0 }
  0x11   :  { %v57_v47 = vadd.f32 %v56_v37, %v55_v41  ;;  %v125_v27 = vsel %vm40_vm1, %v96_v19, 0.0  ;;  %v39_v37 = vld [vmem:[#allocation2] sm:$0x1] }
  0x12   :  { %v112_v2 = vadd.f32 %v111_v57, %v110_v60  ;;  %v127_v30 = vsel %vm40_vm1, %v97_v23, 0.0 }
  0x13   :  { %v59_v53 = vadd.f32 %v58_v43, %v57_v47 }
  0x14   :  { %v114_v8 = vadd.f32 %v113_v63, %v112_v2 }
  0x15   :  { %v61_v59 = vadd.f32 %v60_v49, %v59_v53 }
  0x16   :  { %v116_v13 = vadd.f32 %v115_v5, %v114_v8 }
  0x17   :  { %v63_v1 = vadd.f32 %v62_v55, %v61_v59 }
  0x18   :  { %v118_v18 = vadd.f32 %v117_v11, %v116_v13 }
  0x19   :  { %v65_v7 = vadd.f32 %v64_v61, %v63_v1  ;;  %v158_v61 = vld [vmem:[%s301_s1] sm:$0x1] }
  0x1a   :  { %v120_v22 = vadd.f32 %v119_v16, %v118_v18 }
  0x1b   :  { %v67_v12 = vadd.f32 %v66_v3, %v65_v7 }
  0x1c   :  { %v122_v26 = vadd.f32 %v121_v20, %v120_v22 }
  0x1d   :  { %v69_v17 = vadd.f32 %v68_v9, %v67_v12 }
  0x1e   :  { %v124_v29 = vadd.f32 %v123_v24, %v122_v26 }
  0x1f   :  { %v71_v21 = vadd.f32 %v70_v14, %v69_v17 }
  0x20   :  { %v126_v32 = vadd.f32 %v125_v27, %v124_v29 }
  0x21   :  { %v72_v25 = vrot.slane %v71_v21, 4 }
  0x22   :  { %v128_v34 = vadd.f32 %v127_v30, %v126_v32 }
  0x23   :  { %v73_v28 = vadd.f32 %v72_v25, %v71_v21 }
  0x24   :  { %v129_v36 = vrot.slane %v128_v34, 4 }
  0x25   :  { %v74_v31 = vrot.slane %v73_v28, 2 }
  0x26   :  { %v130_v39 = vadd.f32 %v129_v36, %v128_v34 }
  0x27   :  { %v75_v33 = vadd.f32 %v74_v31, %v73_v28 }
  0x28   :  { %v131_v41 = vrot.slane %v130_v39, 2 }
  0x29   :  { %v76_v35 = vrot.slane %v75_v33, 1 }
  0x2a   :  { %v132_v42 = vadd.f32 %v131_v41, %v130_v39 }
  0x2b   :  { %v77_v38 = vadd.f32 %v76_v35, %v75_v33 }
  0x2c   :  { %v133_v43 = vrot.slane %v132_v42, 1 }
  0x2d   :  { %v78_v40 = vadd.f32 %v77_v38, %v39_v37 }
  0x2e   :  { %v134_v45 = vadd.f32 %v133_v43, %v132_v42 }
  0x2f   :  { %80 = vst.msk [vmem:[#allocation2] sm:$0x1] %vm20_vm0, %v78_v40 }
  0x30   :  { %v135_v46 = vadd.f32 %v134_v45, %v81_v44 }
  0x32   :  { %136 = vst.msk [vmem:[#allocation3] sm:$0x1] %vm20_vm0, %v135_v46 }
  0x36   :  { %v140_v47 = vld [vmem:[#allocation2] sm:$0x1] }
  0x37   :  { %v141_v48 = vmul.f32 0.0078125, %v140_v47 }
  0x39   :  { %v144_v49 = vmul.f32 %v141_v48, %v141_v48  ;;  %v142_v50 = vld [vmem:[#allocation3] sm:$0x1] }
  0x3a   :  { %v143_v51 = vmul.f32 0.0078125, %v142_v50 }
  0x3c   :  { %v145_v52 = vsub.f32 %v143_v51, %v144_v49 }
  0x3e   :  { %v146_v53 = vmax.f32 %v145_v52, 0.0 }
  0x40   :  { %v147_v54 = vadd.f32 1e-05, %v146_v53 }
  0x42   :  { %174 = vrsqrt.f32 %v147_v54  ;;  %vm154_vm3 = vweird.f32 %v147_v54 }
  0x48   :  { %v175_v55 = vpop.eup %174 }
  0x49   :  { %v149_v56 = vmul.f32 %v175_v55, %v147_v54  ;;  %vm155_vm2 = vweird.f32 %v175_v55 }
  0x4a   :  { %vm156_vm4 = vmor %vm154_vm3, %vm155_vm2 }
  0x4b   :  { %v150_v57 = vmul.f32 %v175_v55, %v149_v56 }
  0x4d   :  { %v151_v58 = vmul.f32 0.5, %v150_v57 }
  0x4f   :  { %v152_v59 = vsub.f32 1.5, %v151_v58 }
  0x51   :  { %v153_v60 = vmul.f32 %v175_v55, %v152_v59 }
  0x53   :  { %v157_v62 = vsel %vm156_vm4, %v175_v55, %v153_v60 }
  0x54   :  { %v159_v63 = vmul.f32 %v158_v61, %v157_v62 }
  0x56   :  { %160 = vst.msk [vmem:[%s303_s3] sm:$0x1] %vm20_vm0, %v159_v63  ;;  %v162_v1 = vmul.f32 %v159_v63, %v141_v48 }
  0x58   :  { %v163_v2 = vsub.f32 %v161_v0, %v162_v1 }
  0x5a   :  { %164 = vst.msk [vmem:[%s304_s4] sm:$0x1] %vm20_vm0, %v163_v2 }

// kernel: densenet_forward.44
= control target key start
LH: loop header
LB: loop body
LE: loop exit
PB: predicated region body
PF: predicated region fallthrough
CT: control target
= control target key end

     0   :  { %vm175_vm0 = vcmask 1043456   ;;  %vm25_vm1 = vcmask 130048   ;;  %v343_v5 = vmov 0.0   ;;  %vm150_vm2 = vcmask 195584   ;;  %s612_s1 = inlined_call_operand.vmem [shape: bf16[24,16], index: 1, kind: input, shape index: {}]   ;;  %s613_s0 = inlined_call_operand.vmem [shape: f32[128,24], index: 0, kind: input, shape index: {}]   ;;  %s614_s3 = inlined_call_operand.vmem [shape: f32[1,24], index: 3, kind: input, shape index: {}]   ;;  %s615_s4 = inlined_call_operand.vmem [shape: f32[1,24], index: 4, kind: input, shape index: {}]   ;;  %s616_s2 = inlined_call_operand.vmem [shape: f32[1,16], index: 2, kind: input, shape index: {}]   ;;  %s617_s5 = inlined_call_operand.vmem [shape: f32[128,16], index: 5, kind: output, shape index: {}]  }
   0x1   :  { %v140_v0 = vld [vmem:[%s612_s1 + $0x8] sm:$0xf]  ;;  %v42_v1 = vld [vmem:[%s613_s0] sm:$0xff]  ;;  %26 = vst.msk [vmem:[#allocation2] sm:$0xff] %vm25_vm1, %v343_v5  ;;  %v44_v38 = vld [vmem:[%s613_s0 + $0x10] sm:$0xff] }
   0x2   :  { %v146_v2 = vunpack.c.l.b16 %v140_v0  ;;  %v43_v3 = vld [vmem:[%s613_s0 + $0x8] sm:$0xff]  ;;  %v386_v4 = vld [vmem:[%s614_s3] ss:$0 sm:$0xff]  ;;  %27 = vst.msk [vmem:[#allocation2 + $0x8] sm:$0xff] %vm25_vm1, %v343_v5  ;;  %v45_v42 = vld [vmem:[%s613_s0 + $0x18] sm:$0xff] }
   0x3   :  { %v393_v6 = vld [vmem:[%s615_s4] ss:$0 sm:$0xff]  ;;  %v62_v9 = vmul.f32 %v386_v4, %v42_v1  ;;  %v63_v10 = vmul.f32 %v386_v4, %v43_v3  ;;  %v47_v11 = vld [vmem:[%s613_s0 + $0x28] sm:$0xff]  ;;  %28 = vst.msk [vmem:[#allocation2 + $0x10] sm:$0xff] %vm25_vm1, %v343_v5  ;;  %v48_v43 = vld [vmem:[%s613_s0 + $0x30] sm:$0xff]  ;;  %v64_v49 = vmul.f32 %v386_v4, %v44_v38  ;;  %v65_v50 = vmul.f32 %v386_v4, %v45_v42 }
   0x4   :  { %v46_v7 = vld [vmem:[%s613_s0 + $0x20] sm:$0xff]  ;;  %v148_v8 = vpack.c.b16 %v146_v2, %v146_v2  ;;  %v51_v14 = vld [vmem:[%s613_s0 + $0x48] sm:$0xff]  ;;  %v67_v15 = vmul.f32 %v386_v4, %v47_v11  ;;  %29 = vst.msk [vmem:[#allocation2 + $0x18] sm:$0xff] %vm25_vm1, %v343_v5  ;;  %v49_v44 = vld [vmem:[%s613_s0 + $0x38] sm:$0xff]  ;;  %v68_v51 = vmul.f32 %v386_v4, %v48_v43 }
   0x5   :  { %v66_v12 = vmul.f32 %v386_v4, %v46_v7  ;;  %v50_v13 = vld [vmem:[%s613_s0 + $0x40] sm:$0xff]  ;;  %v71_v17 = vmul.f32 %v386_v4, %v51_v14  ;;  %v82_v20 = vadd.f32 %v393_v6, %v62_v9  ;;  %v83_v21 = vadd.f32 %v393_v6, %v63_v10  ;;  %v55_v23 = vld [vmem:[%s613_s0 + $0x68] sm:$0xff]  ;;  %30 = vst.msk [vmem:[#allocation2 + $0x20] sm:$0xff] %vm25_vm1, %v343_v5  ;;  %v52_v46 = vld [vmem:[%s613_s0 + $0x50] sm:$0xff] }
   0x6   :  { %v70_v16 = vmul.f32 %v386_v4, %v50_v13  ;;  %v54_v18 = vld [vmem:[%s613_s0 + $0x60] sm:$0xff]  ;;  %v177_v19 = vsel %vm175_vm0, %v148_v8, 0  ;;  %v87_v25 = vadd.f32 %v393_v6, %v67_v15  ;;  %31 = vst.msk [vmem:[#allocation2 + $0x28] sm:$0xff] %vm25_vm1, %v343_v5  ;;  %v75_v35 = vmul.f32 %v386_v4, %v55_v23  ;;  %v53_v47 = vld [vmem:[%s613_s0 + $0x58] sm:$0xff]  ;;  %v56_v53 = vld [vmem:[%s613_s0 + $0x70] sm:$0xff] }
   0x7   :  { %v86_v22 = vadd.f32 %v393_v6, %v66_v12  ;;  %185 = vmatpush.bf16.msra.mxu0 %v177_v19  ;;  %333 = vmatpush.bf16.msra.mxu1 %v177_v19  ;;  %v332_v24 = vld [vmem:[%s612_s1] sm:$0xff]  ;;  %v91_v27 = vadd.f32 %v393_v6, %v71_v17  ;;  %v98_v28 = vmax.f32 %v82_v20, 0.0  ;;  %v99_v29 = vmax.f32 %v83_v21, 0.0  ;;  %32 = vst.msk [vmem:[#allocation2 + $0x30] sm:$0xff] %vm25_vm1, %v343_v5  ;;  %v57_v54 = vld [vmem:[%s613_s0 + $0x78] sm:$0xff] }
   0x8   :  { %v90_v26 = vadd.f32 %v393_v6, %v70_v16  ;;  %334 = vmatpush.bf16.msra.mxu2 %v177_v19  ;;  %335 = vmatpush.bf16.msra.mxu3 %v177_v19  ;;  %v74_v31 = vmul.f32 %v386_v4, %v54_v18  ;;  %v103_v32 = vmax.f32 %v87_v25, 0.0  ;;  %33 = vst.msk [vmem:[#allocation2 + $0x38] sm:$0xff] %vm25_vm1, %v343_v5 }
   0x9   :  { %v102_v30 = vmax.f32 %v86_v22, 0.0  ;;  %v107_v34 = vmax.f32 %v91_v27, 0.0  ;;  %v130_v36 = vpack.c.bf16 %v99_v29, %v98_v28  ;;  %v95_v41 = vadd.f32 %v393_v6, %v75_v35  ;;  %34 = vst.msk [vmem:[#allocation2 + $0x40] sm:$0xff] %vm25_vm1, %v343_v5  ;;  %v115_v23 = vld [vmem:[#allocation2 + $0x8] sm:$0xff] }
   0xa   :  { %v106_v33 = vmax.f32 %v90_v26, 0.0  ;;  %v94_v37 = vadd.f32 %v393_v6, %v74_v31  ;;  %35 = vst.msk [vmem:[#allocation2 + $0x48] sm:$0xff] %vm25_vm1, %v343_v5  ;;  %v69_v52 = vmul.f32 %v386_v4, %v49_v44  ;;  %v72_v56 = vmul.f32 %v386_v4, %v52_v46 }
   0xb   :  { %186 = vmatpush.bf16.msra.mxu0 %v332_v24  ;;  %336 = vmatpush.bf16.msra.mxu1 %v332_v24  ;;  %v132_v39 = vpack.c.bf16 %v103_v32, %v102_v30  ;;  %v111_v48 = vmax.f32 %v95_v41, 0.0  ;;  %36 = vst.msk [vmem:[#allocation2 + $0x50] sm:$0xff] %vm25_vm1, %v343_v5  ;;  %v73_v57 = vmul.f32 %v386_v4, %v53_v47 }
   0xc   :  { %v134_v40 = vpack.c.bf16 %v107_v34, %v106_v33  ;;  %337 = vmatpush.bf16.msra.mxu2 %v332_v24  ;;  %338 = vmatpush.bf16.msra.mxu3 %v332_v24  ;;  %v110_v45 = vmax.f32 %v94_v37, 0.0  ;;  %37 = vst.msk [vmem:[#allocation2 + $0x58] sm:$0xff] %vm25_vm1, %v343_v5  ;;  %v76_v58 = vmul.f32 %v386_v4, %v56_v53  ;;  %v516_v24 = vld [vmem:[%s616_s2] ss:$0 sm:$0xff] }
   0xd   :  { %v77_v59 = vmul.f32 %v386_v4, %v57_v54  ;;  %38 = vst.msk [vmem:[#allocation2 + $0x60] sm:$0xff] %vm25_vm1, %v343_v5  ;;  %v84_v60 = vadd.f32 %v393_v6, %v64_v49  ;;  %v85_v61 = vadd.f32 %v393_v6, %v65_v50  ;;  %v88_v62 = vadd.f32 %v393_v6, %v68_v51  ;;  %v119_v29 = vld [vmem:[#allocation2 + $0x28] sm:$0xff] }
   0xe   :  { %324 = vmatmul.msk.bf16.vlgmr.msra.gmra.mxu0 %vm150_vm2, %v130_v36  ;;  %326 = vmatmul.msk.bf16.vlgmr.msra.gmra.mxu1 %vm150_vm2, %v132_v39  ;;  %v136_v55 = vpack.c.bf16 %v111_v48, %v110_v45  ;;  %v89_v63 = vadd.f32 %v393_v6, %v69_v52  ;;  %39 = vst.msk [vmem:[#allocation2 + $0x68] sm:$0xff] %vm25_vm1, %v343_v5  ;;  %v120_v49 = vld [vmem:[#allocation2 + $0x30] sm:$0xff] }
   0xf   :  { %328 = vmatmul.msk.bf16.vlgmr.msra.gmra.mxu2 %vm150_vm2, %v134_v40  ;;  %v92_v0 = vadd.f32 %v393_v6, %v72_v56  ;;  %v93_v1 = vadd.f32 %v393_v6, %v73_v57  ;;  %40 = vst.msk [vmem:[#allocation2 + $0x70] sm:$0xff] %vm25_vm1, %v343_v5  ;;  %v96_v2 = vadd.f32 %v393_v6, %v76_v58  ;;  %v100_v4 = vmax.f32 %v84_v60, 0.0  ;;  %v116_v40 = vld [vmem:[#allocation2 + $0x10] sm:$0xff] }
  0x10   :  { %330 = vmatmul.msk.bf16.vlgmr.msra.gmra.mxu3 %vm150_vm2, %v136_v55  ;;  %41 = vst.msk [vmem:[#allocation2 + $0x78] sm:$0xff] %vm25_vm1, %v343_v5  ;;  %v97_v3 = vadd.f32 %v393_v6, %v77_v59  ;;  %v101_v7 = vmax.f32 %v85_v61, 0.0  ;;  %v104_v8 = vmax.f32 %v88_v62, 0.0  ;;  %v105_v9 = vmax.f32 %v89_v63, 0.0  ;;  %v114_v5 = vld [vmem:[#allocation2] sm:$0xff]  ;;  %v117_v59 = vld [vmem:[#allocation2 + $0x18] sm:$0xff] }
  0x11   :  { %v108_v10 = vmax.f32 %v92_v0, 0.0  ;;  %v109_v11 = vmax.f32 %v93_v1, 0.0  ;;  %v112_v12 = vmax.f32 %v96_v2, 0.0  ;;  %v118_v6 = vld [vmem:[#allocation2 + $0x20] sm:$0xff]  ;;  %v123_v39 = vld [vmem:[#allocation2 + $0x48] sm:$0xff]  ;;  %v121_v1 = vld [vmem:[#allocation2 + $0x38] sm:$0xff] }
  0x12   :  { %v113_v13 = vmax.f32 %v97_v3, 0.0  ;;  %v131_v14 = vpack.c.bf16 %v101_v7, %v100_v4  ;;  %v133_v15 = vpack.c.bf16 %v105_v9, %v104_v8  ;;  %v122_v22 = vld [vmem:[#allocation2 + $0x40] sm:$0xff]  ;;  %v124_v57 = vld [vmem:[#allocation2 + $0x50] sm:$0xff] }
  0x13   :  { %v135_v16 = vpack.c.bf16 %v109_v11, %v108_v10 }
  0x14   :  { %v137_v17 = vpack.c.bf16 %v113_v13, %v112_v12  ;;  %v126_v26 = vld [vmem:[#allocation2 + $0x60] sm:$0xff]  ;;  %v125_v13 = vld [vmem:[#allocation2 + $0x58] sm:$0xff] }
  0x15   :  { %v127_v43 = vld [vmem:[#allocation2 + $0x68] sm:$0xff] }
  0x16   :  { %v128_v62 = vld [vmem:[#allocation2 + $0x70] sm:$0xff] }
  0x1e   :  { %325 = vmatmul.msk.bf16.gmra.mxu0 %vm150_vm2, %v131_v14  ;;  %327 = vmatmul.msk.bf16.gmra.mxu1 %vm150_vm2, %v133_v15 }
  0x1f   :  { %329 = vmatmul.msk.bf16.gmra.mxu2 %vm150_vm2, %v135_v16 }
  0x20   :  { %331 = vmatmul.msk.bf16.gmra.mxu3 %vm150_vm2, %v137_v17 }
  0x8b   :  { %v188_v18 = vpop.f32.mrf.mxu0  ;;  %v198_v19 = vpop.f32.mrf.mxu1 }
  0x8c   :  { %v228_v20 = vadd.f32 %v188_v18, %v114_v5  ;;  %v232_v21 = vadd.f32 %v198_v19, %v118_v6  ;;  %v129_v5 = vld [vmem:[#allocation2 + $0x78] sm:$0xff] }
  0x8e   :  { %245 = vst.msk [vmem:[#allocation2] sm:$0xff] %vm25_vm1, %v228_v20 }
  0x8f   :  { %249 = vst.msk [vmem:[#allocation2 + $0x20] sm:$0xff] %vm25_vm1, %v232_v21 }
  0x92   :  { %v208_v25 = vpop.f32.mrf.mxu2 }
  0x93   :  { %v236_v27 = vadd.f32 %v208_v25, %v122_v22  ;;  %v190_v28 = vpop.f32.mrf.mxu0  ;;  %v200_v30 = vpop.f32.mrf.mxu1 }
  0x94   :  { %v218_v31 = vpop.f32.mrf.mxu3  ;;  %v229_v32 = vadd.f32 %v190_v28, %v115_v23  ;;  %v233_v37 = vadd.f32 %v200_v30, %v119_v29 }
  0x95   :  { %v264_v33 = vld [vmem:[#allocation2] sm:$0xff]  ;;  %253 = vst.msk [vmem:[#allocation2 + $0x40] sm:$0xff] %vm25_vm1, %v236_v27  ;;  %v240_v34 = vadd.f32 %v218_v31, %v126_v26 }
  0x96   :  { %v284_v35 = vadd.f32 %v516_v24, %v264_v33  ;;  %v268_v36 = vld [vmem:[#allocation2 + $0x20] sm:$0xff]  ;;  %246 = vst.msk [vmem:[#allocation2 + $0x8] sm:$0xff] %vm25_vm1, %v229_v32 }
  0x97   :  { %v288_v38 = vadd.f32 %v516_v24, %v268_v36  ;;  %257 = vst.msk [vmem:[#allocation2 + $0x60] sm:$0xff] %vm25_vm1, %v240_v34 }
  0x98   :  { %300 = vst.msk [vmem:[%s617_s5] sm:$0xff] %vm25_vm1, %v284_v35 }
  0x99   :  { %304 = vst.msk [vmem:[%s617_s5 + $0x20] sm:$0xff] %vm25_vm1, %v288_v38 }
  0x9a   :  { %250 = vst.msk [vmem:[#allocation2 + $0x28] sm:$0xff] %vm25_vm1, %v233_v37  ;;  %v210_v41 = vpop.f32.mrf.mxu2 }
  0x9b   :  { %v237_v42 = vadd.f32 %v210_v41, %v123_v39  ;;  %v193_v44 = vpop.f32.mrf.mxu0  ;;  %v203_v45 = vpop.f32.mrf.mxu1 }
  0x9c   :  { %v272_v46 = vld [vmem:[#allocation2 + $0x40] sm:$0xff]  ;;  %v220_v47 = vpop.f32.mrf.mxu3  ;;  %v230_v48 = vadd.f32 %v193_v44, %v116_v40  ;;  %v234_v56 = vadd.f32 %v203_v45, %v120_v49 }
  0x9d   :  { %v292_v50 = vadd.f32 %v516_v24, %v272_v46  ;;  %v265_v51 = vld [vmem:[#allocation2 + $0x8] sm:$0xff]  ;;  %254 = vst.msk [vmem:[#allocation2 + $0x48] sm:$0xff] %vm25_vm1, %v237_v42  ;;  %v241_v54 = vadd.f32 %v220_v47, %v127_v43 }
  0x9e   :  { %v276_v52 = vld [vmem:[#allocation2 + $0x60] sm:$0xff]  ;;  %v285_v53 = vadd.f32 %v516_v24, %v265_v51  ;;  %247 = vst.msk [vmem:[#allocation2 + $0x10] sm:$0xff] %vm25_vm1, %v230_v48 }
  0x9f   :  { %308 = vst.msk [vmem:[%s617_s5 + $0x40] sm:$0xff] %vm25_vm1, %v292_v50  ;;  %v296_v55 = vadd.f32 %v516_v24, %v276_v52 }
  0xa0   :  { %301 = vst.msk [vmem:[%s617_s5 + $0x8] sm:$0xff] %vm25_vm1, %v285_v53 }
  0xa1   :  { %312 = vst.msk [vmem:[%s617_s5 + $0x60] sm:$0xff] %vm25_vm1, %v296_v55  ;;  %v269_v58 = vld [vmem:[#allocation2 + $0x28] sm:$0xff] }
  0xa2   :  { %v289_v60 = vadd.f32 %v516_v24, %v269_v58  ;;  %258 = vst.msk [vmem:[#allocation2 + $0x68] sm:$0xff] %vm25_vm1, %v241_v54  ;;  %v213_v61 = vpop.f32.mrf.mxu2 }
  0xa3   :  { %251 = vst.msk [vmem:[#allocation2 + $0x30] sm:$0xff] %vm25_vm1, %v234_v56  ;;  %v238_v63 = vadd.f32 %v213_v61, %v124_v57  ;;  %v195_v0 = vpop.f32.mrf.mxu0  ;;  %v205_v2 = vpop.f32.mrf.mxu1 }
  0xa4   :  { %305 = vst.msk [vmem:[%s617_s5 + $0x28] sm:$0xff] %vm25_vm1, %v289_v60  ;;  %v273_v3 = vld [vmem:[#allocation2 + $0x48] sm:$0xff]  ;;  %v223_v4 = vpop.f32.mrf.mxu3  ;;  %v231_v7 = vadd.f32 %v195_v0, %v117_v59  ;;  %v235_v12 = vadd.f32 %v205_v2, %v121_v1 }
  0xa5   :  { %v293_v8 = vadd.f32 %v516_v24, %v273_v3  ;;  %v266_v9 = vld [vmem:[#allocation2 + $0x10] sm:$0xff]  ;;  %255 = vst.msk [vmem:[#allocation2 + $0x50] sm:$0xff] %vm25_vm1, %v238_v63  ;;  %v242_v10 = vadd.f32 %v223_v4, %v128_v62 }
  0xa6   :  { %v286_v11 = vadd.f32 %v516_v24, %v266_v9  ;;  %248 = vst.msk [vmem:[#allocation2 + $0x18] sm:$0xff] %vm25_vm1, %v231_v7 }
  0xa7   :  { %309 = vst.msk [vmem:[%s617_s5 + $0x48] sm:$0xff] %vm25_vm1, %v293_v8 }
  0xa8   :  { %302 = vst.msk [vmem:[%s617_s5 + $0x10] sm:$0xff] %vm25_vm1, %v286_v11 }
  0xa9   :  { %v277_v14 = vld [vmem:[#allocation2 + $0x68] sm:$0xff]  ;;  %259 = vst.msk [vmem:[#allocation2 + $0x70] sm:$0xff] %vm25_vm1, %v242_v10 }
  0xaa   :  { %v297_v15 = vadd.f32 %v516_v24, %v277_v14  ;;  %v270_v16 = vld [vmem:[#allocation2 + $0x30] sm:$0xff]  ;;  %252 = vst.msk [vmem:[#allocation2 + $0x38] sm:$0xff] %vm25_vm1, %v235_v12  ;;  %v215_v17 = vpop.f32.mrf.mxu2 }
  0xab   :  { %v290_v6 = vadd.f32 %v516_v24, %v270_v16  ;;  %v239_v18 = vadd.f32 %v215_v17, %v125_v13 }
  0xac   :  { %313 = vst.msk [vmem:[%s617_s5 + $0x68] sm:$0xff] %vm25_vm1, %v297_v15  ;;  %v274_v19 = vld [vmem:[#allocation2 + $0x50] sm:$0xff]  ;;  %v225_v20 = vpop.f32.mrf.mxu3 }
  0xad   :  { %306 = vst.msk [vmem:[%s617_s5 + $0x30] sm:$0xff] %vm25_vm1, %v290_v6  ;;  %v294_v21 = vadd.f32 %v516_v24, %v274_v19  ;;  %v267_v22 = vld [vmem:[#allocation2 + $0x18] sm:$0xff]  ;;  %v243_v23 = vadd.f32 %v225_v20, %v129_v5 }
  0xae   :  { %v287_v25 = vadd.f32 %v516_v24, %v267_v22  ;;  %256 = vst.msk [vmem:[#allocation2 + $0x58] sm:$0xff] %vm25_vm1, %v239_v18 }
  0xaf   :  { %310 = vst.msk [vmem:[%s617_s5 + $0x50] sm:$0xff] %vm25_vm1, %v294_v21 }
  0xb0   :  { %v278_v26 = vld [vmem:[#allocation2 + $0x70] sm:$0xff]  ;;  %303 = vst.msk [vmem:[%s617_s5 + $0x18] sm:$0xff] %vm25_vm1, %v287_v25 }
  0xb1   :  { %v298_v27 = vadd.f32 %v516_v24, %v278_v26  ;;  %v271_v28 = vld [vmem:[#allocation2 + $0x38] sm:$0xff]  ;;  %260 = vst.msk [vmem:[#allocation2 + $0x78] sm:$0xff] %vm25_vm1, %v243_v23 }
  0xb2   :  { %v291_v29 = vadd.f32 %v516_v24, %v271_v28 }
  0xb3   :  { %314 = vst.msk [vmem:[%s617_s5 + $0x70] sm:$0xff] %vm25_vm1, %v298_v27 }
  0xb4   :  { %307 = vst.msk [vmem:[%s617_s5 + $0x38] sm:$0xff] %vm25_vm1, %v291_v29 }
  0xb5   :  { %v275_v30 = vld [vmem:[#allocation2 + $0x58] sm:$0xff] }
  0xb6   :  { %v295_v31 = vadd.f32 %v516_v24, %v275_v30 }
  0xb8   :  { %311 = vst.msk [vmem:[%s617_s5 + $0x58] sm:$0xff] %vm25_vm1, %v295_v31  ;;  %v279_v32 = vld [vmem:[#allocation2 + $0x78] sm:$0xff] }
  0xb9   :  { %v299_v33 = vadd.f32 %v516_v24, %v279_v32 }
  0xbb   :  { %315 = vst.msk [vmem:[%s617_s5 + $0x78] sm:$0xff] %vm25_vm1, %v299_v33 }

// kernel: densenet_forward.48
= control target key start
LH: loop header
LB: loop body
LE: loop exit
PB: predicated region body
PF: predicated region fallthrough
CT: control target
= control target key end

     0   :  { %vm18_vm0 = vcmask 254976   ;;  %vm37_vm1 = vcmask 261120   ;;  %v99_v0 = vmov 0.0   ;;  %vm82_vm2 = vcmask 1041409   ;;  %s190_s1 = inlined_call_operand.vmem [shape: f32[1,1,32], index: 1, kind: input, shape index: {}]   ;;  %s191_s2 = inlined_call_operand.vmem [shape: f32[1,1,32], index: 2, kind: input, shape index: {}]   ;;  %s192_s0 = inlined_call_operand.vmem [shape: f32[2,64,32], index: 0, kind: input, shape index: {}]   ;;  %s193_s3 = inlined_call_operand.vmem [shape: f32[2,32], index: 3, kind: output, shape index: {}]  }
   0x1   :  { %19 = vst.msk [vmem:[#allocation2] sm:$0x3] %vm18_vm0, %v99_v0  ;;  %v20_v1 = vld [vmem:[%s192_s0] sm:$0xff]  ;;  %v21_v2 = vld [vmem:[%s192_s0 + $0x8] sm:$0xff]  ;;  %v22_v3 = vld [vmem:[%s192_s0 + $0x10] sm:$0xff] }
   0x2   :  { %v23_v4 = vld [vmem:[%s192_s0 + $0x18] sm:$0xff]  ;;  %v38_v5 = vsel %vm37_vm1, %v20_v1, 0.0  ;;  %v39_v6 = vsel %vm37_vm1, %v21_v2, 0.0  ;;  %v41_v7 = vsel %vm37_vm1, %v22_v3, 0.0  ;;  %v24_v8 = vld [vmem:[%s192_s0 + $0x20] sm:$0xff]  ;;  %v29_v11 = vld [vmem:[%s192_s0 + $0x48] sm:$0xff] }
   0x3   :  { %v28_v9 = vld [vmem:[%s192_s0 + $0x40] sm:$0xff]  ;;  %v40_v10 = vadd.f32 %v39_v6, %v38_v5  ;;  %v30_v12 = vld [vmem:[%s192_s0 + $0x50] sm:$0xff]  ;;  %v31_v13 = vld [vmem:[%s192_s0 + $0x58] sm:$0xff]  ;;  %v43_v14 = vsel %vm37_vm1, %v23_v4, 0.0  ;;  %v60_v18 = vsel %vm37_vm1, %v29_v11, 0.0  ;;  %v45_v21 = vsel %vm37_vm1, %v24_v8, 0.0 }
   0x4   :  { %v59_v15 = vsel %vm37_vm1, %v28_v9, 0.0  ;;  %v25_v16 = vld [vmem:[%s192_s0 + $0x28] sm:$0xff]  ;;  %v62_v19 = vsel %vm37_vm1, %v30_v12, 0.0  ;;  %v32_v20 = vld [vmem:[%s192_s0 + $0x60] sm:$0xff]  ;;  %v26_v23 = vld [vmem:[%s192_s0 + $0x30] sm:$0xff]  ;;  %v64_v25 = vsel %vm37_vm1, %v31_v13, 0.0 }
   0x5   :  { %v42_v17 = vadd.f32 %v41_v7, %v40_v10  ;;  %v61_v22 = vadd.f32 %v60_v18, %v59_v15  ;;  %v33_v26 = vld [vmem:[%s192_s0 + $0x68] sm:$0xff]  ;;  %v47_v27 = vsel %vm37_vm1, %v25_v16, 0.0  ;;  %v27_v29 = vld [vmem:[%s192_s0 + $0x38] sm:$0xff]  ;;  %v66_v31 = vsel %vm37_vm1, %v32_v20, 0.0  ;;  %v34_v32 = vld [vmem:[%s192_s0 + $0x70] sm:$0xff] }
   0x6   :  { %v49_v33 = vsel %vm37_vm1, %v26_v23, 0.0  ;;  %v68_v36 = vsel %vm37_vm1, %v33_v26, 0.0  ;;  %v35_v37 = vld [vmem:[%s192_s0 + $0x78] sm:$0xff]  ;;  %v51_v38 = vsel %vm37_vm1, %v27_v29, 0.0  ;;  %v70_v41 = vsel %vm37_vm1, %v34_v32, 0.0 }
   0x7   :  { %v44_v24 = vadd.f32 %v43_v14, %v42_v17  ;;  %v63_v28 = vadd.f32 %v62_v19, %v61_v22  ;;  %v72_v44 = vsel %vm37_vm1, %v35_v37, 0.0 }
   0x8   :  { %v36_v58 = vld [vmem:[#allocation2] sm:$0x3] }
   0x9   :  { %v46_v30 = vadd.f32 %v45_v21, %v44_v24  ;;  %v65_v34 = vadd.f32 %v64_v25, %v63_v28 }
   0xb   :  { %v48_v35 = vadd.f32 %v47_v27, %v46_v30  ;;  %v67_v39 = vadd.f32 %v66_v31, %v65_v34 }
   0xd   :  { %v50_v40 = vadd.f32 %v49_v33, %v48_v35  ;;  %v69_v42 = vadd.f32 %v68_v36, %v67_v39 }
   0xf   :  { %v52_v43 = vadd.f32 %v51_v38, %v50_v40  ;;  %v71_v45 = vadd.f32 %v70_v41, %v69_v42 }
  0x11   :  { %v53_v46 = vrot.slane %v52_v43, 4  ;;  %v73_v47 = vadd.f32 %v72_v44, %v71_v45 }
  0x13   :  { %v54_v48 = vadd.f32 %v53_v46, %v52_v43  ;;  %v74_v49 = vrot.slane %v73_v47, 4 }
  0x15   :  { %v55_v50 = vrot.slane %v54_v48, 2  ;;  %v75_v51 = vadd.f32 %v74_v49, %v73_v47 }
  0x17   :  { %v56_v52 = vadd.f32 %v55_v50, %v54_v48  ;;  %v76_v53 = vrot.slane %v75_v51, 2 }
  0x19   :  { %v57_v54 = vrot.slane %v56_v52, 1  ;;  %v77_v55 = vadd.f32 %v76_v53, %v75_v51 }
  0x1b   :  { %v58_v56 = vadd.f32 %v57_v54, %v56_v52  ;;  %v78_v57 = vrot.slane %v77_v55, 1 }
  0x1d   :  { %v79_v59 = vadd.f32 %v78_v57, %v77_v55 }
  0x1f   :  { %v83_v60 = vsel %vm82_vm2, %v79_v59, %v58_v56 }
  0x20   :  { %v85_v61 = vadd.f32 %v83_v60, %v36_v58 }
  0x22   :  { %87 = vst.msk [vmem:[#allocation2] sm:$0x3] %vm18_vm0, %v85_v61 }
  0x29   :  { %v91_v62 = vld [vmem:[#allocation2] sm:$0x3] }
  0x2a   :  { %v92_v63 = vmul.f32 0.015625, %v91_v62 }
  0x2c   :  { %93 = vst.msk [vmem:[%s193_s3] sm:$0x3] %vm18_vm0, %v92_v63 }

// kernel: densenet_forward.50
= control target key start
LH: loop header
LB: loop body
LE: loop exit
PB: predicated region body
PF: predicated region fallthrough
CT: control target
= control target key end

     0   :  { %vm20_vm0 = vcmask 253952   ;;  %vm40_vm1 = vcmask 261120   ;;  %v176_v0 = vmov 0.0   ;;  %s300_s0 = inlined_call_operand.vmem [shape: f32[128,32], index: 0, kind: input, shape index: {}]   ;;  %s301_s1 = inlined_call_operand.vmem [shape: f32[1,32], index: 1, kind: input, shape index: {}]   ;;  %s302_s2 = inlined_call_operand.vmem [shape: f32[1,32], index: 2, kind: input, shape index: {}]   ;;  %s303_s3 = inlined_call_operand.vmem [shape: f32[1,32], index: 3, kind: output, shape index: {0}]   ;;  %s304_s4 = inlined_call_operand.vmem [shape: f32[1,32], index: 4, kind: output, shape index: {1}]  }
   0x1   :  { %21 = vst.msk [vmem:[#allocation2] sm:$0x1] %vm20_vm0, %v176_v0  ;;  %v23_v1 = vld [vmem:[%s300_s0] sm:$0xff]  ;;  %v24_v2 = vld [vmem:[%s300_s0 + $0x8] sm:$0xff]  ;;  %v25_v3 = vld [vmem:[%s300_s0 + $0x10] sm:$0xff] }
   0x2   :  { %22 = vst.msk [vmem:[#allocation3] sm:$0x1] %vm20_vm0, %v176_v0  ;;  %v26_v4 = vld [vmem:[%s300_s0 + $0x18] sm:$0xff]  ;;  %v41_v5 = vsel %vm40_vm1, %v23_v1, 0.0  ;;  %v42_v6 = vsel %vm40_vm1, %v24_v2, 0.0  ;;  %v44_v7 = vsel %vm40_vm1, %v25_v3, 0.0  ;;  %v82_v15 = vmul.f32 %v23_v1, %v23_v1 }
   0x3   :  { %v27_v8 = vld [vmem:[%s300_s0 + $0x20] sm:$0xff]  ;;  %v43_v9 = vadd.f32 %v42_v6, %v41_v5  ;;  %v46_v10 = vsel %vm40_vm1, %v26_v4, 0.0  ;;  %v28_v11 = vld [vmem:[%s300_s0 + $0x28] sm:$0xff]  ;;  %v29_v13 = vld [vmem:[%s300_s0 + $0x30] sm:$0xff]  ;;  %v83_v16 = vmul.f32 %v24_v2, %v24_v2  ;;  %v84_v17 = vmul.f32 %v25_v3, %v25_v3 }
   0x4   :  { %v48_v14 = vsel %vm40_vm1, %v27_v8, 0.0  ;;  %v50_v19 = vsel %vm40_vm1, %v28_v11, 0.0  ;;  %v85_v20 = vmul.f32 %v26_v4, %v26_v4  ;;  %v30_v21 = vld [vmem:[%s300_s0 + $0x38] sm:$0xff]  ;;  %v52_v23 = vsel %vm40_vm1, %v29_v13, 0.0  ;;  %v31_v28 = vld [vmem:[%s300_s0 + $0x40] sm:$0xff]  ;;  %v32_v34 = vld [vmem:[%s300_s0 + $0x48] sm:$0xff] }
   0x5   :  { %v45_v12 = vadd.f32 %v44_v7, %v43_v9  ;;  %v86_v24 = vmul.f32 %v27_v8, %v27_v8  ;;  %v98_v25 = vsel %vm40_vm1, %v82_v15, 0.0  ;;  %v99_v26 = vsel %vm40_vm1, %v83_v16, 0.0  ;;  %v33_v40 = vld [vmem:[%s300_s0 + $0x50] sm:$0xff]  ;;  %v34_v46 = vld [vmem:[%s300_s0 + $0x58] sm:$0xff]  ;;  %v35_v52 = vld [vmem:[%s300_s0 + $0x60] sm:$0xff] }
   0x6   :  { %v101_v27 = vsel %vm40_vm1, %v84_v17, 0.0  ;;  %v100_v30 = vadd.f32 %v99_v26, %v98_v25  ;;  %v54_v31 = vsel %vm40_vm1, %v30_v21, 0.0  ;;  %v87_v32 = vmul.f32 %v28_v11, %v28_v11  ;;  %v36_v58 = vld [vmem:[%s300_s0 + $0x68] sm:$0xff]  ;;  %v37_v0 = vld [vmem:[%s300_s0 + $0x70] sm:$0xff]  ;;  %v38_v6 = vld [vmem:[%s300_s0 + $0x78] sm:$0xff] }
   0x7   :  { %v47_v18 = vadd.f32 %v46_v10, %v45_v12  ;;  %v103_v33 = vsel %vm40_vm1, %v85_v20, 0.0  ;;  %v56_v37 = vsel %vm40_vm1, %v31_v28, 0.0  ;;  %v88_v38 = vmul.f32 %v29_v13, %v29_v13 }
   0x8   :  { %v102_v36 = vadd.f32 %v101_v27, %v100_v30  ;;  %v105_v39 = vsel %vm40_vm1, %v86_v24, 0.0  ;;  %v58_v43 = vsel %vm40_vm1, %v32_v34, 0.0  ;;  %v89_v44 = vmul.f32 %v30_v21, %v30_v21 }
   0x9   :  { %v49_v22 = vadd.f32 %v48_v14, %v47_v18  ;;  %v107_v45 = vsel %vm40_vm1, %v87_v32, 0.0  ;;  %v60_v49 = vsel %vm40_vm1, %v33_v40, 0.0  ;;  %v90_v50 = vmul.f32 %v31_v28, %v31_v28 }
   0xa   :  { %v104_v42 = vadd.f32 %v103_v33, %v102_v36  ;;  %v109_v51 = vsel %vm40_vm1, %v88_v38, 0.0  ;;  %v62_v55 = vsel %vm40_vm1, %v34_v46, 0.0  ;;  %v91_v56 = vmul.f32 %v32_v34, %v32_v34 }
   0xb   :  { %v51_v29 = vadd.f32 %v50_v19, %v49_v22  ;;  %v111_v57 = vsel %vm40_vm1, %v89_v44, 0.0  ;;  %v64_v61 = vsel %vm40_vm1, %v35_v52, 0.0  ;;  %v92_v62 = vmul.f32 %v33_v40, %v33_v40  ;;  %v81_v44 = vld [vmem:[#allocation3] sm:$0x1] }
   0xc   :  { %v106_v48 = vadd.f32 %v105_v39, %v104_v42  ;;  %v113_v63 = vsel %vm40_vm1, %v90_v50, 0.0  ;;  %v66_v3 = vsel %vm40_vm1, %v36_v58, 0.0  ;;  %v93_v4 = vmul.f32 %v34_v46, %v34_v46 }
   0xd   :  { %v53_v35 = vadd.f32 %v52_v23, %v51_v29  ;;  %v115_v5 = vsel %vm40_vm1, %v91_v56, 0.0  ;;  %v68_v9 = vsel %vm40_vm1, %v37_v0, 0.0  ;;  %v94_v10 = vmul.f32 %v35_v52, %v35_v52 }
   0xe   :  { %v108_v54 = vadd.f32 %v107_v45, %v106_v48  ;;  %v117_v11 = vsel %vm40_vm1, %v92_v62, 0.0  ;;  %v70_v14 = vsel %vm40_vm1, %v38_v6, 0.0  ;;  %v95_v15 = vmul.f32 %v36_v58, %v36_v58 }
   0xf   :  { %v55_v41 = vadd.f32 %v54_v31, %v53_v35  ;;  %v119_v16 = vsel %vm40_vm1, %v93_v4, 0.0  ;;  %v96_v19 = vmul.f32 %v37_v0, %v37_v0  ;;  %v121_v20 = vsel %vm40_vm1, %v94_v10, 0.0  ;;  %v161_v0 = vld [vmem:[%s302_s2] sm:$0x1] }
  0x10   :  { %v110_v60 = vadd.f32 %v109_v51, %v108_v54  ;;  %v97_v23 = vmul.f32 %v38_v6, %v38_v6  ;;  %v123_v24 = vsel %vm40_vm1, %v95_v15, 0.0 }
  0x11   :  { %v57_v47 = vadd.f32 %v56_v37, %v55_v41  ;;  %v125_v27 = vsel %vm40_vm1, %v96_v19, 0.0  ;;  %v39_v37 = vld [vmem:[#allocation2] sm:$0x1] }
  0x12   :  { %v112_v2 = vadd.f32 %v111_v57, %v110_v60  ;;  %v127_v30 = vsel %vm40_vm1, %v97_v23, 0.0 }
  0x13   :  { %v59_v53 = vadd.f32 %v58_v43, %v57_v47 }
  0x14   :  { %v114_v8 = vadd.f32 %v113_v63, %v112_v2 }
  0x15   :  { %v61_v59 = vadd.f32 %v60_v49, %v59_v53 }
  0x16   :  { %v116_v13 = vadd.f32 %v115_v5, %v114_v8 }
  0x17   :  { %v63_v1 = vadd.f32 %v62_v55, %v61_v59 }
  0x18   :  { %v118_v18 = vadd.f32 %v117_v11, %v116_v13 }
  0x19   :  { %v65_v7 = vadd.f32 %v64_v61, %v63_v1  ;;  %v158_v61 = vld [vmem:[%s301_s1] sm:$0x1] }
  0x1a   :  { %v120_v22 = vadd.f32 %v119_v16, %v118_v18 }
  0x1b   :  { %v67_v12 = vadd.f32 %v66_v3, %v65_v7 }
  0x1c   :  { %v122_v26 = vadd.f32 %v121_v20, %v120_v22 }
  0x1d   :  { %v69_v17 = vadd.f32 %v68_v9, %v67_v12 }
  0x1e   :  { %v124_v29 = vadd.f32 %v123_v24, %v122_v26 }
  0x1f   :  { %v71_v21 = vadd.f32 %v70_v14, %v69_v17 }
  0x20   :  { %v126_v32 = vadd.f32 %v125_v27, %v124_v29 }
  0x21   :  { %v72_v25 = vrot.slane %v71_v21, 4 }
  0x22   :  { %v128_v34 = vadd.f32 %v127_v30, %v126_v32 }
  0x23   :  { %v73_v28 = vadd.f32 %v72_v25, %v71_v21 }
  0x24   :  { %v129_v36 = vrot.slane %v128_v34, 4 }
  0x25   :  { %v74_v31 = vrot.slane %v73_v28, 2 }
  0x26   :  { %v130_v39 = vadd.f32 %v129_v36, %v128_v34 }
  0x27   :  { %v75_v33 = vadd.f32 %v74_v31, %v73_v28 }
  0x28   :  { %v131_v41 = vrot.slane %v130_v39, 2 }
  0x29   :  { %v76_v35 = vrot.slane %v75_v33, 1 }
  0x2a   :  { %v132_v42 = vadd.f32 %v131_v41, %v130_v39 }
  0x2b   :  { %v77_v38 = vadd.f32 %v76_v35, %v75_v33 }
  0x2c   :  { %v133_v43 = vrot.slane %v132_v42, 1 }
  0x2d   :  { %v78_v40 = vadd.f32 %v77_v38, %v39_v37 }
  0x2e   :  { %v134_v45 = vadd.f32 %v133_v43, %v132_v42 }
  0x2f   :  { %80 = vst.msk [vmem:[#allocation2] sm:$0x1] %vm20_vm0, %v78_v40 }
  0x30   :  { %v135_v46 = vadd.f32 %v134_v45, %v81_v44 }
  0x32   :  { %136 = vst.msk [vmem:[#allocation3] sm:$0x1] %vm20_vm0, %v135_v46 }
  0x36   :  { %v140_v47 = vld [vmem:[#allocation2] sm:$0x1] }
  0x37   :  { %v141_v48 = vmul.f32 0.0078125, %v140_v47 }
  0x39   :  { %v144_v49 = vmul.f32 %v141_v48, %v141_v48  ;;  %v142_v50 = vld [vmem:[#allocation3] sm:$0x1] }
  0x3a   :  { %v143_v51 = vmul.f32 0.0078125, %v142_v50 }
  0x3c   :  { %v145_v52 = vsub.f32 %v143_v51, %v144_v49 }
  0x3e   :  { %v146_v53 = vmax.f32 %v145_v52, 0.0 }
  0x40   :  { %v147_v54 = vadd.f32 1e-05, %v146_v53 }
  0x42   :  { %174 = vrsqrt.f32 %v147_v54  ;;  %vm154_vm3 = vweird.f32 %v147_v54 }
  0x48   :  { %v175_v55 = vpop.eup %174 }
  0x49   :  { %v149_v56 = vmul.f32 %v175_v55, %v147_v54  ;;  %vm155_vm2 = vweird.f32 %v175_v55 }
  0x4a   :  { %vm156_vm4 = vmor %vm154_vm3, %vm155_vm2 }
  0x4b   :  { %v150_v57 = vmul.f32 %v175_v55, %v149_v56 }
  0x4d   :  { %v151_v58 = vmul.f32 0.5, %v150_v57 }
  0x4f   :  { %v152_v59 = vsub.f32 1.5, %v151_v58 }
  0x51   :  { %v153_v60 = vmul.f32 %v175_v55, %v152_v59 }
  0x53   :  { %v157_v62 = vsel %vm156_vm4, %v175_v55, %v153_v60 }
  0x54   :  { %v159_v63 = vmul.f32 %v158_v61, %v157_v62 }
  0x56   :  { %160 = vst.msk [vmem:[%s303_s3] sm:$0x1] %vm20_vm0, %v159_v63  ;;  %v162_v1 = vmul.f32 %v159_v63, %v141_v48 }
  0x58   :  { %v163_v2 = vsub.f32 %v161_v0, %v162_v1 }
  0x5a   :  { %164 = vst.msk [vmem:[%s304_s4] sm:$0x1] %vm20_vm0, %v163_v2 }

// kernel: densenet_forward.49
= control target key start
LH: loop header
LB: loop body
LE: loop exit
PB: predicated region body
PF: predicated region fallthrough
CT: control target
= control target key end

     0   :  { %vm32_vm0 = vcmask 261120   ;;  %vm66_vm1 = vcmask 1041408   ;;  %vm62_vm2 = vcmask 15360   ;;  %s354_s2 = inlined_call_operand.vmem [shape: f32[32,2], index: 2, kind: input, shape index: {}]   ;;  %s355_s3 = inlined_call_operand.vmem [shape: f32[1,2], index: 3, kind: input, shape index: {}]   ;;  %s356_s1 = inlined_call_operand.vmem [shape: f32[8,32], index: 1, kind: input, shape index: {}]   ;;  %s357_s5 = inlined_call_operand.vmem [shape: f32[1,32], index: 5, kind: input, shape index: {}]   ;;  %s358_s4 = inlined_call_operand.vmem [shape: f32[2,32], index: 4, kind: input, shape index: {}]   ;;  %s359_s0 = inlined_call_operand.vmem [shape: f32[2,64,32], index: 0, kind: input, shape index: {}]   ;;  %s360_s6 = inlined_call_operand.vmem [shape: f32[2,64,32], index: 6, kind: output, shape index: {}]  }
   0x1   :  { %v27_v0 = vld [vmem:[%s354_s2 + $0x18] sm:$0xff]  ;;  %v26_v1 = vld [vmem:[%s354_s2 + $0x10] sm:$0xff]  ;;  %v25_v2 = vld [vmem:[%s354_s2 + $0x8] sm:$0xff] }
   0x2   :  { %48 = vmatpush.msra.mxu0 %v27_v0  ;;  %v24_v3 = vld [vmem:[%s354_s2] sm:$0xff]  ;;  %v110_v27 = vld [vmem:[%s359_s0 + $0x8] sm:$0xff]  ;;  %v111_v28 = vld [vmem:[%s359_s0 + $0x10] sm:$0xff] }
   0x3   :  { %v23_v4 = vld [vmem:[%s356_s1] sm:$0xff]  ;;  %v112_v29 = vld [vmem:[%s359_s0 + $0x18] sm:$0xff]  ;;  %v114_v32 = vld [vmem:[%s359_s0 + $0x28] sm:$0xff] }
   0x4   :  { %49 = vmatpush.msra.mxu0 %v26_v1  ;;  %v57_v5 = vld [vmem:[%s358_s4] sm:$0x3]  ;;  %v115_v36 = vld [vmem:[%s359_s0 + $0x30] sm:$0xff]  ;;  %v116_v38 = vld [vmem:[%s359_s0 + $0x38] sm:$0xff] }
   0x5   :  { %165 = vmatpush.msk.msra.mxu1 %vm66_vm1, %v57_v5  ;;  %v176_v6 = vld [vmem:[%s355_s3] ss:$0 sm:$0xff]  ;;  %v118_v43 = vld [vmem:[%s359_s0 + $0x48] sm:$0xff]  ;;  %v119_v45 = vld [vmem:[%s359_s0 + $0x50] sm:$0xff] }
   0x6   :  { %50 = vmatpush.msra.mxu0 %v25_v2  ;;  %v177_v10 = vld [vmem:[%s357_s5] ss:$0 sm:$0xff]  ;;  %v120_v47 = vld [vmem:[%s359_s0 + $0x58] sm:$0xff]  ;;  %v122_v51 = vld [vmem:[%s359_s0 + $0x68] sm:$0xff] }
   0x7   :  { %v109_v26 = vld [vmem:[%s359_s0] sm:$0xff]  ;;  %v123_v53 = vld [vmem:[%s359_s0 + $0x70] sm:$0xff]  ;;  %v124_v55 = vld [vmem:[%s359_s0 + $0x78] sm:$0xff] }
   0x8   :  { %51 = vmatpush.msra.mxu0 %v24_v3  ;;  %v113_v31 = vld [vmem:[%s359_s0 + $0x20] sm:$0xff] }
   0x9   :  { %164 = vmatmul.msk.f32.vlgmr.msra.gmra.mxu0 %vm32_vm0, %v23_v4  ;;  %v117_v41 = vld [vmem:[%s359_s0 + $0x40] sm:$0xff] }
   0xa   :  { %v121_v49 = vld [vmem:[%s359_s0 + $0x60] sm:$0xff] }
  0x86   :  { %v53_v7 = vpop.f32.mrf.mxu0 }
  0x87   :  { %v54_v8 = vadd.f32 %v176_v6, %v53_v7 }
  0x89   :  { %v56_v9 = vmax.f32 %v54_v8, 0.0 }
  0x8b   :  { %166 = vmatmul.msk.f32.vlgmr.msra.gmra.mxu1 %vm62_vm2, %v56_v9 }
 0x108   :  { %v87_v11 = vpop.f32.mrf.mxu1 }
 0x109   :  { %v88_v12 = vadd.f32 %v177_v10, %v87_v11 }
 0x10b   :  { %v167_v13 = vmul.f32 -1.442695, %v88_v12 }
 0x10d   :  { %178 = vpow2.f32 %v167_v13 }
 0x113   :  { %v179_v14 = vpop.eup %178 }
 0x114   :  { %v93_v15 = vadd.f32 1.0, %v179_v14 }
 0x116   :  { %180 = vrcp.f32 %v93_v15  ;;  %v105_v19 = vand.u32 2147483648, %v93_v15  ;;  %v103_v21 = vand.u32 2147483647, %v93_v15  ;;  %vm99_vm4 = vweird.f32 %v93_v15 }
 0x118   :  { %v106_v23 = vor.u32 1.1754944e-38, %v105_v19  ;;  %vm104_vm6 = vcmp.eq.f32.partialorder %v103_v21, 8.507059e+37 }
 0x11c   :  { %v181_v16 = vpop.eup %180 }
 0x11d   :  { %v95_v17 = vmul.f32 %v181_v16, %v93_v15  ;;  %vm100_vm3 = vweird.f32 %v181_v16 }
 0x11e   :  { %vm101_vm5 = vmor %vm99_vm4, %vm100_vm3 }
 0x11f   :  { %v96_v18 = vsub.f32 1.0, %v95_v17 }
 0x121   :  { %v97_v20 = vmul.f32 %v181_v16, %v96_v18 }
 0x123   :  { %v98_v22 = vadd.f32 %v181_v16, %v97_v20 }
 0x125   :  { %v102_v24 = vsel %vm101_vm5, %v181_v16, %v98_v22 }
 0x126   :  { %v107_v25 = vsel %vm104_vm6, %v106_v23, %v102_v24 }
 0x127   :  { %v125_v30 = vperm.slane %v107_v25, 0  ;;  %v142_v40 = vperm.slane %v107_v25, 1 }
 0x129   :  { %v126_v33 = vmul.f32 %v125_v30, %v109_v26  ;;  %v127_v34 = vmul.f32 %v125_v30, %v110_v27  ;;  %v128_v35 = vmul.f32 %v125_v30, %v111_v28  ;;  %v129_v37 = vmul.f32 %v125_v30, %v112_v29 }
 0x12a   :  { %v130_v39 = vmul.f32 %v125_v30, %v113_v31  ;;  %v131_v42 = vmul.f32 %v125_v30, %v114_v32  ;;  %v132_v44 = vmul.f32 %v125_v30, %v115_v36  ;;  %v133_v46 = vmul.f32 %v125_v30, %v116_v38 }
 0x12b   :  { %134 = vst.msk [vmem:[%s360_s6] sm:$0xff] %vm32_vm0, %v126_v33  ;;  %v143_v48 = vmul.f32 %v142_v40, %v117_v41  ;;  %v144_v50 = vmul.f32 %v142_v40, %v118_v43  ;;  %v145_v52 = vmul.f32 %v142_v40, %v119_v45  ;;  %v146_v54 = vmul.f32 %v142_v40, %v120_v47 }
 0x12c   :  { %135 = vst.msk [vmem:[%s360_s6 + $0x8] sm:$0xff] %vm32_vm0, %v127_v34  ;;  %v147_v56 = vmul.f32 %v142_v40, %v121_v49  ;;  %v148_v57 = vmul.f32 %v142_v40, %v122_v51  ;;  %v149_v58 = vmul.f32 %v142_v40, %v123_v53  ;;  %v150_v59 = vmul.f32 %v142_v40, %v124_v55 }
 0x12d   :  { %136 = vst.msk [vmem:[%s360_s6 + $0x10] sm:$0xff] %vm32_vm0, %v128_v35 }
 0x12e   :  { %137 = vst.msk [vmem:[%s360_s6 + $0x18] sm:$0xff] %vm32_vm0, %v129_v37 }
 0x12f   :  { %138 = vst.msk [vmem:[%s360_s6 + $0x20] sm:$0xff] %vm32_vm0, %v130_v39 }
 0x130   :  { %139 = vst.msk [vmem:[%s360_s6 + $0x28] sm:$0xff] %vm32_vm0, %v131_v42 }
 0x131   :  { %140 = vst.msk [vmem:[%s360_s6 + $0x30] sm:$0xff] %vm32_vm0, %v132_v44 }
 0x132   :  { %141 = vst.msk [vmem:[%s360_s6 + $0x38] sm:$0xff] %vm32_vm0, %v133_v46 }
 0x133   :  { %168 = vst.msk [vmem:[%s360_s6 + $0x40] sm:$0xff] %vm32_vm0, %v143_v48 }
 0x134   :  { %169 = vst.msk [vmem:[%s360_s6 + $0x48] sm:$0xff] %vm32_vm0, %v144_v50 }
 0x135   :  { %170 = vst.msk [vmem:[%s360_s6 + $0x50] sm:$0xff] %vm32_vm0, %v145_v52 }
 0x136   :  { %171 = vst.msk [vmem:[%s360_s6 + $0x58] sm:$0xff] %vm32_vm0, %v146_v54 }
 0x137   :  { %172 = vst.msk [vmem:[%s360_s6 + $0x60] sm:$0xff] %vm32_vm0, %v147_v56 }
 0x138   :  { %173 = vst.msk [vmem:[%s360_s6 + $0x68] sm:$0xff] %vm32_vm0, %v148_v57 }
 0x139   :  { %174 = vst.msk [vmem:[%s360_s6 + $0x70] sm:$0xff] %vm32_vm0, %v149_v58 }
 0x13a   :  { %175 = vst.msk [vmem:[%s360_s6 + $0x78] sm:$0xff] %vm32_vm0, %v150_v59 }

// kernel: densenet_forward.51
= control target key start
LH: loop header
LB: loop body
LE: loop exit
PB: predicated region body
PF: predicated region fallthrough
CT: control target
= control target key end

     0   :  { %vm25_vm0 = vcmask 130048   ;;  %v348_v3 = vmov 0.0   ;;  %vm154_vm1 = vcmask 261120   ;;  %s616_s1 = inlined_call_operand.vmem [shape: bf16[32,16], index: 1, kind: input, shape index: {}]   ;;  %s617_s0 = inlined_call_operand.vmem [shape: f32[128,32], index: 0, kind: input, shape index: {}]   ;;  %s618_s3 = inlined_call_operand.vmem [shape: f32[1,32], index: 3, kind: input, shape index: {}]   ;;  %s619_s4 = inlined_call_operand.vmem [shape: f32[1,32], index: 4, kind: input, shape index: {}]   ;;  %s620_s2 = inlined_call_operand.vmem [shape: f32[1,16], index: 2, kind: input, shape index: {}]   ;;  %s621_s5 = inlined_call_operand.vmem [shape: f32[128,16], index: 5, kind: output, shape index: {}]  }
   0x1   :  { %v337_v0 = vld [vmem:[%s616_s1 + $0x8] sm:$0xff]  ;;  %v336_v1 = vld [vmem:[%s616_s1] sm:$0xff]  ;;  %26 = vst.msk [vmem:[#allocation2] sm:$0xff] %vm25_vm0, %v348_v3  ;;  %v44_v26 = vld [vmem:[%s617_s0 + $0x10] sm:$0xff] }
   0x2   :  { %v42_v2 = vld [vmem:[%s617_s0] sm:$0xff]  ;;  %v43_v4 = vld [vmem:[%s617_s0 + $0x8] sm:$0xff]  ;;  %27 = vst.msk [vmem:[#allocation2 + $0x8] sm:$0xff] %vm25_vm0, %v348_v3  ;;  %185 = vmatpush.bf16.msra.mxu0 %v337_v0  ;;  %338 = vmatpush.bf16.msra.mxu1 %v337_v0  ;;  %v45_v31 = vld [vmem:[%s617_s0 + $0x18] sm:$0xff] }
   0x3   :  { %v396_v5 = vld [vmem:[%s618_s3] ss:$0 sm:$0xff]  ;;  %28 = vst.msk [vmem:[#allocation2 + $0x10] sm:$0xff] %vm25_vm0, %v348_v3  ;;  %339 = vmatpush.bf16.msra.mxu2 %v337_v0  ;;  %340 = vmatpush.bf16.msra.mxu3 %v337_v0  ;;  %v47_v10 = vld [vmem:[%s617_s0 + $0x28] sm:$0xff]  ;;  %v48_v32 = vld [vmem:[%s617_s0 + $0x30] sm:$0xff] }
   0x4   :  { %v403_v6 = vld [vmem:[%s619_s4] ss:$0 sm:$0xff]  ;;  %v62_v8 = vmul.f32 %v396_v5, %v42_v2  ;;  %v63_v9 = vmul.f32 %v396_v5, %v43_v4  ;;  %v51_v13 = vld [vmem:[%s617_s0 + $0x48] sm:$0xff]  ;;  %29 = vst.msk [vmem:[#allocation2 + $0x18] sm:$0xff] %vm25_vm0, %v348_v3  ;;  %v67_v14 = vmul.f32 %v396_v5, %v47_v10  ;;  %v49_v39 = vld [vmem:[%s617_s0 + $0x38] sm:$0xff]  ;;  %v64_v45 = vmul.f32 %v396_v5, %v44_v26 }
   0x5   :  { %v46_v7 = vld [vmem:[%s617_s0 + $0x20] sm:$0xff]  ;;  %v71_v16 = vmul.f32 %v396_v5, %v51_v13  ;;  %v55_v18 = vld [vmem:[%s617_s0 + $0x68] sm:$0xff]  ;;  %30 = vst.msk [vmem:[#allocation2 + $0x20] sm:$0xff] %vm25_vm0, %v348_v3  ;;  %v52_v40 = vld [vmem:[%s617_s0 + $0x50] sm:$0xff]  ;;  %v65_v47 = vmul.f32 %v396_v5, %v45_v31  ;;  %v68_v48 = vmul.f32 %v396_v5, %v48_v32  ;;  %v69_v49 = vmul.f32 %v396_v5, %v49_v39 }
   0x6   :  { %v66_v11 = vmul.f32 %v396_v5, %v46_v7  ;;  %v50_v12 = vld [vmem:[%s617_s0 + $0x40] sm:$0xff]  ;;  %v82_v19 = vadd.f32 %v403_v6, %v62_v8  ;;  %v83_v20 = vadd.f32 %v403_v6, %v63_v9  ;;  %31 = vst.msk [vmem:[#allocation2 + $0x28] sm:$0xff] %vm25_vm0, %v348_v3  ;;  %186 = vmatpush.bf16.msra.mxu0 %v336_v1  ;;  %v53_v41 = vld [vmem:[%s617_s0 + $0x58] sm:$0xff]  ;;  %v56_v52 = vld [vmem:[%s617_s0 + $0x70] sm:$0xff] }
   0x7   :  { %v70_v15 = vmul.f32 %v396_v5, %v50_v12  ;;  %v54_v17 = vld [vmem:[%s617_s0 + $0x60] sm:$0xff]  ;;  %341 = vmatpush.bf16.msra.mxu1 %v336_v1  ;;  %v87_v23 = vadd.f32 %v403_v6, %v67_v14  ;;  %v91_v25 = vadd.f32 %v403_v6, %v71_v16  ;;  %32 = vst.msk [vmem:[#allocation2 + $0x30] sm:$0xff] %vm25_vm0, %v348_v3  ;;  %v57_v53 = vld [vmem:[%s617_s0 + $0x78] sm:$0xff] }
   0x8   :  { %v86_v21 = vadd.f32 %v403_v6, %v66_v11  ;;  %v74_v22 = vmul.f32 %v396_v5, %v54_v17  ;;  %342 = vmatpush.bf16.msra.mxu2 %v336_v1  ;;  %343 = vmatpush.bf16.msra.mxu3 %v336_v1  ;;  %v98_v27 = vmax.f32 %v82_v19, 0.0  ;;  %v99_v28 = vmax.f32 %v83_v20, 0.0  ;;  %33 = vst.msk [vmem:[#allocation2 + $0x38] sm:$0xff] %vm25_vm0, %v348_v3  ;;  %v114_v14 = vld [vmem:[#allocation2] sm:$0xff] }
   0x9   :  { %v90_v24 = vadd.f32 %v403_v6, %v70_v15  ;;  %v75_v30 = vmul.f32 %v396_v5, %v55_v18  ;;  %v103_v33 = vmax.f32 %v87_v23, 0.0  ;;  %v107_v35 = vmax.f32 %v91_v25, 0.0  ;;  %34 = vst.msk [vmem:[#allocation2 + $0x40] sm:$0xff] %vm25_vm0, %v348_v3  ;;  %v115_v20 = vld [vmem:[#allocation2 + $0x8] sm:$0xff] }
   0xa   :  { %v102_v29 = vmax.f32 %v86_v21, 0.0  ;;  %v94_v36 = vadd.f32 %v403_v6, %v74_v22  ;;  %v130_v37 = vpack.c.bf16 %v99_v28, %v98_v27  ;;  %35 = vst.msk [vmem:[#allocation2 + $0x48] sm:$0xff] %vm25_vm0, %v348_v3  ;;  %v72_v50 = vmul.f32 %v396_v5, %v52_v40  ;;  %v520_v21 = vld [vmem:[%s620_s2] ss:$0 sm:$0xff] }
   0xb   :  { %v106_v34 = vmax.f32 %v90_v24, 0.0  ;;  %v95_v38 = vadd.f32 %v403_v6, %v75_v30  ;;  %36 = vst.msk [vmem:[#allocation2 + $0x50] sm:$0xff] %vm25_vm0, %v348_v3  ;;  %v73_v51 = vmul.f32 %v396_v5, %v53_v41  ;;  %v84_v55 = vadd.f32 %v403_v6, %v64_v45 }
   0xc   :  { %v132_v42 = vpack.c.bf16 %v103_v33, %v102_v29  ;;  %v110_v44 = vmax.f32 %v94_v36, 0.0  ;;  %328 = vmatmul.msk.bf16.vlgmr.msra.gmra.mxu0 %vm154_vm1, %v130_v37  ;;  %37 = vst.msk [vmem:[#allocation2 + $0x58] sm:$0xff] %vm25_vm0, %v348_v3  ;;  %v85_v56 = vadd.f32 %v403_v6, %v65_v47  ;;  %v76_v57 = vmul.f32 %v396_v5, %v56_v52  ;;  %v116_v37 = vld [vmem:[#allocation2 + $0x10] sm:$0xff] }
   0xd   :  { %v134_v43 = vpack.c.bf16 %v107_v35, %v106_v34  ;;  %v111_v46 = vmax.f32 %v95_v38, 0.0  ;;  %38 = vst.msk [vmem:[#allocation2 + $0x60] sm:$0xff] %vm25_vm0, %v348_v3  ;;  %v77_v58 = vmul.f32 %v396_v5, %v57_v53  ;;  %v88_v59 = vadd.f32 %v403_v6, %v68_v48  ;;  %v119_v23 = vld [vmem:[#allocation2 + $0x28] sm:$0xff] }
   0xe   :  { %330 = vmatmul.msk.bf16.vlgmr.msra.gmra.mxu1 %vm154_vm1, %v132_v42  ;;  %39 = vst.msk [vmem:[#allocation2 + $0x68] sm:$0xff] %vm25_vm0, %v348_v3  ;;  %v89_v60 = vadd.f32 %v403_v6, %v69_v49  ;;  %v92_v61 = vadd.f32 %v403_v6, %v72_v50  ;;  %v93_v62 = vadd.f32 %v403_v6, %v73_v51  ;;  %v100_v63 = vmax.f32 %v84_v55, 0.0 }
   0xf   :  { %332 = vmatmul.msk.bf16.vlgmr.msra.gmra.mxu2 %vm154_vm1, %v134_v43  ;;  %v136_v54 = vpack.c.bf16 %v111_v46, %v110_v44  ;;  %40 = vst.msk [vmem:[#allocation2 + $0x70] sm:$0xff] %vm25_vm0, %v348_v3  ;;  %v101_v0 = vmax.f32 %v85_v56, 0.0  ;;  %v96_v1 = vadd.f32 %v403_v6, %v76_v57  ;;  %v97_v2 = vadd.f32 %v403_v6, %v77_v58  ;;  %v118_v6 = vld [vmem:[#allocation2 + $0x20] sm:$0xff]  ;;  %v120_v44 = vld [vmem:[#allocation2 + $0x30] sm:$0xff]  ;;  %v117_v56 = vld [vmem:[#allocation2 + $0x18] sm:$0xff] }
  0x10   :  { %41 = vst.msk [vmem:[#allocation2 + $0x78] sm:$0xff] %vm25_vm0, %v348_v3  ;;  %v104_v4 = vmax.f32 %v88_v59, 0.0  ;;  %v105_v7 = vmax.f32 %v89_v60, 0.0  ;;  %v108_v5 = vmax.f32 %v92_v61, 0.0  ;;  %v109_v8 = vmax.f32 %v93_v62, 0.0  ;;  %v122_v19 = vld [vmem:[#allocation2 + $0x40] sm:$0xff] }
  0x11   :  { %334 = vmatmul.msk.bf16.vlgmr.msra.gmra.mxu3 %vm154_vm1, %v136_v54  ;;  %v131_v9 = vpack.c.bf16 %v101_v0, %v100_v63  ;;  %v112_v3 = vmax.f32 %v96_v1, 0.0  ;;  %v113_v10 = vmax.f32 %v97_v2, 0.0  ;;  %v123_v36 = vld [vmem:[#allocation2 + $0x48] sm:$0xff]  ;;  %v121_v62 = vld [vmem:[#allocation2 + $0x38] sm:$0xff] }
  0x12   :  { %v133_v11 = vpack.c.bf16 %v105_v7, %v104_v4  ;;  %v135_v12 = vpack.c.bf16 %v109_v8, %v108_v5  ;;  %v124_v54 = vld [vmem:[#allocation2 + $0x50] sm:$0xff] }
  0x13   :  { %v137_v13 = vpack.c.bf16 %v113_v10, %v112_v3  ;;  %v125_v3 = vld [vmem:[#allocation2 + $0x58] sm:$0xff] }
  0x14   :  { %v126_v25 = vld [vmem:[#allocation2 + $0x60] sm:$0xff] }
  0x15   :  { %v127_v40 = vld [vmem:[#allocation2 + $0x68] sm:$0xff] }
  0x16   :  { %v128_v60 = vld [vmem:[#allocation2 + $0x70] sm:$0xff] }
  0x1c   :  { %329 = vmatmul.msk.bf16.gmra.mxu0 %vm154_vm1, %v131_v9 }
  0x1e   :  { %331 = vmatmul.msk.bf16.gmra.mxu1 %vm154_vm1, %v133_v11 }
  0x1f   :  { %333 = vmatmul.msk.bf16.gmra.mxu2 %vm154_vm1, %v135_v12 }
  0x21   :  { %335 = vmatmul.msk.bf16.gmra.mxu3 %vm154_vm1, %v137_v13 }
  0x89   :  { %v188_v15 = vpop.f32.mrf.mxu0 }
  0x8a   :  { %v228_v16 = vadd.f32 %v188_v15, %v114_v14  ;;  %v129_v15 = vld [vmem:[#allocation2 + $0x78] sm:$0xff] }
  0x8b   :  { %v198_v17 = vpop.f32.mrf.mxu1 }
  0x8c   :  { %v232_v18 = vadd.f32 %v198_v17, %v118_v6  ;;  %245 = vst.msk [vmem:[#allocation2] sm:$0xff] %vm25_vm0, %v228_v16 }
  0x8e   :  { %249 = vst.msk [vmem:[#allocation2 + $0x20] sm:$0xff] %vm25_vm0, %v232_v18 }
  0x91   :  { %v190_v26 = vpop.f32.mrf.mxu0 }
  0x92   :  { %v208_v22 = vpop.f32.mrf.mxu2  ;;  %v229_v27 = vadd.f32 %v190_v26, %v115_v20 }
  0x93   :  { %v236_v24 = vadd.f32 %v208_v22, %v122_v19  ;;  %v200_v28 = vpop.f32.mrf.mxu1  ;;  %v264_v29 = vld [vmem:[#allocation2] sm:$0xff] }
  0x94   :  { %v218_v30 = vpop.f32.mrf.mxu3  ;;  %v233_v31 = vadd.f32 %v200_v28, %v119_v23  ;;  %v284_v32 = vadd.f32 %v520_v21, %v264_v29  ;;  %246 = vst.msk [vmem:[#allocation2 + $0x8] sm:$0xff] %vm25_vm0, %v229_v27 }
  0x95   :  { %253 = vst.msk [vmem:[#allocation2 + $0x40] sm:$0xff] %vm25_vm0, %v236_v24  ;;  %v268_v33 = vld [vmem:[#allocation2 + $0x20] sm:$0xff]  ;;  %v240_v34 = vadd.f32 %v218_v30, %v126_v25 }
  0x96   :  { %v288_v35 = vadd.f32 %v520_v21, %v268_v33  ;;  %250 = vst.msk [vmem:[#allocation2 + $0x28] sm:$0xff] %vm25_vm0, %v233_v31 }
  0x97   :  { %300 = vst.msk [vmem:[%s621_s5] sm:$0xff] %vm25_vm0, %v284_v32 }
  0x98   :  { %304 = vst.msk [vmem:[%s621_s5 + $0x20] sm:$0xff] %vm25_vm0, %v288_v35 }
  0x99   :  { %257 = vst.msk [vmem:[#allocation2 + $0x60] sm:$0xff] %vm25_vm0, %v240_v34  ;;  %v193_v41 = vpop.f32.mrf.mxu0 }
  0x9a   :  { %v210_v38 = vpop.f32.mrf.mxu2  ;;  %v230_v43 = vadd.f32 %v193_v41, %v116_v37 }
  0x9b   :  { %v237_v39 = vadd.f32 %v210_v38, %v123_v36  ;;  %v203_v45 = vpop.f32.mrf.mxu1  ;;  %v265_v47 = vld [vmem:[#allocation2 + $0x8] sm:$0xff] }
  0x9c   :  { %v272_v42 = vld [vmem:[#allocation2 + $0x40] sm:$0xff]  ;;  %v220_v48 = vpop.f32.mrf.mxu3  ;;  %v285_v49 = vadd.f32 %v520_v21, %v265_v47  ;;  %247 = vst.msk [vmem:[#allocation2 + $0x10] sm:$0xff] %vm25_vm0, %v230_v43  ;;  %v234_v53 = vadd.f32 %v203_v45, %v120_v44 }
  0x9d   :  { %v292_v46 = vadd.f32 %v520_v21, %v272_v42  ;;  %254 = vst.msk [vmem:[#allocation2 + $0x48] sm:$0xff] %vm25_vm0, %v237_v39  ;;  %v269_v50 = vld [vmem:[#allocation2 + $0x28] sm:$0xff]  ;;  %v241_v51 = vadd.f32 %v220_v48, %v127_v40 }
  0x9e   :  { %v289_v52 = vadd.f32 %v520_v21, %v269_v50  ;;  %301 = vst.msk [vmem:[%s621_s5 + $0x8] sm:$0xff] %vm25_vm0, %v285_v49 }
  0x9f   :  { %308 = vst.msk [vmem:[%s621_s5 + $0x40] sm:$0xff] %vm25_vm0, %v292_v46 }
  0xa0   :  { %v276_v55 = vld [vmem:[#allocation2 + $0x60] sm:$0xff]  ;;  %305 = vst.msk [vmem:[%s621_s5 + $0x28] sm:$0xff] %vm25_vm0, %v289_v52 }
  0xa1   :  { %v296_v57 = vadd.f32 %v520_v21, %v276_v55  ;;  %258 = vst.msk [vmem:[#allocation2 + $0x68] sm:$0xff] %vm25_vm0, %v241_v51  ;;  %v195_v61 = vpop.f32.mrf.mxu0 }
  0xa2   :  { %v213_v58 = vpop.f32.mrf.mxu2  ;;  %251 = vst.msk [vmem:[#allocation2 + $0x30] sm:$0xff] %vm25_vm0, %v234_v53  ;;  %v231_v0 = vadd.f32 %v195_v61, %v117_v56 }
  0xa3   :  { %v238_v59 = vadd.f32 %v213_v58, %v124_v54  ;;  %312 = vst.msk [vmem:[%s621_s5 + $0x60] sm:$0xff] %vm25_vm0, %v296_v57  ;;  %v205_v1 = vpop.f32.mrf.mxu1  ;;  %v266_v4 = vld [vmem:[#allocation2 + $0x10] sm:$0xff] }
  0xa4   :  { %v273_v63 = vld [vmem:[#allocation2 + $0x48] sm:$0xff]  ;;  %v223_v7 = vpop.f32.mrf.mxu3  ;;  %v286_v5 = vadd.f32 %v520_v21, %v266_v4  ;;  %248 = vst.msk [vmem:[#allocation2 + $0x18] sm:$0xff] %vm25_vm0, %v231_v0  ;;  %v235_v9 = vadd.f32 %v205_v1, %v121_v62 }
  0xa5   :  { %v293_v2 = vadd.f32 %v520_v21, %v273_v63  ;;  %255 = vst.msk [vmem:[#allocation2 + $0x50] sm:$0xff] %vm25_vm0, %v238_v59  ;;  %v242_v8 = vadd.f32 %v223_v7, %v128_v60 }
  0xa6   :  { %302 = vst.msk [vmem:[%s621_s5 + $0x10] sm:$0xff] %vm25_vm0, %v286_v5 }
  0xa7   :  { %309 = vst.msk [vmem:[%s621_s5 + $0x48] sm:$0xff] %vm25_vm0, %v293_v2 }
  0xa8   :  { %v277_v10 = vld [vmem:[#allocation2 + $0x68] sm:$0xff]  ;;  %259 = vst.msk [vmem:[#allocation2 + $0x70] sm:$0xff] %vm25_vm0, %v242_v8 }
  0xa9   :  { %v297_v11 = vadd.f32 %v520_v21, %v277_v10  ;;  %v270_v12 = vld [vmem:[#allocation2 + $0x30] sm:$0xff]  ;;  %252 = vst.msk [vmem:[#allocation2 + $0x38] sm:$0xff] %vm25_vm0, %v235_v9 }
  0xaa   :  { %v215_v13 = vpop.f32.mrf.mxu2  ;;  %v290_v14 = vadd.f32 %v520_v21, %v270_v12 }
  0xab   :  { %v239_v6 = vadd.f32 %v215_v13, %v125_v3  ;;  %313 = vst.msk [vmem:[%s621_s5 + $0x68] sm:$0xff] %vm25_vm0, %v297_v11  ;;  %v267_v18 = vld [vmem:[#allocation2 + $0x18] sm:$0xff] }
  0xac   :  { %v274_v16 = vld [vmem:[#allocation2 + $0x50] sm:$0xff]  ;;  %306 = vst.msk [vmem:[%s621_s5 + $0x30] sm:$0xff] %vm25_vm0, %v290_v14  ;;  %v225_v19 = vpop.f32.mrf.mxu3  ;;  %v287_v20 = vadd.f32 %v520_v21, %v267_v18 }
  0xad   :  { %v294_v17 = vadd.f32 %v520_v21, %v274_v16  ;;  %256 = vst.msk [vmem:[#allocation2 + $0x58] sm:$0xff] %vm25_vm0, %v239_v6  ;;  %v243_v22 = vadd.f32 %v225_v19, %v129_v15 }
  0xae   :  { %303 = vst.msk [vmem:[%s621_s5 + $0x18] sm:$0xff] %vm25_vm0, %v287_v20 }
  0xaf   :  { %310 = vst.msk [vmem:[%s621_s5 + $0x50] sm:$0xff] %vm25_vm0, %v294_v17  ;;  %v278_v23 = vld [vmem:[#allocation2 + $0x70] sm:$0xff] }
  0xb0   :  { %v298_v24 = vadd.f32 %v520_v21, %v278_v23  ;;  %v271_v25 = vld [vmem:[#allocation2 + $0x38] sm:$0xff]  ;;  %260 = vst.msk [vmem:[#allocation2 + $0x78] sm:$0xff] %vm25_vm0, %v243_v22 }
  0xb1   :  { %v291_v26 = vadd.f32 %v520_v21, %v271_v25 }
  0xb2   :  { %314 = vst.msk [vmem:[%s621_s5 + $0x70] sm:$0xff] %vm25_vm0, %v298_v24 }
  0xb3   :  { %307 = vst.msk [vmem:[%s621_s5 + $0x38] sm:$0xff] %vm25_vm0, %v291_v26 }
  0xb4   :  { %v275_v27 = vld [vmem:[#allocation2 + $0x58] sm:$0xff] }
  0xb5   :  { %v295_v28 = vadd.f32 %v520_v21, %v275_v27 }
  0xb7   :  { %311 = vst.msk [vmem:[%s621_s5 + $0x58] sm:$0xff] %vm25_vm0, %v295_v28  ;;  %v279_v29 = vld [vmem:[#allocation2 + $0x78] sm:$0xff] }
  0xb8   :  { %v299_v30 = vadd.f32 %v520_v21, %v279_v29 }
  0xba   :  { %315 = vst.msk [vmem:[%s621_s5 + $0x78] sm:$0xff] %vm25_vm0, %v299_v30 }

// kernel: densenet_forward.52
= control target key start
LH: loop header
LB: loop body
LE: loop exit
PB: predicated region body
PF: predicated region fallthrough
CT: control target
= control target key end

     0   :  { %vm43_vm0 = vcmask 130048   ;;  %s134_s0 = inlined_call_operand.vmem [shape: f32[4,32,16], index: 0, kind: input, shape index: {}]   ;;  %s135_s1 = inlined_call_operand.vmem [shape: f32[32,16], index: 1, kind: output, shape index: {}]  }
   0x1   :  { %v8_v0 = vld [vmem:[%s134_s0] sm:$0xff]  ;;  %v9_v4 = vld [vmem:[%s134_s0 + $0x8] sm:$0xff]  ;;  %v10_v9 = vld [vmem:[%s134_s0 + $0x10] sm:$0xff] }
   0x2   :  { %v52_v1 = vld [vmem:[%s134_s0 + $0x20] sm:$0xff]  ;;  %v53_v5 = vld [vmem:[%s134_s0 + $0x28] sm:$0xff]  ;;  %v54_v12 = vld [vmem:[%s134_s0 + $0x30] sm:$0xff] }
   0x3   :  { %v56_v2 = vld [vmem:[%s134_s0 + $0x40] sm:$0xff]  ;;  %v17_v3 = vadd.f32 %v52_v1, %v8_v0  ;;  %v18_v7 = vadd.f32 %v53_v5, %v9_v4  ;;  %v57_v8 = vld [vmem:[%s134_s0 + $0x48] sm:$0xff]  ;;  %v58_v13 = vld [vmem:[%s134_s0 + $0x50] sm:$0xff]  ;;  %v19_v15 = vadd.f32 %v54_v12, %v10_v9 }
   0x4   :  { %v60_v6 = vld [vmem:[%s134_s0 + $0x60] sm:$0xff]  ;;  %v61_v11 = vld [vmem:[%s134_s0 + $0x68] sm:$0xff]  ;;  %v11_v16 = vld [vmem:[%s134_s0 + $0x18] sm:$0xff] }
   0x5   :  { %v26_v10 = vadd.f32 %v56_v2, %v17_v3  ;;  %v27_v14 = vadd.f32 %v57_v8, %v18_v7  ;;  %v55_v17 = vld [vmem:[%s134_s0 + $0x38] sm:$0xff]  ;;  %v62_v20 = vld [vmem:[%s134_s0 + $0x70] sm:$0xff]  ;;  %v28_v23 = vadd.f32 %v58_v13, %v19_v15 }
   0x6   :  { %v59_v18 = vld [vmem:[%s134_s0 + $0x58] sm:$0xff]  ;;  %v20_v21 = vadd.f32 %v55_v17, %v11_v16 }
   0x7   :  { %v35_v19 = vadd.f32 %v60_v6, %v26_v10  ;;  %v36_v22 = vadd.f32 %v61_v11, %v27_v14  ;;  %v63_v24 = vld [vmem:[%s134_s0 + $0x78] sm:$0xff]  ;;  %v37_v28 = vadd.f32 %v62_v20, %v28_v23 }
   0x8   :  { %v29_v26 = vadd.f32 %v59_v18, %v20_v21 }
   0x9   :  { %v39_v25 = vmul.f32 0.25, %v35_v19  ;;  %v40_v27 = vmul.f32 0.25, %v36_v22  ;;  %v41_v30 = vmul.f32 0.25, %v37_v28 }
   0xa   :  { %v38_v29 = vadd.f32 %v63_v24, %v29_v26 }
   0xb   :  { %44 = vst.msk [vmem:[%s135_s1] sm:$0xff] %vm43_vm0, %v39_v25 }
   0xc   :  { %45 = vst.msk [vmem:[%s135_s1 + $0x8] sm:$0xff] %vm43_vm0, %v40_v27  ;;  %v42_v31 = vmul.f32 0.25, %v38_v29 }
   0xd   :  { %46 = vst.msk [vmem:[%s135_s1 + $0x10] sm:$0xff] %vm43_vm0, %v41_v30 }
   0xe   :  { %47 = vst.msk [vmem:[%s135_s1 + $0x18] sm:$0xff] %vm43_vm0, %v42_v31 }

// kernel: densenet_forward.53
= control target key start
LH: loop header
LB: loop body
LE: loop exit
PB: predicated region body
PF: predicated region fallthrough
CT: control target
= control target key end

     0   :  { %vm20_vm0 = vcmask 122880   ;;  %vm28_vm1 = vcmask 130048   ;;  %v104_v0 = vmov 0.0   ;;  %s168_s0 = inlined_call_operand.vmem [shape: f32[32,16], index: 0, kind: input, shape index: {}]   ;;  %s169_s1 = inlined_call_operand.vmem [shape: f32[1,16], index: 1, kind: input, shape index: {}]   ;;  %s170_s2 = inlined_call_operand.vmem [shape: f32[1,16], index: 2, kind: input, shape index: {}]   ;;  %s171_s3 = inlined_call_operand.vmem [shape: f32[1,16], index: 3, kind: output, shape index: {0}]   ;;  %s172_s4 = inlined_call_operand.vmem [shape: f32[1,16], index: 4, kind: output, shape index: {1}]  }
   0x1   :  { %21 = vst.msk [vmem:[#allocation2] sm:$0x1] %vm20_vm0, %v104_v0  ;;  %v23_v1 = vld [vmem:[%s168_s0] sm:$0xff]  ;;  %v24_v2 = vld [vmem:[%s168_s0 + $0x8] sm:$0xff]  ;;  %v25_v3 = vld [vmem:[%s168_s0 + $0x10] sm:$0xff] }
   0x2   :  { %22 = vst.msk [vmem:[#allocation3] sm:$0x1] %vm20_vm0, %v104_v0  ;;  %v26_v4 = vld [vmem:[%s168_s0 + $0x18] sm:$0xff]  ;;  %v29_v5 = vsel %vm28_vm1, %v23_v1, 0.0  ;;  %v30_v6 = vsel %vm28_vm1, %v24_v2, 0.0  ;;  %v32_v7 = vsel %vm28_vm1, %v25_v3, 0.0  ;;  %v46_v8 = vmul.f32 %v23_v1, %v23_v1 }
   0x3   :  { %v31_v9 = vadd.f32 %v30_v6, %v29_v5  ;;  %v47_v10 = vmul.f32 %v24_v2, %v24_v2  ;;  %v48_v11 = vmul.f32 %v25_v3, %v25_v3  ;;  %v34_v12 = vsel %vm28_vm1, %v26_v4, 0.0  ;;  %v86_v53 = vld [vmem:[%s169_s1] sm:$0x1] }
   0x4   :  { %v49_v13 = vmul.f32 %v26_v4, %v26_v4  ;;  %v50_v14 = vsel %vm28_vm1, %v46_v8, 0.0  ;;  %v89_v56 = vld [vmem:[%s170_s2] sm:$0x1] }
   0x5   :  { %v33_v15 = vadd.f32 %v32_v7, %v31_v9  ;;  %v51_v16 = vsel %vm28_vm1, %v47_v10, 0.0  ;;  %v53_v17 = vsel %vm28_vm1, %v48_v11, 0.0 }
   0x6   :  { %v52_v18 = vadd.f32 %v51_v16, %v50_v14  ;;  %v55_v20 = vsel %vm28_vm1, %v49_v13, 0.0 }
   0x7   :  { %v35_v19 = vadd.f32 %v34_v12, %v33_v15 }
   0x8   :  { %v54_v21 = vadd.f32 %v53_v17, %v52_v18  ;;  %v27_v31 = vld [vmem:[#allocation2] sm:$0x1] }
   0x9   :  { %v36_v22 = vrot.slane %v35_v19, 4  ;;  %v45_v36 = vld [vmem:[#allocation3] sm:$0x1] }
   0xa   :  { %v56_v23 = vadd.f32 %v55_v20, %v54_v21 }
   0xb   :  { %v37_v24 = vadd.f32 %v36_v22, %v35_v19 }
   0xc   :  { %v57_v25 = vrot.slane %v56_v23, 4 }
   0xd   :  { %v38_v26 = vrot.slane %v37_v24, 2 }
   0xe   :  { %v58_v27 = vadd.f32 %v57_v25, %v56_v23 }
   0xf   :  { %v39_v28 = vadd.f32 %v38_v26, %v37_v24 }
  0x10   :  { %v59_v29 = vrot.slane %v58_v27, 2 }
  0x11   :  { %v40_v30 = vrot.slane %v39_v28, 1 }
  0x12   :  { %v60_v32 = vadd.f32 %v59_v29, %v58_v27 }
  0x13   :  { %v41_v33 = vadd.f32 %v40_v30, %v39_v28 }
  0x14   :  { %v61_v34 = vrot.slane %v60_v32, 1 }
  0x15   :  { %v42_v35 = vadd.f32 %v41_v33, %v27_v31 }
  0x16   :  { %v62_v37 = vadd.f32 %v61_v34, %v60_v32 }
  0x17   :  { %44 = vst.msk [vmem:[#allocation2] sm:$0x1] %vm20_vm0, %v42_v35 }
  0x18   :  { %v63_v38 = vadd.f32 %v62_v37, %v45_v36 }
  0x1a   :  { %64 = vst.msk [vmem:[#allocation3] sm:$0x1] %vm20_vm0, %v63_v38 }
  0x1e   :  { %v68_v39 = vld [vmem:[#allocation2] sm:$0x1] }
  0x1f   :  { %v69_v40 = vmul.f32 0.03125, %v68_v39 }
  0x21   :  { %v70_v41 = vld [vmem:[#allocation3] sm:$0x1]  ;;  %v72_v42 = vmul.f32 %v69_v40, %v69_v40 }
  0x22   :  { %v71_v43 = vmul.f32 0.03125, %v70_v41 }
  0x24   :  { %v73_v44 = vsub.f32 %v71_v43, %v72_v42 }
  0x26   :  { %v74_v45 = vmax.f32 %v73_v44, 0.0 }
  0x28   :  { %v75_v46 = vadd.f32 1e-05, %v74_v45 }
  0x2a   :  { %102 = vrsqrt.f32 %v75_v46  ;;  %vm82_vm3 = vweird.f32 %v75_v46 }
  0x30   :  { %v103_v47 = vpop.eup %102 }
  0x31   :  { %v77_v48 = vmul.f32 %v103_v47, %v75_v46  ;;  %vm83_vm2 = vweird.f32 %v103_v47 }
  0x32   :  { %vm84_vm4 = vmor %vm82_vm3, %vm83_vm2 }
  0x33   :  { %v78_v49 = vmul.f32 %v103_v47, %v77_v48 }
  0x35   :  { %v79_v50 = vmul.f32 0.5, %v78_v49 }
  0x37   :  { %v80_v51 = vsub.f32 1.5, %v79_v50 }
  0x39   :  { %v81_v52 = vmul.f32 %v103_v47, %v80_v51 }
  0x3b   :  { %v85_v54 = vsel %vm84_vm4, %v103_v47, %v81_v52 }
  0x3c   :  { %v87_v55 = vmul.f32 %v86_v53, %v85_v54 }
  0x3e   :  { %88 = vst.msk [vmem:[%s171_s3] sm:$0x1] %vm20_vm0, %v87_v55  ;;  %v90_v57 = vmul.f32 %v87_v55, %v69_v40 }
  0x40   :  { %v91_v58 = vsub.f32 %v89_v56, %v90_v57 }
  0x42   :  { %92 = vst.msk [vmem:[%s172_s4] sm:$0x1] %vm20_vm0, %v91_v58 }

// kernel: densenet_forward.54
= control target key start
LH: loop header
LB: loop body
LE: loop exit
PB: predicated region body
PF: predicated region fallthrough
CT: control target
= control target key end

     0   :  { %vm25_vm0 = vcmask 130048   ;;  %v137_v3 = vmov 0.0   ;;  %s218_s1 = inlined_call_operand.vmem [shape: bf16[16,16], index: 1, kind: input, shape index: {}]   ;;  %s219_s0 = inlined_call_operand.vmem [shape: f32[32,16], index: 0, kind: input, shape index: {}]   ;;  %s220_s3 = inlined_call_operand.vmem [shape: f32[1,16], index: 3, kind: input, shape index: {}]   ;;  %s221_s4 = inlined_call_operand.vmem [shape: f32[1,16], index: 4, kind: input, shape index: {}]   ;;  %s222_s2 = inlined_call_operand.vmem [shape: f32[1,16], index: 2, kind: input, shape index: {}]   ;;  %s223_s5 = inlined_call_operand.vmem [shape: f32[32,16], index: 5, kind: output, shape index: {}]  }
   0x1   :  { %v131_v0 = vld [vmem:[%s218_s1] sm:$0xff]  ;;  %v31_v2 = vld [vmem:[%s219_s0 + $0x8] sm:$0xff]  ;;  %26 = vst.msk [vmem:[#allocation2] sm:$0xff] %vm25_vm0, %v137_v3  ;;  %v32_v6 = vld [vmem:[%s219_s0 + $0x10] sm:$0xff] }
   0x2   :  { %v30_v1 = vld [vmem:[%s219_s0] sm:$0xff]  ;;  %82 = vmatpush.bf16.msra.mxu0 %v131_v0  ;;  %132 = vmatpush.bf16.msra.mxu1 %v131_v0  ;;  %v33_v7 = vld [vmem:[%s219_s0 + $0x18] sm:$0xff]  ;;  %27 = vst.msk [vmem:[#allocation2 + $0x8] sm:$0xff] %vm25_vm0, %v137_v3 }
   0x3   :  { %v134_v4 = vld [vmem:[%s220_s3] ss:$0 sm:$0xff]  ;;  %28 = vst.msk [vmem:[#allocation2 + $0x10] sm:$0xff] %vm25_vm0, %v137_v3 }
   0x4   :  { %v135_v5 = vld [vmem:[%s221_s4] ss:$0 sm:$0xff]  ;;  %v38_v8 = vmul.f32 %v134_v4, %v30_v1  ;;  %v39_v9 = vmul.f32 %v134_v4, %v31_v2  ;;  %v40_v10 = vmul.f32 %v134_v4, %v32_v6  ;;  %v41_v11 = vmul.f32 %v134_v4, %v33_v7  ;;  %29 = vst.msk [vmem:[#allocation2 + $0x18] sm:$0xff] %vm25_vm0, %v137_v3 }
   0x5   :  { %v136_v30 = vld [vmem:[%s222_s2] ss:$0 sm:$0xff] }
   0x6   :  { %v46_v12 = vadd.f32 %v135_v5, %v38_v8  ;;  %v47_v13 = vadd.f32 %v135_v5, %v39_v9  ;;  %v48_v14 = vadd.f32 %v135_v5, %v40_v10  ;;  %v49_v15 = vadd.f32 %v135_v5, %v41_v11 }
   0x8   :  { %v50_v16 = vmax.f32 %v46_v12, 0.0  ;;  %v51_v17 = vmax.f32 %v47_v13, 0.0  ;;  %v52_v18 = vmax.f32 %v48_v14, 0.0  ;;  %v53_v19 = vmax.f32 %v49_v15, 0.0  ;;  %v54_v22 = vld [vmem:[#allocation2] sm:$0xff] }
   0x9   :  { %v55_v28 = vld [vmem:[#allocation2 + $0x8] sm:$0xff] }
   0xa   :  { %v58_v20 = vpack.c.bf16 %v51_v17, %v50_v16  ;;  %v59_v21 = vpack.c.bf16 %v53_v19, %v52_v18  ;;  %v56_v23 = vld [vmem:[#allocation2 + $0x10] sm:$0xff] }
   0xb   :  { %v57_v29 = vld [vmem:[#allocation2 + $0x18] sm:$0xff] }
   0xc   :  { %129 = vmatmul.msk.bf16.vlgmr.msra.gmra.mxu0 %vm25_vm0, %v58_v20  ;;  %130 = vmatmul.msk.bf16.vlgmr.msra.gmra.mxu1 %vm25_vm0, %v59_v21 }
  0x89   :  { %v84_v24 = vpop.f32.mrf.mxu0  ;;  %v89_v25 = vpop.f32.mrf.mxu1 }
  0x8a   :  { %v94_v26 = vadd.f32 %v84_v24, %v54_v22  ;;  %v96_v27 = vadd.f32 %v89_v25, %v56_v23 }
  0x8c   :  { %98 = vst.msk [vmem:[#allocation2] sm:$0xff] %vm25_vm0, %v94_v26 }
  0x8d   :  { %100 = vst.msk [vmem:[#allocation2 + $0x10] sm:$0xff] %vm25_vm0, %v96_v27 }
  0x91   :  { %v86_v31 = vpop.f32.mrf.mxu0  ;;  %v91_v32 = vpop.f32.mrf.mxu1 }
  0x92   :  { %v95_v33 = vadd.f32 %v86_v31, %v55_v28  ;;  %v97_v34 = vadd.f32 %v91_v32, %v57_v29 }
  0x93   :  { %v105_v35 = vld [vmem:[#allocation2] sm:$0xff] }
  0x94   :  { %v113_v36 = vadd.f32 %v136_v30, %v105_v35  ;;  %v107_v37 = vld [vmem:[#allocation2 + $0x10] sm:$0xff]  ;;  %99 = vst.msk [vmem:[#allocation2 + $0x8] sm:$0xff] %vm25_vm0, %v95_v33 }
  0x95   :  { %v115_v38 = vadd.f32 %v136_v30, %v107_v37  ;;  %101 = vst.msk [vmem:[#allocation2 + $0x18] sm:$0xff] %vm25_vm0, %v97_v34 }
  0x96   :  { %117 = vst.msk [vmem:[%s223_s5] sm:$0xff] %vm25_vm0, %v113_v36 }
  0x97   :  { %119 = vst.msk [vmem:[%s223_s5 + $0x10] sm:$0xff] %vm25_vm0, %v115_v38 }
  0x9b   :  { %v106_v39 = vld [vmem:[#allocation2 + $0x8] sm:$0xff] }
  0x9c   :  { %v114_v40 = vadd.f32 %v136_v30, %v106_v39  ;;  %v108_v41 = vld [vmem:[#allocation2 + $0x18] sm:$0xff] }
  0x9d   :  { %v116_v42 = vadd.f32 %v136_v30, %v108_v41 }
  0x9e   :  { %118 = vst.msk [vmem:[%s223_s5 + $0x8] sm:$0xff] %vm25_vm0, %v114_v40 }
  0x9f   :  { %120 = vst.msk [vmem:[%s223_s5 + $0x18] sm:$0xff] %vm25_vm0, %v116_v42 }

// kernel: densenet_forward.56
= control target key start
LH: loop header
LB: loop body
LE: loop exit
PB: predicated region body
PF: predicated region fallthrough
CT: control target
= control target key end

     0   :  { %vm38_vm0 = vcmask 130048   ;;  %s99_s0 = inlined_call_operand.vmem [shape: f32[32,16], index: 0, kind: input, shape index: {}]   ;;  %s100_s1 = inlined_call_operand.vmem [shape: f32[1,16], index: 1, kind: input, shape index: {}]   ;;  %s101_s2 = inlined_call_operand.vmem [shape: f32[1,16], index: 2, kind: input, shape index: {}]   ;;  %s102_s3 = inlined_call_operand.vmem [shape: f32[32,16], index: 3, kind: output, shape index: {}]  }
   0x1   :  { %v14_v0 = vld [vmem:[%s99_s0] sm:$0xff]  ;;  %v15_v3 = vld [vmem:[%s99_s0 + $0x8] sm:$0xff]  ;;  %v16_v6 = vld [vmem:[%s99_s0 + $0x10] sm:$0xff] }
   0x2   :  { %v47_v1 = vld [vmem:[%s100_s1] ss:$0 sm:$0xff]  ;;  %v17_v7 = vld [vmem:[%s99_s0 + $0x18] sm:$0xff] }
   0x3   :  { %v48_v2 = vld [vmem:[%s101_s2] ss:$0 sm:$0xff]  ;;  %v22_v4 = vmul.f32 %v47_v1, %v14_v0  ;;  %v23_v5 = vmul.f32 %v47_v1, %v15_v3  ;;  %v24_v8 = vmul.f32 %v47_v1, %v16_v6  ;;  %v25_v9 = vmul.f32 %v47_v1, %v17_v7 }
   0x5   :  { %v30_v10 = vadd.f32 %v48_v2, %v22_v4  ;;  %v31_v11 = vadd.f32 %v48_v2, %v23_v5  ;;  %v32_v12 = vadd.f32 %v48_v2, %v24_v8  ;;  %v33_v13 = vadd.f32 %v48_v2, %v25_v9 }
   0x7   :  { %v34_v14 = vmax.f32 %v30_v10, 0.0  ;;  %v35_v15 = vmax.f32 %v31_v11, 0.0  ;;  %v36_v16 = vmax.f32 %v32_v12, 0.0  ;;  %v37_v17 = vmax.f32 %v33_v13, 0.0 }
   0x9   :  { %39 = vst.msk [vmem:[%s102_s3] sm:$0xff] %vm38_vm0, %v34_v14 }
   0xa   :  { %40 = vst.msk [vmem:[%s102_s3 + $0x8] sm:$0xff] %vm38_vm0, %v35_v15 }
   0xb   :  { %41 = vst.msk [vmem:[%s102_s3 + $0x10] sm:$0xff] %vm38_vm0, %v36_v16 }
   0xc   :  { %42 = vst.msk [vmem:[%s102_s3 + $0x18] sm:$0xff] %vm38_vm0, %v37_v17 }

// kernel: densenet_forward.57
= control target key start
LH: loop header
LB: loop body
LE: loop exit
PB: predicated region body
PF: predicated region fallthrough
CT: control target
= control target key end

     0   :  { %vm118_vm0 = vcmask 130048   ;;  %vm25_vm1 = vcmask 64512   ;;  %v252_v21 = vmov 0.0   ;;  %s363_s1 = inlined_call_operand.vmem [shape: bf16[144,8], index: 1, kind: input, shape index: {}]   ;;  %s364_s3 = inlined_call_operand.vmem [shape: f32[1,144], index: 3, kind: input, shape index: {}]   ;;  %s365_s4 = inlined_call_operand.vmem [shape: f32[1,144], index: 4, kind: input, shape index: {}]   ;;  %s366_s0 = inlined_call_operand.vmem [shape: f32[32,144], index: 0, kind: input, shape index: {}]   ;;  %s367_s2 = inlined_call_operand.vmem [shape: f32[1,8], index: 2, kind: input, shape index: {}]   ;;  %s368_s5 = inlined_call_operand.vmem [shape: f32[32,8], index: 5, kind: output, shape index: {}]  }
   0x1   :  { %v240_v0 = vld [vmem:[%s363_s1 + $0x38] sm:$0xff]  ;;  %v241_v1 = vld [vmem:[%s363_s1 + $0x40] sm:$0xff]  ;;  %v31_v2 = vld [vmem:[%s366_s0 + $0x8] sm:$0xff]  ;;  %26 = vst.msk [vmem:[#allocation2] sm:$0xff] %vm25_vm1, %v252_v21 }
   0x2   :  { %125 = vmatpush.bf16.msra.mxu0 %v240_v0  ;;  %242 = vmatpush.bf16.msra.mxu2 %v240_v0  ;;  %v239_v3 = vld [vmem:[%s363_s1 + $0x30] sm:$0xff]  ;;  %v33_v4 = vld [vmem:[%s366_s0 + $0x18] sm:$0xff]  ;;  %v238_v6 = vld [vmem:[%s363_s1 + $0x28] sm:$0xff]  ;;  %27 = vst.msk [vmem:[#allocation2 + $0x8] sm:$0xff] %vm25_vm1, %v252_v21 }
   0x3   :  { %151 = vmatpush.bf16.msra.mxu1 %v241_v1  ;;  %v43_v5 = vpack.c.bf16 %v33_v4, %v31_v2  ;;  %v237_v7 = vld [vmem:[%s363_s1 + $0x20] sm:$0xff]  ;;  %v236_v8 = vld [vmem:[%s363_s1 + $0x18] sm:$0xff]  ;;  %v35_v9 = vld [vmem:[%s366_s0 + $0x28] sm:$0xff]  ;;  %28 = vst.msk [vmem:[#allocation2 + $0x10] sm:$0xff] %vm25_vm1, %v252_v21 }
   0x4   :  { %v37_v10 = vld [vmem:[%s366_s0 + $0x38] sm:$0xff]  ;;  %v235_v11 = vld [vmem:[%s363_s1 + $0x10] sm:$0xff]  ;;  %v234_v13 = vld [vmem:[%s363_s1 + $0x8] sm:$0xff]  ;;  %29 = vst.msk [vmem:[#allocation2 + $0x18] sm:$0xff] %vm25_vm1, %v252_v21 }
   0x5   :  { %v45_v12 = vpack.c.bf16 %v37_v10, %v35_v9  ;;  %v233_v14 = vld [vmem:[%s363_s1] sm:$0xff]  ;;  %v32_v16 = vld [vmem:[%s366_s0 + $0x10] sm:$0xff] }
   0x6   :  { %126 = vmatpush.bf16.msra.mxu0 %v239_v3  ;;  %243 = vmatpush.bf16.msra.mxu2 %v239_v3  ;;  %v30_v15 = vld [vmem:[%s366_s0] sm:$0xff]  ;;  %v36_v18 = vld [vmem:[%s366_s0 + $0x30] sm:$0xff] }
   0x7   :  { %231 = vmatmul.msk.bf16.vlgmr.msra.gmra.mxu1 %vm118_vm0, %v43_v5  ;;  %v34_v17 = vld [vmem:[%s366_s0 + $0x20] sm:$0xff]  ;;  %v42_v19 = vpack.c.bf16 %v32_v16, %v30_v15 }
   0x8   :  { %v44_v20 = vpack.c.bf16 %v36_v18, %v34_v17  ;;  %v38_v24 = vld [vmem:[#allocation2] sm:$0xff] }
   0x9   :  { %v39_v32 = vld [vmem:[#allocation2 + $0x8] sm:$0xff]  ;;  %v251_v34 = vld [vmem:[%s367_s2] ss:$0 sm:$0xff] }
   0xa   :  { %127 = vmatpush.bf16.msra.mxu0 %v238_v6  ;;  %244 = vmatpush.bf16.msra.mxu2 %v238_v6  ;;  %v40_v29 = vld [vmem:[#allocation2 + $0x10] sm:$0xff] }
   0xb   :  { %v41_v41 = vld [vmem:[#allocation2 + $0x18] sm:$0xff] }
   0xe   :  { %128 = vmatpush.bf16.msra.mxu0 %v237_v7  ;;  %245 = vmatpush.bf16.msra.mxu2 %v237_v7 }
  0x12   :  { %129 = vmatpush.bf16.msra.mxu0 %v236_v8  ;;  %246 = vmatpush.bf16.msra.mxu2 %v236_v8 }
  0x16   :  { %130 = vmatpush.bf16.msra.mxu0 %v235_v11  ;;  %247 = vmatpush.bf16.msra.mxu2 %v235_v11 }
  0x17   :  { %232 = vmatmul.msk.bf16.gmra.mxu1 %vm118_vm0, %v45_v12 }
  0x1a   :  { %131 = vmatpush.bf16.msra.mxu0 %v234_v13  ;;  %248 = vmatpush.bf16.msra.mxu2 %v234_v13 }
  0x1e   :  { %132 = vmatpush.bf16.msra.mxu0 %v233_v14  ;;  %249 = vmatpush.bf16.msra.mxu2 %v233_v14 }
  0x21   :  { %133 = vmatmul.bf16.vlgmr.msra.gmra.mxu0 %v42_v19  ;;  %138 = vmatmul.bf16.vlgmr.msra.gmra.mxu2 %v44_v20 }
  0x84   :  { %v153_v22 = vpop.f32.mrf.mxu1 }
  0x8c   :  { %v155_v23 = vpop.f32.mrf.mxu1 }
  0x94   :  { %v158_v28 = vpop.f32.mrf.mxu1 }
  0x9c   :  { %v160_v40 = vpop.f32.mrf.mxu1 }
  0x9e   :  { %v134_v25 = vpop.f32.mrf.mxu0 }
  0x9f   :  { %v154_v26 = vadd.f32 %v153_v22, %v134_v25 }
  0xa1   :  { %v163_v27 = vadd.f32 %v154_v26, %v38_v24 }
  0xa3   :  { %168 = vst.msk [vmem:[#allocation2] sm:$0xff] %vm25_vm1, %v163_v27 }
  0xa4   :  { %v139_v30 = vpop.f32.mrf.mxu2 }
  0xa5   :  { %v159_v31 = vadd.f32 %v158_v28, %v139_v30 }
  0xa6   :  { %v136_v33 = vpop.f32.mrf.mxu0 }
  0xa7   :  { %v165_v35 = vadd.f32 %v159_v31, %v40_v29  ;;  %v156_v36 = vadd.f32 %v155_v23, %v136_v33 }
  0xa9   :  { %170 = vst.msk [vmem:[#allocation2 + $0x10] sm:$0xff] %vm25_vm1, %v165_v35  ;;  %v164_v37 = vadd.f32 %v156_v36, %v39_v32 }
  0xaa   :  { %v175_v38 = vld [vmem:[#allocation2] sm:$0xff] }
  0xab   :  { %v183_v39 = vadd.f32 %v251_v34, %v175_v38  ;;  %169 = vst.msk [vmem:[#allocation2 + $0x8] sm:$0xff] %vm25_vm1, %v164_v37 }
  0xac   :  { %v141_v42 = vpop.f32.mrf.mxu2 }
  0xad   :  { %187 = vst.msk [vmem:[%s368_s5] sm:$0xff] %vm25_vm1, %v183_v39  ;;  %v161_v43 = vadd.f32 %v160_v40, %v141_v42 }
  0xaf   :  { %v166_v44 = vadd.f32 %v161_v43, %v41_v41 }
  0xb0   :  { %v177_v45 = vld [vmem:[#allocation2 + $0x10] sm:$0xff] }
  0xb1   :  { %v185_v46 = vadd.f32 %v251_v34, %v177_v45  ;;  %171 = vst.msk [vmem:[#allocation2 + $0x18] sm:$0xff] %vm25_vm1, %v166_v44 }
  0xb2   :  { %v176_v47 = vld [vmem:[#allocation2 + $0x8] sm:$0xff] }
  0xb3   :  { %189 = vst.msk [vmem:[%s368_s5 + $0x10] sm:$0xff] %vm25_vm1, %v185_v46  ;;  %v184_v48 = vadd.f32 %v251_v34, %v176_v47 }
  0xb5   :  { %188 = vst.msk [vmem:[%s368_s5 + $0x8] sm:$0xff] %vm25_vm1, %v184_v48 }
  0xb8   :  { %v178_v49 = vld [vmem:[#allocation2 + $0x18] sm:$0xff] }
  0xb9   :  { %v186_v50 = vadd.f32 %v251_v34, %v178_v49 }
  0xbb   :  { %190 = vst.msk [vmem:[%s368_s5 + $0x18] sm:$0xff] %vm25_vm1, %v186_v50 }

// kernel: densenet_forward.58
= control target key start
LH: loop header
LB: loop body
LE: loop exit
PB: predicated region body
PF: predicated region fallthrough
CT: control target
= control target key end

     0   :  { %vm20_vm0 = vcmask 188416   ;;  %vm28_vm1 = vcmask 195584   ;;  %v104_v0 = vmov 0.0   ;;  %s168_s0 = inlined_call_operand.vmem [shape: f32[32,24], index: 0, kind: input, shape index: {}]   ;;  %s169_s1 = inlined_call_operand.vmem [shape: f32[1,24], index: 1, kind: input, shape index: {}]   ;;  %s170_s2 = inlined_call_operand.vmem [shape: f32[1,24], index: 2, kind: input, shape index: {}]   ;;  %s171_s3 = inlined_call_operand.vmem [shape: f32[1,24], index: 3, kind: output, shape index: {0}]   ;;  %s172_s4 = inlined_call_operand.vmem [shape: f32[1,24], index: 4, kind: output, shape index: {1}]  }
   0x1   :  { %21 = vst.msk [vmem:[#allocation2] sm:$0x1] %vm20_vm0, %v104_v0  ;;  %v23_v1 = vld [vmem:[%s168_s0] sm:$0xff]  ;;  %v24_v2 = vld [vmem:[%s168_s0 + $0x8] sm:$0xff]  ;;  %v25_v3 = vld [vmem:[%s168_s0 + $0x10] sm:$0xff] }
   0x2   :  { %22 = vst.msk [vmem:[#allocation3] sm:$0x1] %vm20_vm0, %v104_v0  ;;  %v26_v4 = vld [vmem:[%s168_s0 + $0x18] sm:$0xff]  ;;  %v29_v5 = vsel %vm28_vm1, %v23_v1, 0.0  ;;  %v30_v6 = vsel %vm28_vm1, %v24_v2, 0.0  ;;  %v32_v7 = vsel %vm28_vm1, %v25_v3, 0.0  ;;  %v46_v8 = vmul.f32 %v23_v1, %v23_v1 }
   0x3   :  { %v31_v9 = vadd.f32 %v30_v6, %v29_v5  ;;  %v47_v10 = vmul.f32 %v24_v2, %v24_v2  ;;  %v48_v11 = vmul.f32 %v25_v3, %v25_v3  ;;  %v34_v12 = vsel %vm28_vm1, %v26_v4, 0.0  ;;  %v86_v53 = vld [vmem:[%s169_s1] sm:$0x1] }
   0x4   :  { %v49_v13 = vmul.f32 %v26_v4, %v26_v4  ;;  %v50_v14 = vsel %vm28_vm1, %v46_v8, 0.0  ;;  %v89_v56 = vld [vmem:[%s170_s2] sm:$0x1] }
   0x5   :  { %v33_v15 = vadd.f32 %v32_v7, %v31_v9  ;;  %v51_v16 = vsel %vm28_vm1, %v47_v10, 0.0  ;;  %v53_v17 = vsel %vm28_vm1, %v48_v11, 0.0 }
   0x6   :  { %v52_v18 = vadd.f32 %v51_v16, %v50_v14  ;;  %v55_v20 = vsel %vm28_vm1, %v49_v13, 0.0 }
   0x7   :  { %v35_v19 = vadd.f32 %v34_v12, %v33_v15 }
   0x8   :  { %v54_v21 = vadd.f32 %v53_v17, %v52_v18  ;;  %v27_v31 = vld [vmem:[#allocation2] sm:$0x1] }
   0x9   :  { %v36_v22 = vrot.slane %v35_v19, 4  ;;  %v45_v36 = vld [vmem:[#allocation3] sm:$0x1] }
   0xa   :  { %v56_v23 = vadd.f32 %v55_v20, %v54_v21 }
   0xb   :  { %v37_v24 = vadd.f32 %v36_v22, %v35_v19 }
   0xc   :  { %v57_v25 = vrot.slane %v56_v23, 4 }
   0xd   :  { %v38_v26 = vrot.slane %v37_v24, 2 }
   0xe   :  { %v58_v27 = vadd.f32 %v57_v25, %v56_v23 }
   0xf   :  { %v39_v28 = vadd.f32 %v38_v26, %v37_v24 }
  0x10   :  { %v59_v29 = vrot.slane %v58_v27, 2 }
  0x11   :  { %v40_v30 = vrot.slane %v39_v28, 1 }
  0x12   :  { %v60_v32 = vadd.f32 %v59_v29, %v58_v27 }
  0x13   :  { %v41_v33 = vadd.f32 %v40_v30, %v39_v28 }
  0x14   :  { %v61_v34 = vrot.slane %v60_v32, 1 }
  0x15   :  { %v42_v35 = vadd.f32 %v41_v33, %v27_v31 }
  0x16   :  { %v62_v37 = vadd.f32 %v61_v34, %v60_v32 }
  0x17   :  { %44 = vst.msk [vmem:[#allocation2] sm:$0x1] %vm20_vm0, %v42_v35 }
  0x18   :  { %v63_v38 = vadd.f32 %v62_v37, %v45_v36 }
  0x1a   :  { %64 = vst.msk [vmem:[#allocation3] sm:$0x1] %vm20_vm0, %v63_v38 }
  0x1e   :  { %v68_v39 = vld [vmem:[#allocation2] sm:$0x1] }
  0x1f   :  { %v69_v40 = vmul.f32 0.03125, %v68_v39 }
  0x21   :  { %v70_v41 = vld [vmem:[#allocation3] sm:$0x1]  ;;  %v72_v42 = vmul.f32 %v69_v40, %v69_v40 }
  0x22   :  { %v71_v43 = vmul.f32 0.03125, %v70_v41 }
  0x24   :  { %v73_v44 = vsub.f32 %v71_v43, %v72_v42 }
  0x26   :  { %v74_v45 = vmax.f32 %v73_v44, 0.0 }
  0x28   :  { %v75_v46 = vadd.f32 1e-05, %v74_v45 }
  0x2a   :  { %102 = vrsqrt.f32 %v75_v46  ;;  %vm82_vm3 = vweird.f32 %v75_v46 }
  0x30   :  { %v103_v47 = vpop.eup %102 }
  0x31   :  { %v77_v48 = vmul.f32 %v103_v47, %v75_v46  ;;  %vm83_vm2 = vweird.f32 %v103_v47 }
  0x32   :  { %vm84_vm4 = vmor %vm82_vm3, %vm83_vm2 }
  0x33   :  { %v78_v49 = vmul.f32 %v103_v47, %v77_v48 }
  0x35   :  { %v79_v50 = vmul.f32 0.5, %v78_v49 }
  0x37   :  { %v80_v51 = vsub.f32 1.5, %v79_v50 }
  0x39   :  { %v81_v52 = vmul.f32 %v103_v47, %v80_v51 }
  0x3b   :  { %v85_v54 = vsel %vm84_vm4, %v103_v47, %v81_v52 }
  0x3c   :  { %v87_v55 = vmul.f32 %v86_v53, %v85_v54 }
  0x3e   :  { %88 = vst.msk [vmem:[%s171_s3] sm:$0x1] %vm20_vm0, %v87_v55  ;;  %v90_v57 = vmul.f32 %v87_v55, %v69_v40 }
  0x40   :  { %v91_v58 = vsub.f32 %v89_v56, %v90_v57 }
  0x42   :  { %92 = vst.msk [vmem:[%s172_s4] sm:$0x1] %vm20_vm0, %v91_v58 }

// kernel: densenet_forward.59
= control target key start
LH: loop header
LB: loop body
LE: loop exit
PB: predicated region body
PF: predicated region fallthrough
CT: control target
= control target key end

     0   :  { %vm25_vm0 = vcmask 130048   ;;  %vm79_vm1 = vcmask 1043456   ;;  %v147_v2 = vmov 0.0   ;;  %vm72_vm2 = vcmask 195584   ;;  %s230_s1 = inlined_call_operand.vmem [shape: bf16[24,16], index: 1, kind: input, shape index: {}]   ;;  %s231_s0 = inlined_call_operand.vmem [shape: f32[32,24], index: 0, kind: input, shape index: {}]   ;;  %s232_s3 = inlined_call_operand.vmem [shape: f32[1,24], index: 3, kind: input, shape index: {}]   ;;  %s233_s4 = inlined_call_operand.vmem [shape: f32[1,24], index: 4, kind: input, shape index: {}]   ;;  %s234_s2 = inlined_call_operand.vmem [shape: f32[1,16], index: 2, kind: input, shape index: {}]   ;;  %s235_s5 = inlined_call_operand.vmem [shape: f32[32,16], index: 5, kind: output, shape index: {}]  }
   0x1   :  { %v62_v0 = vld [vmem:[%s230_s1 + $0x8] sm:$0xf]  ;;  %v30_v1 = vld [vmem:[%s231_s0] sm:$0xff]  ;;  %26 = vst.msk [vmem:[#allocation2] sm:$0xff] %vm25_vm0, %v147_v2  ;;  %v32_v7 = vld [vmem:[%s231_s0 + $0x10] sm:$0xff] }
   0x2   :  { %v68_v3 = vunpack.c.l.b16 %v62_v0  ;;  %v31_v4 = vld [vmem:[%s231_s0 + $0x8] sm:$0xff]  ;;  %v144_v5 = vld [vmem:[%s232_s3] ss:$0 sm:$0xff]  ;;  %27 = vst.msk [vmem:[#allocation2 + $0x8] sm:$0xff] %vm25_vm0, %v147_v2  ;;  %v33_v11 = vld [vmem:[%s231_s0 + $0x18] sm:$0xff] }
   0x3   :  { %v145_v6 = vld [vmem:[%s233_s4] ss:$0 sm:$0xff]  ;;  %28 = vst.msk [vmem:[#allocation2 + $0x10] sm:$0xff] %vm25_vm0, %v147_v2  ;;  %v38_v9 = vmul.f32 %v144_v5, %v30_v1  ;;  %v39_v10 = vmul.f32 %v144_v5, %v31_v4  ;;  %v40_v12 = vmul.f32 %v144_v5, %v32_v7  ;;  %v41_v13 = vmul.f32 %v144_v5, %v33_v11 }
   0x4   :  { %v70_v8 = vpack.c.b16 %v68_v3, %v68_v3  ;;  %29 = vst.msk [vmem:[#allocation2 + $0x18] sm:$0xff] %vm25_vm0, %v147_v2  ;;  %v140_v18 = vld [vmem:[%s230_s1] sm:$0xff] }
   0x5   :  { %v46_v15 = vadd.f32 %v145_v6, %v38_v9  ;;  %v47_v16 = vadd.f32 %v145_v6, %v39_v10  ;;  %v48_v17 = vadd.f32 %v145_v6, %v40_v12  ;;  %v49_v19 = vadd.f32 %v145_v6, %v41_v13  ;;  %v146_v34 = vld [vmem:[%s234_s2] ss:$0 sm:$0xff] }
   0x6   :  { %v81_v14 = vsel %vm79_vm1, %v70_v8, 0 }
   0x7   :  { %89 = vmatpush.bf16.msra.mxu0 %v81_v14  ;;  %141 = vmatpush.bf16.msra.mxu1 %v81_v14  ;;  %v50_v20 = vmax.f32 %v46_v15, 0.0  ;;  %v51_v21 = vmax.f32 %v47_v16, 0.0  ;;  %v52_v22 = vmax.f32 %v48_v17, 0.0  ;;  %v53_v23 = vmax.f32 %v49_v19, 0.0 }
   0x8   :  { %v54_v26 = vld [vmem:[#allocation2] sm:$0xff] }
   0x9   :  { %v58_v24 = vpack.c.bf16 %v51_v21, %v50_v20  ;;  %v59_v25 = vpack.c.bf16 %v53_v23, %v52_v22  ;;  %v55_v32 = vld [vmem:[#allocation2 + $0x8] sm:$0xff] }
   0xa   :  { %v56_v27 = vld [vmem:[#allocation2 + $0x10] sm:$0xff] }
   0xb   :  { %90 = vmatpush.bf16.msra.mxu0 %v140_v18  ;;  %142 = vmatpush.bf16.msra.mxu1 %v140_v18  ;;  %v57_v33 = vld [vmem:[#allocation2 + $0x18] sm:$0xff] }
   0xe   :  { %138 = vmatmul.msk.bf16.vlgmr.msra.gmra.mxu0 %vm72_vm2, %v58_v24  ;;  %139 = vmatmul.msk.bf16.vlgmr.msra.gmra.mxu1 %vm72_vm2, %v59_v25 }
  0x8b   :  { %v92_v28 = vpop.f32.mrf.mxu0  ;;  %v97_v29 = vpop.f32.mrf.mxu1 }
  0x8c   :  { %v102_v30 = vadd.f32 %v92_v28, %v54_v26  ;;  %v104_v31 = vadd.f32 %v97_v29, %v56_v27 }
  0x8e   :  { %107 = vst.msk [vmem:[#allocation2] sm:$0xff] %vm25_vm0, %v102_v30 }
  0x8f   :  { %109 = vst.msk [vmem:[#allocation2 + $0x10] sm:$0xff] %vm25_vm0, %v104_v31 }
  0x93   :  { %v94_v35 = vpop.f32.mrf.mxu0  ;;  %v99_v36 = vpop.f32.mrf.mxu1 }
  0x94   :  { %v103_v37 = vadd.f32 %v94_v35, %v55_v32  ;;  %v105_v38 = vadd.f32 %v99_v36, %v57_v33 }
  0x95   :  { %v114_v39 = vld [vmem:[#allocation2] sm:$0xff] }
  0x96   :  { %v122_v40 = vadd.f32 %v146_v34, %v114_v39  ;;  %v116_v41 = vld [vmem:[#allocation2 + $0x10] sm:$0xff]  ;;  %108 = vst.msk [vmem:[#allocation2 + $0x8] sm:$0xff] %vm25_vm0, %v103_v37 }
  0x97   :  { %v124_v42 = vadd.f32 %v146_v34, %v116_v41  ;;  %110 = vst.msk [vmem:[#allocation2 + $0x18] sm:$0xff] %vm25_vm0, %v105_v38 }
  0x98   :  { %126 = vst.msk [vmem:[%s235_s5] sm:$0xff] %vm25_vm0, %v122_v40 }
  0x99   :  { %128 = vst.msk [vmem:[%s235_s5 + $0x10] sm:$0xff] %vm25_vm0, %v124_v42 }
  0x9d   :  { %v115_v43 = vld [vmem:[#allocation2 + $0x8] sm:$0xff] }
  0x9e   :  { %v123_v44 = vadd.f32 %v146_v34, %v115_v43  ;;  %v117_v45 = vld [vmem:[#allocation2 + $0x18] sm:$0xff] }
  0x9f   :  { %v125_v46 = vadd.f32 %v146_v34, %v117_v45 }
  0xa0   :  { %127 = vst.msk [vmem:[%s235_s5 + $0x8] sm:$0xff] %vm25_vm0, %v123_v44 }
  0xa1   :  { %129 = vst.msk [vmem:[%s235_s5 + $0x18] sm:$0xff] %vm25_vm0, %v125_v46 }

// kernel: densenet_forward.63
= control target key start
LH: loop header
LB: loop body
LE: loop exit
PB: predicated region body
PF: predicated region fallthrough
CT: control target
= control target key end

     0   :  { %vm18_vm0 = vcmask 254976   ;;  %vm25_vm1 = vcmask 261120   ;;  %v63_v0 = vmov 0.0   ;;  %vm46_vm2 = vcmask 1041409   ;;  %s102_s1 = inlined_call_operand.vmem [shape: f32[1,1,32], index: 1, kind: input, shape index: {}]   ;;  %s103_s2 = inlined_call_operand.vmem [shape: f32[1,1,32], index: 2, kind: input, shape index: {}]   ;;  %s104_s0 = inlined_call_operand.vmem [shape: f32[2,16,32], index: 0, kind: input, shape index: {}]   ;;  %s105_s3 = inlined_call_operand.vmem [shape: f32[2,32], index: 3, kind: output, shape index: {}]  }
   0x1   :  { %19 = vst.msk [vmem:[#allocation2] sm:$0x3] %vm18_vm0, %v63_v0  ;;  %v20_v1 = vld [vmem:[%s104_s0] sm:$0xff]  ;;  %v21_v2 = vld [vmem:[%s104_s0 + $0x8] sm:$0xff]  ;;  %v22_v3 = vld [vmem:[%s104_s0 + $0x10] sm:$0xff] }
   0x2   :  { %v23_v4 = vld [vmem:[%s104_s0 + $0x18] sm:$0xff]  ;;  %v26_v5 = vsel %vm25_vm1, %v20_v1, 0.0  ;;  %v27_v6 = vsel %vm25_vm1, %v21_v2, 0.0  ;;  %v35_v7 = vsel %vm25_vm1, %v22_v3, 0.0 }
   0x3   :  { %v28_v8 = vadd.f32 %v27_v6, %v26_v5  ;;  %v36_v9 = vsel %vm25_vm1, %v23_v4, 0.0 }
   0x4   :  { %v37_v10 = vadd.f32 %v36_v9, %v35_v7 }
   0x5   :  { %v29_v11 = vrot.slane %v28_v8, 4 }
   0x6   :  { %v38_v12 = vrot.slane %v37_v10, 4 }
   0x7   :  { %v30_v13 = vadd.f32 %v29_v11, %v28_v8 }
   0x8   :  { %v39_v14 = vadd.f32 %v38_v12, %v37_v10  ;;  %v24_v22 = vld [vmem:[#allocation2] sm:$0x3] }
   0x9   :  { %v31_v15 = vrot.slane %v30_v13, 2 }
   0xa   :  { %v40_v16 = vrot.slane %v39_v14, 2 }
   0xb   :  { %v32_v17 = vadd.f32 %v31_v15, %v30_v13 }
   0xc   :  { %v41_v18 = vadd.f32 %v40_v16, %v39_v14 }
   0xd   :  { %v33_v19 = vrot.slane %v32_v17, 1 }
   0xe   :  { %v42_v20 = vrot.slane %v41_v18, 1 }
   0xf   :  { %v34_v21 = vadd.f32 %v33_v19, %v32_v17 }
  0x10   :  { %v43_v23 = vadd.f32 %v42_v20, %v41_v18 }
  0x12   :  { %v47_v24 = vsel %vm46_vm2, %v43_v23, %v34_v21 }
  0x13   :  { %v49_v25 = vadd.f32 %v47_v24, %v24_v22 }
  0x15   :  { %51 = vst.msk [vmem:[#allocation2] sm:$0x3] %vm18_vm0, %v49_v25 }
  0x1c   :  { %v55_v26 = vld [vmem:[#allocation2] sm:$0x3] }
  0x1d   :  { %v56_v27 = vmul.f32 0.0625, %v55_v26 }
  0x1f   :  { %57 = vst.msk [vmem:[%s105_s3] sm:$0x3] %vm18_vm0, %v56_v27 }

// kernel: densenet_forward.64
= control target key start
LH: loop header
LB: loop body
LE: loop exit
PB: predicated region body
PF: predicated region fallthrough
CT: control target
= control target key end

     0   :  { %vm32_vm0 = vcmask 261120   ;;  %vm66_vm1 = vcmask 1041408   ;;  %vm62_vm2 = vcmask 15360   ;;  %s228_s2 = inlined_call_operand.vmem [shape: f32[32,2], index: 2, kind: input, shape index: {}]   ;;  %s229_s3 = inlined_call_operand.vmem [shape: f32[1,2], index: 3, kind: input, shape index: {}]   ;;  %s230_s1 = inlined_call_operand.vmem [shape: f32[8,32], index: 1, kind: input, shape index: {}]   ;;  %s231_s5 = inlined_call_operand.vmem [shape: f32[1,32], index: 5, kind: input, shape index: {}]   ;;  %s232_s4 = inlined_call_operand.vmem [shape: f32[2,32], index: 4, kind: input, shape index: {}]   ;;  %s233_s0 = inlined_call_operand.vmem [shape: f32[2,16,32], index: 0, kind: input, shape index: {}]   ;;  %s234_s6 = inlined_call_operand.vmem [shape: f32[2,16,32], index: 6, kind: output, shape index: {}]  }
   0x1   :  { %v27_v0 = vld [vmem:[%s228_s2 + $0x18] sm:$0xff]  ;;  %v26_v1 = vld [vmem:[%s228_s2 + $0x10] sm:$0xff]  ;;  %v25_v2 = vld [vmem:[%s228_s2 + $0x8] sm:$0xff] }
   0x2   :  { %48 = vmatpush.msra.mxu0 %v27_v0  ;;  %v24_v3 = vld [vmem:[%s228_s2] sm:$0xff]  ;;  %v110_v27 = vld [vmem:[%s233_s0 + $0x8] sm:$0xff]  ;;  %v111_v28 = vld [vmem:[%s233_s0 + $0x10] sm:$0xff] }
   0x3   :  { %v23_v4 = vld [vmem:[%s230_s1] sm:$0xff]  ;;  %v112_v29 = vld [vmem:[%s233_s0 + $0x18] sm:$0xff] }
   0x4   :  { %49 = vmatpush.msra.mxu0 %v26_v1  ;;  %v57_v5 = vld [vmem:[%s232_s4] sm:$0x3] }
   0x5   :  { %129 = vmatpush.msk.msra.mxu1 %vm66_vm1, %v57_v5  ;;  %v134_v6 = vld [vmem:[%s229_s3] ss:$0 sm:$0xff] }
   0x6   :  { %50 = vmatpush.msra.mxu0 %v25_v2  ;;  %v135_v10 = vld [vmem:[%s231_s5] ss:$0 sm:$0xff] }
   0x7   :  { %v109_v26 = vld [vmem:[%s233_s0] sm:$0xff] }
   0x8   :  { %51 = vmatpush.msra.mxu0 %v24_v3 }
   0x9   :  { %128 = vmatmul.msk.f32.vlgmr.msra.gmra.mxu0 %vm32_vm0, %v23_v4 }
  0x86   :  { %v53_v7 = vpop.f32.mrf.mxu0 }
  0x87   :  { %v54_v8 = vadd.f32 %v134_v6, %v53_v7 }
  0x89   :  { %v56_v9 = vmax.f32 %v54_v8, 0.0 }
  0x8b   :  { %130 = vmatmul.msk.f32.vlgmr.msra.gmra.mxu1 %vm62_vm2, %v56_v9 }
 0x108   :  { %v87_v11 = vpop.f32.mrf.mxu1 }
 0x109   :  { %v88_v12 = vadd.f32 %v135_v10, %v87_v11 }
 0x10b   :  { %v131_v13 = vmul.f32 -1.442695, %v88_v12 }
 0x10d   :  { %136 = vpow2.f32 %v131_v13 }
 0x113   :  { %v137_v14 = vpop.eup %136 }
 0x114   :  { %v93_v15 = vadd.f32 1.0, %v137_v14 }
 0x116   :  { %138 = vrcp.f32 %v93_v15  ;;  %v105_v19 = vand.u32 2147483648, %v93_v15  ;;  %v103_v21 = vand.u32 2147483647, %v93_v15  ;;  %vm99_vm4 = vweird.f32 %v93_v15 }
 0x118   :  { %v106_v23 = vor.u32 1.1754944e-38, %v105_v19  ;;  %vm104_vm6 = vcmp.eq.f32.partialorder %v103_v21, 8.507059e+37 }
 0x11c   :  { %v139_v16 = vpop.eup %138 }
 0x11d   :  { %v95_v17 = vmul.f32 %v139_v16, %v93_v15  ;;  %vm100_vm3 = vweird.f32 %v139_v16 }
 0x11e   :  { %vm101_vm5 = vmor %vm99_vm4, %vm100_vm3 }
 0x11f   :  { %v96_v18 = vsub.f32 1.0, %v95_v17 }
 0x121   :  { %v97_v20 = vmul.f32 %v139_v16, %v96_v18 }
 0x123   :  { %v98_v22 = vadd.f32 %v139_v16, %v97_v20 }
 0x125   :  { %v102_v24 = vsel %vm101_vm5, %v139_v16, %v98_v22 }
 0x126   :  { %v107_v25 = vsel %vm104_vm6, %v106_v23, %v102_v24 }
 0x127   :  { %v113_v30 = vperm.slane %v107_v25, 0  ;;  %v118_v31 = vperm.slane %v107_v25, 1 }
 0x129   :  { %v114_v32 = vmul.f32 %v113_v30, %v109_v26  ;;  %v115_v33 = vmul.f32 %v113_v30, %v110_v27  ;;  %v119_v34 = vmul.f32 %v118_v31, %v111_v28  ;;  %v120_v35 = vmul.f32 %v118_v31, %v112_v29 }
 0x12b   :  { %116 = vst.msk [vmem:[%s234_s6] sm:$0xff] %vm32_vm0, %v114_v32 }
 0x12c   :  { %117 = vst.msk [vmem:[%s234_s6 + $0x8] sm:$0xff] %vm32_vm0, %v115_v33 }
 0x12d   :  { %132 = vst.msk [vmem:[%s234_s6 + $0x10] sm:$0xff] %vm32_vm0, %v119_v34 }
 0x12e   :  { %133 = vst.msk [vmem:[%s234_s6 + $0x18] sm:$0xff] %vm32_vm0, %v120_v35 }

// kernel: densenet_forward.65
= control target key start
LH: loop header
LB: loop body
LE: loop exit
PB: predicated region body
PF: predicated region fallthrough
CT: control target
= control target key end

     0   :  { %vm20_vm0 = vcmask 253952   ;;  %vm28_vm1 = vcmask 261120   ;;  %v104_v0 = vmov 0.0   ;;  %s168_s0 = inlined_call_operand.vmem [shape: f32[32,32], index: 0, kind: input, shape index: {}]   ;;  %s169_s1 = inlined_call_operand.vmem [shape: f32[1,32], index: 1, kind: input, shape index: {}]   ;;  %s170_s2 = inlined_call_operand.vmem [shape: f32[1,32], index: 2, kind: input, shape index: {}]   ;;  %s171_s3 = inlined_call_operand.vmem [shape: f32[1,32], index: 3, kind: output, shape index: {0}]   ;;  %s172_s4 = inlined_call_operand.vmem [shape: f32[1,32], index: 4, kind: output, shape index: {1}]  }
   0x1   :  { %21 = vst.msk [vmem:[#allocation2] sm:$0x1] %vm20_vm0, %v104_v0  ;;  %v23_v1 = vld [vmem:[%s168_s0] sm:$0xff]  ;;  %v24_v2 = vld [vmem:[%s168_s0 + $0x8] sm:$0xff]  ;;  %v25_v3 = vld [vmem:[%s168_s0 + $0x10] sm:$0xff] }
   0x2   :  { %22 = vst.msk [vmem:[#allocation3] sm:$0x1] %vm20_vm0, %v104_v0  ;;  %v26_v4 = vld [vmem:[%s168_s0 + $0x18] sm:$0xff]  ;;  %v29_v5 = vsel %vm28_vm1, %v23_v1, 0.0  ;;  %v30_v6 = vsel %vm28_vm1, %v24_v2, 0.0  ;;  %v32_v7 = vsel %vm28_vm1, %v25_v3, 0.0  ;;  %v46_v8 = vmul.f32 %v23_v1, %v23_v1 }
   0x3   :  { %v31_v9 = vadd.f32 %v30_v6, %v29_v5  ;;  %v47_v10 = vmul.f32 %v24_v2, %v24_v2  ;;  %v48_v11 = vmul.f32 %v25_v3, %v25_v3  ;;  %v34_v12 = vsel %vm28_vm1, %v26_v4, 0.0  ;;  %v86_v53 = vld [vmem:[%s169_s1] sm:$0x1] }
   0x4   :  { %v49_v13 = vmul.f32 %v26_v4, %v26_v4  ;;  %v50_v14 = vsel %vm28_vm1, %v46_v8, 0.0  ;;  %v89_v56 = vld [vmem:[%s170_s2] sm:$0x1] }
   0x5   :  { %v33_v15 = vadd.f32 %v32_v7, %v31_v9  ;;  %v51_v16 = vsel %vm28_vm1, %v47_v10, 0.0  ;;  %v53_v17 = vsel %vm28_vm1, %v48_v11, 0.0 }
   0x6   :  { %v52_v18 = vadd.f32 %v51_v16, %v50_v14  ;;  %v55_v20 = vsel %vm28_vm1, %v49_v13, 0.0 }
   0x7   :  { %v35_v19 = vadd.f32 %v34_v12, %v33_v15 }
   0x8   :  { %v54_v21 = vadd.f32 %v53_v17, %v52_v18  ;;  %v27_v31 = vld [vmem:[#allocation2] sm:$0x1] }
   0x9   :  { %v36_v22 = vrot.slane %v35_v19, 4  ;;  %v45_v36 = vld [vmem:[#allocation3] sm:$0x1] }
   0xa   :  { %v56_v23 = vadd.f32 %v55_v20, %v54_v21 }
   0xb   :  { %v37_v24 = vadd.f32 %v36_v22, %v35_v19 }
   0xc   :  { %v57_v25 = vrot.slane %v56_v23, 4 }
   0xd   :  { %v38_v26 = vrot.slane %v37_v24, 2 }
   0xe   :  { %v58_v27 = vadd.f32 %v57_v25, %v56_v23 }
   0xf   :  { %v39_v28 = vadd.f32 %v38_v26, %v37_v24 }
  0x10   :  { %v59_v29 = vrot.slane %v58_v27, 2 }
  0x11   :  { %v40_v30 = vrot.slane %v39_v28, 1 }
  0x12   :  { %v60_v32 = vadd.f32 %v59_v29, %v58_v27 }
  0x13   :  { %v41_v33 = vadd.f32 %v40_v30, %v39_v28 }
  0x14   :  { %v61_v34 = vrot.slane %v60_v32, 1 }
  0x15   :  { %v42_v35 = vadd.f32 %v41_v33, %v27_v31 }
  0x16   :  { %v62_v37 = vadd.f32 %v61_v34, %v60_v32 }
  0x17   :  { %44 = vst.msk [vmem:[#allocation2] sm:$0x1] %vm20_vm0, %v42_v35 }
  0x18   :  { %v63_v38 = vadd.f32 %v62_v37, %v45_v36 }
  0x1a   :  { %64 = vst.msk [vmem:[#allocation3] sm:$0x1] %vm20_vm0, %v63_v38 }
  0x1e   :  { %v68_v39 = vld [vmem:[#allocation2] sm:$0x1] }
  0x1f   :  { %v69_v40 = vmul.f32 0.03125, %v68_v39 }
  0x21   :  { %v70_v41 = vld [vmem:[#allocation3] sm:$0x1]  ;;  %v72_v42 = vmul.f32 %v69_v40, %v69_v40 }
  0x22   :  { %v71_v43 = vmul.f32 0.03125, %v70_v41 }
  0x24   :  { %v73_v44 = vsub.f32 %v71_v43, %v72_v42 }
  0x26   :  { %v74_v45 = vmax.f32 %v73_v44, 0.0 }
  0x28   :  { %v75_v46 = vadd.f32 1e-05, %v74_v45 }
  0x2a   :  { %102 = vrsqrt.f32 %v75_v46  ;;  %vm82_vm3 = vweird.f32 %v75_v46 }
  0x30   :  { %v103_v47 = vpop.eup %102 }
  0x31   :  { %v77_v48 = vmul.f32 %v103_v47, %v75_v46  ;;  %vm83_vm2 = vweird.f32 %v103_v47 }
  0x32   :  { %vm84_vm4 = vmor %vm82_vm3, %vm83_vm2 }
  0x33   :  { %v78_v49 = vmul.f32 %v103_v47, %v77_v48 }
  0x35   :  { %v79_v50 = vmul.f32 0.5, %v78_v49 }
  0x37   :  { %v80_v51 = vsub.f32 1.5, %v79_v50 }
  0x39   :  { %v81_v52 = vmul.f32 %v103_v47, %v80_v51 }
  0x3b   :  { %v85_v54 = vsel %vm84_vm4, %v103_v47, %v81_v52 }
  0x3c   :  { %v87_v55 = vmul.f32 %v86_v53, %v85_v54 }
  0x3e   :  { %88 = vst.msk [vmem:[%s171_s3] sm:$0x1] %vm20_vm0, %v87_v55  ;;  %v90_v57 = vmul.f32 %v87_v55, %v69_v40 }
  0x40   :  { %v91_v58 = vsub.f32 %v89_v56, %v90_v57 }
  0x42   :  { %92 = vst.msk [vmem:[%s172_s4] sm:$0x1] %vm20_vm0, %v91_v58 }

// kernel: densenet_forward.66
= control target key start
LH: loop header
LB: loop body
LE: loop exit
PB: predicated region body
PF: predicated region fallthrough
CT: control target
= control target key end

     0   :  { %vm18_vm0 = vcmask 254976   ;;  %v85_v0 = vmov 0.0   ;;  %vm45_vm1 = vcmask 261120   ;;  %vm66_vm2 = vcmask 1041409   ;;  %s130_s0 = inlined_call_operand.vmem [shape: f32[2,16,32], index: 0, kind: input, shape index: {}]   ;;  %s131_s1 = inlined_call_operand.vmem [shape: f32[1,1,32], index: 1, kind: input, shape index: {}]   ;;  %s132_s2 = inlined_call_operand.vmem [shape: f32[1,1,32], index: 2, kind: input, shape index: {}]   ;;  %s133_s3 = inlined_call_operand.vmem [shape: f32[2,32], index: 3, kind: output, shape index: {}]  }
   0x1   :  { %19 = vst.msk [vmem:[#allocation2] sm:$0x3] %vm18_vm0, %v85_v0  ;;  %v20_v1 = vld [vmem:[%s130_s0] sm:$0xff]  ;;  %v21_v2 = vld [vmem:[%s130_s0 + $0x8] sm:$0xff]  ;;  %v22_v3 = vld [vmem:[%s130_s0 + $0x10] sm:$0xff] }
   0x2   :  { %v23_v4 = vld [vmem:[%s130_s0 + $0x18] sm:$0xff]  ;;  %v83_v5 = vld [vmem:[%s131_s1] ss:$0 sm:$0xff] }
   0x3   :  { %v84_v6 = vld [vmem:[%s132_s2] ss:$0 sm:$0xff]  ;;  %v28_v7 = vmul.f32 %v83_v5, %v20_v1  ;;  %v29_v8 = vmul.f32 %v83_v5, %v21_v2  ;;  %v30_v9 = vmul.f32 %v83_v5, %v22_v3  ;;  %v31_v10 = vmul.f32 %v83_v5, %v23_v4 }
   0x5   :  { %v36_v11 = vadd.f32 %v84_v6, %v28_v7  ;;  %v37_v12 = vadd.f32 %v84_v6, %v29_v8  ;;  %v38_v13 = vadd.f32 %v84_v6, %v30_v9  ;;  %v39_v14 = vadd.f32 %v84_v6, %v31_v10 }
   0x7   :  { %v40_v15 = vmax.f32 %v36_v11, 0.0  ;;  %v41_v16 = vmax.f32 %v37_v12, 0.0  ;;  %v42_v17 = vmax.f32 %v38_v13, 0.0  ;;  %v43_v18 = vmax.f32 %v39_v14, 0.0 }
   0x8   :  { %v44_v35 = vld [vmem:[#allocation2] sm:$0x3] }
   0x9   :  { %v46_v19 = vsel %vm45_vm1, %v40_v15, 0.0  ;;  %v47_v20 = vsel %vm45_vm1, %v41_v16, 0.0  ;;  %v55_v21 = vsel %vm45_vm1, %v42_v17, 0.0  ;;  %v56_v22 = vsel %vm45_vm1, %v43_v18, 0.0 }
   0xa   :  { %v48_v23 = vadd.f32 %v47_v20, %v46_v19  ;;  %v57_v24 = vadd.f32 %v56_v22, %v55_v21 }
   0xc   :  { %v49_v25 = vrot.slane %v48_v23, 4  ;;  %v58_v26 = vrot.slane %v57_v24, 4 }
   0xe   :  { %v50_v27 = vadd.f32 %v49_v25, %v48_v23  ;;  %v59_v28 = vadd.f32 %v58_v26, %v57_v24 }
  0x10   :  { %v51_v29 = vrot.slane %v50_v27, 2  ;;  %v60_v30 = vrot.slane %v59_v28, 2 }
  0x12   :  { %v52_v31 = vadd.f32 %v51_v29, %v50_v27  ;;  %v61_v32 = vadd.f32 %v60_v30, %v59_v28 }
  0x14   :  { %v53_v33 = vrot.slane %v52_v31, 1  ;;  %v62_v34 = vrot.slane %v61_v32, 1 }
  0x16   :  { %v54_v36 = vadd.f32 %v53_v33, %v52_v31  ;;  %v63_v37 = vadd.f32 %v62_v34, %v61_v32 }
  0x18   :  { %v67_v38 = vsel %vm66_vm2, %v63_v37, %v54_v36 }
  0x19   :  { %v69_v39 = vadd.f32 %v67_v38, %v44_v35 }
  0x1b   :  { %71 = vst.msk [vmem:[#allocation2] sm:$0x3] %vm18_vm0, %v69_v39 }
  0x22   :  { %v75_v40 = vld [vmem:[#allocation2] sm:$0x3] }
  0x23   :  { %v76_v41 = vmul.f32 0.0625, %v75_v40 }
  0x25   :  { %77 = vst.msk [vmem:[%s133_s3] sm:$0x3] %vm18_vm0, %v76_v41 }

// kernel: densenet_forward.67
= control target key start
LH: loop header
LB: loop body
LE: loop exit
PB: predicated region body
PF: predicated region fallthrough
CT: control target
= control target key end

     0   :  { %vm25_vm0 = vcmask 80896   ;;  %v93_v1 = vmov 0.0   ;;  %vm46_vm1 = vcmask 261120   ;;  %s142_s1 = inlined_call_operand.vmem [shape: bf16[32,10], index: 1, kind: input, shape index: {}]   ;;  %s143_s3 = inlined_call_operand.vmem [shape: f32[1,32], index: 3, kind: input, shape index: {}]   ;;  %s144_s4 = inlined_call_operand.vmem [shape: f32[1,32], index: 4, kind: input, shape index: {}]   ;;  %s145_s0 = inlined_call_operand.vmem [shape: f32[8,32], index: 0, kind: input, shape index: {}]   ;;  %s146_s2 = inlined_call_operand.vmem [shape: f32[1,10], index: 2, kind: input, shape index: {}]   ;;  %s147_s5 = inlined_call_operand.vmem [shape: f32[8,10], index: 5, kind: output, shape index: {}]  }
   0x1   :  { %v90_v0 = vld [vmem:[%s142_s1 + $0x8] sm:$0xff]  ;;  %26 = vst.msk [vmem:[#allocation2] sm:$0xff] %vm25_vm0, %v93_v1  ;;  %v89_v2 = vld [vmem:[%s142_s1] sm:$0xff] }
   0x2   :  { %56 = vmatpush.bf16.msra.mxu0 %v90_v0  ;;  %v27_v3 = vld [vmem:[%s145_s0] sm:$0xff] }
   0x3   :  { %v29_v4 = vpack.c.bf16 %v27_v3, %v27_v3  ;;  %v92_v8 = vld [vmem:[%s146_s2] ss:$0 sm:$0xff] }
   0x6   :  { %57 = vmatpush.bf16.msra.mxu0 %v89_v2 }
   0x8   :  { %v28_v5 = vld [vmem:[#allocation2] sm:$0xff] }
   0x9   :  { %88 = vmatmul.msk.bf16.vlgmr.msra.gmra.mxu0 %vm46_vm1, %v29_v4 }
  0x86   :  { %v59_v6 = vpop.f32.mrf.mxu0 }
  0x87   :  { %v63_v7 = vadd.f32 %v59_v6, %v28_v5 }
  0x89   :  { %65 = vst.msk [vmem:[#allocation2] sm:$0xff] %vm25_vm0, %v63_v7 }
  0x8e   :  { %v61_v9 = vpop.f32.mrf.mxu0 }
  0x90   :  { %v69_v10 = vld [vmem:[#allocation2] sm:$0xff] }
  0x91   :  { %v74_v11 = vadd.f32 %v92_v8, %v69_v10 }
  0x93   :  { %75 = vst.msk [vmem:[%s147_s5] sm:$0xff] %vm25_vm0, %v74_v11 }

</bundles_post_ra>
